<compile_context>
chip_gen: v7x
topology: tpu7x:2x2x1
jax: 0.10.0
libtpu: 0.0.40
codegen_flags: <defaults>
</compile_context>

<pallas_src>
import jax
import jax.numpy as jnp
from jax.experimental import pallas as pl
from jax.experimental.pallas import tpu as pltpu


def _round_up(x, m):
    return (x + m - 1) // m * m


def _fold_bn_matrix(w_oihw, gamma, beta, mean, var, eps, c_in_p, c_out_p):
    """Fold eval-mode BN into the conv and flatten to an im2col weight matrix
    (9*c_in_p, c_out_p) bf16 plus a (1, c_out_p) f32 bias (zero padded)."""
    c_out, c_in = w_oihw.shape[0], w_oihw.shape[1]
    scale = gamma / jnp.sqrt(var + eps)                         # (C_out,)
    bias = beta - mean * scale                                  # (C_out,)
    w = jnp.transpose(w_oihw, (2, 3, 1, 0)) * scale[None, None, None, :]
    w = jnp.pad(w, ((0, 0), (0, 0), (0, c_in_p - c_in), (0, c_out_p - c_out)))
    w = w.reshape(9 * c_in_p, c_out_p).astype(jnp.bfloat16)
    b = jnp.pad(bias, (0, c_out_p - c_out)).reshape(1, c_out_p).astype(jnp.float32)
    return w, b


# ---------------------------------------------------------------------------
# Fused BasicBlock kernel (stride == 1): conv1+bn1+relu -> conv2+bn2+relu
# ---------------------------------------------------------------------------
def _basic_block_kernel(x_ref, w1_ref, b1_ref, w2_ref, b2_ref, o_ref, inter_ref):
    # x_ref:     (1, H+2, Wp, C_in)     bf16  spatially padded input image
    # w1_ref:    (9*C_in, C_out_p)      bf16  conv1 weight, BN1 scale folded
    # b1_ref:    (1, C_out_p)           f32   folded BN1 bias
    # w2_ref:    (9*C_out_p, C_out_p)   bf16  conv2 weight, BN2 scale folded
    # b2_ref:    (1, C_out_p)           f32   folded BN2 bias
    # o_ref:     (H*W, C_out_p)         bf16  output rows for this image
    # inter_ref: (H+2, Wp, C_out_p)     bf16  padded conv1 output (scratch)
    Hp, Wp, c_in = x_ref.shape[1], x_ref.shape[2], x_ref.shape[3]
    rows, c_out = o_ref.shape
    Ho = Hp - 2
    Wo = rows // Ho

    # ---- conv1: in-register im2col (rows, 9*C_in) -> one deep MXU matmul ----
    patches1 = jnp.concatenate(
        [x_ref[0, kh:kh + Ho, kw:kw + Wo, :].reshape(rows, c_in)
         for kh in range(3) for kw in range(3)], axis=-1)
    h1 = jnp.dot(patches1, w1_ref[...], preferred_element_type=jnp.float32)
    h1 = jnp.maximum(h1 + b1_ref[...], 0.0)

    # Stage the conv1 output in VMEM (bf16).  Its zero border is conv2's
    # padding=1, so the intermediate never round-trips HBM.  Only the border
    # is zeroed — every step on purpose: the interior is fully overwritten and
    # this stays correct even when the "parallel" grid axis is split across
    # TensorCores (a pl.when(program_id == 0) one-shot init would not).
    zr = jnp.zeros((1, Wp, c_out), jnp.bfloat16)
    inter_ref[0:1, :, :] = zr
    inter_ref[Ho + 1:Ho + 2, :, :] = zr
    zc = jnp.zeros((Hp, 1, c_out), jnp.bfloat16)
    inter_ref[:, 0:1, :] = zc
    inter_ref[:, Wo + 1:Wo + 2, :] = zc
    inter_ref[1:Ho + 1, 1:Wo + 1, :] = h1.reshape(Ho, Wo, c_out).astype(jnp.bfloat16)

    # ---- conv2: in-VMEM im2col (rows, 9*C_out_p) -> one deep MXU matmul -----
    patches2 = jnp.concatenate(
        [inter_ref[kh:kh + Ho, kw:kw + Wo, :].reshape(rows, c_out)
         for kh in range(3) for kw in range(3)], axis=-1)
    y = jnp.dot(patches2, w2_ref[...], preferred_element_type=jnp.float32)
    o_ref[...] = jnp.maximum(y + b2_ref[...], 0.0).astype(o_ref.dtype)


def _fused_basic_block(x_nhwc, params, eps):
    N, H, W, C_in = x_nhwc.shape
    C_out = params["w1"].shape[0]
    C_out_p = _round_up(C_out, 128)      # lane-dense stores / full MXU width
    Hp = H + 2
    Wp = _round_up(W + 2, 8)             # sublane-aligned padded width
    rows = H * W

    w1, b1 = _fold_bn_matrix(params["w1"], params["g1"], params["b1"],
                             params["m1"], params["v1"], eps, C_in, C_out_p)
    # conv2 consumes the channel-padded bf16 intermediate -> pad its C_in too.
    w2, b2 = _fold_bn_matrix(params["w2"], params["g2"], params["b2"],
                             params["m2"], params["v2"], eps, C_out_p, C_out_p)

    # Spatial padding only in HBM (no 9x im2col blowup); bf16 MXU operands.
    xp = jnp.pad(x_nhwc, ((0, 0), (1, 1), (1, Wp - W - 1), (0, 0))).astype(jnp.bfloat16)

    flops = 2 * N * rows * (9 * C_in + 9 * C_out_p) * C_out_p
    bytes_accessed = (xp.size * 2 + (w1.size + w2.size) * 2
                      + (b1.size + b2.size) * 4 + N * rows * C_out_p * 2)

    # Per-step VMEM footprint (double-buffered blocks + scratch + temporaries),
    # used to size vmem_limit_bytes with headroom but never the full 64 MiB of
    # a v7x core.
    footprint = (2 * Hp * Wp * C_in * 2            # x block (x2 buffers)
                 + 2 * (w1.size + w2.size) * 2     # weights (x2 buffers)
                 + 2 * (b1.size + b2.size) * 4     # biases
                 + 2 * rows * C_out_p * 2          # out block (x2 buffers)
                 + Hp * Wp * C_out_p * 2           # inter scratch (bf16)
                 + rows * 9 * C_in * 2             # conv1 im2col temp
                 + rows * 9 * C_out_p * 2          # conv2 im2col temp
                 + 2 * rows * C_out_p * 4)         # f32 matmul results
    vmem_limit = min(48 * 1024 * 1024, 2 * footprint + 24 * 1024 * 1024)

    out = pl.pallas_call(
        _basic_block_kernel,
        out_shape=jax.ShapeDtypeStruct((N * rows, C_out_p), jnp.bfloat16),
        grid_spec=pltpu.PrefetchScalarGridSpec(
            num_scalar_prefetch=0,
            grid=(N,),                                  # one image per step
            in_specs=[
                pl.BlockSpec((1, Hp, Wp, C_in), lambda n: (n, 0, 0, 0)),
                # TODO(synk): w1/b1/w2/b2 are grid-invariant; single-buffer
                # them (pipeline_mode=pl.Buffered(1)) to save VMEM for large
                # C_out once that path is verified on the target jax version.
                pl.BlockSpec((9 * C_in, C_out_p), lambda n: (0, 0)),
                pl.BlockSpec((1, C_out_p), lambda n: (0, 0)),
                pl.BlockSpec((9 * C_out_p, C_out_p), lambda n: (0, 0)),
                pl.BlockSpec((1, C_out_p), lambda n: (0, 0)),
            ],
            out_specs=pl.BlockSpec((rows, C_out_p), lambda n: (n, 0)),
            scratch_shapes=[
                pltpu.VMEM((Hp, Wp, C_out_p), jnp.bfloat16),
            ],
        ),
        compiler_params=pltpu.CompilerParams(
            dimension_semantics=("parallel",),
            vmem_limit_bytes=vmem_limit),
        cost_estimate=pl.CostEstimate(flops=flops, transcendentals=0,
                                      bytes_accessed=bytes_accessed),
    )(xp, w1, b1, w2, b2)

    if C_out_p != C_out:
        out = out[:, :C_out]
    return out.reshape(N, H, W, C_out)


# ---------------------------------------------------------------------------
# Fallback path (stride != 1 / odd spatial sizes): wrapper-side strided im2col
# ---------------------------------------------------------------------------
def _conv_bn_relu_matmul_kernel(p_ref, w_ref, b_ref, o_ref):
    acc = jnp.dot(p_ref[...], w_ref[...], preferred_element_type=jnp.float32)
    o_ref[...] = jnp.maximum(acc + b_ref[...], 0.0).astype(o_ref.dtype)


def _conv3x3_bn_relu_im2col(x_nhwc, w_oihw, gamma, beta, mean, var,
                            stride, eps, tile_m=1024):
    # TODO(synk): strided 3x3 windows still use wrapper-side im2col; an
    #             in-kernel strided-window version (pl.ds with stride) would
    #             cut the HBM patch traffic further.
    N, H, W, C_in = x_nhwc.shape
    C_out = w_oihw.shape[0]
    C_out_p = _round_up(C_out, 128)
    Ho = (H + 2 - 3) // stride + 1
    Wo = (W + 2 - 3) // stride + 1

    xp = jnp.pad(x_nhwc, ((0, 0), (1, 1), (1, 1), (0, 0)))
    cols = [xp[:, kh:kh + stride * (Ho - 1) + 1:stride,
               kw:kw + stride * (Wo - 1) + 1:stride, :]
            for kh in range(3) for kw in range(3)]
    patches = jnp.concatenate(cols, axis=-1).reshape(N * Ho * Wo, 9 * C_in)
    patches = patches.astype(jnp.bfloat16)

    w_mat, bias = _fold_bn_matrix(w_oihw, gamma, beta, mean, var, eps,
                                  C_in, C_out_p)

    M = patches.shape[0]
    tile_m = min(tile_m, _round_up(M, 16))
    M_p = _round_up(M, tile_m)
    patches = jnp.pad(patches, ((0, M_p - M), (0, 0)))

    footprint = (2 * tile_m * 9 * C_in * 2 + 2 * 9 * C_in * C_out_p * 2
                 + 2 * C_out_p * 4 + 2 * tile_m * C_out_p * 2
                 + tile_m * C_out_p * 4)
    vmem_limit = min(48 * 1024 * 1024, 2 * footprint + 24 * 1024 * 1024)

    out = pl.pallas_call(
        _conv_bn_relu_matmul_kernel,
        out_shape=jax.ShapeDtypeStruct((M_p, C_out_p), jnp.bfloat16),
        grid_spec=pltpu.PrefetchScalarGridSpec(
            num_scalar_prefetch=0,
            grid=(M_p // tile_m,),
            in_specs=[
                pl.BlockSpec((tile_m, 9 * C_in), lambda i: (i, 0)),
                pl.BlockSpec((9 * C_in, C_out_p), lambda i: (0, 0)),
                pl.BlockSpec((1, C_out_p), lambda i: (0, 0)),
            ],
            out_specs=pl.BlockSpec((tile_m, C_out_p), lambda i: (i, 0)),
        ),
        compiler_params=pltpu.CompilerParams(
            dimension_semantics=("parallel",),
            vmem_limit_bytes=vmem_limit),
    )(patches, w_mat, bias)

    if C_out_p != C_out:
        out = out[:, :C_out]
    return out.reshape(N, Ho, Wo, C_out)


# ---------------------------------------------------------------------------
# Public forward (matches BasicBlock.forward; NCHW in / NCHW out like PyTorch)
# ---------------------------------------------------------------------------
def basic_block_forward(x_nchw, params, stride=1, eps=1e-5):
    """relu(bn2(conv2(relu(bn1(conv1(x)))))) — the spec has no residual add."""
    x = jnp.transpose(x_nchw, (0, 2, 3, 1))          # NCHW -> NHWC, once
    _, H, W, _ = x.shape
    if stride == 1 and (H * W) % 16 == 0:
        y = _fused_basic_block(x, params, eps)
    else:
        y = _conv3x3_bn_relu_im2col(x, params["w1"], params["g1"], params["b1"],
                                    params["m1"], params["v1"], stride, eps)
        y = _conv3x3_bn_relu_im2col(y, params["w2"], params["g2"], params["b2"],
                                    params["m2"], params["v2"], 1, eps)
    # Match the PyTorch module's dtype at the block boundary; consumers that
    # can take bf16 should drop this cast to keep the halved HBM writeback.
    return jnp.transpose(y, (0, 3, 1, 2)).astype(jnp.float32)


# ---------------------------------------------------------------------------
# Pure-JAX reference (lax conv), using the same bf16 operand rounding
# ---------------------------------------------------------------------------
def _reference_forward(x_nchw, params, stride=1, eps=1e-5):
    def q(a):  # mimic the kernel's bf16 MXU operands / bf16 intermediate
        return a.astype(jnp.bfloat16).astype(jnp.float32)

    def block(x, w, g, b, m, v, s):
        scale = g / jnp.sqrt(v + eps)
        bias = b - m * scale
        w_f = w * scale.reshape(-1, 1, 1, 1)
        y = jax.lax.conv_general_dilated(
            q(x), q(w_f), window_strides=(s, s), padding=((1, 1), (1, 1)),
            dimension_numbers=("NCHW", "OIHW", "NCHW"))
        return jnp.maximum(y + bias.reshape(1, -1, 1, 1), 0.0)

    y = block(x_nchw, params["w1"], params["g1"], params["b1"],
              params["m1"], params["v1"], stride)
    y = block(y, params["w2"], params["g2"], params["b2"],
              params["m2"], params["v2"], 1)
    return y


def make_params(key, in_channels, out_channels):
    keys = jax.random.split(key, 8)
    return {
        "w1": 0.1 * jax.random.normal(keys[0], (out_channels, in_channels, 3, 3), jnp.float32),
        "g1": 1.0 + 0.1 * jax.random.normal(keys[1], (out_channels,), jnp.float32),
        "b1": 0.05 * jax.random.normal(keys[2], (out_channels,), jnp.float32),
        "m1": 0.05 * jax.random.normal(keys[3], (out_channels,), jnp.float32),
        "v1": 1.0 + 0.1 * jax.nn.softplus(jax.random.normal(keys[4], (out_channels,), jnp.float32)),
        "w2": 0.1 * jax.random.normal(keys[5], (out_channels, out_channels, 3, 3), jnp.float32),
        "g2": 1.0 + 0.1 * jax.random.normal(keys[6], (out_channels,), jnp.float32),
        "b2": 0.05 * jax.random.normal(keys[7], (out_channels,), jnp.float32),
        "m2": jnp.zeros((out_channels,), jnp.float32),
        "v2": jnp.ones((out_channels,), jnp.float32),
    }


if __name__ == "__main__":
    key = jax.random.PRNGKey(0)
    k_x, k_p = jax.random.split(key)

    in_channels, out_channels, stride = 4, 8, 1
    x = jax.random.normal(k_x, (2, in_channels, 16, 16), jnp.float32)  # NCHW
    params = make_params(k_p, in_channels, out_channels)

    fwd = jax.jit(basic_block_forward, static_argnames=("stride",))
    out = jax.block_until_ready(fwd(x, params, stride=stride))
    ref = jax.block_until_ready(_reference_forward(x, params, stride=stride))

    assert out.shape == (2, out_channels, 16, 16), out.shape
    # Kernel uses bf16 MXU operands, a bf16 VMEM intermediate and bf16 output;
    # the reference rounds at the same points, so 1e-2 still catches any real
    # conv/BN/ReLU logic error (wrong tap, missing bias/ReLU, bad BN fold).
    assert jnp.allclose(out, ref, atol=1e-2, rtol=1e-2), "mismatch vs JAX reference"

    print("KERNEL_OK")
</pallas_src>

<mosaic_0001>
module attributes {stable_mosaic.version = 11 : i64} {
  func.func @_basic_block_kernel(%arg0: i32, %arg1: memref<1x18x24x4xbf16, #tpu.memory_space<vmem>>, %arg2: memref<36x128xbf16, #tpu.memory_space<vmem>>, %arg3: memref<1x128xf32, #tpu.memory_space<vmem>>, %arg4: memref<1152x128xbf16, #tpu.memory_space<vmem>>, %arg5: memref<1x128xf32, #tpu.memory_space<vmem>>, %arg6: memref<256x128xbf16, #tpu.memory_space<vmem>>, %arg7: memref<18x24x128xbf16, #tpu.memory_space<vmem>>) attributes {dimension_semantics = [#tpu.dimension_semantics<parallel>], iteration_bounds = array<i64: 2>, scalar_prefetch = 0 : i64, scratch_operands = 1 : i64, tpu.core_type = #tpu.core_type<tc>, window_params = [{transform_indices = @transform_0, window_bounds = array<i64: 1, 18, 24, 4>}, {pipeline_mode = #tpu.pipeline_mode<synchronous>, transform_indices = @transform_1, window_bounds = array<i64: 36, 128>}, {pipeline_mode = #tpu.pipeline_mode<synchronous>, transform_indices = @transform_2, window_bounds = array<i64: 1, 128>}, {pipeline_mode = #tpu.pipeline_mode<synchronous>, transform_indices = @transform_3, window_bounds = array<i64: 1152, 128>}, {pipeline_mode = #tpu.pipeline_mode<synchronous>, transform_indices = @transform_4, window_bounds = array<i64: 1, 128>}, {transform_indices = @transform_5, window_bounds = array<i64: 256, 128>}]} {
    %c0 = arith.constant 0 : index
    %c0_0 = arith.constant 0 : index
    %c0_1 = arith.constant 0 : index
    %c0_2 = arith.constant 0 : index
    %0 = vector.load %arg1[%c0, %c0_0, %c0_1, %c0_2] : memref<1x18x24x4xbf16, #tpu.memory_space<vmem>>, vector<1x16x16x4xbf16>
    %1 = vector.shape_cast %0 : vector<1x16x16x4xbf16> to vector<16x16x4xbf16>
    %2 = vector.shape_cast %1 : vector<16x16x4xbf16> to vector<256x4xbf16>
    %c0_3 = arith.constant 0 : index
    %c0_4 = arith.constant 0 : index
    %c1 = arith.constant 1 : index
    %c0_5 = arith.constant 0 : index
    %3 = vector.load %arg1[%c0_3, %c0_4, %c1, %c0_5] : memref<1x18x24x4xbf16, #tpu.memory_space<vmem>>, vector<1x16x16x4xbf16>
    %4 = vector.shape_cast %3 : vector<1x16x16x4xbf16> to vector<16x16x4xbf16>
    %5 = vector.shape_cast %4 : vector<16x16x4xbf16> to vector<256x4xbf16>
    %c0_6 = arith.constant 0 : index
    %c0_7 = arith.constant 0 : index
    %c2 = arith.constant 2 : index
    %c0_8 = arith.constant 0 : index
    %6 = vector.load %arg1[%c0_6, %c0_7, %c2, %c0_8] : memref<1x18x24x4xbf16, #tpu.memory_space<vmem>>, vector<1x16x16x4xbf16>
    %7 = vector.shape_cast %6 : vector<1x16x16x4xbf16> to vector<16x16x4xbf16>
    %8 = vector.shape_cast %7 : vector<16x16x4xbf16> to vector<256x4xbf16>
    %c0_9 = arith.constant 0 : index
    %c1_10 = arith.constant 1 : index
    %c0_11 = arith.constant 0 : index
    %c0_12 = arith.constant 0 : index
    %9 = vector.load %arg1[%c0_9, %c1_10, %c0_11, %c0_12] : memref<1x18x24x4xbf16, #tpu.memory_space<vmem>>, vector<1x16x16x4xbf16>
    %10 = vector.shape_cast %9 : vector<1x16x16x4xbf16> to vector<16x16x4xbf16>
    %11 = vector.shape_cast %10 : vector<16x16x4xbf16> to vector<256x4xbf16>
    %c0_13 = arith.constant 0 : index
    %c1_14 = arith.constant 1 : index
    %c1_15 = arith.constant 1 : index
    %c0_16 = arith.constant 0 : index
    %12 = vector.load %arg1[%c0_13, %c1_14, %c1_15, %c0_16] : memref<1x18x24x4xbf16, #tpu.memory_space<vmem>>, vector<1x16x16x4xbf16>
    %13 = vector.shape_cast %12 : vector<1x16x16x4xbf16> to vector<16x16x4xbf16>
    %14 = vector.shape_cast %13 : vector<16x16x4xbf16> to vector<256x4xbf16>
    %c0_17 = arith.constant 0 : index
    %c1_18 = arith.constant 1 : index
    %c2_19 = arith.constant 2 : index
    %c0_20 = arith.constant 0 : index
    %15 = vector.load %arg1[%c0_17, %c1_18, %c2_19, %c0_20] : memref<1x18x24x4xbf16, #tpu.memory_space<vmem>>, vector<1x16x16x4xbf16>
    %16 = vector.shape_cast %15 : vector<1x16x16x4xbf16> to vector<16x16x4xbf16>
    %17 = vector.shape_cast %16 : vector<16x16x4xbf16> to vector<256x4xbf16>
    %c0_21 = arith.constant 0 : index
    %c2_22 = arith.constant 2 : index
    %c0_23 = arith.constant 0 : index
    %c0_24 = arith.constant 0 : index
    %18 = vector.load %arg1[%c0_21, %c2_22, %c0_23, %c0_24] : memref<1x18x24x4xbf16, #tpu.memory_space<vmem>>, vector<1x16x16x4xbf16>
    %19 = vector.shape_cast %18 : vector<1x16x16x4xbf16> to vector<16x16x4xbf16>
    %20 = vector.shape_cast %19 : vector<16x16x4xbf16> to vector<256x4xbf16>
    %c0_25 = arith.constant 0 : index
    %c2_26 = arith.constant 2 : index
    %c1_27 = arith.constant 1 : index
    %c0_28 = arith.constant 0 : index
    %21 = vector.load %arg1[%c0_25, %c2_26, %c1_27, %c0_28] : memref<1x18x24x4xbf16, #tpu.memory_space<vmem>>, vector<1x16x16x4xbf16>
    %22 = vector.shape_cast %21 : vector<1x16x16x4xbf16> to vector<16x16x4xbf16>
    %23 = vector.shape_cast %22 : vector<16x16x4xbf16> to vector<256x4xbf16>
    %c0_29 = arith.constant 0 : index
    %c2_30 = arith.constant 2 : index
    %c2_31 = arith.constant 2 : index
    %c0_32 = arith.constant 0 : index
    %24 = vector.load %arg1[%c0_29, %c2_30, %c2_31, %c0_32] : memref<1x18x24x4xbf16, #tpu.memory_space<vmem>>, vector<1x16x16x4xbf16>
    %25 = vector.shape_cast %24 : vector<1x16x16x4xbf16> to vector<16x16x4xbf16>
    %26 = vector.shape_cast %25 : vector<16x16x4xbf16> to vector<256x4xbf16>
    %27 = tpu.concatenate %2, %5, %8, %11, %14, %17, %20, %23, %26 in 1 : vector<256x4xbf16>, vector<256x4xbf16>, vector<256x4xbf16>, vector<256x4xbf16>, vector<256x4xbf16>, vector<256x4xbf16>, vector<256x4xbf16>, vector<256x4xbf16>, vector<256x4xbf16> -> vector<256x36xbf16>
    %c0_33 = arith.constant 0 : index
    %c0_34 = arith.constant 0 : index
    %28 = vector.load %arg2[%c0_33, %c0_34] : memref<36x128xbf16, #tpu.memory_space<vmem>>, vector<36x128xbf16>
    %cst = arith.constant dense<0.000000e+00> : vector<256x128xf32>
    %29 = tpu.matmul %27, %28, %cst {dimension_numbers = #tpu.dot_dimension_numbers<[1], [0], [0], [1], [0, 0, 1, 1], [], []>} : vector<256x36xbf16>, vector<36x128xbf16>, vector<256x128xf32> -> vector<256x128xf32>
    %c0_35 = arith.constant 0 : index
    %c0_36 = arith.constant 0 : index
    %30 = vector.load %arg3[%c0_35, %c0_36] : memref<1x128xf32, #tpu.memory_space<vmem>>, vector<1x128xf32>
    %31 = vector.broadcast %30 : vector<1x128xf32> to vector<256x128xf32>
    %32 = arith.addf %29, %31 : vector<256x128xf32>
    %cst_37 = arith.constant 0.000000e+00 : f32
    %33 = vector.broadcast %cst_37 : f32 to vector<256x128xf32>
    %34 = arith.maximumf %32, %33 : vector<256x128xf32>
    %cst_38 = arith.constant 0.000000e+00 : bf16
    %35 = vector.broadcast %cst_38 : bf16 to vector<1x24x128xbf16>
    %c0_39 = arith.constant 0 : index
    %c0_40 = arith.constant 0 : index
    %c0_41 = arith.constant 0 : index
    %36 = vector.load %arg7[%c0_39, %c0_40, %c0_41] : memref<18x24x128xbf16, #tpu.memory_space<vmem>>, vector<1x24x128xbf16>
    tpu.vector_store %arg7[%c0_39, %c0_40, %c0_41], %35 {strides = array<i32>} : memref<18x24x128xbf16, #tpu.memory_space<vmem>>, vector<1x24x128xbf16>,
    %c17 = arith.constant 17 : index
    %c0_42 = arith.constant 0 : index
    %c0_43 = arith.constant 0 : index
    %37 = vector.load %arg7[%c17, %c0_42, %c0_43] : memref<18x24x128xbf16, #tpu.memory_space<vmem>>, vector<1x24x128xbf16>
    tpu.vector_store %arg7[%c17, %c0_42, %c0_43], %35 {strides = array<i32>} : memref<18x24x128xbf16, #tpu.memory_space<vmem>>, vector<1x24x128xbf16>,
    %cst_44 = arith.constant 0.000000e+00 : bf16
    %38 = vector.broadcast %cst_44 : bf16 to vector<18x1x128xbf16>
    %c0_45 = arith.constant 0 : index
    %c0_46 = arith.constant 0 : index
    %c0_47 = arith.constant 0 : index
    %39 = vector.load %arg7[%c0_45, %c0_46, %c0_47] : memref<18x24x128xbf16, #tpu.memory_space<vmem>>, vector<18x1x128xbf16>
    tpu.vector_store %arg7[%c0_45, %c0_46, %c0_47], %38 {strides = array<i32>} : memref<18x24x128xbf16, #tpu.memory_space<vmem>>, vector<18x1x128xbf16>,
    %c0_48 = arith.constant 0 : index
    %c17_49 = arith.constant 17 : index
    %c0_50 = arith.constant 0 : index
    %40 = vector.load %arg7[%c0_48, %c17_49, %c0_50] : memref<18x24x128xbf16, #tpu.memory_space<vmem>>, vector<18x1x128xbf16>
    tpu.vector_store %arg7[%c0_48, %c17_49, %c0_50], %38 {strides = array<i32>} : memref<18x24x128xbf16, #tpu.memory_space<vmem>>, vector<18x1x128xbf16>,
    %41 = vector.shape_cast %34 : vector<256x128xf32> to vector<16x16x128xf32>
    %42 = arith.truncf %41 : vector<16x16x128xf32> to vector<16x16x128xbf16>
    %c1_51 = arith.constant 1 : index
    %c1_52 = arith.constant 1 : index
    %c0_53 = arith.constant 0 : index
    %43 = vector.load %arg7[%c1_51, %c1_52, %c0_53] : memref<18x24x128xbf16, #tpu.memory_space<vmem>>, vector<16x16x128xbf16>
    tpu.vector_store %arg7[%c1_51, %c1_52, %c0_53], %42 {strides = array<i32>} : memref<18x24x128xbf16, #tpu.memory_space<vmem>>, vector<16x16x128xbf16>,
    %c0_54 = arith.constant 0 : index
    %c0_55 = arith.constant 0 : index
    %c0_56 = arith.constant 0 : index
    %44 = vector.load %arg7[%c0_54, %c0_55, %c0_56] : memref<18x24x128xbf16, #tpu.memory_space<vmem>>, vector<16x16x128xbf16>
    %45 = vector.shape_cast %44 : vector<16x16x128xbf16> to vector<256x128xbf16>
    %c0_57 = arith.constant 0 : index
    %c1_58 = arith.constant 1 : index
    %c0_59 = arith.constant 0 : index
    %46 = vector.load %arg7[%c0_57, %c1_58, %c0_59] : memref<18x24x128xbf16, #tpu.memory_space<vmem>>, vector<16x16x128xbf16>
    %47 = vector.shape_cast %46 : vector<16x16x128xbf16> to vector<256x128xbf16>
    %c0_60 = arith.constant 0 : index
    %c2_61 = arith.constant 2 : index
    %c0_62 = arith.constant 0 : index
    %48 = vector.load %arg7[%c0_60, %c2_61, %c0_62] : memref<18x24x128xbf16, #tpu.memory_space<vmem>>, vector<16x16x128xbf16>
    %49 = vector.shape_cast %48 : vector<16x16x128xbf16> to vector<256x128xbf16>
    %c1_63 = arith.constant 1 : index
    %c0_64 = arith.constant 0 : index
    %c0_65 = arith.constant 0 : index
    %50 = vector.load %arg7[%c1_63, %c0_64, %c0_65] : memref<18x24x128xbf16, #tpu.memory_space<vmem>>, vector<16x16x128xbf16>
    %51 = vector.shape_cast %50 : vector<16x16x128xbf16> to vector<256x128xbf16>
    %c1_66 = arith.constant 1 : index
    %c1_67 = arith.constant 1 : index
    %c0_68 = arith.constant 0 : index
    %52 = vector.load %arg7[%c1_66, %c1_67, %c0_68] : memref<18x24x128xbf16, #tpu.memory_space<vmem>>, vector<16x16x128xbf16>
    %53 = vector.shape_cast %52 : vector<16x16x128xbf16> to vector<256x128xbf16>
    %c1_69 = arith.constant 1 : index
    %c2_70 = arith.constant 2 : index
    %c0_71 = arith.constant 0 : index
    %54 = vector.load %arg7[%c1_69, %c2_70, %c0_71] : memref<18x24x128xbf16, #tpu.memory_space<vmem>>, vector<16x16x128xbf16>
    %55 = vector.shape_cast %54 : vector<16x16x128xbf16> to vector<256x128xbf16>
    %c2_72 = arith.constant 2 : index
    %c0_73 = arith.constant 0 : index
    %c0_74 = arith.constant 0 : index
    %56 = vector.load %arg7[%c2_72, %c0_73, %c0_74] : memref<18x24x128xbf16, #tpu.memory_space<vmem>>, vector<16x16x128xbf16>
    %57 = vector.shape_cast %56 : vector<16x16x128xbf16> to vector<256x128xbf16>
    %c2_75 = arith.constant 2 : index
    %c1_76 = arith.constant 1 : index
    %c0_77 = arith.constant 0 : index
    %58 = vector.load %arg7[%c2_75, %c1_76, %c0_77] : memref<18x24x128xbf16, #tpu.memory_space<vmem>>, vector<16x16x128xbf16>
    %59 = vector.shape_cast %58 : vector<16x16x128xbf16> to vector<256x128xbf16>
    %c2_78 = arith.constant 2 : index
    %c2_79 = arith.constant 2 : index
    %c0_80 = arith.constant 0 : index
    %60 = vector.load %arg7[%c2_78, %c2_79, %c0_80] : memref<18x24x128xbf16, #tpu.memory_space<vmem>>, vector<16x16x128xbf16>
    %61 = vector.shape_cast %60 : vector<16x16x128xbf16> to vector<256x128xbf16>
    %62 = tpu.concatenate %45, %47, %49, %51, %53, %55, %57, %59, %61 in 1 : vector<256x128xbf16>, vector<256x128xbf16>, vector<256x128xbf16>, vector<256x128xbf16>, vector<256x128xbf16>, vector<256x128xbf16>, vector<256x128xbf16>, vector<256x128xbf16>, vector<256x128xbf16> -> vector<256x1152xbf16>
    %c0_81 = arith.constant 0 : index
    %c0_82 = arith.constant 0 : index
    %63 = vector.load %arg4[%c0_81, %c0_82] : memref<1152x128xbf16, #tpu.memory_space<vmem>>, vector<1152x128xbf16>
    %cst_83 = arith.constant dense<0.000000e+00> : vector<256x128xf32>
    %64 = tpu.matmul %62, %63, %cst_83 {dimension_numbers = #tpu.dot_dimension_numbers<[1], [0], [0], [1], [0, 0, 1, 1], [], []>} : vector<256x1152xbf16>, vector<1152x128xbf16>, vector<256x128xf32> -> vector<256x128xf32>
    %c0_84 = arith.constant 0 : index
    %c0_85 = arith.constant 0 : index
    %65 = vector.load %arg5[%c0_84, %c0_85] : memref<1x128xf32, #tpu.memory_space<vmem>>, vector<1x128xf32>
    %66 = vector.broadcast %65 : vector<1x128xf32> to vector<256x128xf32>
    %67 = arith.addf %64, %66 : vector<256x128xf32>
    %cst_86 = arith.constant 0.000000e+00 : f32
    %68 = vector.broadcast %cst_86 : f32 to vector<256x128xf32>
    %69 = arith.maximumf %67, %68 : vector<256x128xf32>
    %70 = arith.truncf %69 : vector<256x128xf32> to vector<256x128xbf16>
    %c0_87 = arith.constant 0 : index
    %c0_88 = arith.constant 0 : index
    %71 = vector.load %arg6[%c0_87, %c0_88] : memref<256x128xbf16, #tpu.memory_space<vmem>>, vector<256x128xbf16>
    tpu.vector_store %arg6[%c0_87, %c0_88], %70 {strides = array<i32>} : memref<256x128xbf16, #tpu.memory_space<vmem>>, vector<256x128xbf16>,
    return
  }
  func.func @transform_0(%arg0: i32) -> (i32, i32, i32, i32) {
    %c0_i32 = arith.constant 0 : i32
    %c0_i32_0 = arith.constant 0 : i32
    %c0_i32_1 = arith.constant 0 : i32
    %c0_i32_2 = arith.constant 0 : i32
    return %arg0, %c0_i32, %c0_i32_0, %c0_i32_1 : i32, i32, i32, i32
  }
  func.func @transform_1(%arg0: i32) -> (i32, i32) {
    %c0_i32 = arith.constant 0 : i32
    %c0_i32_0 = arith.constant 0 : i32
    %c0_i32_1 = arith.constant 0 : i32
    return %c0_i32, %c0_i32_0 : i32, i32
  }
  func.func @transform_2(%arg0: i32) -> (i32, i32) {
    %c0_i32 = arith.constant 0 : i32
    %c0_i32_0 = arith.constant 0 : i32
    %c0_i32_1 = arith.constant 0 : i32
    return %c0_i32, %c0_i32_0 : i32, i32
  }
  func.func @transform_3(%arg0: i32) -> (i32, i32) {
    %c0_i32 = arith.constant 0 : i32
    %c0_i32_0 = arith.constant 0 : i32
    %c0_i32_1 = arith.constant 0 : i32
    return %c0_i32, %c0_i32_0 : i32, i32
  }
  func.func @transform_4(%arg0: i32) -> (i32, i32) {
    %c0_i32 = arith.constant 0 : i32
    %c0_i32_0 = arith.constant 0 : i32
    %c0_i32_1 = arith.constant 0 : i32
    return %c0_i32, %c0_i32_0 : i32, i32
  }
  func.func @transform_5(%arg0: i32) -> (i32, i32) {
    %c0_i32 = arith.constant 0 : i32
    %c0_i32_0 = arith.constant 0 : i32
    return %arg0, %c0_i32 : i32, i32
  }
}

</mosaic_0001>

<bundles_post_ra>
// kernel: basic_block_forward.1
= control target key start
LH: loop header
LB: loop body
LE: loop exit
PB: predicated region body
PF: predicated region fallthrough
CT: control target
= control target key end

     0   :  { %s9813_s18 = smov 0   ;;  %s13945_s0 = inlined_call_operand.vmem [shape: bf16[2,18,24,4], index: 0, kind: input, shape index: {}]   ;;  %s13946_s1 = inlined_call_operand.vmem [shape: bf16[36,128], index: 1, kind: input, shape index: {}]   ;;  %s13947_s2 = inlined_call_operand.vmem [shape: f32[1,128], index: 2, kind: input, shape index: {}]   ;;  %s13948_s3 = inlined_call_operand.vmem [shape: bf16[1152,128], index: 3, kind: input, shape index: {}]   ;;  %s13949_s4 = inlined_call_operand.vmem [shape: f32[1,128], index: 4, kind: input, shape index: {}]   ;;  %s13950_s5 = inlined_call_operand.vmem [shape: bf16[512,128], index: 5, kind: output, shape index: {}]  }
   0x1 LB: > { %s9819_s19 = sadd.s32 4294967295, %s9772_s18   ;;  %p8074_p0 = scmp.ge.s32.totalorder %s9772_s18, 1  ;;  %s9772_s18 = sphi %s9813_s18, %s15_s18  }
   0x2   : > { %p187_p1 = scmp.lt.s32.totalorder %s9772_s18, 3 }
   0x4   : > { %p188_p2 = pnand %p8074_p0, %p187_p1 }
   0x6   : > { %191 = sbr.rel (%p188_p2) target bundleno = 1123 (0x463), region = 40 }
   0xd   : > { %p215_p3 = scmp.lt.s32.totalorder %s9819_s19, 1  ;;  %vm726_vm0 = vcmask 1042432   ;;  %vm727_vm1 = vcmask 1046532   ;;  %s9774_s25 = smov 12   ;;  %vm275_vm3 = vsmask.f32 3328 }
   0xe   : > { %vm9852_vm2 = vmor %vm726_vm0, %vm727_vm1  ;;  %vm276_vm4 = vsmask.f32 7440  ;;  %s9775_s26 = smov 20   ;;  %s9776_s27 = smov 8   ;;  %vm2795_vm6 = vcmask 31744   ;;  %vm2844_vm7 = vcmask 64512  }
   0xf   : > { %s216_s20 = scalar_select %p215_p3, %s9819_s19, 1  ;;  %vm9896_vm5 = vmor %vm275_vm3, %vm276_vm4  ;;  %vm2877_vm8 = vcmask 97280   ;;  %vm2910_vm9 = vcmask 130048   ;;  %vm2943_vm10 = vcmask 162816   ;;  %vm2976_vm11 = vcmask 195584  }
  0x10   : > { %s9777_s28 = smov 4   ;;  %s9778_s29 = smov 16   ;;  %vm13951_vm12 = vcmask 228352   ;;  %vm3135_vm13 = vcmask 1041408   ;;  %vm13952_vm14 = vcmask 261120   ;;  %vm13953_vm15 = vcmask 293888  }
  0x11   : > { %s9502_s21 = smul.u32 216, %s216_s20  ;;  %s9779_s30 = smov 24   ;;  %vm3339_vm0 = vcmask 1040384   ;;  %vm3340_vm1 = vsmask.f32 256 }
  0x12   : > { %s9780_s6 = smov 28   ;;  %s9781_s9 = smov 32   ;;  %vm3396_vm3 = vsmask.f32 7938  ;;  %vm11361_vm4 = vmand %vm3339_vm0, %vm3340_vm1 }
  0x13   : > { %s9828_s24 = scalar_lea.vmem %s13945_s0, %s9502_s21 }
  0x14   : > { %v8096_v0 = vld [vmem:[%s9828_s24 + $0x18] sm:$0xf]  ;;  %v9832_v1 = vld [vmem:[%s9828_s24 + $0x1c] sm:$0xf]  ;;  %v8094_v2 = vld [vmem:[%s9828_s24 + $0xc] sm:$0xf] }
  0x15   : > { %v924_v3 = vshll.u32 %v9832_v1, 16  ;;  %v928_v4 = vshrl.u32 %v9832_v1, 16  ;;  %v8303_v5 = vcombine.low %v8096_v0, %v9832_v1  ;;  %v915_v6 = vshrl.u32 %v8096_v0, 16  ;;  %v9839_v7 = vld [vmem:[%s9828_s24 + $0x10] sm:$0xf] }
  0x16   : > { %v918_v8 = vshll.u32 %v8096_v0, 16  ;;  %v900_v9 = vshll.u32 %v9839_v7, 16  ;;  %v904_v10 = vshrl.u32 %v9839_v7, 16  ;;  %v8302_v11 = vcombine.low %v8094_v2, %v9839_v7  ;;  %v9845_v12 = vld [vmem:[%s9828_s24 + $0x14] sm:$0x1] }
  0x17   : > { %v9847_v13 = vrot.slane %v928_v4, 4  ;;  %2349 = vrot.lane.b32.xlu1 %v8303_v5, %s9774_s25  ;;  %v917_v14 = vrot.slane %v915_v6, 4  ;;  %v891_v15 = vshrl.u32 %v8094_v2, 16  ;;  %v894_v16 = vshll.u32 %v8094_v2, 16  ;;  %v8142_v18 = vld [vmem:[%s9828_s24 + $0xc] sm:$0xe] }
  0x18   : > { %v920_v19 = vrot.slane %v918_v8, 5  ;;  %v9857_v20 = vrot.slane %v904_v10, 4  ;;  %2347 = vrot.lane.b32.xlu0 %v8302_v11, %s9774_s25  ;;  %v8158_v21 = vrot.slane %v8142_v18, 9  ;;  %v1340_v22 = vrot.slane %v9839_v7, 5  ;;  %v228_v23 = vld [vmem:[%s9828_s24 + $0x4] sm:$0xf] }
  0x19   : > { %v893_v24 = vrot.slane %v891_v15, 4  ;;  %v896_v25 = vrot.slane %v894_v16, 5  ;;  %v1343_v26 = vrot.slane %v9845_v12, 5  ;;  %v259_v27 = vld [vmem:[%s9828_s24 + $0x8] sm:$0x1]  ;;  %v731_v28 = vrot.slane %v228_v23, 5 }
  0x1a   : > { %v921_v29 = vor.u32 %v920_v19, %v917_v14  ;;  %v1341_v30 = vsel %vm9852_vm2, %v8158_v21, %v1340_v22  ;;  %v1342_v31 = vrot.slane %v1340_v22, 4  ;;  %v662_v32 = vld [vmem:[%s9828_s24] sm:$0xe]  ;;  %v734_v33 = vrot.slane %v259_v27, 5  ;;  %v230_v34 = vld [vmem:[%s9828_s24 + $0x10] sm:$0xf] }
  0x1b   : > { %v897_v35 = vor.u32 %v896_v25, %v893_v24  ;;  %v8078_v36 = vrot.slane %v662_v32, 9  ;;  %v733_v37 = vrot.slane %v731_v28, 4  ;;  %v260_v38 = vld [vmem:[%s9828_s24 + $0x14] sm:$0x1]  ;;  %v663_v39 = vld [vmem:[%s9828_s24 + $0xc] sm:$0xe] }
  0x1c   : > { %v9870_v40 = vrot.slane %v921_v29, 4  ;;  %v1344_v41 = vsel %vm9852_vm2, %v1342_v31, %v1343_v26  ;;  %v8079_v42 = vrot.slane %v663_v39, 9  ;;  %v738_v43 = vrot.slane %v230_v34, 5  ;;  %v227_v44 = vld [vmem:[%s9828_s24] sm:$0xf] }
  0x1d   : > { %v9875_v45 = vrot.slane %v897_v35, 4  ;;  %v8334_v46 = vcombine.low %v1341_v30, %v1344_v41  ;;  %v732_v47 = vsel %vm9852_vm2, %v8078_v36, %v731_v28  ;;  %v735_v48 = vsel %vm9852_vm2, %v733_v37, %v734_v33  ;;  %v8143_v49 = vld [vmem:[%s9828_s24 + $0x18] sm:$0xe]  ;;  %v8127_v58 = vld [vmem:[%s9828_s24 + $0x20] sm:$0x1] }
  0x1e   : > { %v8286_v50 = vcombine.low %v732_v47, %v735_v48  ;;  %v739_v51 = vsel %vm9852_vm2, %v8079_v42, %v738_v43  ;;  %v740_v52 = vrot.slane %v738_v43, 4  ;;  %v741_v53 = vrot.slane %v260_v38, 5  ;;  %v229_v63 = vld [vmem:[%s9828_s24 + $0xc] sm:$0xf]  ;;  %v8176_v42 = vld [vmem:[%s9828_s24 + $0x24] sm:$0xf] }
  0x1f   : > { %2507 = vrot.lane.b32.xlu0 %v8334_v46, %s9775_s26  ;;  %v279_v54 = vshrl.u32 %v227_v44, 16  ;;  %v282_v55 = vshll.u32 %v227_v44, 16  ;;  %v288_v56 = vshll.u32 %v228_v23, 16  ;;  %v292_v57 = vshrl.u32 %v228_v23, 16 }
  0x20   : > { %2251 = vrot.lane.b32.xlu1 %v8286_v50, %s9776_s27  ;;  %v742_v59 = vsel %vm9852_vm2, %v740_v52, %v741_v53  ;;  %v298_v60 = vshll.u32 %v259_v27, 16  ;;  %v8159_v61 = vrot.slane %v8143_v49, 9  ;;  %v1347_v62 = vrot.slane %v9832_v1, 5 }
  0x21   : > { %v8287_v0 = vcombine.low %v739_v51, %v742_v59  ;;  %v281_v2 = vrot.slane %v279_v54, 4  ;;  %v284_v4 = vrot.slane %v282_v55, 5  ;;  %v290_v5 = vrot.slane %v288_v56, 5  ;;  %v8174_v51 = vld [vmem:[%s9828_s24 + $0x18] sm:$0xf] }
  0x22   : > { %v294_v6 = vrot.slane %v292_v57, 4  ;;  %v300_v8 = vrot.slane %v298_v60, 5  ;;  %v1348_v10 = vsel %vm9852_vm2, %v8159_v61, %v1347_v62  ;;  %v1349_v11 = vrot.slane %v1347_v62, 4  ;;  %v8207_v62 = vld [vmem:[%s9828_s24 + $0x2c] sm:$0x1] }
  0x23   : > { %v285_v14 = vor.u32 %v284_v4, %v281_v2  ;;  %v1350_v15 = vrot.slane %v8127_v58, 5  ;;  %v303_v16 = vshrl.u32 %v229_v63, 16  ;;  %v306_v18 = vshll.u32 %v229_v63, 16 }
  0x24   : > { %2253 = vrot.lane.b32.xlu1 %v8287_v0, %s9776_s27  ;;  %v295_v21 = vor.u32 %v294_v6, %v290_v5  ;;  %v312_v22 = vshll.u32 %v230_v34, 16  ;;  %v316_v23 = vshrl.u32 %v230_v34, 16  ;;  %v322_v24 = vshll.u32 %v260_v38, 16 }
  0x25   : > { %v286_v25 = vrot.slane %v285_v14, 4  ;;  %v1351_v26 = vsel %vm9852_vm2, %v1349_v11, %v1350_v15  ;;  %v305_v27 = vrot.slane %v303_v16, 4  ;;  %v308_v28 = vrot.slane %v306_v18, 5  ;;  %v8223_v14 = vld [vmem:[%s9828_s24 + $0x24] sm:$0xe] }
  0x26   : > { %v296_v29 = vrot.slane %v295_v21, 4  ;;  %v8335_v30 = vcombine.low %v1348_v10, %v1351_v26  ;;  %v314_v31 = vrot.slane %v312_v22, 5  ;;  %v318_v32 = vrot.slane %v316_v23, 4  ;;  %v8222_v26 = vld [vmem:[%s9828_s24 + $0x18] sm:$0xe] }
  0x27   : > { %v291_v33 = vsel %vm9896_vm5, %v286_v25, %v290_v5  ;;  %v309_v35 = vor.u32 %v308_v28, %v305_v27  ;;  %v324_v36 = vrot.slane %v322_v24, 5  ;;  %v926_v34 = vrot.slane %v924_v3, 5  ;;  %v9917_v3 = vld [vmem:[%s9828_s24 + $0x28] sm:$0xf]  ;;  %v8206_v5 = vld [vmem:[%s9828_s24 + $0x20] sm:$0x1] }
  0x28   : > { %v301_v37 = vsel %vm9896_vm5, %v296_v29, %v300_v8  ;;  %2509 = vrot.lane.b32.xlu1 %v8335_v30, %s9775_s26  ;;  %v319_v38 = vor.u32 %v318_v32, %v314_v31  ;;  %v934_v39 = vshll.u32 %v8127_v58, 16  ;;  %v902_v41 = vrot.slane %v900_v9, 5 }
  0x29   : > { %v8270_v43 = vcombine.low %v291_v33, %v301_v37  ;;  %v310_v44 = vrot.slane %v309_v35, 4  ;;  %v927_v46 = vsel %vm9896_vm5, %v9870_v40, %v926_v34  ;;  %v931_v1 = vor.u32 %v9847_v13, %v926_v34 }
  0x2a   : > { %v320_v47 = vrot.slane %v319_v38, 4  ;;  %v936_v48 = vrot.slane %v934_v39, 5  ;;  %v903_v7 = vsel %vm9896_vm5, %v9875_v45, %v902_v41  ;;  %v907_v9 = vor.u32 %v9857_v20, %v902_v41  ;;  %v8175_v20 = vld [vmem:[%s9828_s24 + $0x1c] sm:$0xf] }
  0x2b   : > { %2171 = vrot.lane.b32.xlu0 %v8270_v43, %s9777_s28  ;;  %v315_v49 = vsel %vm9896_vm5, %v310_v44, %v314_v31  ;;  %v932_v40 = vrot.slane %v931_v1, 4  ;;  %v910_v13 = vshll.u32 %v9845_v12, 16  ;;  %v1524_v50 = vshrl.u32 %v8176_v42, 16 }
  0x2c   : > { %v325_v52 = vsel %vm9896_vm5, %v320_v47, %v324_v36  ;;  %v908_v53 = vrot.slane %v907_v9, 4  ;;  %v1527_v54 = vshll.u32 %v8176_v42, 16  ;;  %v1537_v45 = vshrl.u32 %v9917_v3, 16  ;;  %v233_v36 = vld [vmem:[%s9828_s24 + $0x24] sm:$0xf] }
  0x2d   : > { %v8271_v55 = vcombine.low %v315_v49, %v325_v52  ;;  %v937_v56 = vsel %vm9896_vm5, %v932_v40, %v936_v48  ;;  %v912_v57 = vrot.slane %v910_v13, 5  ;;  %v1526_v58 = vrot.slane %v1524_v50, 4  ;;  %v234_v47 = vld [vmem:[%s9828_s24 + $0x28] sm:$0xf]  ;;  %v262_v13 = vld [vmem:[%s9828_s24 + $0x2c] sm:$0x1] }
  0x2e   : > { %v8319_v59 = vcombine.low %v927_v46, %v937_v56  ;;  %v1529_v12 = vrot.slane %v1527_v54, 5  ;;  %v8351_v60 = vcombine.low %v8176_v42, %v9917_v3  ;;  %v1500_v61 = vshrl.u32 %v8174_v51, 16  ;;  %v231_v50 = vld [vmem:[%s9828_s24 + $0x18] sm:$0xf] }
  0x2f   : > { %2173 = vrot.lane.b32.xlu0 %v8271_v55, %s9777_s28  ;;  %v913_v63 = vsel %vm9896_vm5, %v908_v53, %v912_v57  ;;  %v1503_v0 = vshll.u32 %v8174_v51, 16  ;;  %v1513_v2 = vshrl.u32 %v8175_v20, 16  ;;  %v8350_v4 = vcombine.low %v8174_v51, %v8175_v20 }
  0x30   : > { %2429 = vrot.lane.b32.xlu1 %v8319_v59, %s9778_s29  ;;  %v8318_v6 = vcombine.low %v903_v7, %v913_v63  ;;  %v1502_v8 = vrot.slane %v1500_v61, 4  ;;  %v1530_v10 = vor.u32 %v1529_v12, %v1526_v58  ;;  %v1533_v11 = vshll.u32 %v9917_v3, 16 }
  0x31   : > { %v1505_v15 = vrot.slane %v1503_v0, 5  ;;  %v1539_v16 = vrot.slane %v1537_v45, 4  ;;  %v1543_v18 = vshll.u32 %v8207_v62, 16  ;;  %v1509_v21 = vshll.u32 %v8175_v20, 16  ;;  %v9967_v45 = vld [vmem:[%s9828_s24 + $0x1c] sm:$0xf] }
  0x32   : > { %v1531_v22 = vrot.slane %v1530_v10, 4  ;;  %v1535_v23 = vrot.slane %v1533_v11, 5  ;;  %v1515_v24 = vrot.slane %v1513_v2, 4  ;;  %v1519_v25 = vshll.u32 %v8206_v5, 16 }
  0x33   : > { %2427 = vrot.lane.b32.xlu0 %v8318_v6, %s9778_s29  ;;  %v1545_v27 = vrot.slane %v1543_v18, 5  ;;  %v1506_v28 = vor.u32 %v1505_v15, %v1502_v8  ;;  %v1511_v29 = vrot.slane %v1509_v21, 5  ;;  %v8239_v30 = vrot.slane %v8223_v14, 9  ;;  %v9538_v18 = vld [vmem:[%s13946_s1] sm:$0xff]  }
  0x34   : > { %2605 = vrot.lane.b32.xlu1 %v8351_v60, %s9779_s30  ;;  %v1536_v31 = vsel %vm9896_vm5, %v1531_v22, %v1535_v23  ;;  %v1540_v32 = vor.u32 %v1539_v16, %v1535_v23  ;;  %v1521_v33 = vrot.slane %v1519_v25, 5  ;;  %v1956_v35 = vrot.slane %v9917_v3, 5  ;;  %v9973_v60 = vld [vmem:[%s9828_s24 + $0x20] sm:$0x1]  ;;  %v664_v25 = vld [vmem:[%s9828_s24 + $0x18] sm:$0xe]  ;;  %9399 = vmatprep.subr.bf16.mxu0 %v9538_v18 }
  0x35   : > { %v1507_v34 = vrot.slane %v1506_v28, 4  ;;  %v1516_v37 = vor.u32 %v1515_v24, %v1511_v29  ;;  %v1959_v38 = vrot.slane %v8207_v62, 5  ;;  %v8238_v39 = vrot.slane %v8222_v26, 9  ;;  %9400 = vmatpush3.bf16.msra.mxu0 %v9538_v18  ;;  %v8144_v18 = vld [vmem:[%s9828_s24 + $0x24] sm:$0xe] }
  0x36   : > { %v1541_v41 = vrot.slane %v1540_v32, 4  ;;  %v1957_v42 = vsel %vm9852_vm2, %v8239_v30, %v1956_v35  ;;  %v1958_v43 = vrot.slane %v1956_v35, 4  ;;  %v1949_v44 = vrot.slane %v8175_v20, 5 }
  0x37   : > { %2603 = vrot.lane.b32.xlu0 %v8350_v4, %s9779_s30  ;;  %v1512_v46 = vsel %vm9896_vm5, %v1507_v34, %v1511_v29  ;;  %v1517_v1 = vrot.slane %v1516_v37, 4  ;;  %v1952_v3 = vrot.slane %v8206_v5, 5  ;;  %v351_v48 = vshrl.u32 %v233_v36, 16  ;;  %v665_v4 = vld [vmem:[%s9828_s24 + $0x24] sm:$0xe] }
  0x38   : > { %v1546_v7 = vsel %vm9896_vm5, %v1541_v41, %v1545_v27  ;;  %v1960_v9 = vsel %vm9852_vm2, %v1958_v43, %v1959_v38  ;;  %v1950_v49 = vsel %vm9852_vm2, %v8238_v39, %v1949_v44  ;;  %v1951_v40 = vrot.slane %v1949_v44, 4  ;;  %v8100_v38 = vld [vmem:[%s9828_s24 + $0x30] sm:$0xf]  ;;  %v9541_v39 = vld [vmem:[%s13946_s1 + $0x8] sm:$0xff]  }
  0x39   : > { %v8367_v51 = vcombine.low %v1536_v31, %v1546_v7  ;;  %v1522_v52 = vsel %vm9896_vm5, %v1517_v1, %v1521_v33  ;;  %v8383_v53 = vcombine.low %v1957_v42, %v1960_v9  ;;  %v353_v54 = vrot.slane %v351_v48, 4  ;;  %v8098_v1 = vld [vmem:[%s9828_s24 + $0x24] sm:$0xf]  ;;  %9401 = vmatprep.subr.bf16.mxu0 %v9541_v39 }
  0x3a   : > { %v8366_v20 = vcombine.low %v1512_v46, %v1522_v52  ;;  %v1953_v55 = vsel %vm9852_vm2, %v1951_v40, %v1952_v3  ;;  %v354_v56 = vshll.u32 %v233_v36, 16  ;;  %v360_v57 = vshll.u32 %v234_v47, 16  ;;  %v8101_v46 = vld [vmem:[%s9828_s24 + $0x34] sm:$0xf]  ;;  %9402 = vmatpush3.bf16.msra.mxu0 %v9541_v39 }
  0x3b   : > { %2685 = vrot.lane.b32.xlu1 %v8367_v51, %s9780_s6  ;;  %v8382_v58 = vcombine.low %v1950_v49, %v1953_v55  ;;  %v364_v59 = vshrl.u32 %v234_v47, 16  ;;  %v370_v12 = vshll.u32 %v262_v13, 16  ;;  %v327_v61 = vshrl.u32 %v231_v50, 16 }
  0x3c   : > { %2683 = vrot.lane.b32.xlu0 %v8366_v20, %s9780_s6  ;;  %v356_v62 = vrot.slane %v354_v56, 5  ;;  %v362_v63 = vrot.slane %v360_v57, 5  ;;  %v330_v0 = vshll.u32 %v231_v50, 16  ;;  %v336_v2 = vshll.u32 %v9967_v45, 16  ;;  %v8099_v50 = vld [vmem:[%s9828_s24 + $0x28] sm:$0xf] }
  0x3d   : > { %v366_v5 = vrot.slane %v364_v59, 4  ;;  %v372_v6 = vrot.slane %v370_v12, 5  ;;  %v329_v8 = vrot.slane %v327_v61, 4  ;;  %v340_v10 = vshrl.u32 %v9967_v45, 16 }
  0x3e   : > { %v357_v11 = vor.u32 %v356_v62, %v353_v54  ;;  %v332_v14 = vrot.slane %v330_v0, 5  ;;  %v338_v15 = vrot.slane %v336_v2, 5  ;;  %v346_v16 = vshll.u32 %v9973_v60, 16  ;;  %v8145_v62 = vld [vmem:[%s9828_s24 + $0x30] sm:$0xe] }
  0x3f   : > { %2765 = vrot.lane.b32.xlu1 %v8383_v53, %s9781_s9  ;;  %v367_v21 = vor.u32 %v366_v5, %v362_v63  ;;  %v342_v22 = vrot.slane %v340_v10, 4  ;;  %v8081_v23 = vrot.slane %v665_v4, 9  ;;  %v752_v24 = vrot.slane %v234_v47, 5 }
  0x40   : > { %2763 = vrot.lane.b32.xlu0 %v8382_v58, %s9781_s9  ;;  %v358_v26 = vrot.slane %v357_v11, 4  ;;  %v333_v27 = vor.u32 %v332_v14, %v329_v8  ;;  %v348_v28 = vrot.slane %v346_v16, 5  ;;  %v755_v29 = vrot.slane %v262_v13, 5  ;;  %v8128_v58 = vld [vmem:[%s9828_s24 + $0x2c] sm:$0x1] }
  0x41   : > { %v368_v30 = vrot.slane %v367_v21, 4  ;;  %v343_v31 = vor.u32 %v342_v22, %v338_v15  ;;  %v753_v32 = vsel %vm9852_vm2, %v8081_v23, %v752_v24  ;;  %v754_v33 = vrot.slane %v752_v24, 4 }
  0x42   : > { %v363_v35 = vsel %vm9896_vm5, %v358_v26, %v362_v63  ;;  %v334_v36 = vrot.slane %v333_v27, 4  ;;  %v8080_v34 = vrot.slane %v664_v25, 9  ;;  %v745_v37 = vrot.slane %v9967_v45, 5  ;;  %v8129_v45 = vld [vmem:[%s9828_s24 + $0x38] sm:$0x1] }
  0x43   : > { %v373_v41 = vsel %vm9896_vm5, %v368_v30, %v372_v6  ;;  %v344_v42 = vrot.slane %v343_v31, 4  ;;  %v756_v43 = vsel %vm9852_vm2, %v754_v33, %v755_v29  ;;  %v748_v44 = vrot.slane %v9973_v60, 5  ;;  %v10022_v29 = vld [vmem:[%s9828_s24 + $0x3c] sm:$0xf] }
  0x44   : > { %v8273_v3 = vcombine.low %v363_v35, %v373_v41  ;;  %v339_v47 = vsel %vm9896_vm5, %v334_v36, %v338_v15  ;;  %v8289_v48 = vcombine.low %v753_v32, %v756_v43  ;;  %v746_v7 = vsel %vm9852_vm2, %v8080_v34, %v745_v37  ;;  %v8181_v41 = vld [vmem:[%s9828_s24 + $0x40] sm:$0xf] }
  0x45   : > { %v349_v9 = vsel %vm9896_vm5, %v344_v42, %v348_v28  ;;  %v747_v49 = vrot.slane %v745_v37, 4  ;;  %v963_v40 = vshrl.u32 %v8100_v38, 16  ;;  %v966_v13 = vshll.u32 %v8100_v38, 16 }
  0x46   : > { %2177 = vrot.lane.b32.xlu1 %v8273_v3, %s9777_s28  ;;  %v8272_v51 = vcombine.low %v339_v47, %v349_v9  ;;  %v976_v52 = vshrl.u32 %v8101_v46, 16  ;;  %v8305_v53 = vcombine.low %v8100_v38, %v8101_v46  ;;  %v939_v54 = vshrl.u32 %v8098_v1, 16  ;;  %v8178_v47 = vld [vmem:[%s9828_s24 + $0x30] sm:$0xf] }
  0x47   : > { %v749_v20 = vsel %vm9852_vm2, %v747_v49, %v748_v44  ;;  %v965_v55 = vrot.slane %v963_v40, 4  ;;  %v968_v56 = vrot.slane %v966_v13, 5  ;;  %v942_v57 = vshll.u32 %v8098_v1, 16 }
  0x48   : > { %2175 = vrot.lane.b32.xlu0 %v8272_v51, %s9777_s28  ;;  %v8288_v59 = vcombine.low %v746_v7, %v749_v20  ;;  %v941_v12 = vrot.slane %v939_v54, 4  ;;  %v952_v60 = vshrl.u32 %v8099_v50, 16  ;;  %v8304_v61 = vcombine.low %v8098_v1, %v8099_v50 }
  0x49   : > { %v944_v63 = vrot.slane %v942_v57, 5  ;;  %v969_v0 = vor.u32 %v968_v56, %v965_v55  ;;  %v972_v2 = vshll.u32 %v8101_v46, 16  ;;  %v978_v4 = vrot.slane %v976_v52, 4  ;;  %v8208_v56 = vld [vmem:[%s9828_s24 + $0x38] sm:$0x1] }
  0x4a   : > { %2257 = vrot.lane.b32.xlu1 %v8289_v48, %s9776_s27  ;;  %v982_v5 = vshll.u32 %v8129_v45, 16  ;;  %v948_v6 = vshll.u32 %v8099_v50, 16  ;;  %v954_v8 = vrot.slane %v952_v60, 4  ;;  %v958_v10 = vshll.u32 %v8128_v58, 16  ;;  %v8179_v48 = vld [vmem:[%s9828_s24 + $0x34] sm:$0xf] }
  0x4b   : > { %v970_v11 = vrot.slane %v969_v0, 4  ;;  %v974_v14 = vrot.slane %v972_v2, 5  ;;  %v945_v15 = vor.u32 %v944_v63, %v941_v12  ;;  %v8161_v16 = vrot.slane %v8145_v62, 9  ;;  %v8225_v60 = vld [vmem:[%s9828_s24 + $0x3c] sm:$0xe] }
  0x4c   : > { %2255 = vrot.lane.b32.xlu0 %v8288_v59, %s9776_s27  ;;  %v984_v21 = vrot.slane %v982_v5, 5  ;;  %v950_v22 = vrot.slane %v948_v6, 5  ;;  %v960_v23 = vrot.slane %v958_v10, 5  ;;  %v1361_v24 = vrot.slane %v8101_v46, 5 }
  0x4d   : > { %v975_v25 = vsel %vm9896_vm5, %v970_v11, %v974_v14  ;;  %v979_v26 = vor.u32 %v978_v4, %v974_v14  ;;  %v946_v27 = vrot.slane %v945_v15, 4  ;;  %v1364_v28 = vrot.slane %v8129_v45, 5 }
  0x4e   : > { %2353 = vrot.lane.b32.xlu1 %v8305_v53, %s9774_s25  ;;  %v955_v30 = vor.u32 %v954_v8, %v950_v22  ;;  %v1362_v31 = vsel %vm9852_vm2, %v8161_v16, %v1361_v24  ;;  %v1363_v32 = vrot.slane %v1361_v24, 4  ;;  %v8160_v33 = vrot.slane %v8144_v18, 9  ;;  %v8209_v53 = vld [vmem:[%s9828_s24 + $0x44] sm:$0x1]  ;;  %v8224_v8 = vld [vmem:[%s9828_s24 + $0x30] sm:$0xe] }
  0x4f   : > { %v980_v35 = vrot.slane %v979_v26, 4  ;;  %v951_v36 = vsel %vm9896_vm5, %v946_v27, %v950_v22  ;;  %v1354_v34 = vrot.slane %v8099_v50, 5  ;;  %v1357_v37 = vrot.slane %v8128_v58, 5 }
  0x50   : > { %2351 = vrot.lane.b32.xlu0 %v8304_v61, %s9774_s25  ;;  %v956_v38 = vrot.slane %v955_v30, 4  ;;  %v1365_v39 = vsel %vm9852_vm2, %v1363_v32, %v1364_v28  ;;  %v1572_v42 = vshrl.u32 %v10022_v29, 16  ;;  %v1575_v43 = vshll.u32 %v10022_v29, 16 }
  0x51   : > { %v985_v44 = vsel %vm9896_vm5, %v980_v35, %v984_v21  ;;  %v8337_v46 = vcombine.low %v1362_v31, %v1365_v39  ;;  %v1355_v1 = vsel %vm9852_vm2, %v8160_v33, %v1354_v34  ;;  %v1356_v3 = vrot.slane %v1354_v34, 4 }
  0x52   : > { %v8321_v7 = vcombine.low %v975_v25, %v985_v44  ;;  %v961_v9 = vsel %vm9896_vm5, %v956_v38, %v960_v23  ;;  %v1574_v49 = vrot.slane %v1572_v42, 4  ;;  %v1577_v40 = vrot.slane %v1575_v43, 5  ;;  %v237_v23 = vld [vmem:[%s9828_s24 + $0x3c] sm:$0xf]  ;;  %v264_v42 = vld [vmem:[%s9828_s24 + $0x44] sm:$0x1] }
  0x53   : > { %v8320_v13 = vcombine.low %v951_v36, %v961_v9  ;;  %v1358_v50 = vsel %vm9852_vm2, %v1356_v3, %v1357_v37  ;;  %v1585_v51 = vshrl.u32 %v8181_v41, 16  ;;  %v8353_v52 = vcombine.low %v10022_v29, %v8181_v41  ;;  %v238_v36 = vld [vmem:[%s9828_s24 + $0x40] sm:$0xf]  ;;  %v235_v43 = vld [vmem:[%s9828_s24 + $0x30] sm:$0xf] }
  0x54   : > { %2433 = vrot.lane.b32.xlu1 %v8321_v7, %s9778_s29  ;;  %v8336_v54 = vcombine.low %v1355_v1, %v1358_v50  ;;  %v1548_v45 = vshrl.u32 %v8178_v47, 16  ;;  %v1551_v20 = vshll.u32 %v8178_v47, 16  ;;  %v1561_v55 = vshrl.u32 %v8179_v48, 16 }
  0x55   : > { %2431 = vrot.lane.b32.xlu0 %v8320_v13, %s9778_s29  ;;  %v8352_v57 = vcombine.low %v8178_v47, %v8179_v48  ;;  %v1578_v58 = vor.u32 %v1577_v40, %v1574_v49  ;;  %v1581_v59 = vshll.u32 %v8181_v41, 16  ;;  %v1587_v12 = vrot.slane %v1585_v51, 4  ;;  %v236_v47 = vld [vmem:[%s9828_s24 + $0x34] sm:$0xf]  ;;  %v263_v51 = vld [vmem:[%s9828_s24 + $0x38] sm:$0x1] }
  0x56   : > { %v1550_v61 = vrot.slane %v1548_v45, 4  ;;  %v1553_v62 = vrot.slane %v1551_v20, 5  ;;  %v1591_v63 = vshll.u32 %v8209_v53, 16  ;;  %v1557_v0 = vshll.u32 %v8179_v48, 16 }
  0x57   : > { %v1579_v2 = vrot.slane %v1578_v58, 4  ;;  %v1583_v4 = vrot.slane %v1581_v59, 5  ;;  %v1563_v5 = vrot.slane %v1561_v55, 4  ;;  %v1567_v6 = vshll.u32 %v8208_v56, 16  ;;  %v667_v55 = vld [vmem:[%s9828_s24 + $0x3c] sm:$0xe] }
  0x58   : > { %2513 = vrot.lane.b32.xlu1 %v8337_v46, %s9775_s26  ;;  %v1593_v10 = vrot.slane %v1591_v63, 5  ;;  %v1554_v11 = vor.u32 %v1553_v62, %v1550_v61  ;;  %v1559_v14 = vrot.slane %v1557_v0, 5  ;;  %v8241_v15 = vrot.slane %v8225_v60, 9 }
  0x59   : > { %2511 = vrot.lane.b32.xlu0 %v8336_v54, %s9775_s26  ;;  %v1584_v16 = vsel %vm9896_vm5, %v1579_v2, %v1583_v4  ;;  %v1588_v18 = vor.u32 %v1587_v12, %v1583_v4  ;;  %v1569_v21 = vrot.slane %v1567_v6, 5  ;;  %v1970_v22 = vrot.slane %v8181_v41, 5 }
  0x5a   : > { %v1555_v24 = vrot.slane %v1554_v11, 4  ;;  %v1564_v25 = vor.u32 %v1563_v5, %v1559_v14  ;;  %v1973_v26 = vrot.slane %v8209_v53, 5  ;;  %v8240_v27 = vrot.slane %v8224_v8, 9  ;;  %v666_v5 = vld [vmem:[%s9828_s24 + $0x30] sm:$0xe] }
  0x5b   : > { %v1589_v28 = vrot.slane %v1588_v18, 4  ;;  %v1971_v29 = vsel %vm9852_vm2, %v8241_v15, %v1970_v22  ;;  %v1972_v30 = vrot.slane %v1970_v22, 4  ;;  %v1963_v31 = vrot.slane %v8179_v48, 5 }
  0x5c   : > { %2609 = vrot.lane.b32.xlu1 %v8353_v52, %s9779_s30  ;;  %v1560_v32 = vsel %vm9896_vm5, %v1555_v24, %v1559_v14  ;;  %v1565_v33 = vrot.slane %v1564_v25, 4  ;;  %v1966_v35 = vrot.slane %v8208_v56, 5  ;;  %v399_v34 = vshrl.u32 %v237_v23, 16  ;;  %v8104_v25 = vld [vmem:[%s9828_s24 + $0x48] sm:$0xf] }
  0x5d   : > { %2607 = vrot.lane.b32.xlu0 %v8352_v57, %s9779_s30  ;;  %v1594_v37 = vsel %vm9896_vm5, %v1589_v28, %v1593_v10  ;;  %v1974_v38 = vsel %vm9852_vm2, %v1972_v30, %v1973_v26  ;;  %v1964_v39 = vsel %vm9852_vm2, %v8240_v27, %v1963_v31  ;;  %v1965_v41 = vrot.slane %v1963_v31, 4  ;;  %v8105_v30 = vld [vmem:[%s9828_s24 + $0x4c] sm:$0xf]  ;;  %v8102_v31 = vld [vmem:[%s9828_s24 + $0x3c] sm:$0xf] }
  0x5e   : > { %v8369_v44 = vcombine.low %v1584_v16, %v1594_v37  ;;  %v1570_v46 = vsel %vm9896_vm5, %v1565_v33, %v1569_v21  ;;  %v8385_v1 = vcombine.low %v1971_v29, %v1974_v38  ;;  %v401_v3 = vrot.slane %v399_v34, 4 }
  0x5f   : > { %v8368_v48 = vcombine.low %v1560_v32, %v1570_v46  ;;  %v1967_v7 = vsel %vm9852_vm2, %v1965_v41, %v1966_v35  ;;  %v402_v9 = vshll.u32 %v237_v23, 16  ;;  %v408_v49 = vshll.u32 %v238_v36, 16  ;;  %v8103_v41 = vld [vmem:[%s9828_s24 + $0x40] sm:$0xf] }
  0x60   : > { %2689 = vrot.lane.b32.xlu1 %v8369_v44, %s9780_s6  ;;  %v8384_v40 = vcombine.low %v1964_v39, %v1967_v7  ;;  %v412_v13 = vshrl.u32 %v238_v36, 16  ;;  %v418_v50 = vshll.u32 %v264_v42, 16  ;;  %v375_v52 = vshrl.u32 %v235_v43, 16 }
  0x61   : > { %2687 = vrot.lane.b32.xlu0 %v8368_v48, %s9780_s6  ;;  %v404_v53 = vrot.slane %v402_v9, 5  ;;  %v410_v54 = vrot.slane %v408_v49, 5  ;;  %v378_v45 = vshll.u32 %v235_v43, 16  ;;  %v384_v20 = vshll.u32 %v236_v47, 16  ;;  %v8130_v9 = vld [vmem:[%s9828_s24 + $0x44] sm:$0x1] }
  0x62   : > { %v414_v56 = vrot.slane %v412_v13, 4  ;;  %v420_v57 = vrot.slane %v418_v50, 5  ;;  %v377_v58 = vrot.slane %v375_v52, 4  ;;  %v388_v59 = vshrl.u32 %v236_v47, 16 }
  0x63   : > { %v405_v12 = vor.u32 %v404_v53, %v401_v3  ;;  %v380_v60 = vrot.slane %v378_v45, 5  ;;  %v386_v61 = vrot.slane %v384_v20, 5  ;;  %v394_v62 = vshll.u32 %v263_v51, 16 }
  0x64   : > { %2769 = vrot.lane.b32.xlu1 %v8385_v1, %s9781_s9  ;;  %v415_v63 = vor.u32 %v414_v56, %v410_v54  ;;  %v390_v0 = vrot.slane %v388_v59, 4  ;;  %v8083_v2 = vrot.slane %v667_v55, 9  ;;  %v766_v4 = vrot.slane %v238_v36, 5  ;;  %v8131_v1 = vld [vmem:[%s9828_s24 + $0x50] sm:$0x1] }
  0x65   : > { %2767 = vrot.lane.b32.xlu0 %v8384_v40, %s9781_s9  ;;  %v406_v6 = vrot.slane %v405_v12, 4  ;;  %v381_v8 = vor.u32 %v380_v60, %v377_v58  ;;  %v396_v10 = vrot.slane %v394_v62, 5  ;;  %v769_v11 = vrot.slane %v264_v42, 5 }
  0x66   : > { %v416_v14 = vrot.slane %v415_v63, 4  ;;  %v391_v15 = vor.u32 %v390_v0, %v386_v61  ;;  %v767_v16 = vsel %vm9852_vm2, %v8083_v2, %v766_v4  ;;  %v768_v18 = vrot.slane %v766_v4, 4 }
  0x67   : > { %v411_v21 = vsel %vm9896_vm5, %v406_v6, %v410_v54  ;;  %v382_v22 = vrot.slane %v381_v8, 4  ;;  %v8082_v23 = vrot.slane %v666_v5, 9  ;;  %v759_v24 = vrot.slane %v236_v47, 5 }
  0x68   : > { %v421_v26 = vsel %vm9896_vm5, %v416_v14, %v420_v57  ;;  %v392_v27 = vrot.slane %v391_v15, 4  ;;  %v770_v28 = vsel %vm9852_vm2, %v768_v18, %v769_v11  ;;  %v762_v29 = vrot.slane %v263_v51, 5  ;;  %v8147_v51 = vld [vmem:[%s9828_s24 + $0x48] sm:$0xe] }
  0x69   : > { %v8275_v32 = vcombine.low %v411_v21, %v421_v26  ;;  %v387_v33 = vsel %vm9896_vm5, %v382_v22, %v386_v61  ;;  %v8291_v35 = vcombine.low %v767_v16, %v770_v28  ;;  %v760_v36 = vsel %vm9852_vm2, %v8082_v23, %v759_v24  ;;  %v8146_v61 = vld [vmem:[%s9828_s24 + $0x3c] sm:$0xe] }
  0x6a   : > { %v397_v34 = vsel %vm9896_vm5, %v392_v27, %v396_v10  ;;  %v761_v37 = vrot.slane %v759_v24, 4  ;;  %v1011_v38 = vshrl.u32 %v8104_v25, 16  ;;  %v1014_v39 = vshll.u32 %v8104_v25, 16  ;;  %v10115_v10 = vld [vmem:[%s9828_s24 + $0x54] sm:$0xf] }
  0x6b   : > { %2181 = vrot.lane.b32.xlu1 %v8275_v32, %s9777_s28  ;;  %v8274_v42 = vcombine.low %v387_v33, %v397_v34  ;;  %v1024_v43 = vshrl.u32 %v8105_v30, 16  ;;  %v8307_v44 = vcombine.low %v8104_v25, %v8105_v30  ;;  %v987_v46 = vshrl.u32 %v8102_v31, 16  ;;  %v8185_v24 = vld [vmem:[%s9828_s24 + $0x58] sm:$0xf] }
  0x6c   : > { %v763_v3 = vsel %vm9852_vm2, %v761_v37, %v762_v29  ;;  %v1013_v47 = vrot.slane %v1011_v38, 4  ;;  %v1016_v48 = vrot.slane %v1014_v39, 5  ;;  %v990_v7 = vshll.u32 %v8102_v31, 16  ;;  %v8182_v29 = vld [vmem:[%s9828_s24 + $0x48] sm:$0xf] }
  0x6d   : > { %2179 = vrot.lane.b32.xlu0 %v8274_v42, %s9777_s28  ;;  %v8290_v49 = vcombine.low %v760_v36, %v763_v3  ;;  %v989_v40 = vrot.slane %v987_v46, 4  ;;  %v1000_v13 = vshrl.u32 %v8103_v41, 16  ;;  %v8306_v50 = vcombine.low %v8102_v31, %v8103_v41  ;;  %v8211_v36 = vld [vmem:[%s9828_s24 + $0x5c] sm:$0x1] }
  0x6e   : > { %v992_v52 = vrot.slane %v990_v7, 5  ;;  %v1017_v53 = vor.u32 %v1016_v48, %v1013_v47  ;;  %v1020_v54 = vshll.u32 %v8105_v30, 16  ;;  %v1026_v45 = vrot.slane %v1024_v43, 4 }
  0x6f   : > { %2261 = vrot.lane.b32.xlu1 %v8291_v35, %s9776_s27  ;;  %v1030_v20 = vshll.u32 %v8131_v1, 16  ;;  %v996_v55 = vshll.u32 %v8103_v41, 16  ;;  %v1002_v56 = vrot.slane %v1000_v13, 4  ;;  %v1006_v57 = vshll.u32 %v8130_v9, 16  ;;  %v8183_v35 = vld [vmem:[%s9828_s24 + $0x4c] sm:$0xf] }
  0x70   : > { %v1018_v58 = vrot.slane %v1017_v53, 4  ;;  %v1022_v59 = vrot.slane %v1020_v54, 5  ;;  %v993_v12 = vor.u32 %v992_v52, %v989_v40  ;;  %v8163_v60 = vrot.slane %v8147_v51, 9 }
  0x71   : > { %2259 = vrot.lane.b32.xlu0 %v8290_v49, %s9776_s27  ;;  %v1032_v62 = vrot.slane %v1030_v20, 5  ;;  %v998_v63 = vrot.slane %v996_v55, 5  ;;  %v1008_v0 = vrot.slane %v1006_v57, 5  ;;  %v1375_v2 = vrot.slane %v8105_v30, 5  ;;  %v241_v57 = vld [vmem:[%s9828_s24 + $0x54] sm:$0xf] }
  0x72   : > { %v1023_v4 = vsel %vm9896_vm5, %v1018_v58, %v1022_v59  ;;  %v1027_v5 = vor.u32 %v1026_v45, %v1022_v59  ;;  %v994_v6 = vrot.slane %v993_v12, 4  ;;  %v1378_v8 = vrot.slane %v8131_v1, 5  ;;  %v8227_v1 = vld [vmem:[%s9828_s24 + $0x54] sm:$0xe] }
  0x73   : > { %2357 = vrot.lane.b32.xlu1 %v8307_v44, %s9774_s25  ;;  %v1003_v11 = vor.u32 %v1002_v56, %v998_v63  ;;  %v1376_v14 = vsel %vm9852_vm2, %v8163_v60, %v1375_v2  ;;  %v1377_v15 = vrot.slane %v1375_v2, 4  ;;  %v8162_v16 = vrot.slane %v8146_v61, 9 }
  0x74   : > { %v1028_v18 = vrot.slane %v1027_v5, 4  ;;  %v999_v21 = vsel %vm9896_vm5, %v994_v6, %v998_v63  ;;  %v1368_v22 = vrot.slane %v8103_v41, 5  ;;  %v1371_v23 = vrot.slane %v8130_v9, 5  ;;  %v10138_v41 = vld [vmem:[%s9828_s24 + $0x50] sm:$0x1] }
  0x75   : > { %2355 = vrot.lane.b32.xlu0 %v8306_v50, %s9774_s25  ;;  %v1004_v25 = vrot.slane %v1003_v11, 4  ;;  %v1379_v26 = vsel %vm9852_vm2, %v1377_v15, %v1378_v8  ;;  %v1620_v27 = vshrl.u32 %v10115_v10, 16  ;;  %v1623_v28 = vshll.u32 %v10115_v10, 16  ;;  %v8226_v50 = vld [vmem:[%s9828_s24 + $0x48] sm:$0xe] }
  0x76   : > { %v1033_v30 = vsel %vm9896_vm5, %v1028_v18, %v1032_v62  ;;  %v8339_v31 = vcombine.low %v1376_v14, %v1379_v26  ;;  %v1369_v32 = vsel %vm9852_vm2, %v8162_v16, %v1368_v22  ;;  %v1370_v33 = vrot.slane %v1368_v22, 4 }
  0x77   : > { %v8323_v34 = vcombine.low %v1023_v4, %v1033_v30  ;;  %v1009_v37 = vsel %vm9896_vm5, %v1004_v25, %v1008_v0  ;;  %v1622_v38 = vrot.slane %v1620_v27, 4  ;;  %v1625_v39 = vrot.slane %v1623_v28, 5  ;;  %v266_v27 = vld [vmem:[%s9828_s24 + $0x5c] sm:$0x1]  ;;  %v239_v28 = vld [vmem:[%s9828_s24 + $0x48] sm:$0xf] }
  0x78   : > { %v8322_v42 = vcombine.low %v999_v21, %v1009_v37  ;;  %v1372_v43 = vsel %vm9852_vm2, %v1370_v33, %v1371_v23  ;;  %v1633_v44 = vshrl.u32 %v8185_v24, 16  ;;  %v8355_v46 = vcombine.low %v10115_v10, %v8185_v24  ;;  %v242_v21 = vld [vmem:[%s9828_s24 + $0x58] sm:$0xf]  ;;  %v240_v33 = vld [vmem:[%s9828_s24 + $0x4c] sm:$0xf] }
  0x79   : > { %2437 = vrot.lane.b32.xlu1 %v8323_v34, %s9778_s29  ;;  %v8338_v3 = vcombine.low %v1369_v32, %v1372_v43  ;;  %v1596_v47 = vshrl.u32 %v8182_v29, 16  ;;  %v1599_v48 = vshll.u32 %v8182_v29, 16  ;;  %v1609_v7 = vshrl.u32 %v8183_v35, 16 }
  0x7a   : > { %2435 = vrot.lane.b32.xlu0 %v8322_v42, %s9778_s29  ;;  %v8354_v9 = vcombine.low %v8182_v29, %v8183_v35  ;;  %v1626_v49 = vor.u32 %v1625_v39, %v1622_v38  ;;  %v1629_v40 = vshll.u32 %v8185_v24, 16  ;;  %v1635_v13 = vrot.slane %v1633_v44, 4  ;;  %v669_v44 = vld [vmem:[%s9828_s24 + $0x54] sm:$0xe] }
  0x7b   : > { %v1598_v51 = vrot.slane %v1596_v47, 4  ;;  %v1601_v52 = vrot.slane %v1599_v48, 5  ;;  %v1639_v53 = vshll.u32 %v8211_v36, 16  ;;  %v1605_v54 = vshll.u32 %v8183_v35, 16 }
  0x7c   : > { %v1627_v45 = vrot.slane %v1626_v49, 4  ;;  %v1631_v20 = vrot.slane %v1629_v40, 5  ;;  %v1611_v55 = vrot.slane %v1609_v7, 4  ;;  %v1615_v56 = vshll.u32 %v10138_v41, 16  ;;  %v668_v40 = vld [vmem:[%s9828_s24 + $0x48] sm:$0xe] }
  0x7d   : > { %2517 = vrot.lane.b32.xlu1 %v8339_v31, %s9775_s26  ;;  %v1641_v58 = vrot.slane %v1639_v53, 5  ;;  %v1602_v59 = vor.u32 %v1601_v52, %v1598_v51  ;;  %v1607_v12 = vrot.slane %v1605_v54, 5  ;;  %v8243_v60 = vrot.slane %v8227_v1, 9 }
  0x7e   : > { %2515 = vrot.lane.b32.xlu0 %v8338_v3, %s9775_s26  ;;  %v1632_v61 = vsel %vm9896_vm5, %v1627_v45, %v1631_v20  ;;  %v1636_v62 = vor.u32 %v1635_v13, %v1631_v20  ;;  %v1617_v63 = vrot.slane %v1615_v56, 5  ;;  %v1984_v0 = vrot.slane %v8185_v24, 5 }
  0x7f   : > { %v1603_v2 = vrot.slane %v1602_v59, 4  ;;  %v1612_v4 = vor.u32 %v1611_v55, %v1607_v12  ;;  %v1987_v5 = vrot.slane %v8211_v36, 5  ;;  %v8242_v6 = vrot.slane %v8226_v50, 9  ;;  %v10185_v59 = vld [vmem:[%s9828_s24 + $0x60] sm:$0xf] }
  0x80   : > { %v1637_v8 = vrot.slane %v1636_v62, 4  ;;  %v1985_v10 = vsel %vm9852_vm2, %v8243_v60, %v1984_v0  ;;  %v1986_v11 = vrot.slane %v1984_v0, 4  ;;  %v1977_v14 = vrot.slane %v8183_v35, 5  ;;  %v10173_v35 = vld [vmem:[%s9828_s24 + $0x50] sm:$0x1] }
  0x81   : > { %2613 = vrot.lane.b32.xlu1 %v8355_v46, %s9779_s30  ;;  %v1608_v15 = vsel %vm9896_vm5, %v1603_v2, %v1607_v12  ;;  %v1613_v16 = vrot.slane %v1612_v4, 4  ;;  %v1980_v18 = vrot.slane %v10138_v41, 5  ;;  %v447_v22 = vshrl.u32 %v241_v57, 16  ;;  %v10193_v0 = vld [vmem:[%s9828_s24 + $0x54] sm:$0xf] }
  0x82   : > { %2611 = vrot.lane.b32.xlu0 %v8354_v9, %s9779_s30  ;;  %v1642_v23 = vsel %vm9896_vm5, %v1637_v8, %v1641_v58  ;;  %v1988_v24 = vsel %vm9852_vm2, %v1986_v11, %v1987_v5  ;;  %v1978_v25 = vsel %vm9852_vm2, %v8242_v6, %v1977_v14  ;;  %v1979_v26 = vrot.slane %v1977_v14, 4 }
  0x83   : > { %v8371_v29 = vcombine.low %v1632_v61, %v1642_v23  ;;  %v1618_v30 = vsel %vm9896_vm5, %v1613_v16, %v1617_v63  ;;  %v8387_v31 = vcombine.low %v1985_v10, %v1988_v24  ;;  %v449_v32 = vrot.slane %v447_v22, 4  ;;  %v10190_v63 = vld [vmem:[%s9828_s24 + $0x64] sm:$0xf]  ;;  %v10209_v23 = vld [vmem:[%s9828_s24 + $0x58] sm:$0xf] }
  0x84   : > { %v8370_v36 = vcombine.low %v1608_v15, %v1618_v30  ;;  %v1981_v34 = vsel %vm9852_vm2, %v1979_v26, %v1980_v18  ;;  %v450_v37 = vshll.u32 %v241_v57, 16  ;;  %v456_v38 = vshll.u32 %v242_v21, 16 }
  0x85   : > { %2693 = vrot.lane.b32.xlu1 %v8371_v29, %s9780_s6  ;;  %v8386_v39 = vcombine.low %v1978_v25, %v1981_v34  ;;  %v460_v41 = vshrl.u32 %v242_v21, 16  ;;  %v466_v42 = vshll.u32 %v266_v27, 16  ;;  %v423_v43 = vshrl.u32 %v239_v28, 16 }
  0x86   : > { %2691 = vrot.lane.b32.xlu0 %v8370_v36, %s9780_s6  ;;  %v452_v46 = vrot.slane %v450_v37, 5  ;;  %v458_v1 = vrot.slane %v456_v38, 5  ;;  %v426_v3 = vshll.u32 %v239_v28, 16  ;;  %v432_v47 = vshll.u32 %v240_v33, 16  ;;  %v10225_v37 = vld [vmem:[%s9828_s24 + $0x5c] sm:$0x1] }
  0x87   : > { %v462_v48 = vrot.slane %v460_v41, 4  ;;  %v468_v7 = vrot.slane %v466_v42, 5  ;;  %v425_v9 = vrot.slane %v423_v43, 4  ;;  %v436_v49 = vshrl.u32 %v240_v33, 16 }
  0x88   : > { %v453_v13 = vor.u32 %v452_v46, %v449_v32  ;;  %v428_v50 = vrot.slane %v426_v3, 5  ;;  %v434_v51 = vrot.slane %v432_v47, 5  ;;  %v442_v52 = vshll.u32 %v10173_v35, 16  ;;  %v8133_v32 = vld [vmem:[%s9828_s24 + $0x68] sm:$0x1] }
  0x89   : > { %2773 = vrot.lane.b32.xlu1 %v8387_v31, %s9781_s9  ;;  %v463_v53 = vor.u32 %v462_v48, %v458_v1  ;;  %v438_v54 = vrot.slane %v436_v49, 4  ;;  %v8085_v45 = vrot.slane %v669_v44, 9  ;;  %v780_v20 = vrot.slane %v242_v21, 5  ;;  %v10197_v8 = vpop.permute.xlu1 %2349  ;;  %v8149_v44 = vld [vmem:[%s9828_s24 + $0x60] sm:$0xe] }
  0x8a   : > { %2771 = vrot.lane.b32.xlu0 %v8386_v39, %s9781_s9  ;;  %v454_v55 = vrot.slane %v453_v13, 4  ;;  %v429_v56 = vor.u32 %v428_v50, %v425_v9  ;;  %v444_v57 = vrot.slane %v442_v52, 5  ;;  %v783_v58 = vrot.slane %v266_v27, 5  ;;  %v10227_v38 = vpop.permute.xlu0 %2347  ;;  %v8148_v13 = vld [vmem:[%s9828_s24 + $0x54] sm:$0xe] }
  0x8b   : > { %v464_v12 = vrot.slane %v463_v53, 4  ;;  %v439_v60 = vor.u32 %v438_v54, %v434_v51  ;;  %v781_v61 = vsel %vm9852_vm2, %v8085_v45, %v780_v20  ;;  %v782_v62 = vrot.slane %v780_v20, 4  ;;  %v10242_v54 = vld [vmem:[%s9828_s24 + $0x6c] sm:$0xf] }
  0x8c   : > { %v459_v2 = vsel %vm9896_vm5, %v454_v55, %v458_v1  ;;  %v430_v4 = vrot.slane %v429_v56, 4  ;;  %v8084_v5 = vrot.slane %v668_v40, 9  ;;  %v773_v6 = vrot.slane %v240_v33, 5 }
  0x8d   : > { %v469_v10 = vsel %vm9896_vm5, %v464_v12, %v468_v7  ;;  %v440_v11 = vrot.slane %v439_v60, 4  ;;  %v784_v14 = vsel %vm9852_vm2, %v782_v62, %v783_v58  ;;  %v776_v15 = vrot.slane %v10173_v35, 5 }
  0x8e   : > { %v8277_v16 = vcombine.low %v459_v2, %v469_v10  ;;  %v435_v18 = vsel %vm9896_vm5, %v430_v4, %v434_v51  ;;  %v8293_v21 = vcombine.low %v781_v61, %v784_v14  ;;  %v774_v22 = vsel %vm9852_vm2, %v8084_v5, %v773_v6  ;;  %v10256_v4 = vld [vmem:[%s9828_s24 + $0x70] sm:$0xf]  ;;  %v10263_v14 = vld [vmem:[%s9828_s24 + $0x60] sm:$0xf] }
  0x8f   : > { %v445_v24 = vsel %vm9896_vm5, %v440_v11, %v444_v57  ;;  %v775_v25 = vrot.slane %v773_v6, 4  ;;  %v1059_v26 = vshrl.u32 %v10185_v59, 16  ;;  %v1062_v27 = vshll.u32 %v10185_v59, 16 }
  0x90   : > { %2185 = vrot.lane.b32.xlu1 %v8277_v16, %s9777_s28  ;;  %v8276_v28 = vcombine.low %v435_v18, %v445_v24  ;;  %v1072_v29 = vshrl.u32 %v10190_v63, 16  ;;  %v8309_v30 = vcombine.low %v10185_v59, %v10190_v63  ;;  %v1035_v31 = vshrl.u32 %v10193_v0, 16 }
  0x91   : > { %v777_v33 = vsel %vm9852_vm2, %v775_v25, %v776_v15  ;;  %v1061_v35 = vrot.slane %v1059_v26, 4  ;;  %v1064_v36 = vrot.slane %v1062_v27, 5  ;;  %v1038_v34 = vshll.u32 %v10193_v0, 16  ;;  %v10250_v61 = vpop.permute.xlu0 %2507  ;;  %v10266_v15 = vld [vmem:[%s9828_s24 + $0x64] sm:$0xf] }
  0x92   : > { %2183 = vrot.lane.b32.xlu0 %v8276_v28, %s9777_s28  ;;  %v8292_v39 = vcombine.low %v774_v22, %v777_v33  ;;  %v1037_v41 = vrot.slane %v1035_v31, 4  ;;  %v1048_v42 = vshrl.u32 %v10209_v23, 16  ;;  %v8308_v43 = vcombine.low %v10193_v0, %v10209_v23  ;;  %v10234_v46 = vpop.permute.xlu1 %2251  ;;  %v10280_v31 = vld [vmem:[%s9828_s24 + $0x74] sm:$0x1] }
  0x93   : > { %v1040_v1 = vrot.slane %v1038_v34, 5  ;;  %v1065_v3 = vor.u32 %v1064_v36, %v1061_v35  ;;  %v1068_v47 = vshll.u32 %v10190_v63, 16  ;;  %v1074_v48 = vrot.slane %v1072_v29, 4 }
  0x94   : > { %2265 = vrot.lane.b32.xlu1 %v8293_v21, %s9776_s27  ;;  %v1078_v7 = vshll.u32 %v8133_v32, 16  ;;  %v1044_v9 = vshll.u32 %v10209_v23, 16  ;;  %v1050_v49 = vrot.slane %v1048_v42, 4  ;;  %v1054_v40 = vshll.u32 %v10225_v37, 16 }
  0x95   : > { %v1066_v50 = vrot.slane %v1065_v3, 4  ;;  %v1070_v51 = vrot.slane %v1068_v47, 5  ;;  %v1041_v52 = vor.u32 %v1040_v1, %v1037_v41  ;;  %v8165_v53 = vrot.slane %v8149_v44, 9  ;;  %v10294_v44 = vld [vmem:[%s9828_s24 + $0x68] sm:$0x1] }
  0x96   : > { %2263 = vrot.lane.b32.xlu0 %v8292_v39, %s9776_s27  ;;  %v1080_v45 = vrot.slane %v1078_v7, 5  ;;  %v1046_v20 = vrot.slane %v1044_v9, 5  ;;  %v1056_v55 = vrot.slane %v1054_v40, 5  ;;  %v1389_v56 = vrot.slane %v10190_v63, 5  ;;  %v10246_v57 = vpop.permute.xlu1 %2253 }
  0x97   : > { %v1071_v58 = vsel %vm9896_vm5, %v1066_v50, %v1070_v51  ;;  %v1075_v59 = vor.u32 %v1074_v48, %v1070_v51  ;;  %v1042_v12 = vrot.slane %v1041_v52, 4  ;;  %v1392_v60 = vrot.slane %v8133_v32, 5 }
  0x98   : > { %2361 = vrot.lane.b32.xlu1 %v8309_v30, %s9774_s25  ;;  %v1051_v62 = vor.u32 %v1050_v49, %v1046_v20  ;;  %v1390_v0 = vsel %vm9852_vm2, %v8165_v53, %v1389_v56  ;;  %v1391_v2 = vrot.slane %v1389_v56, 4  ;;  %v8164_v63 = vrot.slane %v8148_v13, 9  ;;  %v9692_v56 = vld [vmem:[%s9828_s24] sm:$0xf] }
  0x99   : > { %v1076_v5 = vrot.slane %v1075_v59, 4  ;;  %v1047_v6 = vsel %vm9896_vm5, %v1042_v12, %v1046_v20  ;;  %v1382_v10 = vrot.slane %v10209_v23, 5  ;;  %v1385_v11 = vrot.slane %v10225_v37, 5  ;;  %v8229_v59 = vld [vmem:[%s9828_s24 + $0x6c] sm:$0xe] }
  0x9a   : > { %2359 = vrot.lane.b32.xlu0 %v8308_v43, %s9774_s25  ;;  %v1052_v16 = vrot.slane %v1051_v62, 4  ;;  %v1393_v18 = vsel %vm9852_vm2, %v1391_v2, %v1392_v60  ;;  %v1668_v21 = vshrl.u32 %v10242_v54, 16  ;;  %v1671_v22 = vshll.u32 %v10242_v54, 16  ;;  %v10282_v32 = vpop.permute.xlu1 %2509  ;;  %v8228_v2 = vld [vmem:[%s9828_s24 + $0x60] sm:$0xe] }
  0x9b   : > { %v1081_v23 = vsel %vm9896_vm5, %v1076_v5, %v1080_v45  ;;  %v8341_v24 = vcombine.low %v1390_v0, %v1393_v18  ;;  %v1383_v25 = vsel %vm9852_vm2, %v8164_v63, %v1382_v10  ;;  %v1384_v26 = vrot.slane %v1382_v10, 4  ;;  %v245_v18 = vld [vmem:[%s9828_s24 + $0x6c] sm:$0xf] }
  0x9c   : > { %v8325_v27 = vcombine.low %v1071_v58, %v1081_v23  ;;  %v1057_v28 = vsel %vm9896_vm5, %v1052_v16, %v1056_v55  ;;  %v1670_v29 = vrot.slane %v1668_v21, 4  ;;  %v1673_v30 = vrot.slane %v1671_v22, 5  ;;  %v9691_v55 = vld [vmem:[%s9828_s24 + $0x4] sm:$0xf] }
  0x9d   : > { %v8324_v33 = vcombine.low %v1047_v6, %v1057_v28  ;;  %v1386_v35 = vsel %vm9852_vm2, %v1384_v26, %v1385_v11  ;;  %v1681_v36 = vshrl.u32 %v10256_v4, 16  ;;  %v8357_v34 = vcombine.low %v10242_v54, %v10256_v4  ;;  %v2172_v37 = vpop.permute.xlu0 %2171 }
  0x9e   : > { %2441 = vrot.lane.b32.xlu1 %v8325_v27, %s9778_s29  ;;  %v8340_v39 = vcombine.low %v1383_v25, %v1386_v35  ;;  %v1644_v41 = vshrl.u32 %v10263_v14, 16  ;;  %v1647_v42 = vshll.u32 %v10263_v14, 16  ;;  %v1657_v43 = vshrl.u32 %v10266_v15, 16  ;;  %v9694_v35 = vld [vmem:[%s9828_s24 + $0xc] sm:$0xf] }
  0x9f   : > { %2439 = vrot.lane.b32.xlu0 %v8324_v33, %s9778_s29  ;;  %v8356_v1 = vcombine.low %v10263_v14, %v10266_v15  ;;  %v1674_v3 = vor.u32 %v1673_v30, %v1670_v29  ;;  %v1677_v47 = vshll.u32 %v10256_v4, 16  ;;  %v1683_v48 = vrot.slane %v1681_v36, 4  ;;  %v9693_v33 = vld [vmem:[%s9828_s24 + $0x10] sm:$0xf] }
  0xa0   : > { %v1646_v7 = vrot.slane %v1644_v41, 4  ;;  %v1649_v9 = vrot.slane %v1647_v42, 5  ;;  %v1687_v49 = vshll.u32 %v10280_v31, 16  ;;  %v1653_v40 = vshll.u32 %v10266_v15, 16 }
  0xa1   : > { %v1675_v13 = vrot.slane %v1674_v3, 4  ;;  %v1679_v50 = vrot.slane %v1677_v47, 5  ;;  %v1659_v51 = vrot.slane %v1657_v43, 4  ;;  %v1663_v52 = vshll.u32 %v10294_v44, 16  ;;  %v2174_v53 = vpop.permute.xlu0 %2173 }
  0xa2   : > { %2521 = vrot.lane.b32.xlu1 %v8341_v24, %s9775_s26  ;;  %v1689_v54 = vrot.slane %v1687_v49, 5  ;;  %v1650_v45 = vor.u32 %v1649_v9, %v1646_v7  ;;  %v1655_v20 = vrot.slane %v1653_v40, 5  ;;  %v8254_v58 = vcombine.low %v9692_v56, %v9691_v55  ;;  %v10307_v12 = vpop.permute.xlu1 %2429 }
  0xa3   : > { %2519 = vrot.lane.b32.xlu0 %v8340_v39, %s9775_s26  ;;  %v1680_v60 = vsel %vm9896_vm5, %v1675_v13, %v1679_v50  ;;  %v1684_v62 = vor.u32 %v1683_v48, %v1679_v50  ;;  %v1665_v0 = vrot.slane %v1663_v52, 5  ;;  %v8245_v14 = vrot.slane %v8229_v59, 9  ;;  %v243_v48 = vld [vmem:[%s9828_s24 + $0x60] sm:$0xf]  ;;  %v244_v13 = vld [vmem:[%s9828_s24 + $0x64] sm:$0xf] }
  0xa4   : > { %v1651_v63 = vrot.slane %v1650_v45, 4  ;;  %v1660_v5 = vor.u32 %v1659_v51, %v1655_v20  ;;  %v2798_v6 = vsel %vm2795_vm6, %v8254_v58, %v2172_v37  ;;  %v1998_v16 = vrot.slane %v10256_v4, 5  ;;  %v10343_v37 = vld [vmem:[%s9828_s24 + $0x74] sm:$0x1] }
  0xa5   : > { %v1685_v10 = vrot.slane %v1684_v62, 4  ;;  %v10316_v11 = vsel %vm2844_vm7, %v2798_v6, %v10234_v46  ;;  %v10320_v21 = vpop.permute.xlu0 %2427  ;;  %v2001_v24 = vrot.slane %v10280_v31, 5  ;;  %v8244_v46 = vrot.slane %v8228_v2, 9 }
  0xa6   : > { %2617 = vrot.lane.b32.xlu1 %v8357_v34, %s9779_s30  ;;  %v1656_v22 = vsel %vm9896_vm5, %v1651_v63, %v1655_v20  ;;  %v1661_v23 = vrot.slane %v1660_v5, 4  ;;  %v1999_v25 = vsel %vm9852_vm2, %v8245_v14, %v1998_v16  ;;  %v2000_v26 = vrot.slane %v1998_v16, 4  ;;  %v10332_v28 = vpop.permute.xlu1 %2605  ;;  %v10340_v34 = vld [vmem:[%s9828_s24 + $0x70] sm:$0xf] }
  0xa7   : > { %2615 = vrot.lane.b32.xlu0 %v8356_v1, %s9779_s30  ;;  %v1690_v4 = vsel %vm9896_vm5, %v1685_v10, %v1689_v54  ;;  %v1991_v27 = vrot.slane %v10266_v15, 5  ;;  %v1994_v31 = vrot.slane %v10294_v44, 5  ;;  %v8255_v36 = vcombine.low %v9694_v35, %v9693_v33  ;;  %v10364_v54 = vld [vmem:[%s9828_s24 + $0x68] sm:$0x1]  ;;  %v671_v10 = vld [vmem:[%s9828_s24 + $0x6c] sm:$0xe] }
  0xa8   : > { %v8373_v29 = vcombine.low %v1680_v60, %v1690_v4  ;;  %v1666_v30 = vsel %vm9896_vm5, %v1661_v23, %v1665_v0  ;;  %v2002_v15 = vsel %vm9852_vm2, %v2000_v26, %v2001_v24  ;;  %v495_v3 = vshrl.u32 %v245_v18, 16 }
  0xa9   : > { %v8372_v39 = vcombine.low %v1656_v22, %v1666_v30  ;;  %v1992_v41 = vsel %vm9852_vm2, %v8244_v46, %v1991_v27  ;;  %v1993_v42 = vrot.slane %v1991_v27, 4  ;;  %v10349_v43 = vpop.permute.xlu0 %2603  ;;  %v8389_v44 = vcombine.low %v1999_v25, %v2002_v15  ;;  %v670_v22 = vld [vmem:[%s9828_s24 + $0x60] sm:$0xe] }
  0xaa   : > { %2697 = vrot.lane.b32.xlu1 %v8373_v29, %s9780_s6  ;;  %v2801_v1 = vsel %vm2795_vm6, %v8255_v36, %v2174_v53  ;;  %v498_v47 = vshll.u32 %v245_v18, 16  ;;  %v504_v49 = vshll.u32 %v10340_v34, 16  ;;  %v508_v40 = vshrl.u32 %v10340_v34, 16 }
  0xab   : > { %2695 = vrot.lane.b32.xlu0 %v8372_v39, %s9780_s6  ;;  %v1995_v7 = vsel %vm9852_vm2, %v1993_v42, %v1994_v31  ;;  %v2848_v9 = vsel %vm2844_vm7, %v2801_v1, %v10246_v57  ;;  %v497_v51 = vrot.slane %v495_v3, 4  ;;  %v514_v53 = vshll.u32 %v10343_v37, 16  ;;  %v10398_v1 = vld [vmem:[%s9828_s24 + $0x7c] sm:$0xf] }
  0xac   : > { %v8388_v50 = vcombine.low %v1992_v41, %v1995_v7  ;;  %v500_v52 = vrot.slane %v498_v47, 5  ;;  %v506_v45 = vrot.slane %v504_v49, 5  ;;  %v510_v20 = vrot.slane %v508_v40, 4  ;;  %v10410_v49 = vld [vmem:[%s9828_s24 + $0x70] sm:$0xf] }
  0xad   : > { %v471_v55 = vshrl.u32 %v243_v48, 16  ;;  %v474_v56 = vshll.u32 %v243_v48, 16  ;;  %v10366_v58 = vpop.permute.xlu1 %2685  ;;  %v516_v59 = vrot.slane %v514_v53, 5  ;;  %v480_v60 = vshll.u32 %v244_v13, 16 }
  0xae   : > { %2777 = vrot.lane.b32.xlu1 %v8389_v44, %s9781_s9  ;;  %v501_v57 = vor.u32 %v500_v52, %v497_v51  ;;  %v484_v62 = vshrl.u32 %v244_v13, 16  ;;  %v10369_v0 = vpop.permute.xlu0 %2683  ;;  %v511_v2 = vor.u32 %v510_v20, %v506_v45  ;;  %v490_v6 = vshll.u32 %v10364_v54, 16  ;;  %v10428_v20 = vld [vmem:[%s9828_s24 + $0x80] sm:$0x1] }
  0xaf   : > { %2775 = vrot.lane.b32.xlu0 %v8388_v50, %s9781_s9  ;;  %v473_v63 = vrot.slane %v471_v55, 4  ;;  %v476_v5 = vrot.slane %v474_v56, 5  ;;  %v482_v16 = vrot.slane %v480_v60, 5  ;;  %v2881_v26 = vsel %vm2877_vm8, %v2848_v9, %v10197_v8  ;;  %v8110_v9 = vld [vmem:[%s9828_s24 + $0x6c] sm:$0xf] }
  0xb0   : > { %v502_v14 = vrot.slane %v501_v57, 4  ;;  %v486_v18 = vrot.slane %v484_v62, 4  ;;  %v512_v23 = vrot.slane %v511_v2, 4  ;;  %v492_v46 = vrot.slane %v490_v6, 5  ;;  %v10432_v57 = vld [vmem:[%s9828_s24 + $0x74] sm:$0x1] }
  0xb1   : > { %v477_v24 = vor.u32 %v476_v5, %v473_v63  ;;  %v2879_v27 = vsel %vm2877_vm8, %v10316_v11, %v10227_v38  ;;  %v10382_v29 = vpop.permute.xlu1 %2765  ;;  %v2914_v33 = vsel %vm2910_vm9, %v2881_v26, %v10307_v12  ;;  %v8087_v39 = vrot.slane %v671_v10, 9  ;;  %v8112_v12 = vld [vmem:[%s9828_s24 + $0x78] sm:$0xf] }
  0xb2   : > { %v507_v4 = vsel %vm9896_vm5, %v502_v14, %v506_v45  ;;  %v487_v25 = vor.u32 %v486_v18, %v482_v16  ;;  %v517_v30 = vsel %vm9896_vm5, %v512_v23, %v516_v59  ;;  %v2912_v35 = vsel %vm2910_vm9, %v2879_v27, %v10320_v21  ;;  %v10391_v41 = vpop.permute.xlu0 %2763 }
  0xb3   : > { %v478_v31 = vrot.slane %v477_v24, 4  ;;  %v8279_v36 = vcombine.low %v507_v4, %v517_v30  ;;  %v794_v15 = vrot.slane %v10340_v34, 5  ;;  %v797_v11 = vrot.slane %v10343_v37, 5 }
  0xb4   : > { %v488_v8 = vrot.slane %v487_v25, 4  ;;  %v8086_v42 = vrot.slane %v670_v22, 9  ;;  %v787_v44 = vrot.slane %v244_v13, 5  ;;  %v790_v47 = vrot.slane %v10364_v54, 5  ;;  %v8151_v25 = vld [vmem:[%s9828_s24 + $0x78] sm:$0xe] }
  0xb5   : > { %v483_v38 = vsel %vm9896_vm5, %v478_v31, %v482_v16  ;;  %2189 = vrot.lane.b32.xlu1 %v8279_v36, %s9777_s28  ;;  %v795_v34 = vsel %vm9852_vm2, %v8087_v39, %v794_v15  ;;  %v796_v3 = vrot.slane %v794_v15, 4  ;;  %v2947_v13 = vsel %vm2943_vm10, %v2914_v33, %v10282_v32  ;;  %v8150_v33 = vld [vmem:[%s9828_s24 + $0x6c] sm:$0xe] }
  0xb6   : > { %v493_v21 = vsel %vm9896_vm5, %v488_v8, %v492_v46  ;;  %v788_v37 = vsel %vm9852_vm2, %v8086_v42, %v787_v44  ;;  %v789_v7 = vrot.slane %v787_v44, 4  ;;  %v2945_v50 = vsel %vm2943_vm10, %v2912_v35, %v10250_v61 }
  0xb7   : > { %v8278_v48 = vcombine.low %v483_v38, %v493_v21  ;;  %v798_v40 = vsel %vm9852_vm2, %v796_v3, %v797_v11  ;;  %v2980_v54 = vsel %vm2976_vm11, %v2947_v13, %v10332_v28  ;;  %v2978_v45 = vsel %vm2976_vm11, %v2945_v50, %v10349_v43  ;;  %v9542_v43 = vld [vmem:[%s13946_s1 + $0x10] ss:$0 sps:$4 sm:$0x33]  }
  0xb8   : > { %v10418_v51 = vpop.permute.xlu1 %2177  ;;  %v8295_v52 = vcombine.low %v795_v34, %v798_v40  ;;  %v791_v53 = vsel %vm9852_vm2, %v789_v7, %v790_v47  ;;  %v1107_v55 = vshrl.u32 %v8112_v12, 16  ;;  %v1110_v56 = vshll.u32 %v8112_v12, 16  ;;  %9501 = vmatprep.subr.msk.bf16.mxu0 %vm3135_vm13, %v9542_v43 }
  0xb9   : > { %2187 = vrot.lane.b32.xlu0 %v8278_v48, %s9777_s28  ;;  %v8294_v32 = vcombine.low %v788_v37, %v791_v53  ;;  %v1120_v61 = vshrl.u32 %v10398_v1, 16  ;;  %v8311_v60 = vcombine.low %v8112_v12, %v10398_v1  ;;  %v1083_v62 = vshrl.u32 %v8110_v9, 16 }
  0xba   : > { %v10434_v59 = vpop.permute.xlu0 %2175  ;;  %2269 = vrot.lane.b32.xlu1 %v8295_v52, %s9776_s27  ;;  %v1086_v28 = vshll.u32 %v8110_v9, 16  ;;  %v1096_v2 = vshrl.u32 %v10410_v49, 16  ;;  %v1109_v63 = vrot.slane %v1107_v55, 4  ;;  %v1112_v5 = vrot.slane %v1110_v56, 5 }
  0xbb   : > { %v8310_v6 = vcombine.low %v8110_v9, %v10410_v49  ;;  %v1085_v14 = vrot.slane %v1083_v62, 4  ;;  %v3013_v18 = vsel %vm13951_vm12, %v2980_v54, %v10366_v58  ;;  %v3011_v22 = vsel %vm13951_vm12, %v2978_v45, %v10369_v0  ;;  %v10483_v45 = vld [vmem:[%s9828_s24 + $0x84] sm:$0xf] }
  0xbc   : > { %v10443_v10 = vpop.permute.xlu1 %2257  ;;  %v1088_v16 = vrot.slane %v1086_v28, 5  ;;  %v1113_v23 = vor.u32 %v1112_v5, %v1109_v63  ;;  %v1116_v24 = vshll.u32 %v10398_v1, 16  ;;  %v1122_v46 = vrot.slane %v1120_v61, 4  ;;  %v10492_v61 = vld [vmem:[%s9828_s24 + $0x88] sm:$0xf] }
  0xbd   : > { %2267 = vrot.lane.b32.xlu0 %v8294_v32, %s9776_s27  ;;  %v1126_v4 = vshll.u32 %v10428_v20, 16  ;;  %v1092_v30 = vshll.u32 %v10410_v49, 16  ;;  %v1098_v31 = vrot.slane %v1096_v2, 4  ;;  %v1102_v58 = vshll.u32 %v10432_v57, 16  ;;  %v9695_v2 = vld [vmem:[%s9828_s24 + $0x24] sm:$0xf] }
  0xbe   : > { %v10453_v26 = vpop.permute.xlu0 %2255  ;;  %2365 = vrot.lane.b32.xlu1 %v8311_v60, %s9774_s25  ;;  %v1089_v27 = vor.u32 %v1088_v16, %v1085_v14  ;;  %v1114_v35 = vrot.slane %v1113_v23, 4  ;;  %v1118_v0 = vrot.slane %v1116_v24, 5  ;;  %v3137_v11 = vsel %vm3135_vm13, %v9542_v43, 0  ;;  %v9696_v43 = vld [vmem:[%s9828_s24 + $0x28] sm:$0xf]  ;;  %vm11369_vm13 = vmand %vm3339_vm0, %vm3396_vm3 }
  0xbf   : > { %v1128_v36 = vrot.slane %v1126_v4, 5  ;;  %v1094_v15 = vrot.slane %v1092_v30, 5  ;;  %v1104_v38 = vrot.slane %v1102_v58, 5  ;;  %9404 = vmatpush3.bf16.msra.mxu0 %v3137_v11  ;;  %v8167_v12 = vrot.slane %v8151_v25, 9  ;;  %v10503_v5 = vld [vmem:[%s9828_s24 + $0x7c] sm:$0xf] }
  0xc0   : > { %v10459_v8 = vpop.permute.xlu1 %2353  ;;  %v1090_v39 = vrot.slane %v1089_v27, 4  ;;  %v1119_v42 = vsel %vm9896_vm5, %v1114_v35, %v1118_v0  ;;  %v1123_v44 = vor.u32 %v1122_v46, %v1118_v0  ;;  %v3046_v47 = vsel %vm13952_vm14, %v3013_v18, %v10382_v29  ;;  %v9697_v14 = vld [vmem:[%s9828_s24 + $0x18] sm:$0xf]  ;;  %v9698_v16 = vld [vmem:[%s9828_s24 + $0x1c] sm:$0xf] }
  0xc1   : > { %2363 = vrot.lane.b32.xlu0 %v8310_v6, %s9774_s25  ;;  %v1099_v3 = vor.u32 %v1098_v31, %v1094_v15  ;;  %v1403_v48 = vrot.slane %v10398_v1, 5  ;;  %v1406_v7 = vrot.slane %v10428_v20, 5  ;;  %v8166_v9 = vrot.slane %v8150_v33, 9  ;;  %v10512_v24 = vld [vmem:[%s9828_s24 + $0x8c] sm:$0x1] }
  0xc2   : > { %v10464_v21 = vpop.permute.xlu0 %2351  ;;  %v1095_v34 = vsel %vm9896_vm5, %v1090_v39, %v1094_v15  ;;  %v1124_v37 = vrot.slane %v1123_v44, 4  ;;  %v1396_v40 = vrot.slane %v10410_v49, 5  ;;  %v1399_v53 = vrot.slane %v10432_v57, 5  ;;  %v8190_v57 = vld [vmem:[%s9828_s24 + $0x78] sm:$0xf] }
  0xc3   : > { %v1100_v13 = vrot.slane %v1099_v3, 4  ;;  %v1404_v50 = vsel %vm9852_vm2, %v8167_v12, %v1403_v48  ;;  %v1405_v52 = vrot.slane %v1403_v48, 4  ;;  %v3044_v49 = vsel %vm13952_vm14, %v3011_v22, %v10391_v41  ;;  %v10525_v0 = vld [vmem:[%s9828_s24 + $0x80] sm:$0x1]  ;;  %v8231_v12 = vld [vmem:[%s9828_s24 + $0x84] sm:$0xe] }
  0xc4   : > { %v1129_v29 = vsel %vm9896_vm5, %v1124_v37, %v1128_v36  ;;  %v1397_v1 = vsel %vm9852_vm2, %v8166_v9, %v1396_v40  ;;  %v1398_v54 = vrot.slane %v1396_v40, 4  ;;  %9405 = vmatprep.mubr.msk.bf16.mxu0 %vm13953_vm15, %v3044_v49  ;;  %v8257_v63 = vcombine.low %v9695_v2, %v9696_v43  ;;  %v8230_v37 = vld [vmem:[%s9828_s24 + $0x78] sm:$0xe]  ;;  %v10564_v43 = vld [vmem:[%s9828_s24 + $0x88] sm:$0xf] }
  0xc5   : > { %v8327_v32 = vcombine.low %v1119_v42, %v1129_v29  ;;  %v1105_v55 = vsel %vm9896_vm5, %v1100_v13, %v1104_v38  ;;  %v1407_v56 = vsel %vm9852_vm2, %v1405_v52, %v1406_v7  ;;  %9406 = vmatmul.mubr.msk.bf16.vlgmr.msra.gmra.mrb[0].mxu0 %vm13953_vm15, %v3046_v47  ;;  %v8256_v18 = vcombine.low %v9697_v14, %v9698_v16 }
  0xc6   : > { %v10485_v20 = vpop.permute.xlu1 %2433  ;;  %v8326_v41 = vcombine.low %v1095_v34, %v1105_v55  ;;  %v8343_v62 = vcombine.low %v1404_v50, %v1407_v56  ;;  %v1400_v28 = vsel %vm9852_vm2, %v1398_v54, %v1399_v53  ;;  %v1716_v22 = vshrl.u32 %v10483_v45, 16 }
  0xc7   : > { %v10495_v60 = vpop.permute.xlu0 %2431  ;;  %2445 = vrot.lane.b32.xlu1 %v8327_v32, %s9778_s29  ;;  %v8342_v6 = vcombine.low %v1397_v1, %v1400_v28  ;;  %v1719_v23 = vshll.u32 %v10483_v45, 16  ;;  %v2807_v46 = vsel %vm2795_vm6, %v8257_v63, %v10418_v51  ;;  %v1729_v4 = vshrl.u32 %v10492_v61, 16 }
  0xc8   : > { %2443 = vrot.lane.b32.xlu0 %v8326_v41, %s9778_s29  ;;  %v8359_v25 = vcombine.low %v10483_v45, %v10492_v61  ;;  %v1692_v27 = vshrl.u32 %v8190_v57, 16  ;;  %v2804_v31 = vsel %vm2795_vm6, %v8256_v18, %v10434_v59  ;;  %v1718_v58 = vrot.slane %v1716_v22, 4  ;;  %v10572_v18 = vld [vmem:[%s9828_s24 + $0x8c] sm:$0x1]  ;;  %v247_v22 = vld [vmem:[%s9828_s24 + $0x78] sm:$0xf] }
  0xc9   : > { %v1721_v33 = vrot.slane %v1719_v23, 5  ;;  %v1695_v35 = vshll.u32 %v8190_v57, 16  ;;  %v1705_v39 = vshrl.u32 %v10503_v5, 16  ;;  %v8358_v15 = vcombine.low %v8190_v57, %v10503_v5 }
  0xca   : > { %v10520_v30 = vpop.permute.xlu1 %2513  ;;  %v1694_v51 = vrot.slane %v1692_v27, 4  ;;  %v2852_v38 = vsel %vm2844_vm7, %v2807_v46, %v10443_v10  ;;  %v2850_v59 = vsel %vm2844_vm7, %v2804_v31, %v10453_v26  ;;  %v1725_v44 = vshll.u32 %v10492_v61, 16 }
  0xcb   : > { %v10527_v36 = vpop.permute.xlu0 %2511  ;;  %2525 = vrot.lane.b32.xlu1 %v8343_v62, %s9775_s26  ;;  %v1697_v11 = vrot.slane %v1695_v35, 5  ;;  %v1722_v42 = vor.u32 %v1721_v33, %v1718_v58  ;;  %v1731_v34 = vrot.slane %v1729_v4, 4  ;;  %v1735_v3 = vshll.u32 %v10512_v24, 16  ;;  %v10582_v4 = vld [vmem:[%s9828_s24 + $0x7c] sm:$0xf] }
  0xcc   : > { %2523 = vrot.lane.b32.xlu0 %v8342_v6, %s9775_s26  ;;  %v1701_v47 = vshll.u32 %v10503_v5, 16  ;;  %v1707_v48 = vrot.slane %v1705_v39, 4  ;;  %v1727_v9 = vrot.slane %v1725_v44, 5  ;;  %v1711_v26 = vshll.u32 %v10525_v0, 16 }
  0xcd   : > { %v1723_v7 = vrot.slane %v1722_v42, 4  ;;  %v1698_v40 = vor.u32 %v1697_v11, %v1694_v51  ;;  %v1737_v50 = vrot.slane %v1735_v3, 5  ;;  %v2885_v53 = vsel %vm2877_vm8, %v2852_v38, %v10459_v8 }
  0xce   : > { %v10542_v10 = vpop.permute.xlu1 %2609  ;;  %v1703_v52 = vrot.slane %v1701_v47, 5  ;;  %v2883_v29 = vsel %vm2877_vm8, %v2850_v59, %v10464_v21  ;;  %v1732_v54 = vor.u32 %v1731_v34, %v1727_v9  ;;  %v1713_v45 = vrot.slane %v1711_v26, 5  ;;  %v249_v21 = vld [vmem:[%s9828_s24 + $0x84] sm:$0xf] }
  0xcf   : > { %v10545_v13 = vpop.permute.xlu0 %2607  ;;  %2621 = vrot.lane.b32.xlu1 %v8359_v25, %s9779_s30  ;;  %v1728_v1 = vsel %vm9896_vm5, %v1723_v7, %v1727_v9  ;;  %v1699_v49 = vrot.slane %v1698_v40, 4  ;;  %v8247_v55 = vrot.slane %v8231_v12, 9  ;;  %v2012_v8 = vrot.slane %v10492_v61, 5  ;;  %v673_v34 = vld [vmem:[%s9828_s24 + $0x84] sm:$0xe] }
  0xd0   : > { %2619 = vrot.lane.b32.xlu0 %v8358_v15, %s9779_s30  ;;  %v1708_v32 = vor.u32 %v1707_v48, %v1703_v52  ;;  %v2015_v56 = vrot.slane %v10512_v24, 5  ;;  %v1733_v41 = vrot.slane %v1732_v54, 4  ;;  %v8246_v28 = vrot.slane %v8230_v37, 9 }
  0xd1   : > { %v1704_v62 = vsel %vm9896_vm5, %v1699_v49, %v1703_v52  ;;  %v2005_v2 = vrot.slane %v10503_v5, 5  ;;  %v2013_v61 = vsel %vm9852_vm2, %v8247_v55, %v2012_v8  ;;  %v2014_v14 = vrot.slane %v2012_v8, 4  ;;  %v672_v52 = vld [vmem:[%s9828_s24 + $0x78] sm:$0xe] }
  0xd2   : > { %v10558_v57 = vpop.permute.xlu1 %2689  ;;  %v1709_v6 = vrot.slane %v1708_v32, 4  ;;  %v2008_v16 = vrot.slane %v10525_v0, 5  ;;  %v1738_v23 = vsel %vm9896_vm5, %v1733_v41, %v1737_v50  ;;  %v2918_v46 = vsel %vm2910_vm9, %v2885_v53, %v10485_v20  ;;  %v10593_v20 = vld [vmem:[%s9828_s24 + $0x80] sm:$0x1] }
  0xd3   : > { %v10566_v63 = vpop.permute.xlu0 %2687  ;;  %v2006_v5 = vsel %vm9852_vm2, %v8246_v28, %v2005_v2  ;;  %v2007_v24 = vrot.slane %v2005_v2, 4  ;;  %v8375_v25 = vcombine.low %v1728_v1, %v1738_v23  ;;  %v2016_v31 = vsel %vm9852_vm2, %v2014_v14, %v2015_v56  ;;  %v10618_v28 = vld [vmem:[%s9828_s24 + $0x90] sm:$0xf] }
  0xd4   : > { %v1714_v27 = vsel %vm9896_vm5, %v1709_v6, %v1713_v45  ;;  %v2916_v58 = vsel %vm2910_vm9, %v2883_v29, %v10495_v60  ;;  %v8391_v35 = vcombine.low %v2013_v61, %v2016_v31  ;;  %v543_v51 = vshrl.u32 %v249_v21, 16 }
  0xd5   : > { %v8374_v33 = vcombine.low %v1704_v62, %v1714_v27  ;;  %v2009_v0 = vsel %vm9852_vm2, %v2007_v24, %v2008_v16  ;;  %2701 = vrot.lane.b32.xlu1 %v8375_v25, %s9780_s6  ;;  %v546_v38 = vshll.u32 %v249_v21, 16  ;;  %v552_v11 = vshll.u32 %v10564_v43, 16  ;;  %v10637_v25 = vld [vmem:[%s9828_s24 + $0x84] sm:$0xf] }
  0xd6   : > { %v10595_v39 = vpop.permute.xlu1 %2769  ;;  %v8390_v15 = vcombine.low %v2006_v5, %v2009_v0  ;;  %v556_v59 = vshrl.u32 %v10564_v43, 16  ;;  %v545_v60 = vrot.slane %v543_v51, 4  ;;  %v562_v42 = vshll.u32 %v10572_v18, 16  ;;  %v10630_v5 = vld [vmem:[%s9828_s24 + $0x94] sm:$0xf] }
  0xd7   : > { %2699 = vrot.lane.b32.xlu0 %v8374_v33, %s9780_s6  ;;  %v519_v44 = vshrl.u32 %v247_v22, 16  ;;  %v522_v12 = vshll.u32 %v247_v22, 16  ;;  %v10603_v3 = vpop.permute.xlu0 %2767  ;;  %v548_v47 = vrot.slane %v546_v38, 5  ;;  %v554_v48 = vrot.slane %v552_v11, 5 }
  0xd8   : > { %v558_v37 = vrot.slane %v556_v59, 4  ;;  %v528_v7 = vshll.u32 %v10582_v4, 16  ;;  %v564_v9 = vrot.slane %v562_v42, 5  ;;  %v532_v50 = vshrl.u32 %v10582_v4, 16 }
  0xd9   : > { %v521_v40 = vrot.slane %v519_v44, 4  ;;  %v524_v26 = vrot.slane %v522_v12, 5  ;;  %2781 = vrot.lane.b32.xlu1 %v8391_v35, %s9781_s9  ;;  %v549_v53 = vor.u32 %v548_v47, %v545_v60  ;;  %v538_v54 = vshll.u32 %v10593_v20, 16  ;;  %v10645_v35 = vld [vmem:[%s9828_s24 + $0x88] sm:$0xf] }
  0xda   : > { %v559_v29 = vor.u32 %v558_v37, %v554_v48  ;;  %v530_v1 = vrot.slane %v528_v7, 5  ;;  %v534_v45 = vrot.slane %v532_v50, 4  ;;  %v2951_v32 = vsel %vm2943_vm10, %v2918_v46, %v10520_v30  ;;  %v10663_v44 = vld [vmem:[%s9828_s24 + $0x98] sm:$0x1]  ;;  %v10667_v47 = vld [vmem:[%s9828_s24 + $0x8c] sm:$0x1] }
  0xdb   : > { %2779 = vrot.lane.b32.xlu0 %v8390_v15, %s9781_s9  ;;  %v525_v49 = vor.u32 %v524_v26, %v521_v40  ;;  %v2949_v55 = vsel %vm2943_vm10, %v2916_v58, %v10527_v36  ;;  %v550_v56 = vrot.slane %v549_v53, 4  ;;  %v540_v41 = vrot.slane %v538_v54, 5 }
  0xdc   : > { %v560_v21 = vrot.slane %v559_v29, 4  ;;  %v8089_v62 = vrot.slane %v673_v34, 9  ;;  %v535_v6 = vor.u32 %v534_v45, %v530_v1  ;;  %v808_v61 = vrot.slane %v10564_v43, 5 }
  0xdd   : > { %v10615_v8 = vpop.permute.xlu1 %2181  ;;  %v526_v2 = vrot.slane %v525_v49, 4  ;;  %v811_v14 = vrot.slane %v10572_v18, 5  ;;  %v555_v36 = vsel %vm9896_vm5, %v550_v56, %v554_v48  ;;  %v8088_v22 = vrot.slane %v672_v52, 9 }
  0xde   : > { %v565_v16 = vsel %vm9896_vm5, %v560_v21, %v564_v9  ;;  %v801_v23 = vrot.slane %v10582_v4, 5  ;;  %v536_v46 = vrot.slane %v535_v6, 4  ;;  %v809_v18 = vsel %vm9852_vm2, %v8089_v62, %v808_v61  ;;  %v8152_v62 = vld [vmem:[%s9828_s24 + $0x84] sm:$0xe] }
  0xdf   : > { %v10622_v30 = vpop.permute.xlu0 %2179  ;;  %v8281_v24 = vcombine.low %v555_v36, %v565_v16  ;;  %v531_v43 = vsel %vm9896_vm5, %v526_v2, %v530_v1  ;;  %v810_v31 = vrot.slane %v808_v61, 4  ;;  %v804_v33 = vrot.slane %v10593_v20, 5 }
  0xe0   : > { %v802_v58 = vsel %vm9852_vm2, %v8088_v22, %v801_v23  ;;  %v803_v4 = vrot.slane %v801_v23, 4  ;;  %v541_v0 = vsel %vm9896_vm5, %v536_v46, %v540_v41  ;;  %v2984_v51 = vsel %vm2976_vm11, %v2951_v32, %v10542_v10  ;;  %v8153_v32 = vld [vmem:[%s9828_s24 + $0x90] sm:$0xe] }
  0xe1   : > { %v10639_v27 = vpop.permute.xlu1 %2261  ;;  %2193 = vrot.lane.b32.xlu1 %v8281_v24, %s9777_s28  ;;  %v2982_v15 = vsel %vm2976_vm11, %v2949_v55, %v10545_v13  ;;  %v1155_v38 = vshrl.u32 %v10618_v28, 16  ;;  %v8280_v59 = vcombine.low %v531_v43, %v541_v0  ;;  %v812_v20 = vsel %vm9852_vm2, %v810_v31, %v811_v14  ;;  %v10713_v0 = vld [vmem:[%s9828_s24 + $0x9c] sm:$0xf] }
  0xe2   : > { %v805_v60 = vsel %vm9852_vm2, %v803_v4, %v804_v33  ;;  %v1158_v42 = vshll.u32 %v10618_v28, 16  ;;  %v8297_v12 = vcombine.low %v809_v18, %v812_v20  ;;  %v1168_v13 = vshrl.u32 %v10630_v5, 16  ;;  %v10722_v20 = vld [vmem:[%s9828_s24 + $0x90] sm:$0xf] }
  0xe3   : > { %v10655_v11 = vpop.permute.xlu0 %2259  ;;  %v8296_v10 = vcombine.low %v802_v58, %v805_v60  ;;  %v1157_v34 = vrot.slane %v1155_v38, 4  ;;  %2191 = vrot.lane.b32.xlu0 %v8280_v59, %s9777_s28  ;;  %v8313_v7 = vcombine.low %v10618_v28, %v10630_v5  ;;  %v1131_v9 = vshrl.u32 %v10637_v25, 16  ;;  %v10719_v59 = vld [vmem:[%s9828_s24 + $0xa0] sm:$0xf] }
  0xe4   : > { %v1160_v37 = vrot.slane %v1158_v42, 5  ;;  %v1134_v40 = vshll.u32 %v10637_v25, 16  ;;  %v1144_v26 = vshrl.u32 %v10645_v35, 16  ;;  %v8312_v50 = vcombine.low %v10637_v25, %v10645_v35 }
  0xe5   : > { %v10669_v48 = vpop.permute.xlu1 %2357  ;;  %2273 = vrot.lane.b32.xlu1 %v8297_v12, %s9776_s27  ;;  %v3017_v52 = vsel %vm13951_vm12, %v2984_v51, %v10558_v57  ;;  %v3015_v53 = vsel %vm13951_vm12, %v2982_v15, %v10566_v63  ;;  %v1133_v1 = vrot.slane %v1131_v9, 4  ;;  %v1164_v45 = vshll.u32 %v10630_v5, 16  ;;  %v9699_v12 = vld [vmem:[%s9828_s24 + $0x3c] sm:$0xf]  ;;  %v9701_v9 = vld [vmem:[%s9828_s24 + $0x30] sm:$0xf] }
  0xe6   : > { %v1136_v54 = vrot.slane %v1134_v40, 5  ;;  %v1161_v49 = vor.u32 %v1160_v37, %v1157_v34  ;;  %v1170_v55 = vrot.slane %v1168_v13, 4  ;;  %v1174_v56 = vshll.u32 %v10663_v44, 16  ;;  %v9702_v40 = vld [vmem:[%s9828_s24 + $0x34] sm:$0xf] }
  0xe7   : > { %v10684_v29 = vpop.permute.xlu0 %2355  ;;  %v1140_v21 = vshll.u32 %v10645_v35, 16  ;;  %v1146_v41 = vrot.slane %v1144_v26, 4  ;;  %2271 = vrot.lane.b32.xlu0 %v8296_v10, %s9776_s27  ;;  %v1166_v28 = vrot.slane %v1164_v45, 5  ;;  %v1150_v2 = vshll.u32 %v10667_v47, 16  ;;  %v9700_v10 = vld [vmem:[%s9828_s24 + $0x40] sm:$0xf] }
  0xe8   : > { %v1162_v57 = vrot.slane %v1161_v49, 4  ;;  %v1137_v63 = vor.u32 %v1136_v54, %v1133_v1  ;;  %v1176_v6 = vrot.slane %v1174_v56, 5  ;;  %v3050_v14 = vsel %vm13952_vm14, %v3017_v52, %v10595_v39  ;;  %v10745_v54 = vld [vmem:[%s9828_s24 + $0x94] sm:$0xf] }
  0xe9   : > { %2369 = vrot.lane.b32.xlu1 %v8313_v7, %s9774_s25  ;;  %v1142_v61 = vrot.slane %v1140_v21, 5  ;;  %v3048_v36 = vsel %vm13952_vm14, %v3015_v53, %v10603_v3  ;;  %v1171_v23 = vor.u32 %v1170_v55, %v1166_v28  ;;  %v1152_v43 = vrot.slane %v1150_v2, 5 }
  0xea   : > { %v1167_v22 = vsel %vm9896_vm5, %v1162_v57, %v1166_v28  ;;  %v1138_v24 = vrot.slane %v1137_v63, 4  ;;  %9409 = vmatprep.mubr.msk.bf16.mxu0 %vm13953_vm15, %v3048_v36  ;;  %v8169_v39 = vrot.slane %v8153_v32, 9  ;;  %v1417_v25 = vrot.slane %v10630_v5, 5  ;;  %v8217_v57 = vld [vmem:[%s9828_s24 + $0xa4] sm:$0x1] }
  0xeb   : > { %v10698_v16 = vpop.permute.xlu1 %2437  ;;  %v1147_v18 = vor.u32 %v1146_v41, %v1142_v61  ;;  %v1420_v3 = vrot.slane %v10663_v44, 5  ;;  %9410 = vmatmul.mubr.msk.bf16.gmra.mrb[4].mxu0 %vm13953_vm15, %v3050_v14  ;;  %2367 = vrot.lane.b32.xlu0 %v8312_v50, %s9774_s25  ;;  %v1172_v31 = vrot.slane %v1171_v23, 4  ;;  %v8168_v4 = vrot.slane %v8152_v62, 9 }
  0xec   : > { %v10703_v46 = vpop.permute.xlu0 %2435  ;;  %v1143_v58 = vsel %vm9896_vm5, %v1138_v24, %v1142_v61  ;;  %v1410_v33 = vrot.slane %v10645_v35, 5  ;;  %v1418_v5 = vsel %vm9852_vm2, %v8169_v39, %v1417_v25  ;;  %v1419_v15 = vrot.slane %v1417_v25, 4  ;;  %v8216_v61 = vld [vmem:[%s9828_s24 + $0x98] sm:$0x1] }
  0xed   : > { %v1148_v51 = vrot.slane %v1147_v18, 4  ;;  %v1413_v38 = vrot.slane %v10667_v47, 5  ;;  %v1177_v35 = vsel %vm9896_vm5, %v1172_v31, %v1176_v6  ;;  %v8259_v34 = vcombine.low %v9699_v12, %v9700_v10 }
  0xee   : > { %v1411_v42 = vsel %vm9852_vm2, %v8168_v4, %v1410_v33  ;;  %v1412_v44 = vrot.slane %v1410_v33, 4  ;;  %v8329_v47 = vcombine.low %v1167_v22, %v1177_v35  ;;  %v1421_v7 = vsel %vm9852_vm2, %v1419_v15, %v1420_v3  ;;  %v8233_v4 = vld [vmem:[%s9828_s24 + $0x9c] sm:$0xe]  ;;  %v8232_v15 = vld [vmem:[%s9828_s24 + $0x90] sm:$0xe] }
  0xef   : > { %v10724_v60 = vpop.permute.xlu1 %2517  ;;  %v1153_v37 = vsel %vm9896_vm5, %v1148_v51, %v1152_v43  ;;  %v8258_v26 = vcombine.low %v9701_v9, %v9702_v40  ;;  %v8345_v52 = vcombine.low %v1418_v5, %v1421_v7  ;;  %v2813_v1 = vsel %vm2795_vm6, %v8259_v34, %v10615_v8 }
  0xf0   : > { %v10732_v13 = vpop.permute.xlu0 %2515  ;;  %v8328_v50 = vcombine.low %v1143_v58, %v1153_v37  ;;  %v1414_v53 = vsel %vm9852_vm2, %v1412_v44, %v1413_v38  ;;  %2449 = vrot.lane.b32.xlu1 %v8329_v47, %s9778_s29  ;;  %v1764_v32 = vshrl.u32 %v10713_v0, 16  ;;  %v1767_v55 = vshll.u32 %v10713_v0, 16 }
  0xf1   : > { %v8344_v49 = vcombine.low %v1411_v42, %v1414_v53  ;;  %v2810_v45 = vsel %vm2795_vm6, %v8258_v26, %v10622_v30  ;;  %v1777_v21 = vshrl.u32 %v10719_v59, 16  ;;  %v8361_v8 = vcombine.low %v10713_v0, %v10719_v59 }
  0xf2   : > { %2447 = vrot.lane.b32.xlu0 %v8328_v50, %s9778_s29  ;;  %v1740_v41 = vshrl.u32 %v10722_v20, 16  ;;  %v1743_v62 = vshll.u32 %v10722_v20, 16  ;;  %v1766_v30 = vrot.slane %v1764_v32, 4  ;;  %v1769_v63 = vrot.slane %v1767_v55, 5 }
  0xf3   : > { %v10752_v56 = vpop.permute.xlu1 %2613  ;;  %v1753_v2 = vshrl.u32 %v10745_v54, 16  ;;  %v8360_v6 = vcombine.low %v10722_v20, %v10745_v54  ;;  %v2856_v22 = vsel %vm2844_vm7, %v2813_v1, %v10639_v27  ;;  %v2854_v23 = vsel %vm2844_vm7, %v2810_v45, %v10655_v11  ;;  %v10803_v45 = vld [vmem:[%s9828_s24 + $0xa0] sm:$0xf] }
  0xf4   : > { %v10761_v28 = vpop.permute.xlu0 %2611  ;;  %v1742_v14 = vrot.slane %v1740_v41, 4  ;;  %v1745_v36 = vrot.slane %v1743_v62, 5  ;;  %2529 = vrot.lane.b32.xlu1 %v8345_v52, %s9775_s26  ;;  %v1770_v24 = vor.u32 %v1769_v63, %v1766_v30  ;;  %v1773_v43 = vshll.u32 %v10719_v59, 16  ;;  %v10814_v41 = vld [vmem:[%s9828_s24 + $0xa4] sm:$0x1] }
  0xf5   : > { %v1779_v18 = vrot.slane %v1777_v21, 4  ;;  %v1783_v39 = vshll.u32 %v8217_v57, 16  ;;  %v1749_v31 = vshll.u32 %v10745_v54, 16  ;;  %v1755_v58 = vrot.slane %v1753_v2, 4  ;;  %v251_v30 = vld [vmem:[%s9828_s24 + $0x90] sm:$0xf] }
  0xf6   : > { %2527 = vrot.lane.b32.xlu0 %v8344_v49, %s9775_s26  ;;  %v1746_v3 = vor.u32 %v1745_v36, %v1742_v14  ;;  %v1759_v27 = vshll.u32 %v8216_v61, 16  ;;  %v1771_v11 = vrot.slane %v1770_v24, 4  ;;  %v1775_v0 = vrot.slane %v1773_v43, 5  ;;  %v252_v14 = vld [vmem:[%s9828_s24 + $0x94] sm:$0xf] }
  0xf7   : > { %v10773_v25 = vpop.permute.xlu1 %2693  ;;  %v1785_v51 = vrot.slane %v1783_v39, 5  ;;  %v2889_v5 = vsel %vm2877_vm8, %v2856_v22, %v10669_v48  ;;  %v1751_v20 = vrot.slane %v1749_v31, 5  ;;  %v2887_v42 = vsel %vm2877_vm8, %v2854_v23, %v10684_v29  ;;  %v10827_v43 = vld [vmem:[%s9828_s24 + $0x98] sm:$0x1] }
  0xf8   : > { %v10778_v33 = vpop.permute.xlu0 %2691  ;;  %v1747_v38 = vrot.slane %v1746_v3, 4  ;;  %v1761_v35 = vrot.slane %v1759_v27, 5  ;;  %2625 = vrot.lane.b32.xlu1 %v8361_v8, %s9779_s30  ;;  %v1776_v44 = vsel %vm9896_vm5, %v1771_v11, %v1775_v0  ;;  %v1780_v12 = vor.u32 %v1779_v18, %v1775_v0 }
  0xf9   : > { %v8249_v10 = vrot.slane %v8233_v4, 9  ;;  %v2026_v34 = vrot.slane %v10719_v59, 5  ;;  %v1756_v47 = vor.u32 %v1755_v58, %v1751_v20  ;;  %v2029_v37 = vrot.slane %v8217_v57, 5  ;;  %v253_v59 = vld [vmem:[%s9828_s24 + $0x9c] sm:$0xf] }
  0xfa   : > { %2623 = vrot.lane.b32.xlu0 %v8360_v6, %s9779_s30  ;;  %v1752_v48 = vsel %vm9896_vm5, %v1747_v38, %v1751_v20  ;;  %v8248_v7 = vrot.slane %v8232_v15, 9  ;;  %v1781_v9 = vrot.slane %v1780_v12, 4  ;;  %v2019_v50 = vrot.slane %v10745_v54, 5 }
  0xfb   : > { %v10792_v29 = vpop.permute.xlu1 %2773  ;;  %v2027_v40 = vsel %vm9852_vm2, %v8249_v10, %v2026_v34  ;;  %v2028_v26 = vrot.slane %v2026_v34, 4  ;;  %v1757_v52 = vrot.slane %v1756_v47, 4  ;;  %v2022_v53 = vrot.slane %v8216_v61, 5  ;;  %v674_v34 = vld [vmem:[%s9828_s24 + $0x90] sm:$0xe] }
  0xfc   : > { %v2922_v1 = vsel %vm2910_vm9, %v2889_v5, %v10698_v16  ;;  %v2920_v49 = vsel %vm2910_vm9, %v2887_v42, %v10703_v46  ;;  %v10805_v32 = vpop.permute.xlu0 %2771  ;;  %v1786_v55 = vsel %vm9896_vm5, %v1781_v9, %v1785_v51  ;;  %v2020_v21 = vsel %vm9852_vm2, %v8248_v7, %v2019_v50 }
  0xfd   : > { %v2030_v54 = vsel %vm9852_vm2, %v2028_v26, %v2029_v37  ;;  %v2021_v8 = vrot.slane %v2019_v50, 4  ;;  %v8377_v16 = vcombine.low %v1776_v44, %v1786_v55  ;;  %v1762_v46 = vsel %vm9896_vm5, %v1757_v52, %v1761_v35  ;;  %v675_v35 = vld [vmem:[%s9828_s24 + $0x9c] sm:$0xe] }
  0xfe   : > { %v8393_v62 = vcombine.low %v2027_v40, %v2030_v54  ;;  %v591_v57 = vshrl.u32 %v253_v59, 16  ;;  %v8376_v63 = vcombine.low %v1752_v48, %v1762_v46  ;;  %v594_v6 = vshll.u32 %v253_v59, 16 }
  0xff   : > { %v2023_v2 = vsel %vm9852_vm2, %v2021_v8, %v2022_v53  ;;  %v600_v61 = vshll.u32 %v10803_v45, 16  ;;  %2705 = vrot.lane.b32.xlu1 %v8377_v16, %s9780_s6  ;;  %v604_v23 = vshrl.u32 %v10803_v45, 16  ;;  %v610_v24 = vshll.u32 %v10814_v41, 16 }
 0x100   : > { %v8392_v36 = vcombine.low %v2020_v21, %v2023_v2  ;;  %v593_v22 = vrot.slane %v591_v57, 4  ;;  %2703 = vrot.lane.b32.xlu0 %v8376_v63, %s9780_s6  ;;  %v596_v39 = vrot.slane %v594_v6, 5  ;;  %v825_v31 = vrot.slane %v10814_v41, 5  ;;  %v10862_v57 = vld [vmem:[%s9828_s24 + $0xac] sm:$0xf] }
 0x101   : > { %v602_v3 = vrot.slane %v600_v61, 5  ;;  %v567_v58 = vshrl.u32 %v251_v30, 16  ;;  %v606_v27 = vrot.slane %v604_v23, 4  ;;  %v612_v4 = vrot.slane %v610_v24, 5  ;;  %v8118_v23 = vld [vmem:[%s9828_s24 + $0x9c] sm:$0xf] }
 0x102   : > { %v10829_v18 = vpop.permute.xlu1 %2185  ;;  %v570_v11 = vshll.u32 %v251_v30, 16  ;;  %v576_v0 = vshll.u32 %v252_v14, 16  ;;  %v597_v5 = vor.u32 %v596_v39, %v593_v22  ;;  %v580_v38 = vshrl.u32 %v252_v14, 16  ;;  %v10879_v24 = vld [vmem:[%s9828_s24 + $0xa0] sm:$0xf] }
 0x103   : > { %v569_v15 = vrot.slane %v567_v58, 4  ;;  %v586_v20 = vshll.u32 %v10827_v43, 16  ;;  %2785 = vrot.lane.b32.xlu1 %v8393_v62, %s9781_s9  ;;  %v607_v42 = vor.u32 %v606_v27, %v602_v3  ;;  %v818_v10 = vrot.slane %v10827_v43, 5 }
 0x104   : > { %v10833_v51 = vpop.permute.xlu0 %2183  ;;  %v572_v44 = vrot.slane %v570_v11, 5  ;;  %v578_v12 = vrot.slane %v576_v0, 5  ;;  %2783 = vrot.lane.b32.xlu0 %v8392_v36, %s9781_s9  ;;  %v598_v47 = vrot.slane %v597_v5, 4  ;;  %v582_v37 = vrot.slane %v580_v38, 4  ;;  %v10886_v0 = vld [vmem:[%s9828_s24 + $0xb0] sm:$0x1] }
 0x105   : > { %v588_v7 = vrot.slane %v586_v20, 5  ;;  %v2955_v9 = vsel %vm2943_vm10, %v2922_v1, %v10724_v60  ;;  %v608_v40 = vrot.slane %v607_v42, 4  ;;  %v2953_v50 = vsel %vm2943_vm10, %v2920_v49, %v10732_v13  ;;  %v8120_v13 = vld [vmem:[%s9828_s24 + $0xa8] sm:$0xf] }
 0x106   : > { %v10840_v48 = vpop.permute.xlu1 %2265  ;;  %v573_v26 = vor.u32 %v572_v44, %v569_v15  ;;  %v8091_v59 = vrot.slane %v675_v35, 9  ;;  %v603_v53 = vsel %vm9896_vm5, %v598_v47, %v602_v3  ;;  %v583_v55 = vor.u32 %v582_v37, %v578_v12 }
 0x107   : > { %v822_v54 = vrot.slane %v10803_v45, 5  ;;  %v8090_v21 = vrot.slane %v674_v34, 9  ;;  %v613_v8 = vsel %vm9896_vm5, %v608_v40, %v612_v4  ;;  %v815_v1 = vrot.slane %v252_v14, 5 }
 0x108   : > { %v10847_v52 = vpop.permute.xlu0 %2263  ;;  %v574_v60 = vrot.slane %v573_v26, 4  ;;  %v2988_v41 = vsel %vm2976_vm11, %v2955_v9, %v10752_v56  ;;  %v8283_v16 = vcombine.low %v603_v53, %v613_v8  ;;  %v584_v46 = vrot.slane %v583_v55, 4 }
 0x109   : > { %v823_v62 = vsel %vm9852_vm2, %v8091_v59, %v822_v54  ;;  %v824_v45 = vrot.slane %v822_v54, 4  ;;  %v816_v63 = vsel %vm9852_vm2, %v8090_v21, %v815_v1  ;;  %v817_v56 = vrot.slane %v815_v1, 4  ;;  %v8155_v59 = vld [vmem:[%s9828_s24 + $0xa8] sm:$0xe]  ;;  %v8154_v21 = vld [vmem:[%s9828_s24 + $0x9c] sm:$0xe] }
 0x10a   : > { %v10857_v49 = vpop.permute.xlu1 %2361  ;;  %v579_v30 = vsel %vm9896_vm5, %v574_v60, %v578_v12  ;;  %v2986_v2 = vsel %vm2976_vm11, %v2953_v50, %v10761_v28  ;;  %2197 = vrot.lane.b32.xlu1 %v8283_v16, %s9777_s28  ;;  %v589_v61 = vsel %vm9896_vm5, %v584_v46, %v588_v7  ;;  %v1203_v36 = vshrl.u32 %v8120_v13, 16 }
 0x10b   : > { %v826_v14 = vsel %vm9852_vm2, %v824_v45, %v825_v31  ;;  %v1206_v22 = vshll.u32 %v8120_v13, 16  ;;  %v8282_v43 = vcombine.low %v579_v30, %v589_v61  ;;  %v819_v28 = vsel %vm9852_vm2, %v817_v56, %v818_v10  ;;  %v10900_v10 = vld [vmem:[%s9828_s24 + $0xa4] sm:$0x1] }
 0x10c   : > { %v10870_v6 = vpop.permute.xlu0 %2359  ;;  %v8299_v39 = vcombine.low %v823_v62, %v826_v14  ;;  %v1216_v3 = vshrl.u32 %v10862_v57, 16  ;;  %v8298_v58 = vcombine.low %v816_v63, %v819_v28  ;;  %v1205_v27 = vrot.slane %v1203_v36, 4  ;;  %v9704_v28 = vld [vmem:[%s9828_s24 + $0x58] sm:$0xf] }
 0x10d   : > { %v1208_v4 = vrot.slane %v1206_v22, 5  ;;  %v8315_v11 = vcombine.low %v8120_v13, %v10862_v57  ;;  %2195 = vrot.lane.b32.xlu0 %v8282_v43, %s9777_s28  ;;  %v1179_v31 = vshrl.u32 %v8118_v23, 16  ;;  %v1182_v5 = vshll.u32 %v8118_v23, 16 }
 0x10e   : > { %v1192_v15 = vshrl.u32 %v10879_v24, 16  ;;  %v8314_v38 = vcombine.low %v8118_v23, %v10879_v24  ;;  %2277 = vrot.lane.b32.xlu1 %v8299_v39, %s9776_s27  ;;  %v3021_v35 = vsel %vm13951_vm12, %v2988_v41, %v10773_v25  ;;  %v3019_v42 = vsel %vm13951_vm12, %v2986_v2, %v10778_v33  ;;  %v9703_v39 = vld [vmem:[%s9828_s24 + $0x54] sm:$0xf] }
 0x10f   : > { %v1209_v44 = vor.u32 %v1208_v4, %v1205_v27  ;;  %v1212_v12 = vshll.u32 %v10862_v57, 16  ;;  %v1181_v47 = vrot.slane %v1179_v31, 4  ;;  %v1184_v37 = vrot.slane %v1182_v5, 5  ;;  %v10946_v31 = vld [vmem:[%s9828_s24 + $0xb8] sm:$0xf] }
 0x110   : > { %v10891_v20 = vpop.permute.xlu1 %2441  ;;  %v1218_v7 = vrot.slane %v1216_v3, 4  ;;  %v1222_v9 = vshll.u32 %v10886_v0, 16  ;;  %v1188_v25 = vshll.u32 %v10879_v24, 16  ;;  %v1194_v50 = vrot.slane %v1192_v15, 4 }
 0x111   : > { %v10902_v34 = vpop.permute.xlu0 %2439  ;;  %v1210_v40 = vrot.slane %v1209_v44, 4  ;;  %v1214_v26 = vrot.slane %v1212_v12, 5  ;;  %2275 = vrot.lane.b32.xlu0 %v8298_v58, %s9776_s27  ;;  %v1185_v53 = vor.u32 %v1184_v37, %v1181_v47  ;;  %v1198_v55 = vshll.u32 %v10900_v10, 16  ;;  %v8200_v58 = vld [vmem:[%s9828_s24 + $0xb4] sm:$0xf] }
 0x112   : > { %v1224_v33 = vrot.slane %v1222_v9, 5  ;;  %v3054_v54 = vsel %vm13952_vm14, %v3021_v35, %v10792_v29  ;;  %2373 = vrot.lane.b32.xlu1 %v8315_v11, %s9774_s25  ;;  %v1190_v41 = vrot.slane %v1188_v25, 5  ;;  %v3052_v13 = vsel %vm13952_vm14, %v3019_v42, %v10805_v32  ;;  %v9705_v35 = vld [vmem:[%s9828_s24 + $0x48] sm:$0xf]  ;;  %v9706_v42 = vld [vmem:[%s9828_s24 + $0x4c] sm:$0xf] }
 0x113   : > { %v1215_v60 = vsel %vm9896_vm5, %v1210_v40, %v1214_v26  ;;  %v1219_v1 = vor.u32 %v1218_v7, %v1214_v26  ;;  %v1186_v46 = vrot.slane %v1185_v53, 4  ;;  %v1200_v62 = vrot.slane %v1198_v55, 5  ;;  %9413 = vmatprep.mubr.msk.bf16.mxu0 %vm13953_vm15, %v3052_v13  ;;  %v8198_v12 = vld [vmem:[%s9828_s24 + $0xa8] sm:$0xf]  ;;  %v8199_v9 = vld [vmem:[%s9828_s24 + $0xac] sm:$0xf] }
 0x114   : > { %v10912_v8 = vpop.permute.xlu1 %2521  ;;  %v8171_v45 = vrot.slane %v8155_v59, 9  ;;  %v1431_v29 = vrot.slane %v10862_v57, 5  ;;  %v1195_v63 = vor.u32 %v1194_v50, %v1190_v41  ;;  %v1434_v56 = vrot.slane %v10886_v0, 5  ;;  %9414 = vmatmul.mubr.msk.bf16.gmra.mrb[8].mxu0 %vm13953_vm15, %v3054_v54  ;;  %v8219_v54 = vld [vmem:[%s9828_s24 + $0xbc] sm:$0x1] }
 0x115   : > { %v10919_v16 = vpop.permute.xlu0 %2519  ;;  %v1220_v30 = vrot.slane %v1219_v1, 4  ;;  %v8170_v2 = vrot.slane %v8154_v21, 9  ;;  %2371 = vrot.lane.b32.xlu0 %v8314_v38, %s9774_s25  ;;  %v1191_v32 = vsel %vm9896_vm5, %v1186_v46, %v1190_v41  ;;  %v1424_v14 = vrot.slane %v10879_v24, 5  ;;  %v8218_v41 = vld [vmem:[%s9828_s24 + $0xb0] sm:$0x1] }
 0x116   : > { %v1432_v57 = vsel %vm9852_vm2, %v8171_v45, %v1431_v29  ;;  %v1433_v61 = vrot.slane %v1431_v29, 4  ;;  %v1196_v23 = vrot.slane %v1195_v63, 4  ;;  %v1427_v43 = vrot.slane %v10900_v10, 5 }
 0x117   : > { %v1225_v22 = vsel %vm9896_vm5, %v1220_v30, %v1224_v33  ;;  %v8261_v3 = vcombine.low %v9703_v39, %v9704_v28  ;;  %v1425_v11 = vsel %vm9852_vm2, %v8170_v2, %v1424_v14  ;;  %v1426_v0 = vrot.slane %v1424_v14, 4  ;;  %v8234_v39 = vld [vmem:[%s9828_s24 + $0xa8] sm:$0xe] }
 0x118   : > { %v10931_v36 = vpop.permute.xlu1 %2617  ;;  %v8331_v4 = vcombine.low %v1215_v60, %v1225_v22  ;;  %v1435_v24 = vsel %vm9852_vm2, %v1433_v61, %v1434_v56  ;;  %v1201_v5 = vsel %vm9896_vm5, %v1196_v23, %v1200_v62  ;;  %v8260_v44 = vcombine.low %v9705_v35, %v9706_v42  ;;  %v8235_v61 = vld [vmem:[%s9828_s24 + $0xb4] sm:$0xe] }
 0x119   : > { %v10939_v27 = vpop.permute.xlu0 %2615  ;;  %v8347_v15 = vcombine.low %v1432_v57, %v1435_v24  ;;  %v2819_v38 = vsel %vm2795_vm6, %v8261_v3, %v10829_v18  ;;  %v8330_v10 = vcombine.low %v1191_v32, %v1201_v5  ;;  %v1428_v47 = vsel %vm9852_vm2, %v1426_v0, %v1427_v43 }
 0x11a   : > { %2453 = vrot.lane.b32.xlu1 %v8331_v4, %s9778_s29  ;;  %v1812_v37 = vshrl.u32 %v8200_v58, 16  ;;  %v1815_v7 = vshll.u32 %v8200_v58, 16  ;;  %v8346_v40 = vcombine.low %v1425_v11, %v1428_v47  ;;  %v2816_v26 = vsel %vm2795_vm6, %v8260_v44, %v10833_v51  ;;  %v10997_v47 = vld [vmem:[%s9828_s24 + $0xb4] sm:$0xf] }
 0x11b   : > { %v1825_v18 = vshrl.u32 %v10946_v31, 16  ;;  %v8363_v25 = vcombine.low %v8200_v58, %v10946_v31  ;;  %2451 = vrot.lane.b32.xlu0 %v8330_v10, %s9778_s29  ;;  %v1788_v53 = vshrl.u32 %v8198_v12, 16  ;;  %v1791_v55 = vshll.u32 %v8198_v12, 16 }
 0x11c   : > { %v10963_v50 = vpop.permute.xlu1 %2697  ;;  %v1814_v59 = vrot.slane %v1812_v37, 4  ;;  %v1817_v33 = vrot.slane %v1815_v7, 5  ;;  %v1801_v21 = vshrl.u32 %v8199_v9, 16  ;;  %v8362_v60 = vcombine.low %v8198_v12, %v8199_v9 }
 0x11d   : > { %v2860_v1 = vsel %vm2844_vm7, %v2819_v38, %v10840_v48  ;;  %v2858_v51 = vsel %vm2844_vm7, %v2816_v26, %v10847_v52  ;;  %v10972_v13 = vpop.permute.xlu0 %2695  ;;  %v1790_v46 = vrot.slane %v1788_v53, 4  ;;  %v1793_v62 = vrot.slane %v1791_v55, 5  ;;  %v11006_v26 = vld [vmem:[%s9828_s24 + $0xb8] sm:$0xf]  ;;  %v11015_v53 = vld [vmem:[%s9828_s24 + $0xbc] sm:$0x1] }
 0x11e   : > { %2533 = vrot.lane.b32.xlu1 %v8347_v15, %s9775_s26  ;;  %v1818_v45 = vor.u32 %v1817_v33, %v1814_v59  ;;  %v1821_v29 = vshll.u32 %v10946_v31, 16  ;;  %v1827_v30 = vrot.slane %v1825_v18, 4  ;;  %v1831_v63 = vshll.u32 %v8219_v54, 16  ;;  %v11018_v55 = vld [vmem:[%s9828_s24 + $0xa8] sm:$0xf] }
 0x11f   : > { %v1797_v56 = vshll.u32 %v8199_v9, 16  ;;  %v1803_v2 = vrot.slane %v1801_v21, 4  ;;  %2531 = vrot.lane.b32.xlu0 %v8346_v40, %s9775_s26  ;;  %v1794_v32 = vor.u32 %v1793_v62, %v1790_v46  ;;  %v1807_v57 = vshll.u32 %v8218_v41, 16 }
 0x120   : > { %v1819_v48 = vrot.slane %v1818_v45, 4  ;;  %v1823_v52 = vrot.slane %v1821_v29, 5  ;;  %v1833_v14 = vrot.slane %v1831_v63, 5  ;;  %v2893_v23 = vsel %vm2877_vm8, %v2860_v1, %v10857_v49  ;;  %v10983_v28 = vpop.permute.xlu1 %2777  ;;  %v273_v63 = vld [vmem:[%s9828_s24 + $0xb0] sm:$0x1] }
 0x121   : > { %v1799_v22 = vrot.slane %v1797_v56, 5  ;;  %v2891_v43 = vsel %vm2877_vm8, %v2858_v51, %v10870_v6  ;;  %v1795_v4 = vrot.slane %v1794_v32, 4  ;;  %v1809_v24 = vrot.slane %v1807_v57, 5  ;;  %v10989_v15 = vpop.permute.xlu0 %2775  ;;  %v11026_v51 = vld [vmem:[%s9828_s24 + $0xac] sm:$0xf] }
 0x122   : > { %2629 = vrot.lane.b32.xlu1 %v8363_v25, %s9779_s30  ;;  %v1824_v3 = vsel %vm9896_vm5, %v1819_v48, %v1823_v52  ;;  %v1828_v58 = vor.u32 %v1827_v30, %v1823_v52  ;;  %v8251_v0 = vrot.slane %v8235_v61, 9  ;;  %v2040_v5 = vrot.slane %v10946_v31, 5 }
 0x123   : > { %v1804_v11 = vor.u32 %v1803_v2, %v1799_v22  ;;  %v2043_v49 = vrot.slane %v8219_v54, 5  ;;  %2627 = vrot.lane.b32.xlu0 %v8362_v60, %s9779_s30  ;;  %v1800_v38 = vsel %vm9896_vm5, %v1795_v4, %v1799_v22  ;;  %v8250_v35 = vrot.slane %v8234_v39, 9 }
 0x124   : > { %v1829_v6 = vrot.slane %v1828_v58, 4  ;;  %v2033_v42 = vrot.slane %v8199_v9, 5  ;;  %v2041_v12 = vsel %vm9852_vm2, %v8251_v0, %v2040_v5  ;;  %v2042_v10 = vrot.slane %v2040_v5, 4 }
 0x125   : > { %v1805_v44 = vrot.slane %v1804_v11, 4  ;;  %v2036_v31 = vrot.slane %v8218_v41, 5  ;;  %v2926_v9 = vsel %vm2910_vm9, %v2893_v23, %v10891_v20  ;;  %v2924_v33 = vsel %vm2910_vm9, %v2891_v43, %v10902_v34  ;;  %v677_v43 = vld [vmem:[%s9828_s24 + $0xb4] sm:$0xe] }
 0x126   : > { %v1834_v37 = vsel %vm9896_vm5, %v1829_v6, %v1833_v14  ;;  %v2034_v7 = vsel %vm9852_vm2, %v8250_v35, %v2033_v42  ;;  %v2035_v40 = vrot.slane %v2033_v42, 4  ;;  %v2044_v59 = vsel %vm9852_vm2, %v2042_v10, %v2043_v49  ;;  %v676_v6 = vld [vmem:[%s9828_s24 + $0xa8] sm:$0xe] }
 0x127   : > { %v8379_v18 = vcombine.low %v1824_v3, %v1834_v37  ;;  %v1810_v25 = vsel %vm9896_vm5, %v1805_v44, %v1809_v24  ;;  %v11020_v54 = vpop.permute.xlu1 %2189  ;;  %v8395_v21 = vcombine.low %v2041_v12, %v2044_v59  ;;  %v639_v1 = vshrl.u32 %v10997_v47, 16 }
 0x128   : > { %v8378_v20 = vcombine.low %v1800_v38, %v1810_v25  ;;  %v2037_v60 = vsel %vm9852_vm2, %v2035_v40, %v2036_v31  ;;  %v642_v34 = vshll.u32 %v10997_v47, 16  ;;  %v648_v46 = vshll.u32 %v11006_v26, 16 }
 0x129   : > { %2709 = vrot.lane.b32.xlu1 %v8379_v18, %s9780_s6  ;;  %v8394_v41 = vcombine.low %v2034_v7, %v2037_v60  ;;  %v652_v62 = vshrl.u32 %v11006_v26, 16  ;;  %v641_v29 = vrot.slane %v639_v1, 4  ;;  %v658_v30 = vshll.u32 %v11015_v53, 16  ;;  %v8124_v18 = vld [vmem:[%s9828_s24 + $0xc0] sm:$0xf] }
 0x12a   : > { %2707 = vrot.lane.b32.xlu0 %v8378_v20, %s9780_s6  ;;  %v615_v56 = vshrl.u32 %v11018_v55, 16  ;;  %v618_v2 = vshll.u32 %v11018_v55, 16  ;;  %v644_v48 = vrot.slane %v642_v34, 5  ;;  %v650_v52 = vrot.slane %v648_v46, 5 }
 0x12b   : > { %v11032_v45 = vpop.permute.xlu0 %2187  ;;  %v654_v32 = vrot.slane %v652_v62, 4  ;;  %v624_v57 = vshll.u32 %v11026_v51, 16  ;;  %v660_v61 = vrot.slane %v658_v30, 5  ;;  %v628_v23 = vshrl.u32 %v11026_v51, 16 }
 0x12c   : > { %v617_v14 = vrot.slane %v615_v56, 4  ;;  %v620_v22 = vrot.slane %v618_v2, 5  ;;  %v645_v39 = vor.u32 %v644_v48, %v641_v29  ;;  %v634_v4 = vshll.u32 %v273_v63, 16  ;;  %v11043_v24 = vpop.permute.xlu1 %2269  ;;  %v11080_v56 = vld [vmem:[%s9828_s24 + $0xb4] sm:$0xf] }
 0x12d   : > { %2789 = vrot.lane.b32.xlu1 %v8395_v21, %s9781_s9  ;;  %v655_v3 = vor.u32 %v654_v32, %v650_v52  ;;  %v626_v58 = vrot.slane %v624_v57, 5  ;;  %v630_v0 = vrot.slane %v628_v23, 4  ;;  %v2959_v5 = vsel %vm2943_vm10, %v2926_v9, %v10912_v8  ;;  %v11089_v57 = vld [vmem:[%s9828_s24 + $0xb8] sm:$0xf] }
 0x12e   : > { %2787 = vrot.lane.b32.xlu0 %v8394_v41, %s9781_s9  ;;  %v621_v11 = vor.u32 %v620_v22, %v617_v14  ;;  %v2957_v49 = vsel %vm2943_vm10, %v2924_v33, %v10919_v16  ;;  %v646_v35 = vrot.slane %v645_v39, 4  ;;  %v636_v44 = vrot.slane %v634_v4, 5  ;;  %v11068_v41 = vld [vmem:[%s9828_s24 + $0xc4] sm:$0xf]  ;;  %v11093_v22 = vld [vmem:[%s9828_s24 + $0xc8] sm:$0x1] }
 0x12f   : > { %v11051_v38 = vpop.permute.xlu0 %2267  ;;  %v656_v42 = vrot.slane %v655_v3, 4  ;;  %v8093_v12 = vrot.slane %v677_v43, 9  ;;  %v631_v31 = vor.u32 %v630_v0, %v626_v58  ;;  %v836_v37 = vrot.slane %v11006_v26, 5 }
 0x130   : > { %v622_v10 = vrot.slane %v621_v11, 4  ;;  %v839_v7 = vrot.slane %v11015_v53, 5  ;;  %v651_v8 = vsel %vm9896_vm5, %v646_v35, %v650_v52  ;;  %v8092_v40 = vrot.slane %v676_v6, 9  ;;  %v11070_v34 = vpop.permute.xlu1 %2365  ;;  %v9572_v6 = vld [vmem:[%s13948_s3 + $0x40] sm:$0xff]  }
 0x131   : > { %v661_v16 = vsel %vm9896_vm5, %v656_v42, %v660_v61  ;;  %v829_v9 = vrot.slane %v11026_v51, 5  ;;  %v632_v33 = vrot.slane %v631_v31, 4  ;;  %v837_v20 = vsel %vm9852_vm2, %v8093_v12, %v836_v37  ;;  %v9573_v35 = vld [vmem:[%s13948_s3 + $0x80] sm:$0xff]   ;;  %8927 = vmatprep.subr.bf16.mxu1 %v9572_v6 }
 0x132   : > { %v8285_v25 = vcombine.low %v651_v8, %v661_v16  ;;  %v627_v59 = vsel %vm9896_vm5, %v622_v10, %v626_v58  ;;  %v838_v53 = vrot.slane %v836_v37, 4  ;;  %v832_v1 = vrot.slane %v273_v63, 5  ;;  %v11100_v58 = vld [vmem:[%s9828_s24 + $0xbc] sm:$0x1] }
 0x133   : > { %v830_v21 = vsel %vm9852_vm2, %v8092_v40, %v829_v9  ;;  %v831_v60 = vrot.slane %v829_v9, 4  ;;  %v637_v46 = vsel %vm9896_vm5, %v632_v33, %v636_v44  ;;  %v2992_v62 = vsel %vm2976_vm11, %v2959_v5, %v10931_v36  ;;  %v11082_v63 = vpop.permute.xlu0 %2363 }
 0x134   : > { %2201 = vrot.lane.b32.xlu1 %v8285_v25, %s9777_s28  ;;  %v2990_v29 = vsel %vm2976_vm11, %v2957_v49, %v10939_v27  ;;  %v1251_v30 = vshrl.u32 %v8124_v18, 16  ;;  %v8284_v2 = vcombine.low %v627_v59, %v637_v46  ;;  %v840_v48 = vsel %vm9852_vm2, %v838_v53, %v839_v7  ;;  %v9571_v49 = vld [vmem:[%s13948_s3 + $0xc0] sm:$0xff]  }
 0x135   : > { %v833_v52 = vsel %vm9852_vm2, %v831_v60, %v832_v1  ;;  %v1254_v32 = vshll.u32 %v8124_v18, 16  ;;  %v8301_v36 = vcombine.low %v837_v20, %v840_v48  ;;  %v1264_v27 = vshrl.u32 %v11068_v41, 16  ;;  %9039 = vmatprep.subr.bf16.mxu0 %v9571_v49  ;;  %v8157_v59 = vld [vmem:[%s9828_s24 + $0xc0] sm:$0xe]  ;;  %v8156_v60 = vld [vmem:[%s9828_s24 + $0xb4] sm:$0xe] }
 0x136   : > { %v8300_v61 = vcombine.low %v830_v21, %v833_v52  ;;  %v1253_v14 = vrot.slane %v1251_v30, 4  ;;  %2199 = vrot.lane.b32.xlu0 %v8284_v2, %s9777_s28  ;;  %v8317_v43 = vcombine.low %v8124_v18, %v11068_v41  ;;  %v1227_v39 = vshrl.u32 %v11080_v56, 16  ;;  %9040 = vmatpush3.bf16.msra.mxu0 %v9573_v35  ;;  %v9708_v49 = vld [vmem:[%s9828_s24 + $0x70] sm:$0xf] }
 0x137   : > { %v1256_v23 = vrot.slane %v1254_v32, 5  ;;  %v1230_v3 = vshll.u32 %v11080_v56, 16  ;;  %v1240_v4 = vshrl.u32 %v11089_v57, 16  ;;  %v8316_v11 = vcombine.low %v11080_v56, %v11089_v57  ;;  %v9575_v56 = vld [vmem:[%s13948_s3 + $0xc8] sm:$0xff]   ;;  %v9580_v35 = vld [vmem:[%s13948_s3 + $0x50] sm:$0xff]  }
 0x138   : > { %2281 = vrot.lane.b32.xlu1 %v8301_v36, %s9776_s27  ;;  %v3025_v0 = vsel %vm13951_vm12, %v2992_v62, %v10963_v50  ;;  %v3023_v5 = vsel %vm13951_vm12, %v2990_v29, %v10972_v13  ;;  %v1229_v42 = vrot.slane %v1227_v39, 4  ;;  %v1260_v50 = vshll.u32 %v11068_v41, 16  ;;  %v9574_v13 = vld [vmem:[%s13948_s3] sm:$0xff]   ;;  %v9577_v36 = vld [vmem:[%s13948_s3 + $0x88] sm:$0xff]   ;;  %9041 = vmatprep.subr.bf16.mxu0 %v9575_v56 }
 0x139   : > { %v1232_v44 = vrot.slane %v1230_v3, 5  ;;  %v1257_v12 = vor.u32 %v1256_v23, %v1253_v14  ;;  %v11120_v10 = vpop.permute.xlu1 %2445  ;;  %v1266_v31 = vrot.slane %v1264_v27, 4  ;;  %v1270_v37 = vshll.u32 %v11093_v22, 16  ;;  %8928 = vmatpush3.bf16.msra.mxu1 %v9574_v13 }
 0x13a   : > { %v1236_v7 = vshll.u32 %v11089_v57, 16  ;;  %v1242_v8 = vrot.slane %v1240_v4, 4  ;;  %v11127_v16 = vpop.permute.xlu0 %2443  ;;  %2279 = vrot.lane.b32.xlu0 %v8300_v61, %s9776_s27  ;;  %v1262_v9 = vrot.slane %v1260_v50, 5  ;;  %v1246_v25 = vshll.u32 %v11100_v58, 16  ;;  %v9578_v61 = vld [vmem:[%s13948_s3 + $0x8] sm:$0xff]   ;;  %9042 = vmatpush3.bf16.msra.mxu0 %v9577_v36 }
 0x13b   : > { %v1258_v40 = vrot.slane %v1257_v12, 4  ;;  %v1233_v18 = vor.u32 %v1232_v44, %v1229_v42  ;;  %v1272_v33 = vrot.slane %v1270_v37, 5  ;;  %v3058_v53 = vsel %vm13952_vm14, %v3025_v0, %v10983_v28  ;;  %v9576_v28 = vld [vmem:[%s13948_s3 + $0x48] sm:$0xff]   ;;  %v9581_v42 = vld [vmem:[%s13948_s3 + $0x90] sm:$0xff]   ;;  %v9710_v37 = vld [vmem:[%s9828_s24 + $0x64] sm:$0xf] }
 0x13c   : > { %2377 = vrot.lane.b32.xlu1 %v8317_v43, %s9774_s25  ;;  %v1238_v20 = vrot.slane %v1236_v7, 5  ;;  %v3056_v21 = vsel %vm13952_vm14, %v3023_v5, %v10989_v15  ;;  %v1267_v46 = vor.u32 %v1266_v31, %v1262_v9  ;;  %v1248_v29 = vrot.slane %v1246_v25, 5  ;;  %v11168_v4 = vld [vmem:[%s9828_s24 + $0xcc] sm:$0xf]  ;;  %8929 = vmatprep.subr.bf16.mxu1 %v9576_v28  ;;  %v9582_v44 = vld [vmem:[%s13948_s3 + $0x10] sm:$0xff]  }
 0x13d   : > { %v1263_v1 = vsel %vm9896_vm5, %v1258_v40, %v1262_v9  ;;  %v1234_v62 = vrot.slane %v1233_v18, 4  ;;  %9417 = vmatprep.mubr.msk.bf16.mxu0 %vm13953_vm15, %v3056_v21  ;;  %v11141_v30 = vpop.permute.xlu1 %2525  ;;  %v8173_v2 = vrot.slane %v8157_v59, 9  ;;  %v1445_v48 = vrot.slane %v11068_v41, 5  ;;  %8930 = vmatpush3.bf16.msra.mxu1 %v9578_v61  ;;  %v9709_v31 = vld [vmem:[%s9828_s24 + $0x60] sm:$0xf] }
 0x13e   : > { %v1243_v15 = vor.u32 %v1242_v8, %v1238_v20  ;;  %v1448_v52 = vrot.slane %v11093_v22, 5  ;;  %9418 = vmatmul.mubr.msk.bf16.gmra.mrb[12].mxu0 %vm13953_vm15, %v3058_v53  ;;  %v11152_v32 = vpop.permute.xlu0 %2523  ;;  %2375 = vrot.lane.b32.xlu0 %v8316_v11, %s9774_s25  ;;  %v1268_v14 = vrot.slane %v1267_v46, 4  ;;  %v8172_v27 = vrot.slane %v8156_v60, 9  ;;  %v9579_v11 = vld [vmem:[%s13948_s3 + $0xd0] sm:$0xff]   ;;  %v11198_v40 = vld [vmem:[%s9828_s24 + $0xc0] sm:$0xf] }
 0x13f   : > { %v1239_v41 = vsel %vm9896_vm5, %v1234_v62, %v1238_v20  ;;  %v1438_v22 = vrot.slane %v11089_v57, 5  ;;  %v1446_v43 = vsel %vm9852_vm2, %v8173_v2, %v1445_v48  ;;  %v1447_v39 = vrot.slane %v1445_v48, 4  ;;  %v11195_v8 = vld [vmem:[%s9828_s24 + $0xd0] sm:$0xf]  ;;  %9043 = vmatprep.subr.bf16.mxu0 %v9579_v11  ;;  %8931 = vmatprep.subr.bf16.mxu1 %v9580_v35 }
 0x140   : > { %v1244_v23 = vrot.slane %v1243_v15, 4  ;;  %v1441_v3 = vrot.slane %v11100_v58, 5  ;;  %v1273_v57 = vsel %vm9896_vm5, %v1268_v14, %v1272_v33  ;;  %v9707_v58 = vld [vmem:[%s9828_s24 + $0x6c] sm:$0xf]  ;;  %v8262_v7 = vcombine.low %v9709_v31, %v9710_v37  ;;  %v11205_v33 = vld [vmem:[%s9828_s24 + $0xc4] sm:$0xf]  ;;  %9044 = vmatpush3.bf16.msra.mxu0 %v9581_v42 }
 0x141   : > { %v1439_v0 = vsel %vm9852_vm2, %v8172_v27, %v1438_v22  ;;  %v1440_v5 = vrot.slane %v1438_v22, 4  ;;  %v8263_v6 = vcombine.low %v9707_v58, %v9708_v49  ;;  %v8333_v12 = vcombine.low %v1263_v1, %v1273_v57  ;;  %v11200_v9 = vpop.permute.xlu1 %2621  ;;  %8932 = vmatpush3.bf16.msra.mxu1 %v9582_v44  ;;  %v9584_v27 = vld [vmem:[%s13948_s3 + $0x58] sm:$0xff]   ;;  %v8237_v58 = vld [vmem:[%s9828_s24 + $0xcc] sm:$0xe]  ;;  %v8236_v44 = vld [vmem:[%s9828_s24 + $0xc0] sm:$0xe] }
 0x142   : > { %v1249_v50 = vsel %vm9896_vm5, %v1244_v23, %v1248_v29  ;;  %v1449_v13 = vsel %vm9852_vm2, %v1447_v39, %v1448_v52  ;;  %v1860_v21 = vshrl.u32 %v11168_v4, 16  ;;  %v1863_v60 = vshll.u32 %v11168_v4, 16  ;;  %v11212_v1 = vpop.permute.xlu0 %2619  ;;  %v11227_v52 = vld [vmem:[%s9828_s24 + $0xc8] sm:$0x1]  ;;  %v9585_v22 = vld [vmem:[%s13948_s3 + $0x98] sm:$0xff]   ;;  %8933 = vmatprep.subr.bf16.mxu1 %v9584_v27 }
 0x143   : > { %v8332_v18 = vcombine.low %v1239_v41, %v1249_v50  ;;  %v8349_v25 = vcombine.low %v1446_v43, %v1449_v13  ;;  %v1442_v59 = vsel %vm9852_vm2, %v1440_v5, %v1441_v3  ;;  %2457 = vrot.lane.b32.xlu1 %v8333_v12, %s9778_s29  ;;  %v2825_v53 = vsel %vm2795_vm6, %v8263_v6, %v11020_v54  ;;  %v11221_v54 = vld [vmem:[%s9828_s24 + $0xd4] sm:$0x1]  ;;  %v9586_v23 = vld [vmem:[%s13948_s3 + $0x18] sm:$0xff]   ;;  %v9587_v50 = vld [vmem:[%s13948_s3 + $0xe0] sm:$0xff]  }
 0x144   : > { %v8348_v20 = vcombine.low %v1439_v0, %v1442_v59  ;;  %v2822_v46 = vsel %vm2795_vm6, %v8262_v7, %v11032_v45  ;;  %v1873_v62 = vshrl.u32 %v11195_v8, 16  ;;  %v1836_v29 = vshrl.u32 %v11198_v40, 16  ;;  %v9583_v45 = vld [vmem:[%s13948_s3 + $0xd8] sm:$0xff]  }
 0x145   : > { %2455 = vrot.lane.b32.xlu0 %v8332_v18, %s9778_s29  ;;  %v1839_v56 = vshll.u32 %v11198_v40, 16  ;;  %v1862_v28 = vrot.slane %v1860_v21, 4  ;;  %v1865_v15 = vrot.slane %v1863_v60, 5  ;;  %v8365_v2 = vcombine.low %v11168_v4, %v11195_v8  ;;  %9045 = vmatprep.subr.bf16.mxu0 %v9583_v45 }
 0x146   : > { %v1849_v48 = vshrl.u32 %v11205_v33, 16  ;;  %v1838_v36 = vrot.slane %v1836_v29, 4  ;;  %v8364_v14 = vcombine.low %v11198_v40, %v11205_v33  ;;  %v2864_v41 = vsel %vm2844_vm7, %v2825_v53, %v11043_v24  ;;  %9046 = vmatpush3.bf16.msra.mxu0 %v9585_v22  ;;  %8934 = vmatpush3.bf16.msra.mxu1 %v9586_v23  ;;  %v9589_v40 = vld [vmem:[%s13948_s3 + $0xa0] sm:$0xff]  }
 0x147   : > { %v1841_v61 = vrot.slane %v1839_v56, 5  ;;  %2537 = vrot.lane.b32.xlu1 %v8349_v25, %s9775_s26  ;;  %v1866_v43 = vor.u32 %v1865_v15, %v1862_v28  ;;  %v1869_v39 = vshll.u32 %v11195_v8, 16  ;;  %v1875_v24 = vrot.slane %v1873_v62, 4  ;;  %v11248_v4 = vpop.permute.xlu1 %2701  ;;  %9047 = vmatprep.subr.bf16.mxu0 %v9587_v50  ;;  %v9597_v50 = vld [vmem:[%s13948_s3 + $0xb0] sm:$0xff]  }
 0x148   : > { %v1879_v3 = vshll.u32 %v11221_v54, 16  ;;  %v1845_v57 = vshll.u32 %v11205_v33, 16  ;;  %v1851_v0 = vrot.slane %v1849_v48, 4  ;;  %v1855_v5 = vshll.u32 %v11227_v52, 16 }
 0x149   : > { %2535 = vrot.lane.b32.xlu0 %v8348_v20, %s9775_s26  ;;  %v1842_v11 = vor.u32 %v1841_v61, %v1838_v36  ;;  %v2862_v49 = vsel %vm2844_vm7, %v2822_v46, %v11051_v38  ;;  %v1867_v6 = vrot.slane %v1866_v43, 4  ;;  %v1871_v35 = vrot.slane %v1869_v39, 5  ;;  %v11257_v12 = vpop.permute.xlu0 %2699  ;;  %v9588_v38 = vld [vmem:[%s13948_s3 + $0x60] sm:$0xff]   ;;  %v9594_v43 = vld [vmem:[%s13948_s3 + $0x28] sm:$0xff]  }
 0x14a   : > { %v1881_v42 = vrot.slane %v1879_v3, 5  ;;  %v1847_v31 = vrot.slane %v1845_v57, 5  ;;  %v1857_v37 = vrot.slane %v1855_v5, 5  ;;  %v2897_v7 = vsel %vm2877_vm8, %v2864_v41, %v11070_v34  ;;  %v9590_v34 = vld [vmem:[%s13948_s3 + $0x20] sm:$0xff]   ;;  %8935 = vmatprep.subr.bf16.mxu1 %v9588_v38  ;;  %9048 = vmatpush3.bf16.msra.mxu0 %v9589_v40 }
 0x14b   : > { %v1843_v13 = vrot.slane %v1842_v11, 4  ;;  %2633 = vrot.lane.b32.xlu1 %v8365_v2, %s9779_s30  ;;  %v1876_v18 = vor.u32 %v1875_v24, %v1871_v35  ;;  %v2895_v25 = vsel %vm2877_vm8, %v2862_v49, %v11082_v63  ;;  %v8253_v59 = vrot.slane %v8237_v58, 9  ;;  %v2782_v62 = vpop.permute.xlu1 %2781  ;;  %v9591_v63 = vld [vmem:[%s13948_s3 + $0xe8] sm:$0xff]   ;;  %8936 = vmatpush3.bf16.msra.mxu1 %v9590_v34  ;;  %v9595_v11 = vld [vmem:[%s13948_s3 + $0xf0] sm:$0xff]   ;;  %v9601_v34 = vld [vmem:[%s13948_s3 + $0xb8] sm:$0xff]  }
 0x14c   : > { %v2054_v20 = vrot.slane %v11195_v8, 5  ;;  %v1872_v53 = vsel %vm9896_vm5, %v1867_v6, %v1871_v35  ;;  %v1852_v21 = vor.u32 %v1851_v0, %v1847_v31  ;;  %v2057_v60 = vrot.slane %v11221_v54, 5  ;;  %v9592_v8 = vld [vmem:[%s13948_s3 + $0x68] sm:$0xff]   ;;  %9049 = vmatprep.subr.bf16.mxu0 %v9591_v63  ;;  %v3404_v35 = vld [vmem:[#allocation2 + $0x20] sm:$0x1]  ;;  %v9602_v63 = vld [vmem:[%s13948_s3 + $0x38] sm:$0xff]  }
 0x14d   : > { %2631 = vrot.lane.b32.xlu0 %v8364_v14, %s9779_s30  ;;  %v8252_v46 = vrot.slane %v8236_v44, 9  ;;  %v1877_v29 = vrot.slane %v1876_v18, 4  ;;  %v1848_v56 = vsel %vm9896_vm5, %v1843_v13, %v1847_v31  ;;  %v2047_v15 = vrot.slane %v11205_v33, 5  ;;  %v9593_v54 = vld [vmem:[%s13948_s3 + $0xa8] sm:$0xff]   ;;  %8937 = vmatprep.subr.bf16.mxu1 %v9592_v8  ;;  %v2780_v27 = vpop.permute.xlu0 %2779  ;;  %v9599_v13 = vld [vmem:[%s13948_s3 + $0xf8] sm:$0xff]  }
 0x14e   : > { %v2056_v28 = vrot.slane %v2054_v20, 4  ;;  %v1853_v2 = vrot.slane %v1852_v21, 4  ;;  %v2055_v48 = vsel %vm9852_vm2, %v8253_v59, %v2054_v20  ;;  %v2050_v45 = vrot.slane %v11227_v52, 5  ;;  %9050 = vmatpush3.bf16.msra.mxu0 %v9593_v54  ;;  %v3345_v58 = vld [vmem:[#allocation2 + $0xc] sm:$0x1] }
 0x14f   : > { %v2930_v36 = vsel %vm2910_vm9, %v2897_v7, %v11120_v10  ;;  %v1882_v33 = vsel %vm9896_vm5, %v1877_v29, %v1881_v42  ;;  %v2049_v14 = vrot.slane %v2047_v15, 4  ;;  %v2928_v41 = vsel %vm2910_vm9, %v2895_v25, %v11127_v16  ;;  %v3401_v42 = vld [vmem:[#allocation2 + $0x14] sm:$0x1]  ;;  %8938 = vmatpush3.bf16.msra.mxu1 %v9594_v43  ;;  %9051 = vmatprep.subr.bf16.mxu0 %v9595_v11  ;;  %v9600_v7 = vld [vmem:[%s13948_s3 + $0x78] sm:$0xff]   ;;  %v3354_v18 = vld [vmem:[#allocation2 + $0x30] sm:$0x1] }
 0x150   : > { %v2058_v61 = vsel %vm9852_vm2, %v2056_v28, %v2057_v60  ;;  %v8381_v22 = vcombine.low %v1872_v53, %v1882_v33  ;;  %v1858_v52 = vsel %vm9896_vm5, %v1853_v2, %v1857_v37  ;;  %v2048_v10 = vsel %vm9852_vm2, %v8252_v46, %v2047_v15  ;;  %v3351_v60 = vld [vmem:[#allocation2 + $0x24] sm:$0x1]  ;;  %v3410_v29 = vld [vmem:[#allocation2 + $0x38] sm:$0x1]  ;;  %v3407_v15 = vld [vmem:[#allocation2 + $0x2c] sm:$0x1] }
 0x151   : > { %v2963_v23 = vsel %vm2943_vm10, %v2930_v36, %v11141_v30  ;;  %v8380_v39 = vcombine.low %v1848_v56, %v1858_v52  ;;  %v2051_v24 = vsel %vm9852_vm2, %v2049_v14, %v2050_v45  ;;  %v2961_v16 = vsel %vm2943_vm10, %v2928_v41, %v11152_v32  ;;  %v3348_v32 = vld [vmem:[#allocation2 + $0x18] sm:$0x1] }
 0x152   : > { %v2996_v3 = vsel %vm2976_vm11, %v2963_v23, %v11200_v9  ;;  %2713 = vrot.lane.b32.xlu1 %v8381_v22, %s9780_s6  ;;  %v8397_v30 = vcombine.low %v2055_v48, %v2058_v61  ;;  %v2994_v57 = vsel %vm2976_vm11, %v2961_v16, %v11212_v1  ;;  %v8396_v9 = vcombine.low %v2048_v10, %v2051_v24  ;;  %v9596_v1 = vld [vmem:[%s13948_s3 + $0x70] sm:$0xff]  }
 0x153   : > { %v3029_v0 = vsel %vm13951_vm12, %v2996_v3, %v11248_v4  ;;  %v11327_v5 = vpop.permute.xlu1 %2193  ;;  %2711 = vrot.lane.b32.xlu0 %v8380_v39, %s9780_s6  ;;  %v3027_v49 = vsel %vm13951_vm12, %v2994_v57, %v11257_v12  ;;  %v8269_v44 = vcombine.low %v10997_v47, %v11006_v26  ;;  %v9598_v12 = vld [vmem:[%s13948_s3 + $0x30] sm:$0xff]   ;;  %v8268_v37 = vcombine.low %v11018_v55, %v11026_v51 }
 0x154   : > { %v3062_v6 = vsel %vm13952_vm14, %v3029_v0, %v2782_v62  ;;  %v3060_v4 = vsel %vm13952_vm14, %v3027_v49, %v2780_v27  ;;  %v14008_v40 = vmov 0  ;;  %v3349_v25 = vsel %vm11361_vm4, 0, %v3348_v32  ;;  %8939 = vmatprep.subr.bf16.mxu1 %v9596_v1  ;;  %9052 = vmatpush3.bf16.msra.mxu0 %v9597_v50  ;;  %v3360_v50 = vld [vmem:[#allocation2 + $0x48] sm:$0x1] }
 0x155   : > { %9421 = vmatprep.mubr.msk.bf16.mxu0 %vm13953_vm15, %v3060_v4  ;;  %v11349_v31 = vpop.permute.xlu0 %2191  ;;  %v14009_v40 = vsel %vm11361_vm4, 4294967295, %v14008_v40  ;;  %v14011_v59 = vmov 0  ;;  %v3346_v20 = vsel %vm11361_vm4, 0, %v3345_v58  ;;  %v9782_v53 = vmov 0   ;;  %3350 = vst [vmem:[#allocation2 + $0x18] sm:$0x1] %v3349_v25  ;;  %8940 = vmatpush3.bf16.msra.mxu1 %v9598_v12 }
 0x156   : > { %2793 = vrot.lane.b32.xlu1 %v8397_v30, %s9781_s9  ;;  %9422 = vmatmul.mubr.msk.bf16.gmra.mrb[16].mxu0 %vm13953_vm15, %v3062_v6  ;;  %14010 = vst [vmem:[#allocation3_spill] sm:$0xff] %v14009_v40  ;;  %v14012_v59 = vsel %vm11369_vm13, 4294967295, %v14011_v59  ;;  %3332 = vst [vmem:[#allocation2] sm:$0xf] %v9782_v53  ;;  %v3355_v21 = vsel %vm11361_vm4, 0, %v3354_v18  ;;  %v3405_v46 = vsel %vm11369_vm13, 0, %v3404_v35 }
 0x157   : > { %v11358_v38 = vpop.permute.xlu1 %2273  ;;  %2791 = vrot.lane.b32.xlu0 %v8396_v9, %s9781_s9  ;;  %14013 = vst [vmem:[#allocation4_spill] sm:$0xff] %v14012_v59  ;;  %3333 = vst [vmem:[#allocation2 + $0x4] sm:$0xf] %v9782_v53  ;;  %v3402_v62 = vsel %vm11369_vm13, 0, %v3401_v42  ;;  %v3352_v8 = vsel %vm11361_vm4, 0, %v3351_v60  ;;  %9053 = vmatprep.subr.bf16.mxu0 %v9599_v13  ;;  %v3411_v28 = vsel %vm11369_vm13, 0, %v3410_v29 }
 0x158   : > { %3334 = vst [vmem:[#allocation2 + $0x8] sm:$0xf] %v9782_v53  ;;  %3336 = vst [vmem:[#allocation2 + $0xcc] sm:$0xf] %v9782_v53  ;;  %8941 = vmatprep.subr.bf16.mxu1 %v9600_v7  ;;  %v3408_v54 = vsel %vm11369_vm13, 0, %v3407_v15  ;;  %9054 = vmatpush3.bf16.msra.mxu0 %v9601_v34  ;;  %vm3871_vm0 = vcmask 1043456  }
 0x159   : > { %3337 = vst [vmem:[#allocation2 + $0xd0] sm:$0xf] %v9782_v53  ;;  %3338 = vst [vmem:[#allocation2 + $0xd4] sm:$0xf] %v9782_v53  ;;  %v11389_v56 = vpop.permute.xlu0 %2271  ;;  %8942 = vmatpush3.bf16.msra.mxu1 %v9602_v63  ;;  %v9711_v12 = vld [vmem:[%s9828_s24 + $0x84] sm:$0xf] }
 0x15a   : > { %3347 = vst [vmem:[#allocation2 + $0xc] sm:$0x1] %v3346_v20  ;;  %3356 = vst [vmem:[#allocation2 + $0x30] sm:$0x1] %v3355_v21  ;;  %v9712_v13 = vld [vmem:[%s9828_s24 + $0x88] sm:$0xf] }
 0x15b   : > { %3406 = vst [vmem:[#allocation2 + $0x20] sm:$0x1] %v3405_v46  ;;  %3403 = vst [vmem:[#allocation2 + $0x14] sm:$0x1] %v3402_v62  ;;  %v2370_v2 = vpop.permute.xlu1 %2369  ;;  %v8265_v7 = vcombine.low %v9711_v12, %v9712_v13  ;;  %v3361_v20 = vsel %vm11361_vm4, 0, %v3360_v50 }
 0x15c   : > { %3353 = vst [vmem:[#allocation2 + $0x24] sm:$0x1] %v3352_v8  ;;  %3412 = vst [vmem:[#allocation2 + $0x38] sm:$0x1] %v3411_v28  ;;  %v9713_v34 = vld [vmem:[%s9828_s24 + $0x78] sm:$0xf] }
 0x15d   : > { %3409 = vst [vmem:[#allocation2 + $0x2c] sm:$0x1] %v3408_v54  ;;  %v2368_v48 = vpop.permute.xlu0 %2367  ;;  %v3342_v45 = vld [vmem:[#allocation2] sm:$0x1]  ;;  %v4417_v23 = vld [vmem:[#allocation2] sm:$0xe]  ;;  %v2831_v29 = vsel %vm2795_vm6, %v8265_v7, %v11327_v5 }
 0x15e   : > { %v11395_v33 = vld [vmem:[#allocation2 + $0x4] sm:$0xf]  ;;  %v3343_v61 = vsel %vm11361_vm4, 0, %v3342_v45  ;;  %v8450_v24 = vrot.slane %v4417_v23, 9  ;;  %v9714_v53 = vld [vmem:[%s9828_s24 + $0x7c] sm:$0xf]  ;;  %v2868_v15 = vsel %vm2844_vm7, %v2831_v29, %v11358_v38 }
 0x15f   : > { %v3398_v36 = vld [vmem:[#allocation2 + $0x8] sm:$0x1]  ;;  %3344 = vst [vmem:[#allocation2] sm:$0x1] %v3343_v61  ;;  %v4043_v41 = vshll.u32 %v11395_v33, 16  ;;  %v4047_v27 = vshrl.u32 %v11395_v33, 16  ;;  %v8264_v21 = vcombine.low %v9713_v34, %v9714_v53  ;;  %v2901_v61 = vsel %vm2877_vm8, %v2868_v15, %v2370_v2 }
 0x160   : > { %v3399_v14 = vsel %vm11369_vm13, 0, %v3398_v36  ;;  %v4483_v39 = vrot.slane %v11395_v33, 5  ;;  %3362 = vst [vmem:[#allocation2 + $0x48] sm:$0x1] %v3361_v20  ;;  %v3366_v12 = vld [vmem:[#allocation2 + $0x60] sm:$0x1] }
 0x161   : > { %3400 = vst [vmem:[#allocation2 + $0x8] sm:$0x1] %v3399_v14  ;;  %v4045_v52 = vrot.slane %v4043_v41, 5  ;;  %v4049_v10 = vrot.slane %v4047_v27, 4  ;;  %v2828_v28 = vsel %vm2795_vm6, %v8264_v21, %v11349_v31  ;;  %v9715_v13 = vld [vmem:[%s9828_s24 + $0x9c] sm:$0xf] }
 0x162   : > { %v2450_v22 = vpop.permute.xlu1 %2449  ;;  %v4485_v0 = vrot.slane %v4483_v39, 4  ;;  %v11406_v6 = vsel %vm9852_vm2, %v8450_v24, %v4483_v39  ;;  %v2866_v36 = vsel %vm2844_vm7, %v2828_v28, %v11389_v56  ;;  %v3357_v39 = vld [vmem:[#allocation2 + $0x3c] sm:$0x1]  ;;  %v9716_v7 = vld [vmem:[%s9828_s24 + $0xa0] sm:$0xf] }
 0x163   : > { %v4050_v3 = vor.u32 %v4049_v10, %v4045_v52  ;;  %v2899_v5 = vsel %vm2877_vm8, %v2866_v36, %v2368_v48  ;;  %v2934_v27 = vsel %vm2910_vm9, %v2901_v61, %v2450_v22  ;;  %v9717_v20 = vld [vmem:[%s9828_s24 + $0x90] sm:$0xf]  ;;  %v9718_v34 = vld [vmem:[%s9828_s24 + $0x94] sm:$0xf]  ;;  %s8076_s24 = sshll.u32 %s9819_s19, 5 }
 0x164   : > { %v2448_v43 = vpop.permute.xlu0 %2447  ;;  %v8266_v53 = vcombine.low %v9717_v20, %v9718_v34  ;;  %p221_p4 = scmp.lt.s32.totalorder %s8076_s24, 63 }
 0x165   : > { %v4051_v1 = vrot.slane %v4050_v3, 4  ;;  %v2932_v10 = vsel %vm2910_vm9, %v2899_v5, %v2448_v43  ;;  %v3358_v43 = vsel %vm11361_vm4, 0, %v3357_v39 }
 0x166   : > { %v2530_v16 = vpop.permute.xlu1 %2529  ;;  %v3985_v30 = vld [vmem:[#allocation2] sm:$0xf]  ;;  %3359 = vst [vmem:[#allocation2 + $0x3c] sm:$0x1] %v3358_v43  ;;  %s14247_s24 = smov (!%p221_p4, %s8076_s24), 63 }
 0x167   : > { %v4034_v32 = vshrl.u32 %v3985_v30, 16  ;;  %v4037_v58 = vshll.u32 %v3985_v30, 16  ;;  %v8498_v45 = vcombine.low %v3985_v30, %v11395_v33  ;;  %v2967_v38 = vsel %vm2943_vm10, %v2934_v27, %v2530_v16  ;;  %v3416_v16 = vld [vmem:[#allocation2 + $0x50] sm:$0x1]  ;;  %v3413_v30 = vld [vmem:[#allocation2 + $0x44] sm:$0x1] }
 0x168   : > { %v2528_v11 = vpop.permute.xlu0 %2527  ;;  %v4017_v57 = vld [vmem:[#allocation2 + $0x8] sm:$0x1]  ;;  %s8077_s19 = sshll.u32 %s14247_s24, 2 }
 0x169   : > { %v4053_v9 = vshll.u32 %v4017_v57, 16  ;;  %v4486_v49 = vrot.slane %v4017_v57, 5  ;;  %v4036_v35 = vrot.slane %v4034_v32, 4  ;;  %v4039_v42 = vrot.slane %v4037_v58, 5  ;;  %s13899_s27 = scalar_lea.vmem %s13950_s5, %s8077_s19 }
 0x16a   : > { %v2626_v18 = vpop.permute.xlu1 %2625  ;;  %v3414_v57 = vsel %vm11369_vm13, 0, %v3413_v30 }
 0x16b   : > { %v4055_v4 = vrot.slane %v4053_v9, 5  ;;  %v11412_v25 = vsel %vm9852_vm2, %v4485_v0, %v4486_v49  ;;  %v4040_v46 = vor.u32 %v4039_v42, %v4036_v35  ;;  %v3000_v33 = vsel %vm2976_vm11, %v2967_v38, %v2626_v18  ;;  %3415 = vst [vmem:[#allocation2 + $0x44] sm:$0x1] %v3414_v57  ;;  %v3363_v57 = vld [vmem:[#allocation2 + $0x54] sm:$0x1] }
 0x16c   : > { %v2624_v60 = vpop.permute.xlu0 %2623  ;;  %v8530_v62 = vcombine.low %v11406_v6, %v11412_v25  ;;  %v8267_v18 = vcombine.low %v9715_v13, %v9716_v7 }
 0x16d   : > { %v4041_v63 = vrot.slane %v4040_v46, 4  ;;  %v4056_v8 = vsel %vm9896_vm5, %v4051_v1, %v4055_v4 }
 0x16f   : > { %v4046_v54 = vsel %vm9896_vm5, %v4041_v63, %v4045_v52  ;;  %v2965_v52 = vsel %vm2943_vm10, %v2932_v10, %v2528_v11  ;;  %v3417_v11 = vsel %vm11369_vm13, 0, %v3416_v16  ;;  %v11462_v63 = vld [vmem:[%s13947_s2] ss:$0 sm:$0xff] }
 0x170   : > { %v8514_v41 = vcombine.low %v4046_v54, %v4056_v8  ;;  %v2998_v56 = vsel %vm2976_vm11, %v2965_v52, %v2624_v60  ;;  %3418 = vst [vmem:[#allocation2 + $0x50] sm:$0x1] %v3417_v11  ;;  %v3367_v60 = vsel %vm11361_vm4, 0, %v3366_v12 }
 0x171   : > { %v2706_v14 = vpop.permute.xlu1 %2705  ;;  %3368 = vst [vmem:[#allocation2 + $0x60] sm:$0x1] %v3367_v60  ;;  %v3880_v60 = vld [vmem:[#allocation2 + $0x18] sm:$0xf] }
 0x172   : > { %v2704_v31 = vpop.permute.xlu0 %2703  ;;  %7049 = vmatprep.mubr.bf16.mxu1 %v8514_v41  ;;  %v3033_v2 = vsel %vm13951_vm12, %v3000_v33, %v2706_v14 }
 0x173   : > { %7050 = vmatmul.mubr.bf16.vlgmr.msra.gmra.mrb[0].mxu1 %v8498_v45  ;;  %v3031_v48 = vsel %vm13951_vm12, %v2998_v56, %v2704_v31 }
 0x175   : > { %v2786_v23 = vpop.permute.xlu1 %2785 }
 0x176   : > { %v3066_v22 = vsel %vm13952_vm14, %v3033_v2, %v2786_v23  ;;  %v2784_v24 = vpop.permute.xlu0 %2783 }
 0x177   : > { %v3064_v3 = vsel %vm13952_vm14, %v3031_v48, %v2784_v24 }
 0x178   : > { %9425 = vmatprep.mubr.msk.bf16.mxu0 %vm13953_vm15, %v3064_v3 }
 0x179   : > { %9426 = vmatmul.mubr.msk.bf16.gmra.mrb[20].mxu0 %vm13953_vm15, %v3066_v22 }
 0x17c   : > { %v2198_v0 = vpop.permute.xlu1 %2197 }
 0x17d   : > { %v2837_v8 = vsel %vm2795_vm6, %v8267_v18, %v2198_v0 }
 0x17f   : > { %v2196_v32 = vpop.permute.xlu0 %2195 }
 0x180   : > { %v2278_v58 = vpop.permute.xlu1 %2277  ;;  %v2834_v29 = vsel %vm2795_vm6, %v8266_v53, %v2196_v32 }
 0x181   : > { %v2872_v28 = vsel %vm2844_vm7, %v2837_v8, %v2278_v58 }
 0x183   : > { %v2276_v9 = vpop.permute.xlu0 %2275 }
 0x184   : > { %v2374_v49 = vpop.permute.xlu1 %2373  ;;  %v2870_v15 = vsel %vm2844_vm7, %v2834_v29, %v2276_v9 }
 0x185   : > { %v2905_v45 = vsel %vm2877_vm8, %v2872_v28, %v2374_v49  ;;  %v3364_v49 = vsel %vm11361_vm4, 0, %v3363_v57 }
 0x186   : > { %3365 = vst [vmem:[#allocation2 + $0x54] sm:$0x1] %v3364_v49 }
 0x187   : > { %v2372_v35 = vpop.permute.xlu0 %2371 }
 0x188   : > { %v2903_v36 = vsel %vm2877_vm8, %v2870_v15, %v2372_v35  ;;  %v3422_v35 = vld [vmem:[#allocation2 + $0x68] sm:$0x1]  ;;  %v3873_v15 = vld [vmem:[#allocation2 + $0xc] sm:$0xf] }
 0x189   : > { %v3423_v7 = vsel %vm11369_vm13, 0, %v3422_v35 }
 0x18a   : > { %3424 = vst [vmem:[#allocation2 + $0x68] sm:$0x1] %v3423_v7 }
 0x18c   : > { %v2454_v42 = vpop.permute.xlu1 %2453 }
 0x18d   : > { %v2452_v1 = vpop.permute.xlu0 %2451  ;;  %v2938_v5 = vsel %vm2910_vm9, %v2905_v45, %v2454_v42 }
 0x18e   : > { %v2936_v27 = vsel %vm2910_vm9, %v2903_v36, %v2452_v1 }
 0x190   : > { %v2534_v4 = vpop.permute.xlu1 %2533 }
 0x191   : > { %v2532_v50 = vpop.permute.xlu0 %2531  ;;  %v2971_v52 = vsel %vm2943_vm10, %v2938_v5, %v2534_v4 }
 0x192   : > { %v2969_v33 = vsel %vm2943_vm10, %v2936_v27, %v2532_v50  ;;  %v3419_v50 = vld [vmem:[#allocation2 + $0x5c] sm:$0x1] }
 0x193   : > { %v3420_v53 = vsel %vm11369_vm13, 0, %v3419_v50 }
 0x194   : > { %v2630_v21 = vpop.permute.xlu1 %2629  ;;  %3421 = vst [vmem:[#allocation2 + $0x5c] sm:$0x1] %v3420_v53 }
 0x195   : > { %v2628_v46 = vpop.permute.xlu0 %2627  ;;  %v3004_v39 = vsel %vm2976_vm11, %v2971_v52, %v2630_v21 }
 0x196   : > { %v3002_v48 = vsel %vm2976_vm11, %v2969_v33, %v2628_v46  ;;  %v3877_v33 = vld [vmem:[#allocation2 + $0x14] sm:$0x1] }
 0x198   : > { %v9407_v54 = vpop.f32.mrb[0].mxu0 }
 0x199   : > { %v3182_v14 = vadd.f32 %v9407_v54, %v11462_v63  ;;  %v3173_v41 = vpop.f32.mrb[1].mxu0 }
 0x19a   : > { %v3174_v10 = vadd.f32 %v11462_v63, %v3173_v41  ;;  %v9408_v38 = vpop.f32.mrb[2].mxu0  ;;  %v3884_v41 = vld [vmem:[#allocation2 + $0x20] sm:$0x1] }
 0x19b   : > { %v2710_v61 = vpop.permute.xlu1 %2709  ;;  %v3302_v56 = vmax.f32 %v3182_v14, 0.0  ;;  %v3185_v2 = vadd.f32 %v9408_v38, %v11462_v63  ;;  %v3176_v23 = vpop.f32.mrb[3].mxu0 }
 0x19c   : > { %v2708_v31 = vpop.permute.xlu0 %2707  ;;  %v3300_v22 = vmax.f32 %v3174_v10, 0.0  ;;  %v3177_v24 = vadd.f32 %v11462_v63, %v3176_v23  ;;  %v3037_v43 = vsel %vm13951_vm12, %v3004_v39, %v2710_v61 }
 0x19d   : > { %v3035_v16 = vsel %vm13951_vm12, %v3002_v48, %v2708_v31  ;;  %v8751_v11 = vpack.c.bf16 %v3302_v56, %v3302_v56  ;;  %v3303_v30 = vmax.f32 %v3185_v2, 0.0  ;;  %vm3548_vm12 = vsmask.f32 4368 }
 0x19e   : > { %v8749_v58 = vpack.c.bf16 %v3300_v22, %v3300_v22  ;;  %v3301_v9 = vmax.f32 %v3177_v24, 0.0 }
 0x19f   : > { %v2790_v3 = vpop.permute.xlu1 %2789  ;;  %v3568_v1 = vshrl.u32 %v8751_v11, 16  ;;  %v8752_v4 = vpack.c.bf16 %v3303_v30, %v3303_v30  ;;  %v3571_v20 = vshll.u32 %v8751_v11, 16 }
 0x1a0   : > { %v3070_v0 = vsel %vm13952_vm14, %v3037_v43, %v2790_v3  ;;  %v2788_v32 = vpop.permute.xlu0 %2787  ;;  %v3551_v12 = vshrl.u32 %v8749_v58, 16  ;;  %v8750_v13 = vpack.c.bf16 %v3301_v9, %v3301_v9  ;;  %v3554_v8 = vshll.u32 %v8749_v58, 16 }
 0x1a1   : > { %v3068_v42 = vsel %vm13952_vm14, %v3035_v16, %v2788_v32  ;;  %v3570_v18 = vrot.slane %v3568_v1, 7  ;;  %v3576_v34 = vshrl.u32 %v8752_v4, 16  ;;  %vm11494_vm14 = vmand %vm3871_vm0, %vm3396_vm3  ;;  %v3579_v45 = vshll.u32 %v8752_v4, 16 }
 0x1a2   : > { %9429 = vmatprep.mubr.msk.bf16.mxu0 %vm13953_vm15, %v3068_v42  ;;  %v3553_v46 = vrot.slane %v3551_v12, 7  ;;  %v3559_v29 = vshrl.u32 %v8750_v13, 16  ;;  %v3562_v27 = vshll.u32 %v8750_v13, 16 }
 0x1a3   : > { %9430 = vmatmul.mubr.msk.bf16.gmra.mrb[24].mxu0 %vm13953_vm15, %v3070_v0  ;;  %v3573_v28 = vor.u32 %v3571_v20, %v3570_v18  ;;  %v3578_v54 = vrot.slane %v3576_v34, 7  ;;  %vm11500_vm15 = vmor %vm3340_vm1, %vm3548_vm12  ;;  %v3574_v31 = vrot.slane %v3570_v18, 4 }
 0x1a4   : > { %v3556_v61 = vor.u32 %v3554_v8, %v3553_v46  ;;  %v3561_v5 = vrot.slane %v3559_v29, 7  ;;  %v3557_v56 = vrot.slane %v3553_v46, 4 }
 0x1a5   : > { %v3881_v10 = vsel %vm11494_vm14, %v3573_v28, %v3880_v60  ;;  %v3581_v38 = vor.u32 %v3579_v45, %v3578_v54  ;;  %v3583_v52 = vrot.slane %v3578_v54, 4 }
 0x1a6   : > { %v2202_v36 = vpop.permute.xlu1 %2201  ;;  %3882 = vst [vmem:[#allocation2 + $0x18] sm:$0xf] %v3881_v10  ;;  %v3874_v2 = vsel %vm11494_vm14, %v3556_v61, %v3873_v15  ;;  %v3564_v23 = vor.u32 %v3562_v27, %v3561_v5  ;;  %v3566_v39 = vrot.slane %v3561_v5, 4 }
 0x1a7   : > { %3875 = vst [vmem:[#allocation2 + $0xc] sm:$0xf] %v3874_v2  ;;  %v3582_v22 = vsel %vm11500_vm15, %v3574_v31, %v3581_v38  ;;  %v3885_v24 = vsel %vm11361_vm4, %v3583_v52, %v3884_v41  ;;  %v2843_v60 = vsel %vm2795_vm6, %v8269_v44, %v2202_v36 }
 0x1a8   : > { %v2200_v48 = vpop.permute.xlu0 %2199  ;;  %3883 = vst [vmem:[#allocation2 + $0x1c] sm:$0xf] %v3582_v22  ;;  %3886 = vst [vmem:[#allocation2 + $0x20] sm:$0x1] %v3885_v24  ;;  %v3565_v16 = vsel %vm11500_vm15, %v3557_v56, %v3564_v23  ;;  %v3878_v3 = vsel %vm11361_vm4, %v3566_v39, %v3877_v33 }
 0x1a9   : > { %3876 = vst [vmem:[#allocation2 + $0x10] sm:$0xf] %v3565_v16  ;;  %3879 = vst [vmem:[#allocation2 + $0x14] sm:$0x1] %v3878_v3  ;;  %v2840_v46 = vsel %vm2795_vm6, %v8268_v37, %v2200_v48  ;;  %vm14018_vm6 = vcmask 228352  }
 0x1aa   : > { %v2282_v43 = vpop.permute.xlu1 %2281 }
 0x1ab   : > { %v2876_v54 = vsel %vm2844_vm7, %v2843_v60, %v2282_v43 }
 0x1ac   : > { %v2280_v11 = vpop.permute.xlu0 %2279 }
 0x1ad   : > { %v11530_v53 = vld [vmem:[#allocation2 + $0x18] sm:$0xf]  ;;  %v2874_v45 = vsel %vm2844_vm7, %v2840_v46, %v2280_v11  ;;  %vm14019_vm7 = vmmov %vm14018_vm6 }
 0x1ae   : > { %v2378_v30 = vpop.permute.xlu1 %2377  ;;  %v11516_v57 = vld [vmem:[#allocation2 + $0xc] sm:$0xf]  ;;  %v4082_v51 = vshrl.u32 %v11530_v53, 16  ;;  %v4085_v37 = vshll.u32 %v11530_v53, 16 }
 0x1af   : > { %v4058_v32 = vshrl.u32 %v11516_v57, 16  ;;  %v4061_v58 = vshll.u32 %v11516_v57, 16  ;;  %v11520_v9 = vld [vmem:[#allocation2 + $0xc] sm:$0xf]  ;;  %v11543_v15 = vld [vmem:[#allocation2 + $0x1c] sm:$0xf]  ;;  %v2909_v36 = vsel %vm2877_vm8, %v2876_v54, %v2378_v30 }
 0x1b0   : > { %v2376_v0 = vpop.permute.xlu0 %2375  ;;  %v11522_v49 = vld [vmem:[#allocation2 + $0x10] sm:$0xf]  ;;  %v4642_v1 = vshrl.u32 %v11520_v9, 16  ;;  %v4645_v4 = vshll.u32 %v11520_v9, 16  ;;  %v11526_v50 = vld [vmem:[#allocation2 + $0x14] sm:$0x1] }
 0x1b1   : > { %v4060_v35 = vrot.slane %v4058_v32, 4  ;;  %v4063_v42 = vrot.slane %v4061_v58, 5  ;;  %v4067_v12 = vshll.u32 %v11522_v49, 16  ;;  %v4071_v18 = vshrl.u32 %v11522_v49, 16  ;;  %v11540_v8 = vld [vmem:[#allocation2 + $0x10] sm:$0xf] }
 0x1b2   : > { %v4077_v28 = vshll.u32 %v11526_v50, 16  ;;  %v11547_v61 = vrot.slane %v4642_v1, 4  ;;  %v11549_v47 = vrot.slane %v4645_v4, 5  ;;  %v2907_v41 = vsel %vm2877_vm8, %v2874_v45, %v2376_v0  ;;  %v11557_v52 = vld [vmem:[#allocation2 + $0x20] sm:$0x1] }
 0x1b3   : > { %v4064_v7 = vor.u32 %v4063_v42, %v4060_v35  ;;  %v4069_v34 = vrot.slane %v4067_v12, 5  ;;  %v4073_v29 = vrot.slane %v4071_v18, 4  ;;  %v4651_v27 = vshll.u32 %v11540_v8, 16 }
 0x1b4   : > { %v4091_v31 = vshll.u32 %v11543_v15, 16  ;;  %v4079_v38 = vrot.slane %v4077_v28, 5  ;;  %v4084_v33 = vrot.slane %v4082_v51, 4  ;;  %v4087_v56 = vrot.slane %v4085_v37, 5 }
 0x1b5   : > { %v2458_v13 = vpop.permute.xlu1 %2457  ;;  %v4065_v44 = vrot.slane %v4064_v7, 4  ;;  %v4074_v55 = vor.u32 %v4073_v29, %v4069_v34  ;;  %v4655_v2 = vshrl.u32 %v11540_v8, 16  ;;  %v8546_v23 = vcombine.low %v11520_v9, %v11540_v8 }
 0x1b6   : > { %v4093_v39 = vrot.slane %v4091_v31, 5  ;;  %v4095_v48 = vshrl.u32 %v11543_v15, 16  ;;  %v4648_v22 = vor.u32 %v11549_v47, %v11547_v61  ;;  %v4088_v3 = vor.u32 %v4087_v56, %v4084_v33  ;;  %v11645_v47 = vld [vmem:[#allocation2 + $0x18] sm:$0xf] }
 0x1b7   : > { %v2456_v20 = vpop.permute.xlu0 %2455  ;;  %v4075_v10 = vrot.slane %v4074_v55, 4  ;;  %v4070_v43 = vsel %vm9896_vm5, %v4065_v44, %v4069_v34  ;;  %v4101_v35 = vshll.u32 %v11557_v52, 16  ;;  %v2942_v42 = vsel %vm2910_vm9, %v2909_v36, %v2458_v13 }
 0x1b8   : > { %v4097_v58 = vrot.slane %v4095_v48, 4  ;;  %v2940_v1 = vsel %vm2910_vm9, %v2907_v41, %v2456_v20  ;;  %v8499_v18 = vcombine.low %v11516_v57, %v11522_v49  ;;  %v4089_v45 = vrot.slane %v4088_v3, 4 }
 0x1b9   : > { %v2538_v26 = vpop.permute.xlu1 %2537  ;;  %v4080_v16 = vsel %vm9896_vm5, %v4075_v10, %v4079_v38  ;;  %v4103_v37 = vrot.slane %v4101_v35, 5  ;;  %v8500_v41 = vcombine.low %v11530_v53, %v11543_v15  ;;  %v9619_v53 = vld [vmem:[%s13948_s3 + $0x140] sm:$0xff]   ;;  %v9623_v35 = vld [vmem:[%s13948_s3 + $0x148] sm:$0xff]   ;;  %vm14020_vm8 = vcmask 261120  }
 0x1ba   : > { %v8515_v32 = vcombine.low %v4070_v43, %v4080_v16  ;;  %v2975_v34 = vsel %vm2943_vm10, %v2942_v42, %v2538_v26  ;;  %v4098_v28 = vor.u32 %v4097_v58, %v4093_v39  ;;  %v4094_v3 = vsel %vm9896_vm5, %v4089_v45, %v4093_v39  ;;  %v9621_v58 = vld [vmem:[%s13948_s3 + $0x100] sm:$0xff]   ;;  %9151 = vmatprep.subr.bf16.mxu1 %v9619_v53  ;;  %vm14021_vm9 = vmmov %vm14020_vm8 }
 0x1bb   : > { %v2536_v5 = vpop.permute.xlu0 %2535  ;;  %9152 = vmatpush3.bf16.msra.mxu1 %v9621_v58  ;;  %v11632_v9 = vrot.slane %v4648_v22, 4  ;;  %v4657_v58 = vrot.slane %v4655_v2, 4  ;;  %v4418_v22 = vld [vmem:[#allocation2 + $0xc] sm:$0xe] }
 0x1bc   : > { %7057 = vmatprep.mubr.bf16.mxu1 %v8515_v32  ;;  %v2973_v54 = vsel %vm2943_vm10, %v2940_v1, %v2536_v5  ;;  %v4099_v51 = vrot.slane %v4098_v28, 4  ;;  %v3887_v1 = vld [vmem:[#allocation2 + $0x24] sm:$0xf]  ;;  %v3891_v28 = vld [vmem:[#allocation2 + $0x2c] sm:$0x1]  ;;  %9153 = vmatprep.subr.bf16.mxu1 %v9623_v35  ;;  %vm14022_vm10 = vcmask 293888  }
 0x1bd   : > { %v2634_v11 = vpop.permute.xlu1 %2633  ;;  %7058 = vmatmul.mubr.bf16.gmra.mrb[4].mxu1 %v8499_v18  ;;  %v11641_v35 = vld [vmem:[#allocation2 + $0x1c] sm:$0xf] }
 0x1be   : > { %v9411_v24 = vpop.f32.mrb[4].mxu0  ;;  %v3008_v57 = vsel %vm2976_vm11, %v2975_v34, %v2634_v11  ;;  %v4104_v33 = vsel %vm9896_vm5, %v4099_v51, %v4103_v37  ;;  %v3372_v51 = vld [vmem:[#allocation2 + $0x78] sm:$0x1]  ;;  %v3369_v37 = vld [vmem:[#allocation2 + $0x6c] sm:$0x1] }
 0x1bf   : > { %v3198_v30 = vadd.f32 %v9411_v24, %v11462_v63  ;;  %v3189_v0 = vpop.f32.mrb[5].mxu0  ;;  %v2632_v4 = vpop.permute.xlu0 %2631  ;;  %v3894_v24 = vld [vmem:[#allocation2 + $0x30] sm:$0xf] }
 0x1c0   : > { %v3190_v12 = vadd.f32 %v11462_v63, %v3189_v0  ;;  %v9412_v7 = vpop.f32.mrb[6].mxu0  ;;  %v3006_v31 = vsel %vm2976_vm11, %v2973_v54, %v2632_v4  ;;  %v3898_v4 = vld [vmem:[#allocation2 + $0x38] sm:$0x1]  ;;  %v9625_v54 = vld [vmem:[%s13948_s3 + $0x108] sm:$0xff]   ;;  %vm14023_vm11 = vmmov %vm14022_vm10 }
 0x1c1   : > { %v3306_v60 = vmax.f32 %v3198_v30, 0.0  ;;  %v3201_v46 = vadd.f32 %v9412_v7, %v11462_v63  ;;  %v3192_v29 = vpop.f32.mrb[7].mxu0  ;;  %v8516_v7 = vcombine.low %v4094_v3, %v4104_v33  ;;  %9154 = vmatpush3.bf16.msra.mxu1 %v9625_v54 }
 0x1c2   : > { %v3304_v13 = vmax.f32 %v3190_v12, 0.0  ;;  %v3193_v20 = vadd.f32 %v11462_v63, %v3192_v29 }
 0x1c3   : > { %v8755_v44 = vpack.c.bf16 %v3306_v60, %v3306_v60  ;;  %v3307_v55 = vmax.f32 %v3201_v46, 0.0  ;;  %7065 = vmatprep.mubr.bf16.mxu1 %v8516_v7  ;;  %v8451_v7 = vrot.slane %v4418_v22, 9 }
 0x1c4   : > { %v8753_v26 = vpack.c.bf16 %v3304_v13, %v3304_v13  ;;  %v3305_v36 = vmax.f32 %v3193_v20, 0.0  ;;  %v2714_v10 = vpop.permute.xlu1 %2713 }
 0x1c5   : > { %v3602_v5 = vshrl.u32 %v8755_v44, 16  ;;  %v8756_v38 = vpack.c.bf16 %v3307_v55, %v3307_v55  ;;  %v2712_v56 = vpop.permute.xlu0 %2711  ;;  %v3605_v48 = vshll.u32 %v8755_v44, 16  ;;  %v3041_v11 = vsel %vm14018_vm6, %v3008_v57, %v2714_v10  ;;  %7066 = vmatmul.mubr.bf16.gmra.mrb[8].mxu1 %v8500_v41  ;;  %v3428_v10 = vld [vmem:[#allocation2 + $0x80] sm:$0x1] }
 0x1c6   : > { %v3585_v43 = vshrl.u32 %v8753_v26, 16  ;;  %v8754_v16 = vpack.c.bf16 %v3305_v36, %v3305_v36  ;;  %v3588_v0 = vshll.u32 %v8753_v26, 16  ;;  %v3039_v42 = vsel %vm14019_vm7, %v3006_v31, %v2712_v56 }
 0x1c7   : > { %v3604_v30 = vrot.slane %v3602_v5, 7  ;;  %v3610_v32 = vshrl.u32 %v8756_v38, 16  ;;  %v3613_v46 = vshll.u32 %v8756_v38, 16  ;;  %v3425_v5 = vld [vmem:[#allocation2 + $0x74] sm:$0x1] }
 0x1c8   : > { %v3587_v39 = vrot.slane %v3585_v43, 7  ;;  %v3593_v12 = vshrl.u32 %v8754_v16, 16  ;;  %v2794_v18 = vpop.permute.xlu1 %2793  ;;  %v3596_v29 = vshll.u32 %v8754_v16, 16  ;;  %v3373_v43 = vsel %vm11361_vm4, 0, %v3372_v51 }
 0x1c9   : > { %v3607_v34 = vor.u32 %v3605_v48, %v3604_v30  ;;  %v3612_v60 = vrot.slane %v3610_v32, 7  ;;  %v3074_v13 = vsel %vm14020_vm8, %v3041_v11, %v2794_v18  ;;  %v2792_v20 = vpop.permute.xlu0 %2791  ;;  %v3608_v45 = vrot.slane %v3604_v30, 4  ;;  %3374 = vst [vmem:[#allocation2 + $0x78] sm:$0x1] %v3373_v43 }
 0x1ca   : > { %v3590_v44 = vor.u32 %v3588_v0, %v3587_v39  ;;  %v3595_v55 = vrot.slane %v3593_v12, 7  ;;  %v3072_v57 = vsel %vm14021_vm9, %v3039_v42, %v2792_v20  ;;  %v3591_v38 = vrot.slane %v3587_v39, 4  ;;  %v3378_v0 = vld [vmem:[#allocation2 + $0x90] sm:$0x1] }
 0x1cb   : > { %v3895_v26 = vsel %vm11494_vm14, %v3607_v34, %v3894_v24  ;;  %v3615_v36 = vor.u32 %v3613_v46, %v3612_v60  ;;  %v3617_v31 = vrot.slane %v3612_v60, 4  ;;  %9433 = vmatprep.mubr.msk.bf16.mxu0 %vm14022_vm10, %v3072_v57  ;;  %v3370_v16 = vsel %vm11361_vm4, 0, %v3369_v37 }
 0x1cc   : > { %3896 = vst [vmem:[#allocation2 + $0x30] sm:$0xf] %v3895_v26  ;;  %v3888_v33 = vsel %vm11494_vm14, %v3590_v44, %v3887_v1  ;;  %v3598_v56 = vor.u32 %v3596_v29, %v3595_v55  ;;  %v3600_v48 = vrot.slane %v3595_v55, 4  ;;  %9434 = vmatmul.mubr.msk.bf16.gmra.mrb[28].mxu0 %vm14023_vm11, %v3074_v13  ;;  %3371 = vst [vmem:[#allocation2 + $0x6c] sm:$0x1] %v3370_v16  ;;  %v3429_v11 = vsel %vm11369_vm13, 0, %v3428_v10 }
 0x1cd   : > { %3889 = vst [vmem:[#allocation2 + $0x24] sm:$0xf] %v3888_v33  ;;  %v3616_v24 = vsel %vm11500_vm15, %v3608_v45, %v3615_v36  ;;  %v3899_v41 = vsel %vm11361_vm4, %v3617_v31, %v3898_v4  ;;  %7210 = vmatprep.mubr.bf16.mxu0 %v8546_v23  ;;  %v3426_v30 = vsel %vm11369_vm13, 0, %v3425_v5  ;;  %v4490_v23 = vrot.slane %v11522_v49, 5  ;;  %3430 = vst [vmem:[#allocation2 + $0x80] sm:$0x1] %v3429_v11 }
 0x1ce   : > { %3897 = vst [vmem:[#allocation2 + $0x34] sm:$0xf] %v3616_v24  ;;  %3900 = vst [vmem:[#allocation2 + $0x38] sm:$0x1] %v3899_v41  ;;  %v3599_v3 = vsel %vm11500_vm15, %v3591_v38, %v3598_v56  ;;  %v3892_v53 = vsel %vm11361_vm4, %v3600_v48, %v3891_v28  ;;  %v11637_v32 = vrot.slane %v4651_v27, 5  ;;  %v3379_v61 = vsel %vm11361_vm4, 0, %v3378_v0 }
 0x1cf   : > { %3890 = vst [vmem:[#allocation2 + $0x28] sm:$0xf] %v3599_v3  ;;  %3893 = vst [vmem:[#allocation2 + $0x2c] sm:$0x1] %v3892_v53  ;;  %v4492_v49 = vrot.slane %v4490_v23, 4  ;;  %v8547_v27 = vcombine.low %v11645_v47, %v11641_v35  ;;  %v4493_v1 = vrot.slane %v11526_v50, 5 }
 0x1d0   : > { %3427 = vst [vmem:[#allocation2 + $0x74] sm:$0x1] %v3426_v30  ;;  %3380 = vst [vmem:[#allocation2 + $0x90] sm:$0x1] %v3379_v61  ;;  %v4654_v42 = vsel %vm9896_vm5, %v11632_v9, %v11637_v32  ;;  %v4658_v2 = vor.u32 %v4657_v58, %v11637_v32  ;;  %v4497_v34 = vrot.slane %v11543_v15, 5  ;;  %v4491_v15 = vsel %vm9852_vm2, %v8451_v7, %v4490_v23  ;;  %v9632_v9 = vld [vmem:[%s13948_s3 + $0x1c0] sm:$0xff]  }
 0x1d1   : > { %v4494_v60 = vsel %vm9852_vm2, %v4492_v49, %v4493_v1  ;;  %v11683_v45 = vld [vmem:[#allocation2 + $0x14] sm:$0x1]  ;;  %v4419_v36 = vld [vmem:[#allocation2 + $0x18] sm:$0xe]  ;;  %v4500_v41 = vrot.slane %v11557_v52, 5  ;;  %9263 = vmatprep.subr.bf16.mxu0 %v9632_v9 }
 0x1d2   : > { %v11677_v13 = vrot.slane %v4658_v2, 4  ;;  %v8531_v26 = vcombine.low %v4491_v15, %v4494_v60  ;;  %v4499_v31 = vrot.slane %v4497_v34, 4  ;;  %v4661_v24 = vshll.u32 %v11683_v45, 16  ;;  %v3375_v49 = vld [vmem:[#allocation2 + $0x84] sm:$0x1]  ;;  %v9629_v15 = vld [vmem:[%s13948_s3 + $0x110] sm:$0xff]  }
 0x1d3   : > { %v11671_v6 = vld [vmem:[#allocation2 + $0x30] sm:$0xf]  ;;  %v8452_v53 = vrot.slane %v4419_v36, 9 }
 0x1d4   : > { %v11653_v39 = vld [vmem:[#allocation2 + $0x24] sm:$0xf]  ;;  %7211 = vmatmul.mubr.bf16.vlgmr.msra.gmra.mrb[32].mxu0 %v8530_v62  ;;  %v4130_v10 = vshrl.u32 %v11671_v6, 16  ;;  %v4133_v5 = vshll.u32 %v11671_v6, 16  ;;  %v4501_v0 = vsel %vm9852_vm2, %v4499_v31, %v4500_v41  ;;  %v4663_v7 = vrot.slane %v4661_v24, 5 }
 0x1d5   : > { %v4106_v4 = vshrl.u32 %v11653_v39, 16  ;;  %v4109_v12 = vshll.u32 %v11653_v39, 16  ;;  %7218 = vmatprep.mubr.bf16.mxu0 %v8547_v27  ;;  %v11667_v46 = vld [vmem:[#allocation2 + $0x24] sm:$0xf]  ;;  %v11686_v57 = vld [vmem:[#allocation2 + $0x34] sm:$0xf]  ;;  %v4498_v60 = vsel %vm9852_vm2, %v8452_v53, %v4497_v34 }
 0x1d6   : > { %v11662_v18 = vld [vmem:[#allocation2 + $0x28] sm:$0xf]  ;;  %v11673_v25 = vld [vmem:[#allocation2 + $0x2c] sm:$0x1]  ;;  %v11690_v56 = vld [vmem:[#allocation2 + $0x38] sm:$0x1]  ;;  %v4664_v34 = vsel %vm9896_vm5, %v11677_v13, %v4663_v7 }
 0x1d7   : > { %v11669_v29 = vld [vmem:[#allocation2 + $0x28] sm:$0xf]  ;;  %v4108_v62 = vrot.slane %v4106_v4, 4  ;;  %v4111_v50 = vrot.slane %v4109_v12, 5  ;;  %v8548_v20 = vcombine.low %v11667_v46, %v11662_v18  ;;  %v4125_v37 = vshll.u32 %v11673_v25, 16  ;;  %v9627_v12 = vld [vmem:[%s13948_s3 + $0x150] sm:$0xff]  }
 0x1d8   : > { %v4115_v28 = vshll.u32 %v11669_v29, 16  ;;  %v4119_v54 = vshrl.u32 %v11669_v29, 16  ;;  %v4139_v48 = vshll.u32 %v11686_v57, 16  ;;  %v4132_v43 = vrot.slane %v4130_v10, 4  ;;  %v3434_v27 = vld [vmem:[#allocation2 + $0x98] sm:$0x1]  ;;  %9155 = vmatprep.subr.bf16.mxu1 %v9627_v12 }
 0x1d9   : > { %v4112_v44 = vor.u32 %v4111_v50, %v4108_v62  ;;  %v4135_v16 = vrot.slane %v4133_v5, 5  ;;  %v4143_v3 = vshrl.u32 %v11686_v57, 16  ;;  %v4127_v30 = vrot.slane %v4125_v37, 5  ;;  %v3431_v4 = vld [vmem:[#allocation2 + $0x8c] sm:$0x1]  ;;  %9156 = vmatpush3.bf16.msra.mxu1 %v9629_v15  ;;  %v9631_v53 = vld [vmem:[%s13948_s3 + $0x158] sm:$0xff]  }
 0x1da   : > { %v4117_v55 = vrot.slane %v4115_v28, 5  ;;  %v4121_v51 = vrot.slane %v4119_v54, 4  ;;  %v4141_v23 = vrot.slane %v4139_v48, 5  ;;  %v4149_v22 = vshll.u32 %v11690_v56, 16  ;;  %v11709_v62 = vld [vmem:[#allocation2 + $0x34] sm:$0xf]  ;;  %9157 = vmatprep.subr.bf16.mxu1 %v9631_v53 }
 0x1db   : > { %v4113_v38 = vrot.slane %v4112_v44, 4  ;;  %v4136_v58 = vor.u32 %v4135_v16, %v4132_v43  ;;  %v4145_v61 = vrot.slane %v4143_v3, 4  ;;  %v4504_v1 = vrot.slane %v11669_v29, 5  ;;  %v11723_v37 = vld [vmem:[#allocation2 + $0x30] sm:$0xf] }
 0x1dc   : > { %v4122_v33 = vor.u32 %v4121_v51, %v4117_v55  ;;  %7219 = vmatmul.mubr.bf16.gmra.mrb[36].mxu0 %v8531_v26  ;;  %v3376_v44 = vsel %vm11361_vm4, 0, %v3375_v49  ;;  %v8532_v51 = vcombine.low %v4498_v60, %v4501_v0  ;;  %v4151_v36 = vrot.slane %v4149_v22, 5  ;;  %v4420_v13 = vld [vmem:[#allocation2 + $0x24] sm:$0xe]  ;;  %v3908_v15 = vld [vmem:[#allocation2 + $0x48] sm:$0xf] }
 0x1dd   : > { %7226 = vmatprep.mubr.bf16.mxu0 %v8548_v20  ;;  %v4118_v52 = vsel %vm9896_vm5, %v4113_v38, %v4117_v55  ;;  %v4137_v28 = vrot.slane %v4136_v58, 4  ;;  %v4146_v54 = vor.u32 %v4145_v61, %v4141_v23  ;;  %v8501_v20 = vcombine.low %v11653_v39, %v11669_v29  ;;  %3377 = vst [vmem:[#allocation2 + $0x84] sm:$0x1] %v3376_v44  ;;  %v9635_v22 = vld [vmem:[%s13948_s3 + $0x180] sm:$0xff]  }
 0x1de   : > { %v4123_v11 = vrot.slane %v4122_v33, 4  ;;  %v3435_v55 = vsel %vm11369_vm13, 0, %v3434_v27  ;;  %v3432_v39 = vsel %vm11369_vm13, 0, %v3431_v4  ;;  %v8549_v29 = vcombine.low %v11723_v37, %v11709_v62  ;;  %9264 = vmatpush3.bf16.msra.mxu0 %v9635_v22 }
 0x1df   : > { %v4147_v26 = vrot.slane %v4146_v54, 4  ;;  %3436 = vst [vmem:[#allocation2 + $0x98] sm:$0x1] %v3435_v55  ;;  %v4506_v31 = vrot.slane %v4504_v1, 4  ;;  %3433 = vst [vmem:[#allocation2 + $0x8c] sm:$0x1] %v3432_v39  ;;  %v4142_v10 = vsel %vm9896_vm5, %v4137_v28, %v4141_v23  ;;  %v11738_v38 = vcombine.low %v4654_v42, %v4664_v34 }
 0x1e0   : > { %v4128_v2 = vsel %vm9896_vm5, %v4123_v11, %v4127_v30  ;;  %v4507_v33 = vrot.slane %v11673_v25, 5  ;;  %v8453_v41 = vrot.slane %v4420_v13, 9  ;;  %v8502_v11 = vcombine.low %v11671_v6, %v11686_v57  ;;  %v9634_v30 = vld [vmem:[%s13948_s3 + $0x118] sm:$0xff]   ;;  %v3912_v39 = vld [vmem:[#allocation2 + $0x50] sm:$0x1] }
 0x1e1   : > { %v8517_v50 = vcombine.low %v4118_v52, %v4128_v2  ;;  %v4152_v5 = vsel %vm9896_vm5, %v4147_v26, %v4151_v36  ;;  %14024 = vst [vmem:[#allocation5_spill] sm:$0xff] %v11738_v38  ;;  %9158 = vmatpush3.bf16.msra.mxu1 %v9634_v30  ;;  %v3901_v34 = vld [vmem:[#allocation2 + $0x3c] sm:$0xf]  ;;  %v4511_v13 = vrot.slane %v11686_v57, 5  ;;  %v4690_v30 = vshrl.u32 %v11667_v46, 16 }
 0x1e2   : > { %v8518_v48 = vcombine.low %v4142_v10, %v4152_v5  ;;  %v4508_v43 = vsel %vm9852_vm2, %v4506_v31, %v4507_v33  ;;  %v4505_v25 = vsel %vm9852_vm2, %v8453_v41, %v4504_v1 }
 0x1e3   : > { %7073 = vmatprep.mubr.bf16.mxu1 %v8517_v50  ;;  %v8533_v61 = vcombine.low %v4505_v25, %v4508_v43  ;;  %v4513_v25 = vrot.slane %v4511_v13, 4 }
 0x1e4   : > { %7074 = vmatmul.mubr.bf16.gmra.mrb[12].mxu1 %v8501_v20  ;;  %7227 = vmatmul.mubr.bf16.gmra.mrb[40].mxu0 %v8532_v51 }
 0x1e5   : > { %7234 = vmatprep.mubr.bf16.mxu0 %v8549_v29  ;;  %7081 = vmatprep.mubr.bf16.mxu1 %v8518_v48 }
 0x1e7   : > { %v9415_v24 = vpop.f32.mrb[8].mxu0 }
 0x1e8   : > { %v3214_v16 = vadd.f32 %v9415_v24, %v11462_v63  ;;  %v3205_v3 = vpop.f32.mrb[9].mxu0  ;;  %v3905_v24 = vld [vmem:[#allocation2 + $0x44] sm:$0x1] }
 0x1e9   : > { %v3206_v32 = vadd.f32 %v11462_v63, %v3205_v3  ;;  %v9416_v42 = vpop.f32.mrb[10].mxu0 }
 0x1ea   : > { %v3310_v23 = vmax.f32 %v3214_v16, 0.0  ;;  %v3217_v0 = vadd.f32 %v9416_v42, %v11462_v63  ;;  %v3208_v58 = vpop.f32.mrb[11].mxu0  ;;  %v3384_v42 = vld [vmem:[#allocation2 + $0xa8] sm:$0x1] }
 0x1eb   : > { %v3308_v49 = vmax.f32 %v3206_v32, 0.0  ;;  %v3209_v27 = vadd.f32 %v11462_v63, %v3208_v58 }
 0x1ec   : > { %7082 = vmatmul.mubr.bf16.gmra.mrb[16].mxu1 %v8502_v11  ;;  %v8759_v6 = vpack.c.bf16 %v3310_v23, %v3310_v23  ;;  %v3311_v52 = vmax.f32 %v3217_v0, 0.0  ;;  %7235 = vmatmul.mubr.bf16.gmra.mrb[44].mxu0 %v8533_v61  ;;  %v3385_v11 = vsel %vm11361_vm4, 0, %v3384_v42  ;;  %v4421_v23 = vld [vmem:[#allocation2 + $0x30] sm:$0xe]  ;;  %v4514_v0 = vrot.slane %v11690_v56, 5  ;;  %v9637_v42 = vld [vmem:[%s13948_s3 + $0x160] sm:$0xff]  }
 0x1ed   : > { %v8757_v2 = vpack.c.bf16 %v3308_v49, %v3308_v49  ;;  %v3309_v1 = vmax.f32 %v3209_v27, 0.0  ;;  %3386 = vst [vmem:[#allocation2 + $0xa8] sm:$0x1] %v3385_v11  ;;  %v8454_v58 = vrot.slane %v4421_v23, 9  ;;  %v11784_v49 = vrot.slane %v4690_v30, 4  ;;  %v9638_v23 = vld [vmem:[%s13948_s3 + $0x1c8] sm:$0xff]   ;;  %9159 = vmatprep.subr.bf16.mxu1 %v9637_v42 }
 0x1ee   : > { %v3636_v4 = vshrl.u32 %v8759_v6, 16  ;;  %v8760_v12 = vpack.c.bf16 %v3311_v52, %v3311_v52  ;;  %v3639_v28 = vshll.u32 %v8759_v6, 16  ;;  %v4515_v61 = vsel %vm9852_vm2, %v4513_v25, %v4514_v0  ;;  %v3381_v30 = vld [vmem:[#allocation2 + $0x9c] sm:$0x1]  ;;  %v9640_v0 = vld [vmem:[%s13948_s3 + $0x120] sm:$0xff]   ;;  %9265 = vmatprep.subr.bf16.mxu0 %v9638_v23 }
 0x1ef   : > { %v3619_v7 = vshrl.u32 %v8757_v2, 16  ;;  %v8758_v60 = vpack.c.bf16 %v3309_v1, %v3309_v1  ;;  %v3622_v44 = vshll.u32 %v8757_v2, 16  ;;  %v4693_v27 = vshll.u32 %v11667_v46, 16  ;;  %9160 = vmatpush3.bf16.msra.mxu1 %v9640_v0 }
 0x1f0   : > { %v3638_v50 = vrot.slane %v3636_v4, 7  ;;  %v3644_v54 = vshrl.u32 %v8760_v12, 16  ;;  %v3647_v26 = vshll.u32 %v8760_v12, 16  ;;  %v4512_v4 = vsel %vm9852_vm2, %v8454_v58, %v4511_v13 }
 0x1f1   : > { %v3621_v20 = vrot.slane %v3619_v7, 7  ;;  %v3627_v55 = vshrl.u32 %v8758_v60, 16  ;;  %v3630_v31 = vshll.u32 %v8758_v60, 16  ;;  %v8534_v7 = vcombine.low %v4512_v4, %v4515_v61 }
 0x1f2   : > { %v3641_v63 = vor.u32 %v3639_v28, %v3638_v50  ;;  %v3646_v51 = vrot.slane %v3644_v54, 7  ;;  %v3642_v10 = vrot.slane %v3638_v50, 4 }
 0x1f3   : > { %v3624_v36 = vor.u32 %v3622_v44, %v3621_v20  ;;  %v3629_v29 = vrot.slane %v3627_v55, 7  ;;  %v3625_v41 = vrot.slane %v3621_v20, 4  ;;  %v11797_v55 = vrot.slane %v4693_v27, 5 }
 0x1f4   : > { %v3909_v5 = vsel %vm11494_vm14, %v3641_v63, %v3908_v15  ;;  %v3649_v33 = vor.u32 %v3647_v26, %v3646_v51  ;;  %v3651_v48 = vrot.slane %v3646_v51, 4 }
 0x1f5   : > { %3910 = vst [vmem:[#allocation2 + $0x48] sm:$0xf] %v3909_v5  ;;  %v3902_v43 = vsel %vm11494_vm14, %v3624_v36, %v3901_v34  ;;  %v3632_v16 = vor.u32 %v3630_v31, %v3629_v29  ;;  %v3634_v3 = vrot.slane %v3629_v29, 4 }
 0x1f6   : > { %3903 = vst [vmem:[#allocation2 + $0x3c] sm:$0xf] %v3902_v43  ;;  %v3650_v53 = vsel %vm11500_vm15, %v3642_v10, %v3649_v33  ;;  %v3913_v57 = vsel %vm11361_vm4, %v3651_v48, %v3912_v39 }
 0x1f7   : > { %3911 = vst [vmem:[#allocation2 + $0x4c] sm:$0xf] %v3650_v53  ;;  %3914 = vst [vmem:[#allocation2 + $0x50] sm:$0x1] %v3913_v57  ;;  %v3633_v9 = vsel %vm11500_vm15, %v3625_v41, %v3632_v16  ;;  %v3906_v32 = vsel %vm11361_vm4, %v3634_v3, %v3905_v24 }
 0x1f8   : > { %3904 = vst [vmem:[#allocation2 + $0x40] sm:$0xf] %v3633_v9  ;;  %3907 = vst [vmem:[#allocation2 + $0x44] sm:$0x1] %v3906_v32 }
 0x1fc   : > { %v4603_v60 = vld [vmem:[#allocation2 + $0x48] sm:$0xf] }
 0x1fd   : > { %v11782_v22 = vld [vmem:[#allocation2 + $0x3c] sm:$0xf]  ;;  %v11793_v28 = vld [vmem:[#allocation2 + $0x48] sm:$0xf] }
 0x1fe   : > { %v4154_v6 = vshrl.u32 %v11782_v22, 16  ;;  %v4157_v52 = vshll.u32 %v11782_v22, 16  ;;  %v4601_v2 = vld [vmem:[#allocation2 + $0x3c] sm:$0xf]  ;;  %v4604_v56 = vld [vmem:[#allocation2 + $0x4c] sm:$0xf] }
 0x1ff   : > { %v4602_v1 = vld [vmem:[#allocation2 + $0x40] sm:$0xf]  ;;  %v4022_v54 = vld [vmem:[#allocation2 + $0x44] sm:$0x1]  ;;  %v8551_v63 = vcombine.low %v4603_v60, %v4604_v56  ;;  %v4422_v51 = vld [vmem:[#allocation2 + $0x3c] sm:$0xe] }
 0x200   : > { %v8550_v12 = vcombine.low %v4601_v2, %v4602_v1  ;;  %v11791_v50 = vld [vmem:[#allocation2 + $0x40] sm:$0xf]  ;;  %v4156_v15 = vrot.slane %v4154_v6, 4  ;;  %v4159_v46 = vrot.slane %v4157_v52, 5  ;;  %v4173_v34 = vshll.u32 %v4022_v54, 16  ;;  %v9641_v2 = vld [vmem:[%s13948_s3 + $0x188] sm:$0xff]  }
 0x201   : > { %v4163_v20 = vshll.u32 %v11791_v50, 16  ;;  %v4167_v44 = vshrl.u32 %v11791_v50, 16  ;;  %v4518_v26 = vrot.slane %v11791_v50, 5  ;;  %v4521_v31 = vrot.slane %v4022_v54, 5  ;;  %v11800_v13 = vld [vmem:[#allocation2 + $0x4c] sm:$0xf]  ;;  %9266 = vmatpush3.bf16.msra.mxu0 %v9641_v2 }
 0x202   : > { %7242 = vmatprep.mubr.bf16.mxu0 %v8550_v12  ;;  %v4160_v36 = vor.u32 %v4159_v46, %v4156_v15  ;;  %v8455_v10 = vrot.slane %v4422_v51, 9  ;;  %v4178_v33 = vshrl.u32 %v11793_v28, 16  ;;  %v4181_v48 = vshll.u32 %v11793_v28, 16  ;;  %v11804_v16 = vld [vmem:[#allocation2 + $0x50] sm:$0x1] }
 0x203   : > { %7243 = vmatmul.mubr.bf16.gmra.mrb[48].mxu0 %v8534_v7  ;;  %v4165_v39 = vrot.slane %v4163_v20, 5  ;;  %v4169_v29 = vrot.slane %v4167_v44, 4  ;;  %v4520_v5 = vrot.slane %v4518_v26, 4  ;;  %v4175_v43 = vrot.slane %v4173_v34, 5  ;;  %v3440_v52 = vld [vmem:[#allocation2 + $0xb0] sm:$0x1] }
 0x204   : > { %7250 = vmatprep.mubr.bf16.mxu0 %v8551_v63  ;;  %v4161_v24 = vrot.slane %v4160_v36, 4  ;;  %v4187_v3 = vshll.u32 %v11800_v13, 16  ;;  %v4180_v57 = vrot.slane %v4178_v33, 4  ;;  %v4183_v9 = vrot.slane %v4181_v48, 5  ;;  %v3437_v12 = vld [vmem:[#allocation2 + $0xa4] sm:$0x1] }
 0x205   : > { %v4170_v41 = vor.u32 %v4169_v29, %v4165_v39  ;;  %v4522_v53 = vsel %vm9852_vm2, %v4520_v5, %v4521_v31  ;;  %v4191_v32 = vshrl.u32 %v11800_v13, 16  ;;  %v4519_v58 = vsel %vm9852_vm2, %v8455_v10, %v4518_v26  ;;  %v9643_v33 = vld [vmem:[%s13948_s3 + $0x168] sm:$0xff]   ;;  %v9644_v48 = vld [vmem:[%s13948_s3 + $0x1d0] sm:$0xff]  }
 0x206   : > { %v4189_v11 = vrot.slane %v4187_v3, 5  ;;  %v4184_v61 = vor.u32 %v4183_v9, %v4180_v57  ;;  %v4197_v6 = vshll.u32 %v11804_v16, 16  ;;  %v4166_v1 = vsel %vm9896_vm5, %v4161_v24, %v4165_v39  ;;  %v4627_v39 = vld [vmem:[#allocation2 + $0x2c] sm:$0x1]  ;;  %v9647_v3 = vld [vmem:[%s13948_s3 + $0x190] sm:$0xff]   ;;  %9161 = vmatprep.subr.bf16.mxu1 %v9643_v33  ;;  %9267 = vmatprep.subr.bf16.mxu0 %v9644_v48 }
 0x207   : > { %v4171_v25 = vrot.slane %v4170_v41, 4  ;;  %v4193_v27 = vrot.slane %v4191_v32, 4  ;;  %v8535_v56 = vcombine.low %v4519_v58, %v4522_v53  ;;  %v8503_v15 = vcombine.low %v11782_v22, %v11791_v50  ;;  %9268 = vmatpush3.bf16.msra.mxu0 %v9647_v3  ;;  %v3919_v48 = vld [vmem:[#allocation2 + $0x5c] sm:$0x1]  ;;  %v9722_v38 = vld [vmem:[#allocation2 + $0x48] sm:$0xf] }
 0x208   : > { %v4185_v60 = vrot.slane %v4184_v61, 4  ;;  %v3382_v46 = vsel %vm11361_vm4, 0, %v3381_v30  ;;  %v3441_v20 = vsel %vm11369_vm13, 0, %v3440_v52  ;;  %v4199_v63 = vrot.slane %v4197_v6, 5 }
 0x209   : > { %v4176_v4 = vsel %vm9896_vm5, %v4171_v25, %v4175_v43  ;;  %v4194_v54 = vor.u32 %v4193_v27, %v4189_v11  ;;  %3383 = vst [vmem:[#allocation2 + $0x9c] sm:$0x1] %v3382_v46  ;;  %3442 = vst [vmem:[#allocation2 + $0xb0] sm:$0x1] %v3441_v20  ;;  %v3438_v34 = vsel %vm11369_vm13, 0, %v3437_v12  ;;  %v4696_v51 = vor.u32 %v11797_v55, %v11784_v49  ;;  %v9646_v43 = vld [vmem:[%s13948_s3 + $0x128] sm:$0xff]  }
 0x20a   : > { %v8519_v7 = vcombine.low %v4166_v1, %v4176_v4  ;;  %v4703_v26 = vshrl.u32 %v11662_v18, 16  ;;  %3439 = vst [vmem:[#allocation2 + $0xa4] sm:$0x1] %v3438_v34  ;;  %v4190_v22 = vsel %vm9896_vm5, %v4185_v60, %v4189_v11  ;;  %v4699_v10 = vshll.u32 %v11662_v18, 16  ;;  %v11848_v49 = vld [vmem:[%s13947_s2] ss:$0 sm:$0xff]  ;;  %9162 = vmatpush3.bf16.msra.mxu1 %v9646_v43 }
 0x20b   : > { %7251 = vmatmul.mubr.bf16.gmra.mrb[52].mxu0 %v8535_v56  ;;  %v4195_v44 = vrot.slane %v4194_v54, 4  ;;  %v4697_v31 = vrot.slane %v4696_v51, 4  ;;  %v4709_v57 = vshll.u32 %v4627_v39, 16  ;;  %v8504_v25 = vcombine.low %v11793_v28, %v11800_v13  ;;  %v3922_v46 = vld [vmem:[#allocation2 + $0x60] sm:$0xf] }
 0x20c   : > { %7089 = vmatprep.mubr.bf16.mxu1 %v8519_v7  ;;  %v4705_v24 = vrot.slane %v4703_v26, 4  ;;  %v4701_v53 = vrot.slane %v4699_v10, 5  ;;  %v3915_v51 = vld [vmem:[#allocation2 + $0x54] sm:$0xf] }
 0x20d   : > { %7090 = vmatmul.mubr.bf16.gmra.mrb[20].mxu1 %v8503_v15  ;;  %v4200_v50 = vsel %vm9896_vm5, %v4195_v44, %v4199_v63  ;;  %v4711_v2 = vrot.slane %v4709_v57, 5 }
 0x20e   : > { %v8520_v36 = vcombine.low %v4190_v22, %v4200_v50  ;;  %v4702_v23 = vsel %vm9896_vm5, %v4697_v31, %v4701_v53  ;;  %v4706_v0 = vor.u32 %v4705_v24, %v4701_v53  ;;  %v4525_v31 = vrot.slane %v11800_v13, 5  ;;  %v11877_v24 = vld [vmem:[#allocation2 + $0x18] sm:$0xf]  ;;  %v11881_v53 = vld [vmem:[#allocation2 + $0x1c] sm:$0xf] }
 0x20f   : > { %14026 = vst [vmem:[#allocation7_spill] sm:$0xff] %v11877_v24  ;;  %14027 = vst [vmem:[#allocation8_spill] sm:$0xff] %v11881_v53  ;;  %v4666_v13 = vshrl.u32 %v11645_v47, 16 }
 0x210   : > { %7097 = vmatprep.mubr.bf16.mxu1 %v8520_v36  ;;  %v4707_v52 = vrot.slane %v4706_v0, 4  ;;  %v3926_v36 = vld [vmem:[#allocation2 + $0x68] sm:$0x1]  ;;  %v5260_v0 = vshll.u32 %v11881_v53, 16 }
 0x211   : > { %v9419_v29 = vpop.f32.mrb[12].mxu0 }
 0x212   : > { %v3230_v55 = vadd.f32 %v11848_v49, %v9419_v29  ;;  %v3221_v5 = vpop.f32.mrb[13].mxu0  ;;  %v4712_v12 = vsel %vm9896_vm5, %v4707_v52, %v4711_v2  ;;  %v11897_v52 = vrot.slane %v4666_v13, 4  ;;  %v4423_v2 = vld [vmem:[#allocation2 + $0x48] sm:$0xe] }
 0x213   : > { %v3222_v18 = vadd.f32 %v11848_v49, %v3221_v5  ;;  %v9420_v41 = vpop.f32.mrb[14].mxu0  ;;  %v11872_v15 = vcombine.low %v4702_v23, %v4712_v12  ;;  %v4669_v23 = vshll.u32 %v11645_v47, 16  ;;  %v5091_v12 = vrot.slane %v11540_v8, 5  ;;  %v9661_v8 = vld [vmem:[%s13948_s3 + $0x1a8] sm:$0xff]  }
 0x214   : > { %v3314_v9 = vmax.f32 %v3230_v55, 0.0  ;;  %v3233_v32 = vadd.f32 %v11848_v49, %v9420_v41  ;;  %v3224_v42 = vpop.f32.mrb[15].mxu0 }
 0x215   : > { %v3312_v11 = vmax.f32 %v3222_v18, 0.0  ;;  %v3225_v30 = vadd.f32 %v11848_v49, %v3224_v42  ;;  %7098 = vmatmul.mubr.bf16.gmra.mrb[24].mxu1 %v8504_v25  ;;  %14025 = vst [vmem:[#allocation6_spill] sm:$0xff] %v11872_v15 }
 0x216   : > { %v8763_v58 = vpack.c.bf16 %v3314_v9, %v3314_v9  ;;  %v3315_v61 = vmax.f32 %v3233_v32, 0.0  ;;  %v5234_v32 = vld [vmem:[#allocation2 + $0x20] sm:$0x1] }
 0x217   : > { %v8761_v27 = vpack.c.bf16 %v3312_v11, %v3312_v11  ;;  %v3313_v6 = vmax.f32 %v3225_v30, 0.0  ;;  %v5251_v11 = vshrl.u32 %v11877_v24, 16  ;;  %v5254_v30 = vshll.u32 %v11877_v24, 16 }
 0x218   : > { %v3670_v1 = vshrl.u32 %v8763_v58, 16  ;;  %v8764_v28 = vpack.c.bf16 %v3315_v61, %v3315_v61  ;;  %v3673_v60 = vshll.u32 %v8763_v58, 16  ;;  %v5264_v58 = vshrl.u32 %v11881_v53, 16  ;;  %v5028_v53 = vld [vmem:[#allocation2 + $0x30] sm:$0xe] }
 0x219   : > { %v3653_v4 = vshrl.u32 %v8761_v27, 16  ;;  %v8762_v56 = vpack.c.bf16 %v3313_v6, %v3313_v6  ;;  %v3656_v44 = vshll.u32 %v8761_v27, 16  ;;  %v4527_v61 = vrot.slane %v4525_v31, 4  ;;  %v3390_v27 = vld [vmem:[#allocation2 + $0xc0] sm:$0x1] }
 0x21a   : > { %v3672_v7 = vrot.slane %v3670_v1, 7  ;;  %v3678_v54 = vshrl.u32 %v8764_v28, 16  ;;  %v3681_v22 = vshll.u32 %v8764_v28, 16  ;;  %v5270_v6 = vshll.u32 %v5234_v32, 16  ;;  %v5025_v28 = vld [vmem:[#allocation2 + $0xc] sm:$0xe] }
 0x21b   : > { %v3655_v20 = vrot.slane %v3653_v4, 7  ;;  %v3661_v63 = vshrl.u32 %v8762_v56, 16  ;;  %v3664_v29 = vshll.u32 %v8762_v56, 16  ;;  %v3391_v1 = vsel %vm11361_vm4, 0, %v3390_v27 }
 0x21c   : > { %v3675_v34 = vor.u32 %v3673_v60, %v3672_v7  ;;  %v3680_v26 = vrot.slane %v3678_v54, 7  ;;  %v3676_v10 = vrot.slane %v3672_v7, 4  ;;  %v4528_v4 = vrot.slane %v11804_v16, 5  ;;  %3392 = vst [vmem:[#allocation2 + $0xc0] sm:$0x1] %v3391_v1 }
 0x21d   : > { %v3658_v50 = vor.u32 %v3656_v44, %v3655_v20  ;;  %v3663_v39 = vrot.slane %v3661_v63, 7  ;;  %v3659_v18 = vrot.slane %v3655_v20, 4  ;;  %v11902_v47 = vrot.slane %v5251_v11, 4 }
 0x21e   : > { %v3923_v55 = vsel %vm11494_vm14, %v3675_v34, %v3922_v46  ;;  %v3683_v5 = vor.u32 %v3681_v22, %v3680_v26  ;;  %v3685_v33 = vrot.slane %v3680_v26, 4  ;;  %v11904_v56 = vrot.slane %v5254_v30, 5 }
 0x21f   : > { %3924 = vst [vmem:[#allocation2 + $0x60] sm:$0xf] %v3923_v55  ;;  %v3916_v41 = vsel %vm11494_vm14, %v3658_v50, %v3915_v51  ;;  %v3666_v43 = vor.u32 %v3664_v29, %v3663_v39  ;;  %v3668_v3 = vrot.slane %v3663_v39, 4  ;;  %v11907_v7 = vrot.slane %v4669_v23, 5 }
 0x220   : > { %3917 = vst [vmem:[#allocation2 + $0x54] sm:$0xf] %v3916_v41  ;;  %v3684_v57 = vsel %vm11500_vm15, %v3676_v10, %v3683_v5  ;;  %v3927_v9 = vsel %vm11361_vm4, %v3685_v33, %v3926_v36  ;;  %v11910_v54 = vrot.slane %v5260_v0, 5  ;;  %v11912_v46 = vrot.slane %v5264_v58, 4 }
 0x221   : > { %3925 = vst [vmem:[#allocation2 + $0x64] sm:$0xf] %v3684_v57  ;;  %3928 = vst [vmem:[#allocation2 + $0x68] sm:$0x1] %v3927_v9  ;;  %v3667_v42 = vsel %vm11500_vm15, %v3659_v18, %v3666_v43  ;;  %v3920_v25 = vsel %vm11361_vm4, %v3668_v3, %v3919_v48  ;;  %v8456_v20 = vrot.slane %v4423_v2, 9  ;;  %v4529_v44 = vsel %vm9852_vm2, %v4527_v61, %v4528_v4 }
 0x222   : > { %3918 = vst [vmem:[#allocation2 + $0x58] sm:$0xf] %v3667_v42  ;;  %3921 = vst [vmem:[#allocation2 + $0x5c] sm:$0x1] %v3920_v25  ;;  %v11918_v63 = vrot.slane %v5270_v6, 5  ;;  %v8466_v34 = vrot.slane %v5025_v28, 9  ;;  %v5257_v5 = vor.u32 %v11904_v56, %v11902_v47  ;;  %v5267_v13 = vor.u32 %v11912_v46, %v11910_v54 }
 0x223   : > { %v4714_v51 = vshrl.u32 %v11723_v37, 16  ;;  %v4717_v26 = vshll.u32 %v11723_v37, 16  ;;  %v4526_v10 = vsel %vm9852_vm2, %v8456_v20, %v4525_v31  ;;  %v9658_v56 = vld [vmem:[%s13948_s3 + $0x138] sm:$0xff]   ;;  %v5094_v37 = vrot.slane %v11683_v45, 5 }
 0x224   : > { %v11932_v33 = vsel %vm9852_vm2, %v8466_v34, %v5091_v12  ;;  %v8536_v18 = vcombine.low %v4526_v10, %v4529_v44 }
 0x225   : > { %v12020_v46 = vrot.slane %v4717_v26, 5  ;;  %v12033_v26 = vld [vmem:[#allocation2 + $0x24] sm:$0xf] }
 0x226   : > { %v4607_v55 = vld [vmem:[#allocation2 + $0x60] sm:$0xf]  ;;  %14028 = vst [vmem:[#allocation9_spill] sm:$0xff] %v12033_v26 }
 0x227   : > { %v11916_v16 = vld [vmem:[#allocation2 + $0x54] sm:$0xf] }
 0x228   : > { %v4608_v22 = vld [vmem:[#allocation2 + $0x64] sm:$0xf]  ;;  %v4202_v50 = vshrl.u32 %v11916_v16, 16  ;;  %v4205_v36 = vshll.u32 %v11916_v16, 16  ;;  %v4605_v39 = vld [vmem:[#allocation2 + $0x54] sm:$0xf] }
 0x229   : > { %v4606_v29 = vld [vmem:[#allocation2 + $0x58] sm:$0xf]  ;;  %v8553_v41 = vcombine.low %v4607_v55, %v4608_v22  ;;  %v9423_v43 = vpop.f32.mrb[16].mxu0  ;;  %v11939_v9 = vld [vmem:[#allocation2 + $0x5c] sm:$0x1] }
 0x22a   : > { %v8552_v48 = vcombine.low %v4605_v39, %v4606_v29  ;;  %v11934_v3 = vld [vmem:[#allocation2 + $0x58] sm:$0xf]  ;;  %v3246_v31 = vadd.f32 %v11848_v49, %v9423_v43  ;;  %v3237_v57 = vpop.f32.mrb[17].mxu0  ;;  %v4204_v32 = vrot.slane %v4202_v50, 4  ;;  %v4207_v42 = vrot.slane %v4205_v36, 5 }
 0x22b   : > { %v4211_v25 = vshll.u32 %v11934_v3, 16  ;;  %v3238_v11 = vadd.f32 %v11848_v49, %v3237_v57  ;;  %v9424_v30 = vpop.f32.mrb[18].mxu0  ;;  %v4215_v23 = vshrl.u32 %v11934_v3, 16  ;;  %v4221_v0 = vshll.u32 %v11939_v9, 16  ;;  %v4424_v58 = vld [vmem:[#allocation2 + $0x54] sm:$0xe] }
 0x22c   : > { %7258 = vmatprep.mubr.bf16.mxu0 %v8552_v48  ;;  %v4532_v61 = vrot.slane %v11934_v3, 5  ;;  %v3318_v27 = vmax.f32 %v3246_v31, 0.0  ;;  %v3249_v6 = vadd.f32 %v11848_v49, %v9424_v30  ;;  %v3240_v2 = vpop.f32.mrb[19].mxu0  ;;  %v4208_v1 = vor.u32 %v4207_v42, %v4204_v32  ;;  %v9650_v32 = vld [vmem:[%s13948_s3 + $0x1d8] sm:$0xff]  }
 0x22d   : > { %7259 = vmatmul.mubr.bf16.gmra.mrb[56].mxu0 %v8536_v18  ;;  %v4213_v28 = vrot.slane %v4211_v25, 5  ;;  %v3316_v4 = vmax.f32 %v3238_v11, 0.0  ;;  %v3241_v20 = vadd.f32 %v11848_v49, %v3240_v2  ;;  %v4217_v44 = vrot.slane %v4215_v23, 4  ;;  %v9652_v23 = vld [vmem:[%s13948_s3 + $0x130] sm:$0xff]   ;;  %9269 = vmatprep.subr.bf16.mxu0 %v9650_v32 }
 0x22e   : > { %7266 = vmatprep.mubr.bf16.mxu0 %v8553_v41  ;;  %v4223_v34 = vrot.slane %v4221_v0, 5  ;;  %v8767_v22 = vpack.c.bf16 %v3318_v27, %v3318_v27  ;;  %v3319_v50 = vmax.f32 %v3249_v6, 0.0  ;;  %v4209_v36 = vrot.slane %v4208_v1, 4  ;;  %v9649_v41 = vld [vmem:[%s13948_s3 + $0x170] sm:$0xff]   ;;  %v9653_v0 = vld [vmem:[%s13948_s3 + $0x198] sm:$0xff]  }
 0x22f   : > { %v8457_v39 = vrot.slane %v4424_v58, 9  ;;  %v8765_v29 = vpack.c.bf16 %v3316_v4, %v3316_v4  ;;  %v3317_v10 = vmax.f32 %v3241_v20, 0.0  ;;  %v4218_v55 = vor.u32 %v4217_v44, %v4213_v28  ;;  %9163 = vmatprep.subr.bf16.mxu1 %v9649_v41  ;;  %v3936_v1 = vld [vmem:[#allocation2 + $0x78] sm:$0xf]  ;;  %9270 = vmatpush3.bf16.msra.mxu0 %v9653_v0  ;;  %v11967_v41 = vld [vmem:[#allocation2 + $0x60] sm:$0xf] }
 0x230   : > { %v4534_v48 = vrot.slane %v4532_v61, 4  ;;  %v3704_v18 = vshrl.u32 %v8767_v22, 16  ;;  %v3707_v43 = vshll.u32 %v8767_v22, 16  ;;  %v8768_v31 = vpack.c.bf16 %v3319_v50, %v3319_v50  ;;  %9164 = vmatpush3.bf16.msra.mxu1 %v9652_v23 }
 0x231   : > { %v4214_v57 = vsel %vm9896_vm5, %v4209_v36, %v4213_v28  ;;  %v3687_v42 = vshrl.u32 %v8765_v29, 16  ;;  %v3690_v25 = vshll.u32 %v8765_v29, 16  ;;  %v8766_v11 = vpack.c.bf16 %v3317_v10, %v3317_v10  ;;  %v3929_v36 = vld [vmem:[#allocation2 + $0x6c] sm:$0xf]  ;;  %v3940_v10 = vld [vmem:[#allocation2 + $0x80] sm:$0x1] }
 0x232   : > { %v4219_v30 = vrot.slane %v4218_v55, 4  ;;  %v3706_v58 = vrot.slane %v3704_v18, 7  ;;  %v3712_v27 = vshrl.u32 %v8768_v31, 16  ;;  %v3715_v6 = vshll.u32 %v8768_v31, 16 }
 0x233   : > { %v4533_v2 = vsel %vm9852_vm2, %v8457_v39, %v4532_v61  ;;  %v3689_v28 = vrot.slane %v3687_v42, 7  ;;  %v3695_v4 = vshrl.u32 %v8766_v11, 16  ;;  %v3698_v20 = vshll.u32 %v8766_v11, 16  ;;  %v3933_v11 = vld [vmem:[#allocation2 + $0x74] sm:$0x1] }
 0x234   : > { %v4224_v44 = vsel %vm9896_vm5, %v4219_v30, %v4223_v34  ;;  %v3709_v22 = vor.u32 %v3707_v43, %v3706_v58  ;;  %v3710_v50 = vrot.slane %v3706_v58, 4  ;;  %v3714_v29 = vrot.slane %v3712_v27, 7  ;;  %v11973_v30 = vld [vmem:[#allocation2 + $0x64] sm:$0xf] }
 0x235   : > { %v8521_v55 = vcombine.low %v4214_v57, %v4224_v44  ;;  %v3692_v18 = vor.u32 %v3690_v25, %v3689_v28  ;;  %v3693_v31 = vrot.slane %v3689_v28, 4  ;;  %v3697_v61 = vrot.slane %v3695_v4, 7  ;;  %v3387_v4 = vld [vmem:[#allocation2 + $0xb4] sm:$0x1] }
 0x236   : > { %v4535_v39 = vrot.slane %v11939_v9, 5  ;;  %v3937_v32 = vsel %vm11494_vm14, %v3709_v22, %v3936_v1  ;;  %v3717_v42 = vor.u32 %v3715_v6, %v3714_v29  ;;  %v3719_v34 = vrot.slane %v3714_v29, 4  ;;  %v3446_v22 = vld [vmem:[#allocation2 + $0xc8] sm:$0x1] }
 0x237   : > { %7105 = vmatprep.mubr.bf16.mxu1 %v8521_v55  ;;  %v8505_v43 = vcombine.low %v11916_v16, %v11934_v3  ;;  %3938 = vst [vmem:[#allocation2 + $0x78] sm:$0xf] %v3937_v32  ;;  %v3930_v57 = vsel %vm11494_vm14, %v3692_v18, %v3929_v36  ;;  %v3700_v25 = vor.u32 %v3698_v20, %v3697_v61  ;;  %v3702_v9 = vrot.slane %v3697_v61, 4  ;;  %v9656_v55 = vld [vmem:[%s13948_s3 + $0x1e0] sm:$0xff]  }
 0x238   : > { %v4536_v23 = vsel %vm9852_vm2, %v4534_v48, %v4535_v39  ;;  %3931 = vst [vmem:[#allocation2 + $0x6c] sm:$0xf] %v3930_v57  ;;  %v3718_v0 = vsel %vm11500_vm15, %v3710_v50, %v3717_v42  ;;  %v3941_v58 = vsel %vm11361_vm4, %v3719_v34, %v3940_v10  ;;  %v4226_v16 = vshrl.u32 %v11967_v41, 16  ;;  %v4025_v48 = vld [vmem:[#allocation2 + $0x68] sm:$0x1]  ;;  %9271 = vmatprep.subr.bf16.mxu0 %v9656_v55 }
 0x239   : > { %v8537_v27 = vcombine.low %v4533_v2, %v4536_v23  ;;  %7106 = vmatmul.mubr.bf16.gmra.mrb[28].mxu1 %v8505_v43  ;;  %3939 = vst [vmem:[#allocation2 + $0x7c] sm:$0xf] %v3718_v0  ;;  %3942 = vst [vmem:[#allocation2 + $0x80] sm:$0x1] %v3941_v58  ;;  %v3701_v3 = vsel %vm11500_vm15, %v3693_v31, %v3700_v25  ;;  %v3934_v6 = vsel %vm11361_vm4, %v3702_v9, %v3933_v11  ;;  %v9660_v34 = vld [vmem:[%s13948_s3 + $0x1e8] sm:$0xff]  }
 0x23a   : > { %v4229_v1 = vshll.u32 %v11967_v41, 16  ;;  %v4235_v28 = vshll.u32 %v11973_v30, 16  ;;  %v11992_v2 = vrot.slane %v4714_v51, 4  ;;  %3932 = vst [vmem:[#allocation2 + $0x70] sm:$0xf] %v3701_v3  ;;  %v4228_v20 = vrot.slane %v4226_v16, 4 }
 0x23b   : > { %3935 = vst [vmem:[#allocation2 + $0x74] sm:$0x1] %v3934_v6  ;;  %7267 = vmatmul.mubr.bf16.gmra.mrb[60].mxu0 %v8537_v27  ;;  %v4239_v44 = vshrl.u32 %v11973_v30, 16  ;;  %v5258_v50 = vrot.slane %v5257_v5, 4  ;;  %v4539_v10 = vrot.slane %v11973_v30, 5  ;;  %v9655_v51 = vld [vmem:[%s13948_s3 + $0x178] sm:$0xff]  }
 0x23c   : > { %v4231_v36 = vrot.slane %v4229_v1, 5  ;;  %v4237_v29 = vrot.slane %v4235_v28, 5  ;;  %v5268_v18 = vrot.slane %v5267_v13, 4  ;;  %v4245_v61 = vshll.u32 %v4025_v48, 16  ;;  %v9659_v5 = vld [vmem:[%s13948_s3 + $0x1a0] sm:$0xff]   ;;  %9165 = vmatprep.subr.bf16.mxu1 %v9655_v51 }
 0x23d   : > { %v4241_v31 = vrot.slane %v4239_v44, 4  ;;  %v3388_v47 = vsel %vm11361_vm4, 0, %v3387_v4  ;;  %v5093_v39 = vrot.slane %v5091_v12, 4  ;;  %v4541_v32 = vrot.slane %v4539_v10, 4  ;;  %v4425_v43 = vld [vmem:[#allocation2 + $0x60] sm:$0xe]  ;;  %9166 = vmatpush3.bf16.msra.mxu1 %v9658_v56  ;;  %9272 = vmatpush3.bf16.msra.mxu0 %v9659_v5 }
 0x23e   : > { %v4232_v13 = vor.u32 %v4231_v36, %v4228_v20  ;;  %3389 = vst [vmem:[#allocation2 + $0xb4] sm:$0x1] %v3388_v47  ;;  %v3447_v42 = vsel %vm11369_vm13, 0, %v3446_v22  ;;  %v4542_v23 = vrot.slane %v4025_v48, 5  ;;  %9273 = vmatprep.subr.bf16.mxu0 %v9660_v34  ;;  %v5273_v0 = vsel %vm9896_vm5, %v5268_v18, %v11918_v63  ;;  %v12048_v3 = vld [vmem:[#allocation2 + $0x28] sm:$0xf] }
 0x23f   : > { %v4242_v11 = vor.u32 %v4241_v31, %v4237_v29  ;;  %3448 = vst [vmem:[#allocation2 + $0xc8] sm:$0x1] %v3447_v42  ;;  %v4247_v27 = vrot.slane %v4245_v61, 5  ;;  %v5263_v45 = vsel %vm9896_vm5, %v5258_v50, %v11910_v54  ;;  %v12046_v16 = vsel %vm9852_vm2, %v5093_v39, %v5094_v37  ;;  %14030 = vst [vmem:[#allocation11_spill] sm:$0xff] %v12048_v3  ;;  %v12062_v44 = vld [vmem:[#allocation2 + $0x6c] sm:$0xf] }
 0x240   : > { %v4233_v9 = vrot.slane %v4232_v13, 4  ;;  %14029 = vst [vmem:[#allocation10_spill] sm:$0xff] %v12046_v16  ;;  %v8458_v48 = vrot.slane %v4425_v43, 9  ;;  %v4543_v1 = vsel %vm9852_vm2, %v4541_v32, %v4542_v23  ;;  %v5275_v63 = vshrl.u32 %v12033_v26, 16  ;;  %v12064_v22 = vld [vmem:[#allocation2 + $0x78] sm:$0xf] }
 0x241   : > { %v4243_v58 = vrot.slane %v4242_v11, 4  ;;  %v12050_v6 = vld [vmem:[#allocation2 + $0x70] sm:$0xf]  ;;  %v5278_v28 = vshll.u32 %v12033_v26, 16  ;;  %v8506_v20 = vcombine.low %v11967_v41, %v11973_v30  ;;  %v12066_v50 = vld [vmem:[#allocation2 + $0x7c] sm:$0xf]  ;;  %9274 = vmatpush3.bf16.msra.mxu0 %v9661_v8  ;;  %v12070_v51 = vcombine.low %v5263_v45, %v5273_v0 }
 0x242   : > { %14031 = vst [vmem:[#allocation12_spill] sm:$0xff] %v12050_v6  ;;  %v4238_v4 = vsel %vm9896_vm5, %v4233_v9, %v4237_v29  ;;  %14032 = vst [vmem:[#allocation13_spill] sm:$0xff] %v12066_v50  ;;  %v12068_v36 = vld [vmem:[#allocation2 + $0x6c] sm:$0xf]  ;;  %v8554_v29 = vcombine.low %v12062_v44, %v12050_v6  ;;  %v4540_v18 = vsel %vm9852_vm2, %v8458_v48, %v4539_v10  ;;  %v12076_v31 = vld [vmem:[#allocation2 + $0x70] sm:$0xf] }
 0x243   : > { %v4248_v54 = vsel %vm9896_vm5, %v4243_v58, %v4247_v27  ;;  %v4026_v41 = vld [vmem:[#allocation2 + $0x74] sm:$0x1]  ;;  %v4250_v30 = vshrl.u32 %v12068_v36, 16  ;;  %v8538_v61 = vcombine.low %v4540_v18, %v4543_v1  ;;  %v4253_v47 = vshll.u32 %v12068_v36, 16  ;;  %v12082_v39 = vld [vmem:[#allocation2 + $0x78] sm:$0xf] }
 0x244   : > { %v8522_v55 = vcombine.low %v4238_v4, %v4248_v54  ;;  %v4259_v56 = vshll.u32 %v12076_v31, 16  ;;  %v4263_v5 = vshrl.u32 %v12076_v31, 16  ;;  %7274 = vmatprep.mubr.bf16.mxu0 %v8554_v29  ;;  %v8555_v13 = vcombine.low %v12064_v22, %v12066_v50  ;;  %v12087_v42 = vld [vmem:[#allocation2 + $0x7c] sm:$0xf]  ;;  %v4426_v9 = vld [vmem:[#allocation2 + $0x6c] sm:$0xe] }
 0x245   : > { %v4252_v10 = vrot.slane %v4250_v30, 4  ;;  %v4546_v32 = vrot.slane %v12076_v31, 5  ;;  %7275 = vmatmul.mubr.bf16.gmra.mrb[64].mxu0 %v8538_v61  ;;  %v4255_v11 = vrot.slane %v4253_v47, 5  ;;  %v4269_v37 = vshll.u32 %v4026_v41, 16  ;;  %v12090_v58 = vld [vmem:[#allocation2 + $0x80] sm:$0x1] }
 0x246   : > { %7113 = vmatprep.mubr.bf16.mxu1 %v8522_v55  ;;  %v4261_v43 = vrot.slane %v4259_v56, 5  ;;  %v4265_v8 = vrot.slane %v4263_v5, 4  ;;  %7282 = vmatprep.mubr.bf16.mxu0 %v8555_v13  ;;  %v4549_v0 = vrot.slane %v4026_v41, 5  ;;  %v4274_v27 = vshrl.u32 %v12082_v39, 16  ;;  %v9662_v55 = vld [vmem:[%s13948_s3 + $0x1f0] sm:$0xff]  }
 0x247   : > { %7114 = vmatmul.mubr.bf16.gmra.mrb[32].mxu1 %v8506_v20  ;;  %v4548_v23 = vrot.slane %v4546_v32, 4  ;;  %v12093_v45 = vrot.slane %v5275_v63, 4  ;;  %v4256_v48 = vor.u32 %v4255_v11, %v4252_v10  ;;  %v4277_v4 = vshll.u32 %v12082_v39, 16  ;;  %v8943_v20 = vpop.f32.mrb[0].mxu1  ;;  %v9664_v29 = vld [vmem:[%s13948_s3 + $0x1b0] sm:$0xff]   ;;  %v9665_v63 = vld [vmem:[%s13948_s3 + $0x1f8] sm:$0xff]   ;;  %9275 = vmatprep.subr.bf16.mxu0 %v9662_v55 }
 0x248   : > { %v4266_v1 = vor.u32 %v4265_v8, %v4261_v43  ;;  %v4283_v54 = vshll.u32 %v12087_v42, 16  ;;  %v8459_v18 = vrot.slane %v4426_v9, 9  ;;  %v4276_v30 = vrot.slane %v4274_v27, 4  ;;  %v3443_v47 = vld [vmem:[#allocation2 + $0xbc] sm:$0x1]  ;;  %v8944_v56 = vpop.f32.mrb[1].mxu1  ;;  %9276 = vmatpush3.bf16.msra.mxu0 %v9664_v29 }
 0x249   : > { %v4550_v41 = vsel %vm9852_vm2, %v4548_v23, %v4549_v0  ;;  %v4287_v61 = vshrl.u32 %v12087_v42, 16  ;;  %v4257_v5 = vrot.slane %v4256_v48, 4  ;;  %v4271_v10 = vrot.slane %v4269_v37, 5  ;;  %v12109_v8 = vpop.f32.mrb[2].mxu1  ;;  %v9666_v0 = vld [vmem:[%s13948_s3 + $0x1b8] sm:$0xff]   ;;  %v9668_v37 = vld [vmem:[%s13948_s3 + $0x200] sm:$0xff]   ;;  %9277 = vmatprep.subr.bf16.mxu0 %v9665_v63 }
 0x24a   : > { %v4267_v13 = vrot.slane %v4266_v1, 4  ;;  %v4279_v11 = vrot.slane %v4277_v4, 5  ;;  %v4547_v12 = vsel %vm9852_vm2, %v8459_v18, %v4546_v32  ;;  %v4285_v25 = vrot.slane %v4283_v54, 5  ;;  %v8947_v23 = vpop.f32.mrb[3].mxu1  ;;  %9485 = vmatprep.subr.bf16.mxu1 %v9668_v37  ;;  %v9721_v26 = vld [vmem:[#allocation2 + $0x28] sm:$0xf] }
 0x24b   : > { %v4289_v9 = vrot.slane %v4287_v61, 4  ;;  %v4293_v60 = vshll.u32 %v12090_v58, 16  ;;  %v4262_v48 = vsel %vm9896_vm5, %v4257_v5, %v4261_v43  ;;  %v8539_v1 = vcombine.low %v4547_v12, %v4550_v41 }
 0x24c   : > { %v9427_v27 = vpop.f32.mrb[20].mxu0  ;;  %v4272_v32 = vsel %vm9896_vm5, %v4267_v13, %v4271_v10  ;;  %v4280_v4 = vor.u32 %v4279_v11, %v4276_v30  ;;  %v5288_v61 = vshrl.u32 %v12048_v3, 16  ;;  %v8507_v43 = vcombine.low %v12068_v36, %v12076_v31  ;;  %9278 = vmatpush3.bf16.msra.mxu0 %v9666_v0  ;;  %v12132_v11 = vld [vmem:[#allocation2 + $0x2c] sm:$0x1] }
 0x24d   : > { %v3262_v54 = vadd.f32 %v11848_v49, %v9427_v27  ;;  %v3253_v55 = vpop.f32.mrb[21].mxu0  ;;  %v8523_v29 = vcombine.low %v4262_v48, %v4272_v32  ;;  %v4290_v18 = vor.u32 %v4289_v9, %v4285_v25  ;;  %7283 = vmatmul.mubr.bf16.gmra.mrb[68].mxu0 %v8539_v1  ;;  %v3444_v12 = vsel %vm11369_vm13, 0, %v3443_v47  ;;  %9437 = vmatprep.subr.bf16.mxu0 %v9668_v37 }
 0x24e   : > { %v3254_v57 = vadd.f32 %v11848_v49, %v3253_v55  ;;  %v9428_v34 = vpop.f32.mrb[22].mxu0  ;;  %v4281_v5 = vrot.slane %v4280_v4, 4  ;;  %v4295_v10 = vrot.slane %v4293_v60, 5  ;;  %3445 = vst [vmem:[#allocation2 + $0xbc] sm:$0x1] %v3444_v12  ;;  %v5280_v31 = vrot.slane %v5278_v28, 5 }
 0x24f   : > { %v3322_v63 = vmax.f32 %v3262_v54, 0.0  ;;  %v3265_v41 = vadd.f32 %v11848_v49, %v9428_v34  ;;  %v3256_v30 = vpop.f32.mrb[23].mxu0  ;;  %7121 = vmatprep.mubr.bf16.mxu1 %v8523_v29  ;;  %v4291_v13 = vrot.slane %v4290_v18, 4  ;;  %v12141_v48 = vadd.f32 %v8944_v56, %v8943_v20  ;;  %v12149_v18 = vld [vmem:[#allocation2 + $0x1c] sm:$0xf] }
 0x250   : > { %v3320_v9 = vmax.f32 %v3254_v57, 0.0  ;;  %v3257_v27 = vadd.f32 %v11848_v49, %v3256_v30  ;;  %7122 = vmatmul.mubr.bf16.gmra.mrb[36].mxu1 %v8507_v43  ;;  %v4286_v36 = vsel %vm9896_vm5, %v4281_v5, %v4285_v25  ;;  %v5294_v49 = vshll.u32 %v12132_v11, 16  ;;  %v3943_v11 = vld [vmem:[#allocation2 + $0x84] sm:$0xf] }
 0x251   : > { %v8771_v34 = vpack.c.bf16 %v3322_v63, %v3322_v63  ;;  %v3323_v47 = vmax.f32 %v3265_v41, 0.0  ;;  %v4296_v60 = vsel %vm9896_vm5, %v4291_v13, %v4295_v10  ;;  %v14033_v25 = vshll.u32 %v12048_v3, 16  ;;  %v3950_v63 = vld [vmem:[#allocation2 + $0x90] sm:$0xf] }
 0x252   : > { %v8769_v0 = vpack.c.bf16 %v3320_v9, %v3320_v9  ;;  %v3321_v32 = vmax.f32 %v3257_v27, 0.0  ;;  %v8524_v57 = vcombine.low %v4286_v36, %v4296_v60  ;;  %v5290_v28 = vrot.slane %v5288_v61, 4 }
 0x253   : > { %v3738_v1 = vshrl.u32 %v8771_v34, 16  ;;  %v8772_v4 = vpack.c.bf16 %v3323_v47, %v3323_v47  ;;  %v12146_v54 = vrot.slane %v14033_v25, 5  ;;  %v5281_v29 = vor.u32 %v5280_v31, %v12093_v45  ;;  %v3954_v31 = vld [vmem:[#allocation2 + $0x98] sm:$0x1] }
 0x254   : > { %v3721_v37 = vshrl.u32 %v8769_v0, 16  ;;  %v8770_v55 = vpack.c.bf16 %v3321_v32, %v3321_v32  ;;  %7129 = vmatprep.mubr.bf16.mxu1 %v8524_v57  ;;  %v5098_v20 = vrot.slane %v12149_v18, 5  ;;  %v3741_v43 = vshll.u32 %v8771_v34, 16 }
 0x255   : > { %v3740_v56 = vrot.slane %v3738_v1, 7  ;;  %v3746_v5 = vshrl.u32 %v8772_v4, 16  ;;  %v12153_v12 = vadd.f32 %v8947_v23, %v12109_v8  ;;  %v3724_v30 = vshll.u32 %v8769_v0, 16 }
 0x256   : > { %v3723_v41 = vrot.slane %v3721_v37, 7  ;;  %v3729_v13 = vshrl.u32 %v8770_v55, 16  ;;  %v8508_v61 = vcombine.low %v12082_v39, %v12087_v42  ;;  %v3749_v9 = vshll.u32 %v8772_v4, 16  ;;  %v3947_v39 = vld [vmem:[#allocation2 + $0x8c] sm:$0x1] }
 0x257   : > { %v3743_v10 = vor.u32 %v3741_v43, %v3740_v56  ;;  %v3748_v45 = vrot.slane %v3746_v5, 7  ;;  %v5291_v27 = vor.u32 %v5290_v28, %v12146_v54  ;;  %v3732_v47 = vshll.u32 %v8770_v55, 16  ;;  %v4626_v28 = vld [vmem:[#allocation2 + $0x20] sm:$0x1]  ;;  %v5026_v37 = vld [vmem:[#allocation2 + $0x18] sm:$0xe] }
 0x258   : > { %v3726_v36 = vor.u32 %v3724_v30, %v3723_v41  ;;  %v3731_v34 = vrot.slane %v3729_v13, 7  ;;  %7130 = vmatmul.mubr.bf16.gmra.mrb[40].mxu1 %v8508_v61  ;;  %v4553_v8 = vrot.slane %v12087_v42, 5  ;;  %v3744_v23 = vrot.slane %v3740_v56, 4 }
 0x259   : > { %v3951_v60 = vsel %vm11494_vm14, %v3743_v10, %v3950_v63  ;;  %v3751_v0 = vor.u32 %v3749_v9, %v3748_v45  ;;  %v3753_v32 = vrot.slane %v3748_v45, 4  ;;  %v3727_v57 = vrot.slane %v3723_v41, 4  ;;  %v12169_v63 = vld [vmem:[#allocation2 + $0x30] sm:$0xf]  ;;  %v12175_v10 = vld [vmem:[#allocation2 + $0x34] sm:$0xf] }
 0x25a   : > { %3952 = vst [vmem:[#allocation2 + $0x90] sm:$0xf] %v3951_v60  ;;  %v3944_v1 = vsel %vm11494_vm14, %v3726_v36, %v3943_v11  ;;  %v3734_v4 = vor.u32 %v3732_v47, %v3731_v34  ;;  %v3736_v25 = vrot.slane %v3731_v34, 4  ;;  %v5282_v5 = vrot.slane %v5281_v29, 4  ;;  %14034 = vst [vmem:[#allocation14_spill] sm:$0xff] %v12169_v63 }
 0x25b   : > { %3945 = vst [vmem:[#allocation2 + $0x84] sm:$0xf] %v3944_v1  ;;  %v3752_v55 = vsel %vm11500_vm15, %v3744_v23, %v3751_v0  ;;  %v3955_v56 = vsel %vm11361_vm4, %v3753_v32, %v3954_v31  ;;  %v5292_v13 = vrot.slane %v5291_v27, 4  ;;  %v5100_v61 = vrot.slane %v5098_v20, 4  ;;  %14035 = vst [vmem:[#allocation15_spill] sm:$0xff] %v12175_v10 }
 0x25c   : > { %3953 = vst [vmem:[#allocation2 + $0x94] sm:$0xf] %v3752_v55  ;;  %3956 = vst [vmem:[#allocation2 + $0x98] sm:$0x1] %v3955_v56  ;;  %v3735_v41 = vsel %vm11500_vm15, %v3727_v57, %v3734_v4  ;;  %v3948_v30 = vsel %vm11361_vm4, %v3736_v25, %v3947_v39  ;;  %v8467_v11 = vrot.slane %v5026_v37, 9  ;;  %v4675_v45 = vshll.u32 %v12149_v18, 16 }
 0x25d   : > { %3946 = vst [vmem:[#allocation2 + $0x88] sm:$0xf] %v3735_v41  ;;  %3949 = vst [vmem:[#allocation2 + $0x8c] sm:$0x1] %v3948_v30  ;;  %v4685_v9 = vshll.u32 %v4626_v28, 16  ;;  %v4555_v36 = vrot.slane %v4553_v8, 4  ;;  %v5287_v23 = vsel %vm9896_vm5, %v5282_v5, %v12146_v54  ;;  %v14038_v54 = vor.u32 %v11907_v7, %v11897_v52 }
 0x25e   : > { %v5296_v31 = vrot.slane %v5294_v49, 5  ;;  %v5101_v34 = vrot.slane %v4626_v28, 5  ;;  %v5299_v47 = vshrl.u32 %v12169_v63, 16  ;;  %v4427_v27 = vld [vmem:[#allocation2 + $0x78] sm:$0xe]  ;;  %v12188_v60 = vsel %vm9852_vm2, %v8467_v11, %v5098_v20 }
 0x25f   : > { %14036 = vst [vmem:[#allocation16_spill] sm:$0xff] %v12188_v60  ;;  %v12190_v0 = vld [vmem:[#allocation2 + $0x38] sm:$0x1]  ;;  %v5302_v18 = vshll.u32 %v12169_v63, 16  ;;  %v5308_v32 = vshll.u32 %v12175_v10, 16  ;;  %v4556_v49 = vrot.slane %v12090_v58, 5 }
 0x260   : > { %v5297_v39 = vsel %vm9896_vm5, %v5292_v13, %v5296_v31  ;;  %v12199_v57 = vsel %vm9852_vm2, %v5100_v61, %v5101_v34  ;;  %v12204_v20 = vrot.slane %v14038_v54, 4  ;;  %v12206_v1 = vrot.slane %v4675_v45, 5  ;;  %v12228_v13 = vld [vmem:[#allocation2 + $0x24] sm:$0xe] }
 0x261   : > { %14037 = vst [vmem:[#allocation17_spill] sm:$0xff] %v12199_v57  ;;  %v14039_v4 = vshrl.u32 %v11641_v35, 16  ;;  %v12212_v28 = vrot.slane %v4685_v9, 5  ;;  %v5312_v58 = vshrl.u32 %v12175_v10, 16  ;;  %v8460_v37 = vrot.slane %v4427_v27, 9 }
 0x262   : > { %v4557_v55 = vsel %vm9852_vm2, %v4555_v36, %v4556_v49  ;;  %v12217_v56 = vld [vmem:[#allocation2 + $0x84] sm:$0xf]  ;;  %v12219_v5 = vrot.slane %v5299_v47, 4  ;;  %v12224_v41 = vrot.slane %v5302_v18, 5  ;;  %v12226_v30 = vrot.slane %v5308_v32, 5 }
 0x263   : > { %v12210_v25 = vrot.slane %v14039_v4, 4  ;;  %v4298_v7 = vshrl.u32 %v12217_v56, 16  ;;  %v4301_v35 = vshll.u32 %v12217_v56, 16  ;;  %v12230_v61 = vld [vmem:[#allocation2 + $0x84] sm:$0xf]  ;;  %v4554_v45 = vsel %vm9852_vm2, %v8460_v37, %v4553_v8 }
 0x264   : > { %v12232_v11 = vld [vmem:[#allocation2 + $0x88] sm:$0xf]  ;;  %v12238_v9 = vld [vmem:[#allocation2 + $0x94] sm:$0xf]  ;;  %v12240_v36 = vcombine.low %v5287_v23, %v5297_v39  ;;  %v8540_v27 = vcombine.low %v4554_v45, %v4557_v55  ;;  %v12248_v18 = vld [vmem:[#allocation2 + $0x90] sm:$0xf] }
 0x265   : > { %14040 = vst [vmem:[#allocation18_spill] sm:$0xff] %v12232_v11  ;;  %14041 = vst [vmem:[#allocation19_spill] sm:$0xff] %v12238_v9  ;;  %v8556_v47 = vcombine.low %v12230_v61, %v12232_v11  ;;  %v12250_v42 = vld [vmem:[#allocation2 + $0x88] sm:$0xf]  ;;  %v12252_v32 = vld [vmem:[#allocation2 + $0x90] sm:$0xf]  ;;  %v8557_v55 = vcombine.low %v12248_v18, %v12238_v9 }
 0x266   : > { %14042 = vst [vmem:[#allocation20_spill] sm:$0xff] %v12240_v36  ;;  %v4028_v49 = vld [vmem:[#allocation2 + $0x8c] sm:$0x1]  ;;  %v4300_v39 = vrot.slane %v4298_v7, 4  ;;  %v4303_v54 = vrot.slane %v4301_v35, 5  ;;  %v4307_v4 = vshll.u32 %v12250_v42, 16 }
 0x267   : > { %v4311_v37 = vshrl.u32 %v12250_v42, 16  ;;  %7290 = vmatprep.mubr.bf16.mxu0 %v8556_v47  ;;  %v4428_v45 = vld [vmem:[#allocation2 + $0x84] sm:$0xe]  ;;  %v4560_v34 = vrot.slane %v12250_v42, 5  ;;  %v12265_v29 = vrot.slane %v5312_v58, 4  ;;  %v8468_v31 = vrot.slane %v12228_v13, 9 }
 0x268   : > { %7291 = vmatmul.mubr.bf16.gmra.mrb[72].mxu0 %v8540_v27  ;;  %v4304_v43 = vor.u32 %v4303_v54, %v4300_v39  ;;  %v4309_v8 = vrot.slane %v4307_v4, 5  ;;  %v4317_v35 = vshll.u32 %v4028_v49, 16  ;;  %v12268_v23 = vld [vmem:[#allocation2 + $0x94] sm:$0xf]  ;;  %v4563_v47 = vrot.slane %v4028_v49, 5 }
 0x269   : > { %v4313_v7 = vrot.slane %v4311_v37, 4  ;;  %7298 = vmatprep.mubr.bf16.mxu0 %v8557_v55  ;;  %v4562_v52 = vrot.slane %v4560_v34, 4  ;;  %v4322_v59 = vshrl.u32 %v12252_v32, 16  ;;  %v4325_v15 = vshll.u32 %v12252_v32, 16  ;;  %v12272_v3 = vld [vmem:[#allocation2 + $0x98] sm:$0x1] }
 0x26a   : > { %v4305_v10 = vrot.slane %v4304_v43, 4  ;;  %v8461_v58 = vrot.slane %v4428_v45, 9  ;;  %v4331_v13 = vshll.u32 %v12268_v23, 16  ;;  %v4335_v4 = vshrl.u32 %v12268_v23, 16 }
 0x26b   : > { %v4314_v63 = vor.u32 %v4313_v7, %v4309_v8  ;;  %v4564_v27 = vsel %vm9852_vm2, %v4562_v52, %v4563_v47  ;;  %v4324_v39 = vrot.slane %v4322_v59, 4  ;;  %v4327_v54 = vrot.slane %v4325_v15, 5  ;;  %v12285_v52 = vld [vmem:[#allocation2 + $0x3c] sm:$0xf] }
 0x26c   : > { %v4319_v49 = vrot.slane %v4317_v35, 5  ;;  %v4333_v55 = vrot.slane %v4331_v13, 5  ;;  %v5105_v57 = vrot.slane %v9721_v26, 5  ;;  %v4561_v43 = vsel %vm9852_vm2, %v8461_v58, %v4560_v34  ;;  %14043 = vst [vmem:[#allocation21_spill] sm:$0xff] %v12285_v52  ;;  %v9723_v34 = vld [vmem:[#allocation2 + $0x3c] sm:$0xf] }
 0x26d   : > { %v4315_v37 = vrot.slane %v4314_v63, 4  ;;  %v4328_v45 = vor.u32 %v4327_v54, %v4324_v39  ;;  %v4337_v7 = vrot.slane %v4335_v4, 4  ;;  %v4341_v60 = vshll.u32 %v12272_v3, 16 }
 0x26e   : > { %v4762_v36 = vshrl.u32 %v9722_v38, 16  ;;  %v4310_v59 = vsel %vm9896_vm5, %v4305_v10, %v4309_v8  ;;  %v8541_v63 = vcombine.low %v4561_v43, %v4564_v27  ;;  %v4765_v35 = vshll.u32 %v9722_v38, 16 }
 0x26f   : > { %v4320_v15 = vsel %vm9896_vm5, %v4315_v37, %v4319_v49  ;;  %v4329_v47 = vrot.slane %v4328_v45, 4  ;;  %v4338_v13 = vor.u32 %v4337_v7, %v4333_v55  ;;  %v4738_v58 = vshrl.u32 %v9723_v34, 16 }
 0x270   : > { %v8525_v26 = vcombine.low %v4310_v59, %v4320_v15  ;;  %v4741_v39 = vshll.u32 %v9723_v34, 16  ;;  %7299 = vmatmul.mubr.bf16.gmra.mrb[76].mxu0 %v8541_v63  ;;  %v8509_v54 = vcombine.low %v12217_v56, %v12250_v42  ;;  %v5315_v10 = vor.u32 %v12265_v29, %v12226_v30  ;;  %v12319_v15 = vld [vmem:[#allocation2 + $0x40] sm:$0xf] }
 0x271   : > { %v4339_v8 = vrot.slane %v4338_v13, 4  ;;  %v4343_v4 = vrot.slane %v4341_v60, 5  ;;  %v5323_v27 = vshrl.u32 %v12285_v52, 16  ;;  %v5326_v38 = vshll.u32 %v12285_v52, 16  ;;  %14047 = vst [vmem:[#allocation23_spill] sm:$0xff] %v12319_v15 }
 0x272   : > { %7137 = vmatprep.mubr.bf16.mxu1 %v8525_v26  ;;  %v5305_v37 = vor.u32 %v12224_v41, %v12219_v5  ;;  %v14044_v49 = vshll.u32 %v12190_v0, 16  ;;  %v12299_v56 = vsel %vm9852_vm2, %v8468_v31, %v5105_v57  ;;  %v12303_v42 = vrot.slane %v4762_v36, 4  ;;  %v12316_v31 = vld [vmem:[#allocation2 + $0x4c] sm:$0xf]  ;;  %v12323_v34 = vld [vmem:[#allocation2 + $0x40] sm:$0xf] }
 0x273   : > { %7138 = vmatmul.mubr.bf16.gmra.mrb[44].mxu1 %v8509_v54  ;;  %14045 = vst [vmem:[#allocation22_spill] sm:$0xff] %v12299_v56  ;;  %v4334_v60 = vsel %vm9896_vm5, %v4329_v47, %v4333_v55  ;;  %v4344_v45 = vsel %vm9896_vm5, %v4339_v8, %v4343_v4  ;;  %v14046_v5 = vor.u32 %v12210_v25, %v12206_v1  ;;  %v12312_v41 = vrot.slane %v4738_v58, 4 }
 0x274   : > { %v5320_v43 = vrot.slane %v14044_v49, 5  ;;  %v12314_v7 = vrot.slane %v4765_v35, 5  ;;  %v8526_v36 = vcombine.low %v4334_v60, %v4344_v45  ;;  %v12321_v63 = vrot.slane %v4741_v39, 5  ;;  %v12329_v35 = vld [vmem:[%s13947_s2] ss:$0 sm:$0xff] }
 0x275   : > { %v4683_v0 = vrot.slane %v14046_v5, 4  ;;  %v5316_v26 = vrot.slane %v5315_v10, 4  ;;  %v5325_v47 = vrot.slane %v5323_v27, 4  ;;  %v5328_v13 = vrot.slane %v5326_v38, 5 }
 0x276   : > { %v9431_v55 = vpop.f32.mrb[24].mxu0  ;;  %7145 = vmatprep.mubr.bf16.mxu1 %v8526_v36  ;;  %v5306_v8 = vrot.slane %v5305_v37, 4  ;;  %v5107_v39 = vrot.slane %v5105_v57, 4  ;;  %v5332_v38 = vshll.u32 %v12319_v15, 16  ;;  %v5336_v49 = vshrl.u32 %v12319_v15, 16 }
 0x277   : > { %v3278_v58 = vadd.f32 %v12329_v35, %v9431_v55  ;;  %v3269_v54 = vpop.f32.mrb[25].mxu0  ;;  %v4688_v27 = vsel %vm9896_vm5, %v4683_v0, %v12212_v28  ;;  %v8510_v36 = vcombine.low %v12252_v32, %v12268_v23  ;;  %v9727_v37 = vld [vmem:[#allocation2 + $0x2c] sm:$0x1]  ;;  %v5321_v59 = vsel %vm9896_vm5, %v5316_v26, %v5320_v43 }
 0x278   : > { %v3270_v4 = vadd.f32 %v12329_v35, %v3269_v54  ;;  %v9432_v10 = vpop.f32.mrb[26].mxu0  ;;  %v5108_v57 = vrot.slane %v9727_v37, 5  ;;  %v5329_v28 = vor.u32 %v5328_v13, %v5325_v47  ;;  %v5338_v29 = vrot.slane %v5336_v49, 4 }
 0x279   : > { %v3326_v60 = vmax.f32 %v3278_v58, 0.0  ;;  %v3281_v45 = vadd.f32 %v12329_v35, %v9432_v10  ;;  %v3272_v5 = vpop.f32.mrb[27].mxu0  ;;  %v5311_v58 = vsel %vm9896_vm5, %v5306_v8, %v12226_v30  ;;  %v14049_v47 = vsel %vm9896_vm5, %v12204_v20, %v12206_v1 }
 0x27a   : > { %v3324_v55 = vmax.f32 %v3270_v4, 0.0  ;;  %v3273_v54 = vadd.f32 %v12329_v35, %v3272_v5  ;;  %v12349_v10 = vsel %vm9852_vm2, %v5107_v39, %v5108_v57  ;;  %v12351_v4 = vld [vmem:[#allocation2 + $0x44] sm:$0x1]  ;;  %v12353_v5 = vrot.slane %v5332_v38, 5 }
 0x27b   : > { %v8775_v0 = vpack.c.bf16 %v3326_v60, %v3326_v60  ;;  %v3327_v25 = vmax.f32 %v3281_v45, 0.0  ;;  %7146 = vmatmul.mubr.bf16.gmra.mrb[48].mxu1 %v8510_v36  ;;  %14048 = vst [vmem:[#allocation24_spill] sm:$0xff] %v12349_v10  ;;  %v12360_v13 = vcombine.low %v14049_v47, %v4688_v27  ;;  %v12362_v30 = vcombine.low %v5311_v58, %v5321_v59  ;;  %v3964_v36 = vld [vmem:[#allocation2 + $0xa8] sm:$0xf]  ;;  %v12370_v59 = vld [vmem:[#allocation2 + $0x4c] sm:$0xf] }
 0x27c   : > { %v8773_v32 = vpack.c.bf16 %v3324_v55, %v3324_v55  ;;  %v3325_v37 = vmax.f32 %v3273_v54, 0.0  ;;  %v12366_v45 = vrot.slane %v5329_v28, 4  ;;  %v5342_v57 = vshll.u32 %v12351_v4, 16  ;;  %14052 = vst [vmem:[#allocation27_spill] sm:$0xff] %v12370_v59  ;;  %v3957_v58 = vld [vmem:[#allocation2 + $0x9c] sm:$0xf] }
 0x27d   : > { %v3772_v43 = vshrl.u32 %v8775_v0, 16  ;;  %v8776_v26 = vpack.c.bf16 %v3327_v25, %v3327_v25  ;;  %14050 = vst [vmem:[#allocation25_spill] sm:$0xff] %v12360_v13  ;;  %14051 = vst [vmem:[#allocation26_spill] sm:$0xff] %v12362_v30  ;;  %v3775_v49 = vshll.u32 %v8775_v0, 16  ;;  %v5339_v1 = vor.u32 %v5338_v29, %v12353_v5  ;;  %v12372_v60 = vld [vmem:[#allocation2 + $0x34] sm:$0xf] }
 0x27e   : > { %v3755_v8 = vshrl.u32 %v8773_v32, 16  ;;  %v8774_v39 = vpack.c.bf16 %v3325_v37, %v3325_v37  ;;  %v3758_v54 = vshll.u32 %v8773_v32, 16  ;;  %v4567_v4 = vrot.slane %v12268_v23, 5  ;;  %v4628_v30 = vld [vmem:[#allocation2 + $0x38] sm:$0x1] }
 0x27f   : > { %v3774_v38 = vrot.slane %v3772_v43, 7  ;;  %v3780_v25 = vshrl.u32 %v8776_v26, 16  ;;  %v3783_v47 = vshll.u32 %v8776_v26, 16  ;;  %v3968_v43 = vld [vmem:[#allocation2 + $0xb0] sm:$0x1]  ;;  %v4882_v21 = vshrl.u32 %v12230_v61, 16 }
 0x280   : > { %v3757_v55 = vrot.slane %v3755_v8, 7  ;;  %v3763_v20 = vshrl.u32 %v8774_v39, 16  ;;  %v3766_v56 = vshll.u32 %v8774_v39, 16 }
 0x281   : > { %v3777_v27 = vor.u32 %v3775_v49, %v3774_v38  ;;  %v3782_v37 = vrot.slane %v3780_v25, 7  ;;  %v3778_v32 = vrot.slane %v3774_v38, 4  ;;  %v3961_v49 = vld [vmem:[#allocation2 + $0xa4] sm:$0x1] }
 0x282   : > { %v3760_v0 = vor.u32 %v3758_v54, %v3757_v55  ;;  %v3765_v10 = vrot.slane %v3763_v20, 7  ;;  %v3761_v26 = vrot.slane %v3757_v55, 4  ;;  %v12380_v20 = vld [vmem:[#allocation2 + $0x48] sm:$0xf] }
 0x283   : > { %v3965_v29 = vsel %vm11494_vm14, %v3777_v27, %v3964_v36  ;;  %v3785_v8 = vor.u32 %v3783_v47, %v3782_v37  ;;  %v3787_v13 = vrot.slane %v3782_v37, 4  ;;  %14053 = vst [vmem:[#allocation28_spill] sm:$0xff] %v12380_v20  ;;  %v4723_v27 = vshll.u32 %v12372_v60, 16 }
 0x284   : > { %3966 = vst [vmem:[#allocation2 + $0xa8] sm:$0xf] %v3965_v29  ;;  %v3958_v25 = vsel %vm11494_vm14, %v3760_v0, %v3957_v58  ;;  %v3768_v28 = vor.u32 %v3766_v56, %v3765_v10  ;;  %v3770_v54 = vrot.slane %v3765_v10, 4  ;;  %v4733_v58 = vshll.u32 %v4628_v30, 16 }
 0x285   : > { %3959 = vst [vmem:[#allocation2 + $0x9c] sm:$0xf] %v3958_v25  ;;  %v3786_v39 = vsel %vm11500_vm15, %v3778_v32, %v3785_v8  ;;  %v3969_v38 = vsel %vm11361_vm4, %v3787_v13, %v3968_v43  ;;  %v5335_v13 = vsel %vm9896_vm5, %v12366_v45, %v12353_v5  ;;  %v5340_v37 = vrot.slane %v5339_v1, 4  ;;  %v9729_v32 = vld [vmem:[#allocation2 + $0x60] sm:$0xf] }
 0x286   : > { %3967 = vst [vmem:[#allocation2 + $0xac] sm:$0xf] %v3786_v39  ;;  %3970 = vst [vmem:[#allocation2 + $0xb0] sm:$0x1] %v3969_v38  ;;  %v3769_v56 = vsel %vm11500_vm15, %v3761_v26, %v3768_v28  ;;  %v3962_v10 = vsel %vm11361_vm4, %v3770_v54, %v3961_v49  ;;  %v8469_v47 = vrot.slane %v5028_v53, 9  ;;  %v14054_v0 = vrot.slane %v12372_v60, 5 }
 0x287   : > { %3960 = vst [vmem:[#allocation2 + $0xa0] sm:$0xf] %v3769_v56  ;;  %3963 = vst [vmem:[#allocation2 + $0xa4] sm:$0x1] %v3962_v10  ;;  %v4810_v28 = vshrl.u32 %v9729_v32, 16  ;;  %v4813_v29 = vshll.u32 %v9729_v32, 16  ;;  %v14055_v5 = vor.u32 %v12020_v46, %v11992_v2 }
 0x288   : > { %v5114_v43 = vrot.slane %v14054_v0, 4  ;;  %v4569_v8 = vrot.slane %v4567_v4, 4  ;;  %v5344_v49 = vrot.slane %v5342_v57, 5  ;;  %v12403_v26 = vld [vmem:[#allocation2 + $0x54] sm:$0xf]  ;;  %v5115_v39 = vrot.slane %v4628_v30, 5 }
 0x289   : > { %v4786_v25 = vshrl.u32 %v12403_v26, 16  ;;  %v4429_v54 = vld [vmem:[#allocation2 + $0x90] sm:$0xe]  ;;  %v12409_v53 = vrot.slane %v14055_v5, 4  ;;  %v14056_v45 = vshrl.u32 %v11709_v62, 16  ;;  %v4570_v38 = vrot.slane %v12272_v3, 5 }
 0x28a   : > { %v12416_v56 = vrot.slane %v4723_v27, 5  ;;  %v12418_v57 = vrot.slane %v4733_v58, 5  ;;  %v5345_v30 = vsel %vm9896_vm5, %v5340_v37, %v5344_v49  ;;  %v12426_v2 = vsel %vm9852_vm2, %v5114_v43, %v5115_v39 }
 0x28b   : > { %v12413_v1 = vrot.slane %v14056_v45, 4  ;;  %14057 = vst [vmem:[#allocation29_spill] sm:$0xff] %v12426_v2  ;;  %v12429_v46 = vrot.slane %v4810_v28, 4  ;;  %v12431_v3 = vrot.slane %v4813_v29, 5  ;;  %v8462_v27 = vrot.slane %v4429_v54, 9 }
 0x28c   : > { %v4571_v58 = vsel %vm9852_vm2, %v4569_v8, %v4570_v38  ;;  %v12435_v32 = vld [vmem:[#allocation2 + $0x9c] sm:$0xf]  ;;  %v12437_v5 = vrot.slane %v4786_v25, 4  ;;  %v12439_v45 = vld [vmem:[#allocation2 + $0x64] sm:$0xf]  ;;  %v14064_v25 = vmov %v14054_v0  ;;  %v12472_v60 = vcombine.low %v5335_v13, %v5345_v30 }
 0x28d   : > { %14058 = vst [vmem:[#allocation30_spill] sm:$0xff] %v12429_v46  ;;  %14059 = vst [vmem:[#allocation31_spill] sm:$0xff] %v12431_v3  ;;  %v4346_v43 = vshrl.u32 %v12435_v32, 16  ;;  %v4349_v49 = vshll.u32 %v12435_v32, 16  ;;  %v12444_v28 = vld [vmem:[#allocation2 + $0x9c] sm:$0xf]  ;;  %v4568_v8 = vsel %vm9852_vm2, %v8462_v27, %v4567_v4  ;;  %v12458_v39 = vsel %vm9852_vm2, %v8469_v47, %v14064_v25 }
 0x28e   : > { %14060 = vst [vmem:[#allocation32_spill] sm:$0xff] %v12439_v45  ;;  %14061 = vst [vmem:[#allocation33_spill] sm:$0xff] %v12444_v28  ;;  %v12446_v29 = vld [vmem:[#allocation2 + $0xa0] sm:$0xf]  ;;  %v12452_v54 = vld [vmem:[#allocation2 + $0xac] sm:$0xf]  ;;  %v8542_v36 = vcombine.low %v4568_v8, %v4571_v58  ;;  %v4730_v30 = vor.u32 %v12413_v1, %v12416_v56 }
 0x28f   : > { %14062 = vst [vmem:[#allocation34_spill] sm:$0xff] %v12446_v29  ;;  %14063 = vst [vmem:[#allocation35_spill] sm:$0xff] %v12452_v54  ;;  %v8558_v23 = vcombine.low %v12444_v28, %v12446_v29  ;;  %v12466_v37 = vld [vmem:[#allocation2 + $0xa8] sm:$0xf]  ;;  %v12468_v4 = vld [vmem:[#allocation2 + $0xa0] sm:$0xf] }
 0x290   : > { %14065 = vst [vmem:[#allocation36_spill] sm:$0xff] %v12458_v39  ;;  %14066 = vst [vmem:[#allocation37_spill] sm:$0xff] %v12466_v37  ;;  %v12470_v27 = vld [vmem:[#allocation2 + $0xa8] sm:$0xf]  ;;  %v4030_v25 = vld [vmem:[#allocation2 + $0xa4] sm:$0x1]  ;;  %v8559_v8 = vcombine.low %v12466_v37, %v12452_v54 }
 0x291   : > { %14067 = vst [vmem:[#allocation38_spill] sm:$0xff] %v12472_v60  ;;  %v4348_v38 = vrot.slane %v4346_v43, 4  ;;  %v4351_v62 = vrot.slane %v4349_v49, 5  ;;  %v4355_v55 = vshll.u32 %v12468_v4, 16  ;;  %v4359_v10 = vshrl.u32 %v12468_v4, 16  ;;  %7306 = vmatprep.mubr.bf16.mxu0 %v8558_v23 }
 0x292   : > { %v4858_v58 = vshrl.u32 %v12064_v22, 16  ;;  %v4430_v0 = vld [vmem:[#allocation2 + $0x9c] sm:$0xe]  ;;  %v4574_v13 = vrot.slane %v12468_v4, 5  ;;  %7307 = vmatmul.mubr.bf16.gmra.mrb[80].mxu0 %v8542_v36  ;;  %v4365_v15 = vshll.u32 %v4030_v25, 16  ;;  %v4577_v39 = vrot.slane %v4030_v25, 5 }
 0x293   : > { %v4352_v47 = vor.u32 %v4351_v62, %v4348_v38  ;;  %v4357_v43 = vrot.slane %v4355_v55, 5  ;;  %v4361_v49 = vrot.slane %v4359_v10, 4  ;;  %v12484_v52 = vld [vmem:[#allocation2 + $0xac] sm:$0xf]  ;;  %7314 = vmatprep.mubr.bf16.mxu0 %v8559_v8  ;;  %v4370_v23 = vshrl.u32 %v12470_v27, 16  ;;  %v8949_v38 = vpop.f32.mrb[4].mxu1 }
 0x294   : > { %v4576_v2 = vrot.slane %v4574_v13, 4  ;;  %v4373_v29 = vshll.u32 %v12470_v27, 16  ;;  %v8463_v54 = vrot.slane %v4430_v0, 9  ;;  %v12488_v3 = vld [vmem:[#allocation2 + $0xb0] sm:$0x1]  ;;  %v4379_v36 = vshll.u32 %v12484_v52, 16 }
 0x295   : > { %v4353_v60 = vrot.slane %v4352_v47, 4  ;;  %v4362_v45 = vor.u32 %v4361_v49, %v4357_v43  ;;  %v4372_v1 = vrot.slane %v4370_v23, 4  ;;  %v4383_v62 = vshrl.u32 %v12484_v52, 16  ;;  %v8950_v28 = vpop.f32.mrb[5].mxu1 }
 0x296   : > { %v4578_v55 = vsel %vm9852_vm2, %v4576_v2, %v4577_v39  ;;  %v4375_v10 = vrot.slane %v4373_v29, 5  ;;  %v4367_v8 = vrot.slane %v4365_v15, 5  ;;  %v4381_v46 = vrot.slane %v4379_v36, 5  ;;  %v8952_v16 = vpop.f32.mrb[6].mxu1 }
 0x297   : > { %v4363_v25 = vrot.slane %v4362_v45, 4  ;;  %v4731_v37 = vrot.slane %v4730_v30, 4  ;;  %v4575_v0 = vsel %vm9852_vm2, %v8463_v54, %v4574_v13  ;;  %v4385_v49 = vrot.slane %v4383_v62, 4  ;;  %v8953_v15 = vpop.f32.mrb[7].mxu1 }
 0x298   : > { %v4376_v47 = vor.u32 %v4375_v10, %v4372_v1  ;;  %v4389_v24 = vshll.u32 %v12488_v3, 16  ;;  %v4358_v2 = vsel %vm9896_vm5, %v4353_v60, %v4357_v43  ;;  %v8543_v39 = vcombine.low %v4575_v0, %v4578_v55 }
 0x299   : > { %v4368_v29 = vsel %vm9896_vm5, %v4363_v25, %v4367_v8  ;;  %v12501_v45 = vadd.f32 %v8950_v28, %v8949_v38  ;;  %v14068_v30 = vshll.u32 %v12403_v26, 16  ;;  %v4386_v36 = vor.u32 %v4385_v49, %v4381_v46  ;;  %v12513_v28 = vld [vmem:[#allocation2 + $0x58] sm:$0xf] }
 0x29a   : > { %v8527_v54 = vcombine.low %v4358_v2, %v4368_v29  ;;  %v4377_v13 = vrot.slane %v4376_v47, 4  ;;  %v4834_v1 = vshrl.u32 %v12062_v44, 16  ;;  %v4861_v10 = vshll.u32 %v12064_v22, 16  ;;  %7315 = vmatmul.mubr.bf16.gmra.mrb[84].mxu0 %v8543_v39  ;;  %v8955_v2 = vpop.f32.mrb[8].mxu1 }
 0x29b   : > { %v12505_v23 = vrot.slane %v14068_v30, 5  ;;  %v8511_v60 = vcombine.low %v12435_v32, %v12468_v4  ;;  %v12511_v43 = vadd.f32 %v8953_v15, %v8952_v16  ;;  %v4837_v26 = vshll.u32 %v12062_v44, 16  ;;  %v5238_v32 = vld [vmem:[#allocation2 + $0x50] sm:$0x1]  ;;  %v8956_v15 = vpop.f32.mrb[9].mxu1 }
 0x29c   : > { %7153 = vmatprep.mubr.bf16.mxu1 %v8527_v54  ;;  %v4387_v62 = vrot.slane %v4386_v36, 4  ;;  %v4391_v38 = vrot.slane %v4389_v24, 5  ;;  %v12517_v25 = vrot.slane %v4858_v58, 4  ;;  %v4726_v22 = vsel %vm9896_vm5, %v12409_v53, %v12416_v56  ;;  %v5029_v53 = vld [vmem:[#allocation2 + $0x3c] sm:$0xe] }
 0x29d   : > { %14069 = vst [vmem:[#allocation39_spill] sm:$0xff] %v12511_v43  ;;  %7154 = vmatmul.mubr.bf16.gmra.mrb[52].mxu1 %v8511_v60  ;;  %v4736_v16 = vsel %vm9896_vm5, %v4731_v37, %v12418_v57  ;;  %v14071_v4 = vshrl.u32 %v12380_v20, 16  ;;  %v4382_v44 = vsel %vm9896_vm5, %v4377_v13, %v4381_v46  ;;  %v14072_v58 = vshll.u32 %v12380_v20, 16  ;;  %v12543_v46 = vld [vmem:[%s13949_s4] ss:$0 sm:$0xff]  ;;  %v8958_v60 = vpop.f32.mrb[10].mxu1 }
 0x29e   : > { %14070 = vst [vmem:[#allocation40_spill] sm:$0xff] %v12517_v25  ;;  %v4392_v24 = vsel %vm9896_vm5, %v4387_v62, %v4391_v38  ;;  %v5356_v47 = vshll.u32 %v12370_v59, 16  ;;  %v12535_v56 = vrot.slane %v4834_v1, 4  ;;  %v12537_v49 = vrot.slane %v4861_v10, 5 }
 0x29f   : > { %v5349_v8 = vrot.slane %v14071_v4, 4  ;;  %v5352_v0 = vrot.slane %v14072_v58, 5  ;;  %v8528_v37 = vcombine.low %v4382_v44, %v4392_v24  ;;  %v12545_v29 = vrot.slane %v4837_v26, 5  ;;  %v9435_v13 = vpop.f32.mrb[28].mxu0  ;;  %v8959_v4 = vpop.f32.mrb[11].mxu1 }
 0x2a0   : > { %14073 = vst [vmem:[#allocation41_spill] sm:$0xff] %v12537_v49  ;;  %v5360_v30 = vshrl.u32 %v12370_v59, 16  ;;  %v5366_v54 = vshll.u32 %v5238_v32, 16  ;;  %v12551_v36 = vadd.f32 %v12141_v48, %v12543_v46  ;;  %v12555_v1 = vadd.f32 %v12153_v12, %v12543_v46  ;;  %v3285_v38 = vpop.f32.mrb[29].mxu0  ;;  %v12564_v24 = vld [vmem:[#allocation2 + $0x44] sm:$0x1] }
 0x2a1   : > { %7161 = vmatprep.mubr.bf16.mxu1 %v8528_v37  ;;  %v12557_v10 = vadd.f32 %v8956_v15, %v8955_v2  ;;  %v12559_v26 = vcombine.low %v4726_v22, %v4736_v16  ;;  %v3294_v62 = vadd.f32 %v12329_v35, %v9435_v13  ;;  %v5353_v32 = vor.u32 %v5352_v0, %v5349_v8  ;;  %v9436_v12 = vpop.f32.mrb[30].mxu0  ;;  %v3982_v49 = vld [vmem:[#allocation2 + $0xc8] sm:$0x1] }
 0x2a2   : > { %14074 = vst [vmem:[#allocation42_spill] sm:$0xff] %v12551_v36  ;;  %14075 = vst [vmem:[#allocation43_spill] sm:$0xff] %v12555_v1  ;;  %v12562_v44 = vrot.slane %v5356_v47, 5  ;;  %v5119_v48 = vrot.slane %v12323_v34, 5  ;;  %v3286_v58 = vadd.f32 %v12329_v35, %v3285_v38  ;;  %v8512_v37 = vcombine.low %v12470_v27, %v12484_v52  ;;  %v3288_v13 = vpop.f32.mrb[31].mxu0 }
 0x2a3   : > { %14076 = vst [vmem:[#allocation44_spill] sm:$0xff] %v12559_v26  ;;  %v12570_v2 = vadd.f32 %v8959_v4, %v8958_v60  ;;  %v8470_v22 = vrot.slane %v5029_v53, 9  ;;  %v3330_v16 = vmax.f32 %v3294_v62, 0.0  ;;  %v3297_v15 = vadd.f32 %v12329_v35, %v9436_v12  ;;  %v3978_v1 = vld [vmem:[#allocation2 + $0xc0] sm:$0xf] }
 0x2a4   : > { %v12573_v8 = vrot.slane %v5360_v30, 4  ;;  %v12575_v0 = vrot.slane %v5366_v54, 5  ;;  %v3328_v47 = vmax.f32 %v3286_v58, 0.0  ;;  %v3289_v57 = vadd.f32 %v12329_v35, %v3288_v13  ;;  %v12590_v54 = vld [vmem:[#allocation2 + $0x54] sm:$0xf] }
 0x2a5   : > { %7162 = vmatmul.mubr.bf16.gmra.mrb[56].mxu1 %v8512_v37  ;;  %v14077_v27 = vor.u32 %v12321_v63, %v12312_v41  ;;  %v8779_v53 = vpack.c.bf16 %v3330_v16, %v3330_v16  ;;  %v3331_v62 = vmax.f32 %v3297_v15, 0.0  ;;  %v12584_v4 = vrot.slane %v5353_v32, 4  ;;  %14079 = vst [vmem:[#allocation46_spill] sm:$0xff] %v12590_v54 }
 0x2a6   : > { %v12588_v30 = vsel %vm9852_vm2, %v8470_v22, %v5119_v48  ;;  %v8777_v58 = vpack.c.bf16 %v3328_v47, %v3328_v47  ;;  %v3329_v35 = vmax.f32 %v3289_v57, 0.0  ;;  %v5121_v12 = vrot.slane %v5119_v48, 4 }
 0x2a7   : > { %v12582_v60 = vrot.slane %v14077_v27, 4  ;;  %14078 = vst [vmem:[#allocation45_spill] sm:$0xff] %v12588_v30  ;;  %v4747_v37 = vshll.u32 %v12323_v34, 16  ;;  %v3806_v13 = vshrl.u32 %v8779_v53, 16  ;;  %v8780_v39 = vpack.c.bf16 %v3331_v62, %v3331_v62  ;;  %v9055_v22 = vpop.f32.mrb[32].mxu0 }
 0x2a8   : > { %v14080_v63 = vshrl.u32 %v12323_v34, 16  ;;  %v3789_v16 = vshrl.u32 %v8777_v58, 16  ;;  %v8778_v15 = vpack.c.bf16 %v3329_v35, %v3329_v35  ;;  %v4906_v57 = vshrl.u32 %v12248_v18, 16  ;;  %v9056_v62 = vpop.f32.mrb[33].mxu0  ;;  %v3971_v35 = vld [vmem:[#allocation2 + $0xb4] sm:$0xf] }
 0x2a9   : > { %v3808_v48 = vrot.slane %v3806_v13, 7  ;;  %v3809_v55 = vshll.u32 %v8779_v53, 16  ;;  %v3814_v38 = vshrl.u32 %v8780_v39, 16  ;;  %v3792_v41 = vshll.u32 %v8777_v58, 16 }
 0x2aa   : > { %v12597_v32 = vrot.slane %v14080_v63, 4  ;;  %v3791_v36 = vrot.slane %v3789_v16, 7  ;;  %v3797_v50 = vshrl.u32 %v8778_v15, 16  ;;  %v12602_v34 = vadd.f32 %v9056_v62, %v9055_v22  ;;  %v9058_v63 = vpop.f32.mrb[34].mxu0  ;;  %v3975_v62 = vld [vmem:[#allocation2 + $0xbc] sm:$0x1] }
 0x2ab   : > { %v3811_v59 = vor.u32 %v3809_v55, %v3808_v48  ;;  %v3816_v20 = vrot.slane %v3814_v38, 7  ;;  %v3817_v6 = vshll.u32 %v8780_v39, 16  ;;  %v9059_v27 = vpop.f32.mrb[35].mxu0  ;;  %v3800_v53 = vshll.u32 %v8778_v15, 16 }
 0x2ac   : > { %14081 = vst [vmem:[#allocation47_spill] sm:$0xff] %v12602_v34  ;;  %v3794_v26 = vor.u32 %v3792_v41, %v3791_v36  ;;  %v3799_v13 = vrot.slane %v3797_v50, 7  ;;  %v12605_v25 = vadd.f32 %v9059_v27, %v9058_v63  ;;  %v3812_v43 = vrot.slane %v3808_v48, 4  ;;  %v12611_v41 = vld [vmem:[#allocation2 + $0x58] sm:$0xf] }
 0x2ad   : > { %v3979_v58 = vsel %vm11494_vm14, %v3811_v59, %v3978_v1  ;;  %v3819_v16 = vor.u32 %v3817_v6, %v3816_v20  ;;  %v3821_v22 = vrot.slane %v3816_v20, 4  ;;  %v3795_v55 = vrot.slane %v3791_v36, 4  ;;  %14083 = vst [vmem:[#allocation49_spill] sm:$0xff] %v12611_v41  ;;  %v12620_v20 = vld [vmem:[#allocation2 + $0x64] sm:$0xf] }
 0x2ae   : > { %14082 = vst [vmem:[#allocation48_spill] sm:$0xff] %v12605_v25  ;;  %3980 = vst [vmem:[#allocation2 + $0xc0] sm:$0xf] %v3979_v58  ;;  %v3972_v39 = vsel %vm11494_vm14, %v3794_v26, %v3971_v35  ;;  %v3802_v38 = vor.u32 %v3800_v53, %v3799_v13  ;;  %v3804_v47 = vrot.slane %v3799_v13, 4  ;;  %v4909_v50 = vshll.u32 %v12248_v18, 16 }
 0x2af   : > { %3973 = vst [vmem:[#allocation2 + $0xb4] sm:$0xf] %v3972_v39  ;;  %v3820_v15 = vsel %vm11500_vm15, %v3812_v43, %v3819_v16  ;;  %v3983_v6 = vsel %vm11361_vm4, %v3821_v22, %v3982_v49  ;;  %v12618_v59 = vrot.slane %v4747_v37, 5  ;;  %v9061_v1 = vpop.f32.mrb[36].mxu0  ;;  %v4885_v49 = vshll.u32 %v12230_v61, 16 }
 0x2b0   : > { %3981 = vst [vmem:[#allocation2 + $0xc4] sm:$0xf] %v3820_v15  ;;  %3984 = vst [vmem:[#allocation2 + $0xc8] sm:$0x1] %v3983_v6  ;;  %v3803_v36 = vsel %vm11500_vm15, %v3795_v55, %v3802_v38  ;;  %v3976_v18 = vsel %vm11361_vm4, %v3804_v47, %v3975_v62  ;;  %v9062_v26 = vpop.f32.mrb[37].mxu0  ;;  %v14084_v37 = vrot.slane %v12564_v24, 5 }
 0x2b1   : > { %3974 = vst [vmem:[#allocation2 + $0xb8] sm:$0xf] %v3803_v36  ;;  %3977 = vst [vmem:[#allocation2 + $0xbc] sm:$0x1] %v3976_v18  ;;  %v5380_v27 = vshll.u32 %v12611_v41, 16  ;;  %v5384_v47 = vshrl.u32 %v12611_v41, 16  ;;  %v12642_v63 = vadd.f32 %v9062_v26, %v9061_v1  ;;  %v4754_v55 = vor.u32 %v12597_v32, %v12618_v59 }
 0x2b2   : > { %v12636_v14 = vsel %vm9852_vm2, %v5121_v12, %v14084_v37  ;;  %v12640_v48 = vld [vmem:[#allocation2 + $0x60] sm:$0xf]  ;;  %v9064_v35 = vpop.f32.mrb[38].mxu0  ;;  %v14087_v61 = vrot.slane %v12484_v52, 5  ;;  %v12650_v12 = vrot.slane %v4906_v57, 4  ;;  %v12652_v16 = vrot.slane %v4909_v50, 5 }
 0x2b3   : > { %14085 = vst [vmem:[#allocation50_spill] sm:$0xff] %v12636_v14  ;;  %14086 = vst [vmem:[#allocation51_spill] sm:$0xff] %v12642_v63  ;;  %v9065_v22 = vpop.f32.mrb[39].mxu0  ;;  %v4431_v62 = vld [vmem:[#allocation2 + $0xa8] sm:$0xe]  ;;  %v5374_v39 = vshll.u32 %v12590_v54, 16  ;;  %v14093_v37 = vor.u32 %v12573_v8, %v12562_v44 }
 0x2b4   : > { %v4583_v13 = vrot.slane %v14087_v61, 4  ;;  %14088 = vst [vmem:[#allocation52_spill] sm:$0xff] %v12650_v12  ;;  %14089 = vst [vmem:[#allocation53_spill] sm:$0xff] %v12652_v16  ;;  %v12657_v38 = vrot.slane %v4882_v21, 4  ;;  %v12660_v6 = vadd.f32 %v9065_v22, %v9064_v35  ;;  %v4584_v36 = vrot.slane %v12488_v3, 5 }
 0x2b5   : > { %v12663_v18 = vrot.slane %v4885_v49, 5  ;;  %v12666_v50 = vrot.slane %v5380_v27, 5  ;;  %v12668_v1 = vrot.slane %v5384_v47, 4  ;;  %v8464_v26 = vrot.slane %v4431_v62, 9  ;;  %v12706_v53 = vld [vmem:[#allocation2 + $0xc0] sm:$0xf] }
 0x2b6   : > { %14090 = vst [vmem:[#allocation54_spill] sm:$0xff] %v12657_v38  ;;  %14091 = vst [vmem:[#allocation55_spill] sm:$0xff] %v12660_v6  ;;  %v4585_v32 = vsel %vm9852_vm2, %v4583_v13, %v4584_v36  ;;  %v12672_v21 = vld [vmem:[#allocation2 + $0xb4] sm:$0xf]  ;;  %v12677_v35 = vrot.slane %v14093_v37, 4  ;;  %v14094_v3 = vshrl.u32 %v12590_v54, 16 }
 0x2b7   : > { %14092 = vst [vmem:[#allocation56_spill] sm:$0xff] %v12663_v18  ;;  %v12683_v61 = vld [vmem:[#allocation2 + $0xb4] sm:$0xf]  ;;  %v4394_v27 = vshrl.u32 %v12672_v21, 16  ;;  %v4397_v47 = vshll.u32 %v12672_v21, 16  ;;  %v12687_v22 = vrot.slane %v4754_v55, 4 }
 0x2b8   : > { %v12681_v49 = vrot.slane %v14094_v3, 4  ;;  %14095 = vst [vmem:[#allocation57_spill] sm:$0xff] %v12683_v61  ;;  %v12689_v13 = vrot.slane %v5374_v39, 5  ;;  %v12691_v62 = vld [vmem:[#allocation2 + $0xb8] sm:$0xf]  ;;  %v14097_v8 = vrot.slane %v12484_v52, 5 }
 0x2b9   : > { %14096 = vst [vmem:[#allocation58_spill] sm:$0xff] %v12691_v62  ;;  %v12697_v37 = vld [vmem:[#allocation2 + $0xc4] sm:$0xf]  ;;  %v9067_v3 = vpop.f32.mrb[40].mxu0  ;;  %v4771_v58 = vshll.u32 %v12316_v31, 16  ;;  %v8560_v39 = vcombine.low %v12683_v61, %v12691_v62  ;;  %v14099_v43 = vshrl.u32 %v12316_v31, 16 }
 0x2ba   : > { %v4582_v36 = vsel %vm9852_vm2, %v8464_v26, %v14097_v8  ;;  %14098 = vst [vmem:[#allocation59_spill] sm:$0xff] %v12697_v37  ;;  %v12708_v52 = vld [vmem:[#allocation2 + $0xb8] sm:$0xf]  ;;  %v9068_v26 = vpop.f32.mrb[41].mxu0  ;;  %v5387_v8 = vor.u32 %v12668_v1, %v12666_v50  ;;  %v4032_v6 = vld [vmem:[#allocation2 + $0xbc] sm:$0x1] }
 0x2bb   : > { %v8544_v57 = vcombine.low %v4582_v36, %v4585_v32  ;;  %v12714_v15 = vrot.slane %v14099_v43, 4  ;;  %v4396_v63 = vrot.slane %v4394_v27, 4  ;;  %v4399_v25 = vrot.slane %v4397_v47, 5  ;;  %7322 = vmatprep.mubr.bf16.mxu0 %v8560_v39  ;;  %v9070_v9 = vpop.f32.mrb[42].mxu0  ;;  %v4432_v12 = vld [vmem:[#allocation2 + $0xb4] sm:$0xe] }
 0x2bc   : > { %v4403_v55 = vshll.u32 %v12708_v52, 16  ;;  %v4407_v34 = vshrl.u32 %v12708_v52, 16  ;;  %v8561_v32 = vcombine.low %v12706_v53, %v12697_v37  ;;  %v7068_v36 = vadd.f32 %v12557_v10, %v12543_v46  ;;  %v9071_v18 = vpop.f32.mrb[43].mxu0  ;;  %v8961_v39 = vpop.f32.mrb[12].mxu1  ;;  %v5239_v14 = vld [vmem:[#allocation2 + $0x5c] sm:$0x1] }
 0x2bd   : > { %v4413_v40 = vshll.u32 %v4032_v6, 16  ;;  %v4588_v1 = vrot.slane %v12708_v52, 5  ;;  %7323 = vmatmul.mubr.bf16.gmra.mrb[88].mxu0 %v8544_v57  ;;  %v7071_v43 = vadd.f32 %v12570_v2, %v12543_v46  ;;  %v4400_v27 = vor.u32 %v4399_v25, %v4396_v63  ;;  %v8962_v10 = vpop.f32.mrb[13].mxu1 }
 0x2be   : > { %v4405_v47 = vrot.slane %v4403_v55, 5  ;;  %v4409_v16 = vrot.slane %v4407_v34, 4  ;;  %7330 = vmatprep.mubr.bf16.mxu0 %v8561_v32  ;;  %v4591_v11 = vrot.slane %v4032_v6, 5  ;;  %v9069_v41 = vadd.f32 %v9068_v26, %v9067_v3  ;;  %v8964_v57 = vpop.f32.mrb[14].mxu1 }
 0x2bf   : > { %v4590_v38 = vrot.slane %v4588_v1, 4  ;;  %v9072_v54 = vadd.f32 %v9071_v18, %v9070_v9  ;;  %v4401_v30 = vrot.slane %v4400_v27, 4  ;;  %v12725_v37 = vadd.f32 %v8962_v10, %v8961_v39  ;;  %v8965_v6 = vpop.f32.mrb[15].mxu1  ;;  %v9073_v18 = vpop.f32.mrb[44].mxu0 }
 0x2c0   : > { %v4410_v62 = vor.u32 %v4409_v16, %v4405_v47  ;;  %v12727_v61 = vrot.slane %v4771_v58, 5  ;;  %v8465_v25 = vrot.slane %v4432_v12, 9  ;;  %v12731_v34 = vadd.f32 %v9069_v41, %v7068_v36  ;;  %v8967_v55 = vpop.f32.mrb[16].mxu1  ;;  %v9074_v32 = vpop.f32.mrb[45].mxu0  ;;  %v4630_v36 = vld [vmem:[#allocation2 + $0x50] sm:$0x1] }
 0x2c1   : > { %v4592_v2 = vsel %vm9852_vm2, %v4590_v38, %v4591_v11  ;;  %v12733_v63 = vadd.f32 %v9072_v54, %v7071_v43  ;;  %v4415_v9 = vrot.slane %v4413_v40, 5  ;;  %v5390_v26 = vshll.u32 %v5239_v14, 16  ;;  %v8968_v41 = vpop.f32.mrb[17].mxu1 }
 0x2c2   : > { %14100 = vst [vmem:[#allocation60_spill] sm:$0xff] %v12731_v34  ;;  %v4411_v3 = vrot.slane %v4410_v62, 4  ;;  %v5126_v16 = vrot.slane %v12316_v31, 5  ;;  %v4406_v58 = vsel %vm9896_vm5, %v4401_v30, %v4405_v47  ;;  %v4589_v12 = vsel %vm9852_vm2, %v8465_v25, %v4588_v1  ;;  %v9076_v31 = vpop.f32.mrb[46].mxu0  ;;  %v8970_v30 = vpop.f32.mrb[18].mxu1 }
 0x2c3   : > { %14101 = vst [vmem:[#allocation61_spill] sm:$0xff] %v12733_v63  ;;  %v12740_v11 = vadd.f32 %v8965_v6, %v8964_v57  ;;  %v5377_v54 = vor.u32 %v12689_v13, %v12681_v49  ;;  %v8545_v38 = vcombine.low %v4589_v12, %v4592_v2  ;;  %v12746_v14 = vadd.f32 %v9074_v32, %v9073_v18  ;;  %v9077_v1 = vpop.f32.mrb[47].mxu0  ;;  %v8971_v27 = vpop.f32.mrb[19].mxu1  ;;  %v5030_v6 = vld [vmem:[#allocation2 + $0x48] sm:$0xe]  ;;  %v14128_v63 = vld [vmem:[#allocation26_spill] sm:$0xff] }
 0x2c4   : > { %v4416_v40 = vsel %vm9896_vm5, %v4411_v3, %v4415_v9  ;;  %v12748_v62 = vadd.f32 %v8968_v41, %v8967_v55  ;;  %v5369_v47 = vsel %vm9896_vm5, %v12677_v35, %v12575_v0  ;;  %v5388_v49 = vrot.slane %v5387_v8, 4  ;;  %v5031_v41 = vld [vmem:[#allocation2 + $0x54] sm:$0xe] }
 0x2c5   : > { %14102 = vst [vmem:[#allocation62_spill] sm:$0xff] %v12740_v11  ;;  %14103 = vst [vmem:[#allocation63_spill] sm:$0xff] %v12746_v14  ;;  %v8529_v43 = vcombine.low %v4406_v58, %v4416_v40  ;;  %v4778_v13 = vor.u32 %v12714_v15, %v12727_v61  ;;  %7331 = vmatmul.mubr.bf16.gmra.mrb[92].mxu0 %v8545_v38  ;;  %v8513_v39 = vcombine.low %v12672_v21, %v12708_v52  ;;  %v5240_v58 = vld [vmem:[#allocation2 + $0x68] sm:$0x1] }
 0x2c6   : > { %v12758_v10 = vadd.f32 %v9077_v1, %v9076_v31  ;;  %v12760_v57 = vadd.f32 %v8971_v27, %v8970_v30  ;;  %v14105_v25 = vshll.u32 %v12564_v24, 16  ;;  %7532 = vmatprep.mubr.bf16.mxu0 %v12070_v51  ;;  %v4750_v0 = vsel %vm9896_vm5, %v12582_v60, %v12618_v59  ;;  %v14108_v59 = vld [vmem:[#allocation10_spill] sm:$0xff]  ;;  %v9671_v40 = vld [vmem:[%s13948_s3 + $0x208] sm:$0xff]  }
 0x2c7   : > { %7169 = vmatprep.mubr.bf16.mxu1 %v8529_v43  ;;  %v5378_v15 = vrot.slane %v5377_v54, 4  ;;  %v5392_v35 = vrot.slane %v5390_v26, 5  ;;  %v4781_v8 = vshll.u32 %v4630_v36, 16  ;;  %v14106_v21 = vsel %vm9896_vm5, %v12584_v4, %v12562_v44 }
 0x2c8   : > { %14104 = vst [vmem:[#allocation64_spill] sm:$0xff] %v12758_v10  ;;  %v4759_v2 = vrot.slane %v14105_v25, 5  ;;  %7170 = vmatmul.mubr.bf16.gmra.mrb[60].mxu1 %v8513_v39  ;;  %v12774_v24 = vcombine.low %v14106_v21, %v5369_v47  ;;  %v5128_v52 = vrot.slane %v5126_v16, 4  ;;  %v14107_v3 = vor.u32 %v12314_v7, %v12303_v42 }
 0x2c9   : > { %v14109_v9 = vcombine.low %v11932_v33, %v14108_v59  ;;  %v5393_v18 = vsel %vm9896_vm5, %v5388_v49, %v5392_v35  ;;  %v8471_v55 = vrot.slane %v5030_v6, 9  ;;  %v4779_v44 = vrot.slane %v4778_v13, 4  ;;  %v12818_v49 = vld [vmem:[#allocation2 + $0x6c] sm:$0xf]  ;;  %v14111_v13 = vld [vmem:[#allocation8_spill] sm:$0xff] }
 0x2ca   : > { %v4760_v51 = vsel %vm9896_vm5, %v12687_v22, %v4759_v2  ;;  %v4769_v60 = vrot.slane %v14107_v3, 4  ;;  %v5395_v4 = vshrl.u32 %v12640_v48, 16  ;;  %v5129_v26 = vrot.slane %v4630_v36, 5  ;;  %v12813_v36 = vld [vmem:[#allocation2 + $0x70] sm:$0xf]  ;;  %v14115_v3 = vld [vmem:[#allocation5_spill] sm:$0xff] }
 0x2cb   : > { %7371 = vmatprep.mubr.bf16.mxu1 %v14109_v9  ;;  %v5398_v22 = vshll.u32 %v12640_v48, 16  ;;  %v5404_v12 = vshll.u32 %v12620_v20, 16  ;;  %v5408_v42 = vshrl.u32 %v12620_v20, 16  ;;  %v12791_v7 = vcombine.low %v4750_v0, %v4760_v51  ;;  %v14113_v0 = vld [vmem:[#allocation20_spill] sm:$0xff] }
 0x2cc   : > { %v5383_v33 = vsel %vm9896_vm5, %v5378_v15, %v12666_v50  ;;  %v4783_v32 = vrot.slane %v4781_v8, 5  ;;  %v4795_v54 = vshll.u32 %v12513_v28, 16  ;;  %v12804_v31 = vsel %vm9852_vm2, %v8471_v55, %v5126_v16  ;;  %v14110_v16 = vld [vmem:[#allocation7_spill] sm:$0xff]  ;;  %v14116_v55 = vld [vmem:[#allocation37_spill] sm:$0xff] }
 0x2cd   : > { %v12800_v38 = vcombine.low %v5383_v33, %v5393_v18  ;;  %v12808_v30 = vsel %vm9852_vm2, %v5128_v52, %v5129_v26  ;;  %v4774_v50 = vsel %vm9896_vm5, %v4769_v60, %v12727_v61  ;;  %v5397_v1 = vrot.slane %v5395_v4, 4  ;;  %v9733_v52 = vld [vmem:[%s13948_s3 + $0x200] sm:$0xff]   ;;  %v9674_v60 = vld [vmem:[%s13948_s3 + $0x210] sm:$0xff]   ;;  %v14118_v26 = vld [vmem:[#allocation17_spill] sm:$0xff] }
 0x2ce   : > { %v4784_v43 = vsel %vm9896_vm5, %v4779_v44, %v4783_v32  ;;  %v5414_v27 = vshll.u32 %v5240_v58, 16  ;;  %v5133_v47 = vrot.slane %v12513_v28, 5  ;;  %v14112_v39 = vcombine.low %v14110_v16, %v14111_v13  ;;  %v14117_v4 = vld [vmem:[#allocation16_spill] sm:$0xff]  ;;  %v14120_v33 = vld [vmem:[#allocation33_spill] sm:$0xff]  ;;  %v12858_v16 = vld [vmem:[#allocation2 + $0x7c] sm:$0xf] }
 0x2cf   : > { %v5400_v25 = vrot.slane %v5398_v22, 5  ;;  %v12823_v2 = vrot.slane %v5404_v12, 5  ;;  %v5410_v6 = vrot.slane %v5408_v42, 4  ;;  %v8472_v61 = vrot.slane %v5031_v41, 9 }
 0x2d0   : > { %7533 = vmatmul.mubr.bf16.vlgmr.msra.gmra.mrb[96].mxu0 %v14112_v39  ;;  %v12826_v15 = vrot.slane %v4795_v54, 5  ;;  %v14114_v35 = vshrl.u32 %v12513_v28, 16  ;;  %v5428_v21 = vshll.u32 %v12813_v36, 16  ;;  %v5432_v51 = vshrl.u32 %v12813_v36, 16  ;;  %7372 = vmatmul.mubr.bf16.vlgmr.msra.gmra.mrb[64].mxu1 %v14115_v3  ;;  %v12873_v3 = vld [vmem:[#allocation2 + $0x78] sm:$0xf] }
 0x2d1   : > { %7540 = vmatprep.mubr.bf16.mxu0 %v14113_v0  ;;  %9438 = vmatpush3.bf16.msra.mxu0 %v9733_v52  ;;  %v12841_v28 = vcombine.low %v4774_v50, %v4784_v43  ;;  %v5419_v9 = vshrl.u32 %v12818_v49, 16  ;;  %v5422_v18 = vshll.u32 %v12818_v49, 16  ;;  %v4954_v44 = vshrl.u32 %v14116_v55, 16  ;;  %v4631_v43 = vld [vmem:[#allocation2 + $0x5c] sm:$0x1] }
 0x2d2   : > { %v4801_v8 = vrot.slane %v14114_v35, 4  ;;  %9439 = vmatprep.subr.bf16.mxu0 %v9671_v40  ;;  %9493 = vmatpush3.bf16.msra.mxu1 %v9733_v52  ;;  %v14119_v58 = vcombine.low %v14117_v4, %v14118_v26  ;;  %v12849_v22 = vrot.slane %v5414_v27, 5  ;;  %v12853_v12 = vsel %vm9852_vm2, %v8472_v61, %v5133_v47  ;;  %v14122_v35 = vld [vmem:[#allocation31_spill] sm:$0xff] }
 0x2d3   : > { %v5135_v42 = vrot.slane %v5133_v47, 4  ;;  %v4930_v32 = vshrl.u32 %v14120_v33, 16  ;;  %v4957_v41 = vshll.u32 %v14116_v55, 16  ;;  %9486 = vmatprep.subr.bf16.mxu1 %v9671_v40  ;;  %v5401_v54 = vor.u32 %v5400_v25, %v5397_v1  ;;  %v12867_v47 = vld [vmem:[%s13948_s3 + $0x218] sm:$0xff]  }
 0x2d4   : > { %7379 = vmatprep.mubr.bf16.mxu1 %v14119_v58  ;;  %v5411_v50 = vor.u32 %v5410_v6, %v12823_v2  ;;  %v4933_v13 = vshll.u32 %v14120_v33, 16  ;;  %v4802_v27 = vor.u32 %v4801_v8, %v12826_v15  ;;  %v12862_v39 = vrot.slane %v5428_v21, 5  ;;  %v14121_v6 = vld [vmem:[#allocation30_spill] sm:$0xff]  ;;  %v14125_v58 = vld [vmem:[#allocation9_spill] sm:$0xff]  ;;  %v14126_v33 = vld [vmem:[#allocation11_spill] sm:$0xff] }
 0x2d5   : > { %v5434_v61 = vrot.slane %v5432_v51, 4  ;;  %9440 = vmatpush3.bf16.msra.mxu0 %v9671_v40  ;;  %v5421_v0 = vrot.slane %v5419_v9, 4  ;;  %v5424_v1 = vrot.slane %v5422_v18, 5  ;;  %v12875_v8 = vrot.slane %v4954_v44, 4  ;;  %v5241_v51 = vld [vmem:[#allocation2 + $0x74] sm:$0x1] }
 0x2d6   : > { %9441 = vmatprep.subr.bf16.mxu0 %v9674_v60  ;;  %9494 = vmatpush3.bf16.msra.mxu1 %v9671_v40  ;;  %v4805_v21 = vshll.u32 %v4631_v43, 16  ;;  %v12881_v18 = vrot.slane %v4957_v41, 5  ;;  %v14127_v25 = vcombine.low %v14125_v58, %v14126_v33  ;;  %v5402_v44 = vrot.slane %v5401_v54, 4  ;;  %v14129_v41 = vld [vmem:[#allocation25_spill] sm:$0xff]  ;;  %v14130_v58 = vld [vmem:[#allocation32_spill] sm:$0xff]  ;;  %v14132_v54 = vld [vmem:[#allocation39_spill] sm:$0xff] }
 0x2d7   : > { %9487 = vmatprep.subr.bf16.mxu1 %v9674_v60  ;;  %v5412_v59 = vrot.slane %v5411_v50, 4  ;;  %v12887_v40 = vrot.slane %v4930_v32, 4  ;;  %v12889_v52 = vrot.slane %v4933_v13, 5  ;;  %v4803_v55 = vrot.slane %v4802_v27, 4  ;;  %v9680_v32 = vld [vmem:[%s13948_s3 + $0x220] sm:$0xff]   ;;  %v14134_v13 = vld [vmem:[#allocation22_spill] sm:$0xff] }
 0x2d8   : > { %14123 = vst [vmem:[#allocation10_spill] sm:$0xff] %v12881_v18  ;;  %7541 = vmatmul.mubr.bf16.gmra.mrb[100].mxu0 %v14127_v25  ;;  %v5435_v9 = vor.u32 %v5434_v61, %v12862_v39  ;;  %7380 = vmatmul.mubr.bf16.gmra.mrb[68].mxu1 %v14129_v41  ;;  %v5136_v26 = vrot.slane %v4631_v43, 5  ;;  %v5425_v34 = vor.u32 %v5424_v1, %v5421_v0  ;;  %v5438_v10 = vshll.u32 %v5241_v51, 16  ;;  %v14135_v43 = vld [vmem:[#allocation24_spill] sm:$0xff]  ;;  %v9079_v61 = vpop.f32.mrb[48].mxu0 }
 0x2d9   : > { %7548 = vmatprep.mubr.bf16.mxu0 %v14128_v63  ;;  %9442 = vmatpush3.bf16.msra.mxu0 %v9674_v60  ;;  %v5140_v25 = vrot.slane %v14130_v58, 5  ;;  %v12901_v63 = vadd.f32 %v12501_v45, %v12543_v46  ;;  %v12905_v50 = vadd.f32 %v14132_v54, %v12543_v46  ;;  %v14136_v27 = vcombine.low %v14134_v13, %v14135_v43  ;;  %v9080_v51 = vpop.f32.mrb[49].mxu0  ;;  %v13089_v18 = vld [vmem:[#allocation2 + $0x90] sm:$0xf] }
 0x2da   : > { %9443 = vmatprep.subr.bf16.mxu0 %v12867_v47  ;;  %9495 = vmatpush3.bf16.msra.mxu1 %v9674_v60  ;;  %v4807_v0 = vrot.slane %v4805_v21, 5  ;;  %v4819_v1 = vshll.u32 %v14130_v58, 16  ;;  %v5407_v33 = vsel %vm9896_vm5, %v5402_v44, %v12823_v2  ;;  %v5417_v45 = vsel %vm9896_vm5, %v5412_v59, %v12849_v22  ;;  %v9082_v43 = vpop.f32.mrb[50].mxu0  ;;  %v12929_v59 = vld [vmem:[#allocation2 + $0x68] sm:$0x1] }
 0x2db   : > { %14131 = vst [vmem:[#allocation7_spill] sm:$0xff] %v12901_v63  ;;  %14133 = vst [vmem:[#allocation8_spill] sm:$0xff] %v12905_v50  ;;  %7387 = vmatprep.mubr.bf16.mxu1 %v14136_v27  ;;  %v12919_v41 = vsel %vm9852_vm2, %v5135_v42, %v5136_v26  ;;  %9488 = vmatprep.subr.bf16.mxu1 %v12867_v47  ;;  %v14137_v60 = vor.u32 %v12505_v23, %v12437_v5  ;;  %v5436_v44 = vrot.slane %v5435_v9, 4  ;;  %v5032_v22 = vld [vmem:[#allocation2 + $0x60] sm:$0xe]  ;;  %v9083_v42 = vpop.f32.mrb[51].mxu0 }
 0x2dc   : > { %v7084_v54 = vadd.f32 %v12748_v62, %v12543_v46  ;;  %v9081_v13 = vadd.f32 %v9080_v51, %v9079_v61  ;;  %v4808_v2 = vsel %vm9896_vm5, %v4803_v55, %v4807_v0  ;;  %v5426_v26 = vrot.slane %v5425_v34, 4  ;;  %v9683_v62 = vld [vmem:[%s13948_s3 + $0x228] sm:$0xff]   ;;  %v14140_v34 = vld [vmem:[#allocation14_spill] sm:$0xff] }
 0x2dd   : > { %v4793_v21 = vrot.slane %v14137_v60, 4  ;;  %9444 = vmatpush3.bf16.msra.mxu0 %v12867_v47  ;;  %v5440_v27 = vrot.slane %v5438_v10, 5  ;;  %v5142_v14 = vrot.slane %v5140_v25, 4  ;;  %v14138_v5 = vshrl.u32 %v14130_v58, 16  ;;  %v14141_v10 = vld [vmem:[#allocation15_spill] sm:$0xff] }
 0x2de   : > { %9445 = vmatprep.subr.bf16.mxu0 %v9680_v32  ;;  %v7087_v55 = vadd.f32 %v12760_v57, %v12543_v46  ;;  %v12939_v9 = vadd.f32 %v9081_v13, %v7084_v54  ;;  %v9084_v61 = vadd.f32 %v9083_v42, %v9082_v43  ;;  %9496 = vmatpush3.bf16.msra.mxu1 %v12867_v47  ;;  %v12942_v0 = vrot.slane %v4819_v1, 5  ;;  %v14143_v13 = vld [vmem:[#allocation38_spill] sm:$0xff] }
 0x2df   : > { %v4825_v23 = vrot.slane %v14138_v5, 4  ;;  %v14142_v51 = vcombine.low %v14140_v34, %v14141_v10  ;;  %v12947_v58 = vcombine.low %v5407_v33, %v5417_v45  ;;  %v4798_v57 = vsel %vm9896_vm5, %v4793_v21, %v12826_v15  ;;  %9489 = vmatprep.subr.bf16.mxu1 %v9680_v32  ;;  %v14146_v42 = vld [vmem:[#allocation6_spill] sm:$0xff] }
 0x2e0   : > { %14139 = vst [vmem:[#allocation20_spill] sm:$0xff] %v12939_v9  ;;  %v5143_v54 = vrot.slane %v12929_v59, 5  ;;  %v12956_v47 = vadd.f32 %v9084_v61, %v7087_v55  ;;  %v5441_v1 = vsel %vm9896_vm5, %v5436_v44, %v5440_v27  ;;  %v8473_v43 = vrot.slane %v5032_v22, 9  ;;  %7388 = vmatmul.mubr.bf16.gmra.mrb[72].mxu1 %v14146_v42  ;;  %v12977_v44 = vld [vmem:[%s13948_s3 + $0x230] sm:$0xff]   ;;  %v14148_v22 = vld [vmem:[#allocation36_spill] sm:$0xff]  ;;  %v14149_v27 = vld [vmem:[#allocation29_spill] sm:$0xff] }
 0x2e1   : > { %7549 = vmatmul.mubr.bf16.gmra.mrb[104].mxu0 %v14142_v51  ;;  %v14145_v33 = vor.u32 %v14122_v35, %v14121_v6  ;;  %v12966_v15 = vcombine.low %v4798_v57, %v4808_v2  ;;  %v5443_v5 = vshrl.u32 %v12873_v3, 16  ;;  %v5446_v55 = vshll.u32 %v12873_v3, 16  ;;  %v14147_v6 = vld [vmem:[#allocation34_spill] sm:$0xff]  ;;  %v9085_v61 = vpop.f32.mrb[52].mxu0  ;;  %v14155_v9 = vld [vmem:[#allocation21_spill] sm:$0xff] }
 0x2e2   : > { %7556 = vmatprep.mubr.bf16.mxu0 %v14143_v13  ;;  %14144 = vst [vmem:[#allocation5_spill] sm:$0xff] %v12956_v47  ;;  %9446 = vmatpush3.bf16.msra.mxu0 %v9680_v32  ;;  %v12970_v21 = vsel %vm9852_vm2, %v5142_v14, %v5143_v54  ;;  %v14150_v2 = vcombine.low %v14148_v22, %v14149_v27  ;;  %v9086_v51 = vpop.f32.mrb[53].mxu0  ;;  %v4829_v54 = vshll.u32 %v12929_v59, 16  ;;  %v5452_v13 = vshll.u32 %v12858_v16, 16  ;;  %v13005_v59 = vld [vmem:[#allocation2 + $0x88] sm:$0xf] }
 0x2e3   : > { %v12963_v45 = vrot.slane %v14145_v33, 4  ;;  %9447 = vmatprep.subr.bf16.mxu0 %v9683_v62  ;;  %v5431_v14 = vsel %vm9896_vm5, %v5426_v26, %v12862_v39  ;;  %v12988_v34 = vsel %vm9852_vm2, %v8473_v43, %v5140_v25  ;;  %v4826_v10 = vor.u32 %v4825_v23, %v12942_v0  ;;  %9497 = vmatpush3.bf16.msra.mxu1 %v9680_v32  ;;  %v8973_v39 = vpop.f32.mrb[20].mxu1  ;;  %v9088_v25 = vpop.f32.mrb[54].mxu0  ;;  %v13015_v47 = vld [vmem:[#allocation2 + $0x84] sm:$0xf] }
 0x2e4   : > { %7395 = vmatprep.mubr.bf16.mxu1 %v14150_v2  ;;  %v12991_v57 = vcombine.low %v5431_v14, %v5441_v1  ;;  %v5456_v33 = vshrl.u32 %v12858_v16, 16  ;;  %9490 = vmatprep.subr.bf16.mxu1 %v9683_v62  ;;  %v5002_v42 = vshrl.u32 %v12706_v53, 16  ;;  %v12997_v26 = vadd.f32 %v9086_v51, %v9085_v61  ;;  %v14152_v1 = vld [vmem:[#allocation57_spill] sm:$0xff]  ;;  %v8974_v27 = vpop.f32.mrb[21].mxu1  ;;  %v9089_v2 = vpop.f32.mrb[55].mxu0 }
 0x2e5   : > { %v4822_v32 = vsel %vm9896_vm5, %v12963_v45, %v12942_v0  ;;  %v4978_v43 = vshrl.u32 %v14152_v1, 16  ;;  %v5005_v22 = vshll.u32 %v12706_v53, 16  ;;  %v5242_v61 = vld [vmem:[#allocation2 + $0x80] sm:$0x1]  ;;  %v5445_v14 = vrot.slane %v5443_v5, 4  ;;  %v8976_v60 = vpop.f32.mrb[22].mxu1 }
 0x2e6   : > { %14151 = vst [vmem:[#allocation37_spill] sm:$0xff] %v12997_v26  ;;  %9448 = vmatpush3.bf16.msra.mxu0 %v9683_v62  ;;  %v5448_v51 = vrot.slane %v5446_v55, 5  ;;  %v4981_v35 = vshll.u32 %v14152_v1, 16  ;;  %v13011_v23 = vadd.f32 %v8974_v27, %v8973_v39  ;;  %v13013_v0 = vadd.f32 %v9089_v2, %v9088_v25  ;;  %v14156_v53 = vld [vmem:[#allocation23_spill] sm:$0xff]  ;;  %v8977_v11 = vpop.f32.mrb[23].mxu1  ;;  %v14165_v39 = vld [vmem:[#allocation44_spill] sm:$0xff] }
 0x2e7   : > { %9449 = vmatprep.subr.bf16.mxu0 %v12977_v44  ;;  %v4827_v45 = vrot.slane %v4826_v10, 4  ;;  %9498 = vmatpush3.bf16.msra.mxu1 %v9683_v62  ;;  %v14157_v26 = vcombine.low %v14155_v9, %v14156_v53  ;;  %v4831_v5 = vrot.slane %v4829_v54, 5  ;;  %v13020_v55 = vrot.slane %v5452_v13, 5  ;;  %v9689_v25 = vld [vmem:[%s13948_s3 + $0x238] sm:$0xff]   ;;  %v13032_v9 = vld [vmem:[#allocation2 + $0x70] sm:$0xf] }
 0x2e8   : > { %14153 = vst [vmem:[#allocation16_spill] sm:$0xff] %v13011_v23  ;;  %14154 = vst [vmem:[#allocation17_spill] sm:$0xff] %v13013_v0  ;;  %v5458_v50 = vrot.slane %v5456_v33, 4  ;;  %v13027_v10 = vrot.slane %v5002_v42, 4  ;;  %v13030_v62 = vadd.f32 %v8977_v11, %v8976_v60  ;;  %v4843_v54 = vshll.u32 %v13032_v9, 16  ;;  %v14160_v13 = vld [vmem:[#allocation40_spill] sm:$0xff]  ;;  %7396 = vmatmul.mubr.bf16.gmra.mrb[76].mxu1 %v14165_v39  ;;  %9491 = vmatprep.subr.bf16.mxu1 %v12977_v44 }
 0x2e9   : > { %7557 = vmatmul.mubr.bf16.gmra.mrb[108].mxu0 %v14157_v26  ;;  %v14161_v26 = vld [vmem:[#allocation41_spill] sm:$0xff]  ;;  %v13037_v1 = vrot.slane %v4978_v43, 4  ;;  %v13039_v27 = vrot.slane %v5005_v22, 5  ;;  %v5449_v42 = vor.u32 %v5448_v51, %v5445_v14  ;;  %v13044_v11 = vrot.slane %v4981_v35, 5  ;;  %v13052_v33 = vld [vmem:[#allocation2 + $0x74] sm:$0x1] }
 0x2ea   : > { %14158 = vst [vmem:[#allocation33_spill] sm:$0xff] %v13027_v10  ;;  %7564 = vmatprep.mubr.bf16.mxu0 %v12774_v24  ;;  %14159 = vst [vmem:[#allocation30_spill] sm:$0xff] %v13030_v62  ;;  %v14168_v0 = vld [vmem:[#allocation45_spill] sm:$0xff]  ;;  %v14169_v62 = vld [vmem:[#allocation50_spill] sm:$0xff]  ;;  %v4832_v43 = vsel %vm9896_vm5, %v4827_v45, %v4831_v5  ;;  %v5462_v22 = vshll.u32 %v5242_v61, 16  ;;  %v5459_v14 = vor.u32 %v5458_v50, %v13020_v55  ;;  %v5147_v35 = vrot.slane %v13032_v9, 5 }
 0x2eb   : > { %14162 = vst [vmem:[#allocation31_spill] sm:$0xff] %v13037_v1  ;;  %14163 = vst [vmem:[#allocation9_spill] sm:$0xff] %v13039_v27  ;;  %v14170_v23 = vcombine.low %v14168_v0, %v14169_v62  ;;  %9499 = vmatpush3.bf16.msra.mxu1 %v12977_v44  ;;  %v5033_v51 = vld [vmem:[#allocation2 + $0x6c] sm:$0xe]  ;;  %v5467_v39 = vshrl.u32 %v13015_v47, 16  ;;  %v5470_v53 = vshll.u32 %v13015_v47, 16  ;;  %9450 = vmatpush3.bf16.msra.mxu0 %v12977_v44 }
 0x2ec   : > { %14166 = vst [vmem:[#allocation11_spill] sm:$0xff] %v13044_v11  ;;  %9492 = vmatprep.subr.bf16.mxu1 %v9689_v25  ;;  %v13060_v0 = vrot.slane %v4843_v54, 5  ;;  %v14171_v61 = vld [vmem:[#allocation12_spill] sm:$0xff]  ;;  %v5476_v62 = vshll.u32 %v13005_v59, 16  ;;  %v5480_v50 = vshrl.u32 %v13005_v59, 16  ;;  %9451 = vmatprep.subr.bf16.mxu0 %v9689_v25  ;;  %v13068_v9 = vadd.f32 %v12725_v37, %v12543_v46  ;;  %v14175_v37 = vld [vmem:[#allocation27_spill] sm:$0xff] }
 0x2ed   : > { %7403 = vmatprep.mubr.bf16.mxu1 %v14170_v23  ;;  %v8979_v23 = vpop.f32.mrb[24].mxu1  ;;  %v14172_v45 = vshrl.u32 %v14171_v61, 16  ;;  %v13070_v27 = vcombine.low %v4822_v32, %v4832_v43  ;;  %v5450_v10 = vrot.slane %v5449_v42, 4  ;;  %v13072_v44 = vld [vmem:[#allocation2 + $0x7c] sm:$0xf]  ;;  %v8474_v63 = vrot.slane %v5033_v51, 9 }
 0x2ee   : > { %14173 = vst [vmem:[#allocation26_spill] sm:$0xff] %v13068_v9  ;;  %v8980_v60 = vpop.f32.mrb[25].mxu1  ;;  %v4867_v54 = vshll.u32 %v13072_v44, 16  ;;  %v5150_v11 = vrot.slane %v13052_v33, 5  ;;  %v13078_v1 = vld [vmem:[#allocation2 + $0x94] sm:$0xf] }
 0x2ef   : > { %v4849_v5 = vrot.slane %v14172_v45, 4  ;;  %v13075_v2 = vadd.f32 %v8980_v60, %v8979_v23  ;;  %v8982_v61 = vpop.f32.mrb[26].mxu1  ;;  %v5464_v45 = vrot.slane %v5462_v22, 5  ;;  %9500 = vmatpush3.bf16.msra.mxu1 %v9689_v25  ;;  %v14174_v46 = vld [vmem:[#allocation28_spill] sm:$0xff]  ;;  %v5460_v42 = vrot.slane %v5459_v14, 4  ;;  %9452 = vmatpush3.bf16.msra.mxu0 %v9689_v25  ;;  %v14177_v14 = vld [vmem:[#allocation13_spill] sm:$0xff] }
 0x2f0   : > { %v14176_v9 = vcombine.low %v14174_v46, %v14175_v37  ;;  %v8983_v32 = vpop.f32.mrb[27].mxu1  ;;  %v5149_v43 = vrot.slane %v5147_v35, 4  ;;  %v5469_v24 = vrot.slane %v5467_v39, 4  ;;  %v5472_v4 = vrot.slane %v5470_v53, 5  ;;  %7404 = vmatmul.mubr.bf16.gmra.mrb[80].mxu1 %v12791_v7 }
 0x2f1   : > { %v13084_v60 = vadd.f32 %v8983_v32, %v8982_v61  ;;  %v4850_v22 = vor.u32 %v4849_v5, %v13060_v0  ;;  %v13087_v51 = vrot.slane %v5476_v62, 5  ;;  %v5482_v23 = vrot.slane %v5480_v50, 4  ;;  %v5243_v61 = vld [vmem:[#allocation2 + $0x8c] sm:$0x1] }
 0x2f2   : > { %7565 = vmatmul.mubr.bf16.gmra.mrb[112].mxu0 %v14176_v9  ;;  %v13092_v9 = vrot.slane %v4867_v54, 5  ;;  %v14178_v46 = vshrl.u32 %v14177_v14, 16  ;;  %v5500_v53 = vshll.u32 %v13078_v1, 16  ;;  %v14179_v5 = vcombine.low %v12804_v31, %v12808_v30 }
 0x2f3   : > { %7572 = vmatprep.mubr.bf16.mxu0 %v12800_v38  ;;  %v5504_v38 = vshrl.u32 %v13078_v1, 16  ;;  %v5455_v62 = vsel %vm9896_vm5, %v5450_v10, %v13020_v55  ;;  %v13106_v7 = vsel %vm9852_vm2, %v8474_v63, %v5147_v35  ;;  %v14180_v25 = vor.u32 %v12545_v29, %v12535_v56  ;;  %v4634_v56 = vld [vmem:[#allocation2 + $0x80] sm:$0x1]  ;;  %v5034_v29 = vld [vmem:[#allocation2 + $0x78] sm:$0xe] }
 0x2f4   : > { %v4873_v39 = vrot.slane %v14178_v46, 4  ;;  %7411 = vmatprep.mubr.bf16.mxu1 %v14179_v5  ;;  %v4853_v54 = vshll.u32 %v13052_v33, 16  ;;  %v5465_v37 = vsel %vm9896_vm5, %v5460_v42, %v5464_v45  ;;  %v13116_v31 = vsel %vm9852_vm2, %v5149_v43, %v5150_v11 }
 0x2f5   : > { %v4841_v50 = vrot.slane %v14180_v25, 4  ;;  %v5491_v30 = vshrl.u32 %v13089_v18, 16  ;;  %v5494_v55 = vshll.u32 %v13089_v18, 16  ;;  %v4851_v63 = vrot.slane %v4850_v22, 4  ;;  %v14181_v22 = vld [vmem:[#allocation46_spill] sm:$0xff] }
 0x2f6   : > { %v5473_v10 = vor.u32 %v5472_v4, %v5469_v24  ;;  %v5483_v35 = vor.u32 %v5482_v23, %v13087_v51  ;;  %v5154_v33 = vrot.slane %v13072_v44, 5  ;;  %v5486_v32 = vshll.u32 %v5243_v61, 16  ;;  %v14182_v23 = vld [vmem:[#allocation49_spill] sm:$0xff] }
 0x2f7   : > { %v4874_v14 = vor.u32 %v4873_v39, %v13092_v9  ;;  %v13123_v45 = vrot.slane %v5500_v53, 5  ;;  %v5506_v42 = vrot.slane %v5504_v38, 4  ;;  %v13125_v11 = vcombine.low %v5455_v62, %v5465_v37  ;;  %v5244_v37 = vld [vmem:[#allocation2 + $0x98] sm:$0x1] }
 0x2f8   : > { %v8586_v43 = vcombine.low %v13106_v7, %v13116_v31  ;;  %v4846_v4 = vsel %vm9896_vm5, %v4841_v50, %v13060_v0  ;;  %v4855_v24 = vrot.slane %v4853_v54, 5  ;;  %v14183_v46 = vcombine.low %v14181_v22, %v14182_v23  ;;  %7412 = vmatmul.mubr.bf16.gmra.mrb[84].mxu1 %v12841_v28  ;;  %v5035_v22 = vld [vmem:[#allocation2 + $0x84] sm:$0xe] }
 0x2f9   : > { %v8475_v44 = vrot.slane %v5034_v29, 9  ;;  %v4877_v5 = vshll.u32 %v4634_v56, 16  ;;  %v5493_v39 = vrot.slane %v5491_v30, 4  ;;  %v5496_v53 = vrot.slane %v5494_v55, 5  ;;  %v9736_v29 = vld [vmem:[#allocation2 + $0x88] sm:$0xf] }
 0x2fa   : > { %7573 = vmatmul.mubr.bf16.gmra.mrb[116].mxu0 %v14183_v46  ;;  %v4856_v38 = vsel %vm9896_vm5, %v4851_v63, %v4855_v24  ;;  %v5474_v62 = vrot.slane %v5473_v10, 4  ;;  %v5484_v25 = vrot.slane %v5483_v35, 4  ;;  %v5156_v61 = vrot.slane %v5154_v33, 4  ;;  %v4635_v10 = vld [vmem:[#allocation2 + $0x8c] sm:$0x1] }
 0x2fb   : > { %7580 = vmatprep.mubr.bf16.mxu0 %v12947_v58  ;;  %v5488_v0 = vrot.slane %v5486_v32, 5  ;;  %v4875_v50 = vrot.slane %v4874_v14, 4  ;;  %v5507_v54 = vor.u32 %v5506_v42, %v13123_v45  ;;  %v5161_v23 = vrot.slane %v9736_v29, 5  ;;  %v13152_v46 = vld [vmem:[#allocation2 + $0x9c] sm:$0xf] }
 0x2fc   : > { %v14184_v30 = vcombine.low %v12853_v12, %v12919_v41  ;;  %v13145_v58 = vsel %vm9852_vm2, %v8475_v44, %v5154_v33  ;;  %v5157_v55 = vrot.slane %v4634_v56, 5  ;;  %v14185_v63 = vor.u32 %v14161_v26, %v14160_v13  ;;  %v13163_v56 = vld [vmem:[#allocation2 + $0xa0] sm:$0xf] }
 0x2fd   : > { %v4891_v35 = vshll.u32 %v9736_v29, 16  ;;  %v13150_v32 = vcombine.low %v4846_v4, %v4856_v38  ;;  %v4879_v14 = vrot.slane %v4877_v5, 5  ;;  %v5497_v42 = vor.u32 %v5496_v53, %v5493_v39  ;;  %v14186_v53 = vld [vmem:[#allocation18_spill] sm:$0xff] }
 0x2fe   : > { %7419 = vmatprep.mubr.bf16.mxu1 %v14184_v30  ;;  %v4865_v28 = vrot.slane %v14185_v63, 4  ;;  %v5510_v24 = vshll.u32 %v5244_v37, 16  ;;  %v5479_v12 = vsel %vm9896_vm5, %v5474_v62, %v13087_v51  ;;  %v5489_v41 = vsel %vm9896_vm5, %v5484_v25, %v5488_v0 }
 0x2ff   : > { %v13161_v13 = vsel %vm9852_vm2, %v5156_v61, %v5157_v55  ;;  %v8476_v26 = vrot.slane %v5035_v22, 9  ;;  %v4880_v33 = vsel %vm9896_vm5, %v4875_v50, %v4879_v14  ;;  %v5508_v4 = vrot.slane %v5507_v54, 4  ;;  %v14189_v55 = vld [vmem:[#allocation54_spill] sm:$0xff] }
 0x300   : > { %v5163_v44 = vrot.slane %v5161_v23, 4  ;;  %v5164_v5 = vrot.slane %v4635_v10, 5  ;;  %v13167_v39 = vrot.slane %v4891_v35, 5  ;;  %v14187_v51 = vshrl.u32 %v14186_v53, 16  ;;  %7420 = vmatmul.mubr.bf16.gmra.mrb[88].mxu1 %v12966_v15 }
 0x301   : > { %v5515_v62 = vshrl.u32 %v13152_v46, 16  ;;  %v5518_v25 = vshll.u32 %v13152_v46, 16  ;;  %v14188_v61 = vcombine.low %v12640_v48, %v12620_v20  ;;  %v5498_v37 = vrot.slane %v5497_v42, 4  ;;  %v14190_v20 = vld [vmem:[#allocation56_spill] sm:$0xff] }
 0x302   : > { %v4897_v38 = vrot.slane %v14187_v51, 4  ;;  %v5512_v0 = vrot.slane %v5510_v24, 5  ;;  %v5524_v50 = vshll.u32 %v13163_v56, 16  ;;  %v5528_v54 = vshrl.u32 %v13163_v56, 16  ;;  %v13221_v51 = vld [vmem:[%s13949_s4] ss:$0 sm:$0xff] }
 0x303   : > { %7581 = vmatmul.mubr.bf16.gmra.mrb[120].mxu0 %v14188_v61  ;;  %v13179_v22 = vcombine.low %v5479_v12, %v5489_v41  ;;  %v8587_v29 = vcombine.low %v13145_v58, %v13161_v13  ;;  %v4870_v30 = vsel %vm9896_vm5, %v4865_v28, %v13092_v9  ;;  %v4888_v48 = vor.u32 %v14190_v20, %v14189_v55  ;;  %v13205_v12 = vld [vmem:[#allocation2 + $0xac] sm:$0xf]  ;;  %v9091_v41 = vpop.f32.mrb[56].mxu0  ;;  %v13328_v13 = vld [vmem:[#allocation2 + $0xbc] sm:$0x1] }
 0x304   : > { %7588 = vmatprep.mubr.bf16.mxu0 %v12991_v57  ;;  %v13189_v63 = vcombine.low %v4870_v30, %v4880_v33  ;;  %v5513_v35 = vsel %vm9896_vm5, %v5508_v4, %v5512_v0  ;;  %v13195_v57 = vsel %vm9852_vm2, %v8476_v26, %v5161_v23  ;;  %v13199_v14 = vsel %vm9852_vm2, %v5163_v44, %v5164_v5  ;;  %v9737_v5 = vld [vmem:[#allocation2 + $0x94] sm:$0xf] }
 0x305   : > { %v14191_v9 = vcombine.low %v12988_v34, %v12970_v21  ;;  %v4898_v28 = vor.u32 %v4897_v38, %v13167_v39  ;;  %v4901_v15 = vshll.u32 %v4635_v10, 16  ;;  %v5517_v42 = vrot.slane %v5515_v62, 4  ;;  %v9092_v21 = vpop.f32.mrb[57].mxu0 }
 0x306   : > { %v5520_v24 = vrot.slane %v5518_v25, 5  ;;  %v5503_v23 = vsel %vm9896_vm5, %v5498_v37, %v13123_v45  ;;  %v8604_v26 = vcombine.low %v13089_v18, %v13078_v1  ;;  %v13212_v33 = vrot.slane %v5524_v50, 5  ;;  %v9094_v62 = vpop.f32.mrb[58].mxu0  ;;  %v13225_v25 = vld [vmem:[#allocation2 + $0xa8] sm:$0xf] }
 0x307   : > { %7427 = vmatprep.mubr.bf16.mxu1 %v14191_v9  ;;  %v5530_v4 = vrot.slane %v5528_v54, 4  ;;  %v13214_v34 = vcombine.low %v5503_v23, %v5513_v35  ;;  %v8588_v10 = vcombine.low %v13195_v57, %v13199_v14  ;;  %v4889_v44 = vrot.slane %v4888_v48, 4  ;;  %v9095_v0 = vpop.f32.mrb[59].mxu0  ;;  %v13236_v9 = vld [vmem:[#allocation2 + $0xa4] sm:$0x1] }
 0x308   : > { %v4915_v53 = vshll.u32 %v9737_v5, 16  ;;  %v7100_v45 = vadd.f32 %v13221_v51, %v13075_v2  ;;  %v9093_v38 = vadd.f32 %v9092_v21, %v9091_v41  ;;  %v5548_v61 = vshll.u32 %v13205_v12, 16  ;;  %v5036_v23 = vld [vmem:[#allocation2 + $0x90] sm:$0xe]  ;;  %v3393_v21 = vld [vmem:[#allocation2 + $0xcc] sm:$0x1]  ;;  %7428 = vmatmul.mubr.bf16.gmra.mrb[92].mxu1 %v13070_v27 }
 0x309   : > { %v5552_v37 = vshrl.u32 %v13205_v12, 16  ;;  %v4899_v50 = vrot.slane %v4898_v28, 4  ;;  %v4903_v54 = vrot.slane %v4901_v15, 5  ;;  %v5521_v30 = vor.u32 %v5520_v24, %v5517_v42  ;;  %v14193_v28 = vld [vmem:[#allocation52_spill] sm:$0xff]  ;;  %v14194_v15 = vld [vmem:[#allocation53_spill] sm:$0xff]  ;;  %v14195_v24 = vld [vmem:[#allocation19_spill] sm:$0xff]  ;;  %7435 = vmatprep.mubr.bf16.mxu1 %v8586_v43 }
 0x30a   : > { %v5168_v55 = vrot.slane %v9737_v5, 5  ;;  %v7103_v20 = vadd.f32 %v13221_v51, %v13084_v60  ;;  %v14192_v48 = vcombine.low %v12818_v49, %v12813_v36  ;;  %v13234_v2 = vadd.f32 %v9093_v38, %v7100_v45  ;;  %v3449_v45 = vld [vmem:[#allocation2 + $0xd4] sm:$0x1] }
 0x30b   : > { %v9096_v35 = vadd.f32 %v9095_v0, %v9094_v62  ;;  %v5531_v41 = vor.u32 %v5530_v4, %v13212_v33  ;;  %v4912_v42 = vor.u32 %v14194_v15, %v14193_v28  ;;  %v14196_v60 = vshrl.u32 %v14195_v24, 16  ;;  %v4636_v4 = vld [vmem:[#allocation2 + $0x98] sm:$0x1] }
 0x30c   : > { %7589 = vmatmul.mubr.bf16.gmra.mrb[124].mxu0 %v14192_v48  ;;  %v5539_v36 = vshrl.u32 %v13225_v25, 16  ;;  %v5542_v49 = vshll.u32 %v13225_v25, 16  ;;  %v13249_v62 = vrot.slane %v4915_v53, 5  ;;  %v13251_v0 = vrot.slane %v5548_v61, 5 }
 0x30d   : > { %7596 = vmatprep.mubr.bf16.mxu0 %v13125_v11  ;;  %v4921_v5 = vrot.slane %v14196_v60, 4  ;;  %v13247_v38 = vadd.f32 %v9096_v35, %v7103_v20  ;;  %v5554_v11 = vrot.slane %v5552_v37, 4  ;;  %v4894_v48 = vsel %vm9896_vm5, %v4889_v44, %v13167_v39 }
 0x30e   : > { %v4904_v28 = vsel %vm9896_vm5, %v4899_v50, %v4903_v54  ;;  %v5534_v27 = vshll.u32 %v13236_v9, 16  ;;  %v8477_v20 = vrot.slane %v5036_v23, 9  ;;  %v13262_v35 = vrot.slane %v5521_v30, 4  ;;  %v13273_v30 = vld [vmem:[#allocation2 + $0xb0] sm:$0x1] }
 0x30f   : > { %14197 = vst [vmem:[#allocation25_spill] sm:$0xff] %v13247_v38  ;;  %v5170_v53 = vrot.slane %v5168_v55, 4  ;;  %v3394_v37 = vsel %vm11361_vm4, 0, %v3393_v21  ;;  %v3450_v7 = vsel %vm11369_vm13, 0, %v3449_v45  ;;  %v13268_v31 = vrot.slane %v5531_v41, 4 }
 0x310   : > { %v4925_v43 = vshll.u32 %v4636_v4, 16  ;;  %v5541_v24 = vrot.slane %v5539_v36, 4  ;;  %v5544_v39 = vrot.slane %v5542_v49, 5  ;;  %3395 = vst [vmem:[#allocation2 + $0xcc] sm:$0x1] %v3394_v37  ;;  %v5171_v44 = vrot.slane %v4636_v4, 5  ;;  %7436 = vmatmul.mubr.bf16.gmra.mrb[96].mxu1 %v13150_v32 }
 0x311   : > { %3451 = vst [vmem:[#allocation2 + $0xd4] sm:$0x1] %v3450_v7  ;;  %v13270_v50 = vrot.slane %v4912_v42, 4  ;;  %v4922_v54 = vor.u32 %v4921_v5, %v13249_v62  ;;  %v5555_v23 = vor.u32 %v5554_v11, %v13251_v0  ;;  %v13276_v21 = vcombine.low %v4894_v48, %v4904_v28  ;;  %v9739_v36 = vld [vmem:[#allocation2 + $0xa0] sm:$0xf]  ;;  %v8985_v42 = vpop.f32.mrb[28].mxu1  ;;  %7443 = vmatprep.mubr.bf16.mxu1 %v8587_v29 }
 0x312   : > { %v5536_v60 = vrot.slane %v5534_v27, 5  ;;  %v13280_v41 = vsel %vm9852_vm2, %v8477_v20, %v5168_v55  ;;  %v4939_v49 = vshll.u32 %v9739_v36, 16  ;;  %v14200_v45 = vcombine.low %v12873_v3, %v12858_v16  ;;  %v13295_v11 = vld [vmem:[#allocation2 + $0xa4] sm:$0x1]  ;;  %v13297_v28 = vld [vmem:[#allocation2 + $0xb4] sm:$0xf] }
 0x313   : > { %v5527_v5 = vsel %vm9896_vm5, %v13262_v35, %v13212_v33  ;;  %v13291_v4 = vsel %vm9852_vm2, %v5170_v53, %v5171_v44  ;;  %v8605_v55 = vcombine.low %v13152_v46, %v13163_v56  ;;  %v5175_v48 = vrot.slane %v9739_v36, 5  ;;  %v8986_v16 = vpop.f32.mrb[29].mxu1  ;;  %v5037_v35 = vld [vmem:[#allocation2 + $0x9c] sm:$0xe]  ;;  %v9097_v53 = vpop.f32.mrb[60].mxu0 }
 0x314   : > { %7597 = vmatmul.mubr.bf16.gmra.mrb[128].mxu0 %v14200_v45  ;;  %v5537_v3 = vsel %vm9896_vm5, %v13268_v31, %v5536_v60  ;;  %v4927_v33 = vrot.slane %v4925_v43, 5  ;;  %v5545_v27 = vor.u32 %v5544_v39, %v5541_v24  ;;  %v5558_v20 = vshll.u32 %v13273_v30, 16  ;;  %v8988_v37 = vpop.f32.mrb[30].mxu1  ;;  %v13311_v44 = vld [vmem:[#allocation2 + $0xb8] sm:$0xf]  ;;  %v9098_v31 = vpop.f32.mrb[61].mxu0 }
 0x315   : > { %7604 = vmatprep.mubr.bf16.mxu0 %v13179_v22  ;;  %v13305_v61 = vadd.f32 %v8986_v16, %v8985_v42  ;;  %v4918_v22 = vsel %vm9896_vm5, %v13270_v50, %v13249_v62  ;;  %v4923_v15 = vrot.slane %v4922_v54, 4  ;;  %v5556_v7 = vrot.slane %v5555_v23, 4  ;;  %v8989_v43 = vpop.f32.mrb[31].mxu1  ;;  %v9100_v50 = vpop.f32.mrb[62].mxu0 }
 0x316   : > { %v13316_v32 = vrot.slane %v4939_v49, 5  ;;  %v14201_v24 = vshrl.u32 %v14147_v6, 16  ;;  %v5563_v60 = vshrl.u32 %v13297_v28, 16  ;;  %v5566_v36 = vshll.u32 %v13297_v28, 16  ;;  %v9101_v29 = vpop.f32.mrb[63].mxu0 }
 0x317   : > { %v13322_v62 = vadd.f32 %v9098_v31, %v9097_v53  ;;  %v13324_v54 = vadd.f32 %v8989_v43, %v8988_v37  ;;  %v5177_v23 = vrot.slane %v5175_v48, 4  ;;  %v4936_v58 = vor.u32 %v12889_v52, %v12887_v40 }
 0x318   : > { %v4945_v39 = vrot.slane %v14201_v24, 4  ;;  %v5546_v49 = vrot.slane %v5545_v27, 4  ;;  %v5560_v45 = vrot.slane %v5558_v20, 5  ;;  %v8478_v6 = vrot.slane %v5037_v35, 9  ;;  %7444 = vmatmul.mubr.bf16.gmra.mrb[100].mxu1 %v13189_v63 }
 0x319   : > { %v5178_v42 = vrot.slane %v13295_v11, 5  ;;  %v13331_v16 = vadd.f32 %v9101_v29, %v9100_v50  ;;  %v4928_v53 = vsel %vm9896_vm5, %v4923_v15, %v4927_v33  ;;  %v5572_v37 = vshll.u32 %v13311_v44, 16  ;;  %7451 = vmatprep.mubr.bf16.mxu1 %v8588_v10 }
 0x31a   : > { %v5576_v31 = vshrl.u32 %v13311_v44, 16  ;;  %v5561_v52 = vsel %vm9896_vm5, %v5556_v7, %v5560_v45  ;;  %v4946_v40 = vor.u32 %v4945_v39, %v13316_v32  ;;  %v5565_v43 = vrot.slane %v5563_v60, 4 }
 0x31b   : > { %v5568_v27 = vrot.slane %v5566_v36, 5  ;;  %v14202_v20 = vcombine.low %v13015_v47, %v13005_v59  ;;  %v13345_v35 = vsel %vm9852_vm2, %v5177_v23, %v5178_v42  ;;  %v13347_v33 = vrot.slane %v4936_v58, 4  ;;  %v13360_v59 = vld [vmem:[#allocation2 + $0xb0] sm:$0x1]  ;;  %v9740_v58 = vld [vmem:[#allocation2 + $0xac] sm:$0xf] }
 0x31c   : > { %v4949_v15 = vshll.u32 %v13295_v11, 16  ;;  %v5582_v24 = vshll.u32 %v13328_v13, 16  ;;  %v8621_v7 = vcombine.low %v5527_v5, %v5537_v3  ;;  %v8589_v39 = vcombine.low %v13280_v41, %v13291_v4  ;;  %v5038_v4 = vld [vmem:[#allocation2 + $0xa8] sm:$0xe]  ;;  %v13370_v3 = vld [vmem:[#allocation2 + $0xc0] sm:$0xf] }
 0x31d   : > { %7605 = vmatmul.mubr.bf16.gmra.mrb[132].mxu0 %v14202_v20  ;;  %v13354_v60 = vcombine.low %v4918_v22, %v4928_v53  ;;  %v13358_v47 = vsel %vm9852_vm2, %v8478_v6, %v5175_v48  ;;  %v5551_v11 = vsel %vm9896_vm5, %v5546_v49, %v13251_v0  ;;  %v13368_v5 = vrot.slane %v5572_v37, 5  ;;  %v13385_v49 = vld [vmem:[#allocation2 + $0xc4] sm:$0xf]  ;;  %v8991_v6 = vpop.f32.mrb[32].mxu1  ;;  %v9103_v53 = vpop.f32.mrb[64].mxu0  ;;  %v14203_v37 = vld [vmem:[#allocation10_spill] sm:$0xff] }
 0x31e   : > { %7612 = vmatprep.mubr.bf16.mxu0 %v13214_v34  ;;  %v5578_v41 = vrot.slane %v5576_v31, 4  ;;  %v13375_v48 = vcombine.low %v5551_v11, %v5561_v52  ;;  %v8590_v63 = vcombine.low %v13358_v47, %v13345_v35  ;;  %v4947_v22 = vrot.slane %v4946_v40, 4  ;;  %v8992_v40 = vpop.f32.mrb[33].mxu1  ;;  %v9104_v20 = vpop.f32.mrb[65].mxu0 }
 0x31f   : > { %v5569_v0 = vor.u32 %v5568_v27, %v5565_v43  ;;  %v4942_v36 = vsel %vm9896_vm5, %v13347_v33, %v13316_v32  ;;  %v4951_v50 = vrot.slane %v4949_v15, 5  ;;  %v13383_v23 = vrot.slane %v5582_v24, 5  ;;  %v8994_v11 = vpop.f32.mrb[34].mxu1  ;;  %v14204_v32 = vld [vmem:[#allocation35_spill] sm:$0xff] }
 0x320   : > { %v5182_v29 = vrot.slane %v9740_v58, 5  ;;  %v8479_v57 = vrot.slane %v5038_v4, 9  ;;  %v5185_v14 = vrot.slane %v13360_v59, 5  ;;  %v4963_v10 = vshll.u32 %v9740_v58, 16  ;;  %7452 = vmatmul.mubr.bf16.gmra.mrb[104].mxu1 %v13276_v21 }
 0x321   : > { %v5587_v45 = vshrl.u32 %v13370_v3, 16  ;;  %v5579_v42 = vor.u32 %v5578_v41, %v13368_v5  ;;  %v4960_v31 = vor.u32 %v14203_v37, %v12875_v8  ;;  %v5590_v52 = vshll.u32 %v13370_v3, 16  ;;  %7459 = vmatprep.mubr.bf16.mxu1 %v8589_v39 }
 0x322   : > { %v4952_v43 = vsel %vm9896_vm5, %v4947_v22, %v4951_v50  ;;  %v13397_v27 = vrot.slane %v5569_v0, 4  ;;  %v5596_v33 = vshll.u32 %v13385_v49, 16  ;;  %v5600_v15 = vshrl.u32 %v13385_v49, 16  ;;  %v9106_v22 = vpop.f32.mrb[66].mxu0  ;;  %v13408_v0 = vld [vmem:[#allocation2 + $0xd0] sm:$0xf] }
 0x323   : > { %v8993_v24 = vadd.f32 %v8992_v40, %v8991_v6  ;;  %v13406_v8 = vsel %vm9852_vm2, %v8479_v57, %v5182_v29  ;;  %v5184_v41 = vrot.slane %v5182_v29, 4  ;;  %v9105_v4 = vadd.f32 %v9104_v20, %v9103_v53  ;;  %v8995_v50 = vpop.f32.mrb[35].mxu1  ;;  %v9107_v58 = vpop.f32.mrb[67].mxu0 }
 0x324   : > { %v13410_v37 = vrot.slane %v4963_v10, 5  ;;  %v14205_v34 = vshrl.u32 %v14204_v32, 16  ;;  %v4973_v1 = vshll.u32 %v13360_v59, 16  ;;  %v8996_v29 = vadd.f32 %v8995_v50, %v8994_v11  ;;  %v13445_v11 = vld [vmem:[#allocation2 + $0xbc] sm:$0x1] }
 0x325   : > { %7613 = vmatmul.mubr.bf16.gmra.mrb[136].mxu0 %v8604_v26  ;;  %v5589_v26 = vrot.slane %v5587_v45, 4  ;;  %v7116_v57 = vadd.f32 %v13221_v51, %v8993_v24  ;;  %v9108_v6 = vadd.f32 %v9107_v58, %v9106_v22  ;;  %v5592_v53 = vrot.slane %v5590_v52, 5 }
 0x326   : > { %7620 = vmatprep.mubr.bf16.mxu0 %v8621_v7  ;;  %v4969_v18 = vrot.slane %v14205_v34, 4  ;;  %v13417_v40 = vrot.slane %v5596_v33, 5  ;;  %v5602_v7 = vrot.slane %v5600_v15, 4  ;;  %v5620_v10 = vshll.u32 %v13408_v0, 16  ;;  %v13437_v15 = vld [vmem:[#allocation2 + $0xc8] sm:$0x1] }
 0x327   : > { %v5624_v20 = vshrl.u32 %v13408_v0, 16  ;;  %v7119_v34 = vadd.f32 %v13221_v51, %v8996_v29  ;;  %v13422_v32 = vcombine.low %v4942_v36, %v4952_v43  ;;  %v5580_v59 = vrot.slane %v5579_v42, 4  ;;  %v13439_v36 = vld [vmem:[#allocation2 + $0xcc] sm:$0xf] }
 0x328   : > { %v13424_v45 = vadd.f32 %v9105_v4, %v7116_v57  ;;  %v5575_v21 = vsel %vm9896_vm5, %v13397_v27, %v13368_v5  ;;  %v13432_v39 = vsel %vm9852_vm2, %v5184_v41, %v5185_v14  ;;  %v13434_v52 = vrot.slane %v4960_v31, 4  ;;  %v13447_v5 = vld [vmem:[#allocation2 + $0xb8] sm:$0xf]  ;;  %v9109_v27 = vpop.f32.mrb[68].mxu0  ;;  %7460 = vmatmul.mubr.bf16.gmra.mrb[108].mxu1 %v13354_v60  ;;  %v14208_v60 = vld [vmem:[#allocation58_spill] sm:$0xff] }
 0x329   : > { %v4970_v33 = vor.u32 %v4969_v18, %v13410_v37  ;;  %v13441_v42 = vadd.f32 %v9108_v6, %v7119_v34  ;;  %v13443_v43 = vrot.slane %v4973_v1, 5  ;;  %v5593_v24 = vor.u32 %v5592_v53, %v5589_v26  ;;  %v9110_v41 = vpop.f32.mrb[69].mxu0  ;;  %v8997_v18 = vpop.f32.mrb[36].mxu1  ;;  %7467 = vmatprep.mubr.bf16.mxu1 %v8590_v63 }
 0x32a   : > { %14206 = vst [vmem:[#allocation32_spill] sm:$0xff] %v13424_v45  ;;  %v14003_v14 = vrot.slane %v13447_v5, 5  ;;  %v5603_v31 = vor.u32 %v5602_v7, %v13417_v40  ;;  %v4987_v4 = vshll.u32 %v13447_v5, 16  ;;  %v13452_v22 = vrot.slane %v5620_v10, 5  ;;  %v9112_v26 = vpop.f32.mrb[70].mxu0  ;;  %v8998_v7 = vpop.f32.mrb[37].mxu1 }
 0x32b   : > { %14207 = vst [vmem:[#allocation39_spill] sm:$0xff] %v13441_v42  ;;  %v5626_v50 = vrot.slane %v5624_v20, 4  ;;  %v5606_v58 = vshll.u32 %v13437_v15, 16  ;;  %v13458_v1 = vadd.f32 %v9110_v41, %v9109_v27  ;;  %v5611_v57 = vshrl.u32 %v13439_v36, 16  ;;  %v9113_v10 = vpop.f32.mrb[71].mxu0 }
 0x32c   : > { %v5614_v29 = vshll.u32 %v13439_v36, 16  ;;  %v5585_v6 = vsel %vm9896_vm5, %v5580_v59, %v13383_v23  ;;  %v8591_v46 = vcombine.low %v13406_v8, %v13432_v39  ;;  %v5192_v53 = vrot.slane %v13445_v11, 5  ;;  %v13471_v20 = vld [vmem:[#allocation2 + $0xd4] sm:$0x1]  ;;  %v9000_v8 = vpop.f32.mrb[38].mxu1 }
 0x32d   : > { %7621 = vmatmul.mubr.bf16.gmra.mrb[140].mxu0 %v8605_v55  ;;  %v13468_v55 = vrot.slane %v4970_v33, 4  ;;  %v13474_v34 = vrot.slane %v5593_v24, 4  ;;  %v5191_v23 = vrot.slane %v14003_v14, 4  ;;  %v13480_v59 = vadd.f32 %v8998_v7, %v8997_v18  ;;  %v9001_v27 = vpop.f32.mrb[39].mxu1 }
 0x32e   : > { %7628 = vmatprep.mubr.bf16.mxu0 %v13375_v48  ;;  %v13476_v48 = vld [vmem:[#allocation2 + $0xb4] sm:$0xe]  ;;  %v13482_v39 = vadd.f32 %v9113_v10, %v9112_v26  ;;  %v5604_v33 = vrot.slane %v5603_v31, 4  ;;  %v13487_v41 = vrot.slane %v4987_v4, 5  ;;  %v14209_v24 = vshrl.u32 %v14208_v60, 16 }
 0x32f   : > { %v5627_v45 = vor.u32 %v5626_v50, %v13452_v22  ;;  %v13494_v14 = vadd.f32 %v9001_v27, %v9000_v8  ;;  %v5613_v18 = vrot.slane %v5611_v57, 4  ;;  %v5616_v7 = vrot.slane %v5614_v29, 5  ;;  %v14210_v50 = vld [vmem:[#allocation31_spill] sm:$0xff] }
 0x330   : > { %v13491_v42 = vrot.slane %v14209_v24, 4  ;;  %v5630_v26 = vshll.u32 %v13471_v20, 16  ;;  %v8623_v10 = vcombine.low %v5575_v21, %v5585_v6  ;;  %v4966_v35 = vsel %vm9896_vm5, %v13434_v52, %v13410_v37  ;;  %v14211_v57 = vld [vmem:[#allocation11_spill] sm:$0xff]  ;;  %v5647_v52 = vld [vmem:[#allocation2 + $0xb4] sm:$0xe]  ;;  %7468 = vmatmul.mubr.bf16.gmra.mrb[112].mxu1 %v13422_v32 }
 0x331   : > { %v5608_v47 = vrot.slane %v5606_v58, 5  ;;  %v8480_v63 = vrot.slane %v13476_v48, 9  ;;  %v4976_v31 = vsel %vm9896_vm5, %v13468_v55, %v13443_v43  ;;  %v5599_v4 = vsel %vm9896_vm5, %v13474_v34, %v13417_v40  ;;  %v13520_v43 = vld [vmem:[#allocation2 + $0xc4] sm:$0xf]  ;;  %v5648_v55 = vld [vmem:[#allocation2 + $0xc0] sm:$0xe]  ;;  %7475 = vmatprep.mubr.bf16.mxu1 %v8591_v46 }
 0x332   : > { %v13512_v21 = vsel %vm9852_vm2, %v5191_v23, %v5192_v53  ;;  %v4994_v29 = vor.u32 %v13491_v42, %v13487_v41  ;;  %v5791_v40 = vrot.slane %v13311_v44, 5  ;;  %v5649_v34 = vld [vmem:[#allocation2 + $0xcc] sm:$0xe]  ;;  %v14212_v53 = vcombine.low %v13225_v25, %v13205_v12  ;;  %v9003_v48 = vpop.f32.mrb[40].mxu1  ;;  %v14218_v6 = vld [vmem:[#allocation51_spill] sm:$0xff] }
 0x333   : > { %v5609_v58 = vsel %vm9896_vm5, %v5604_v33, %v5608_v47  ;;  %v5617_v23 = vor.u32 %v5616_v7, %v5613_v18  ;;  %v13527_v8 = vrot.slane %v5627_v45, 4  ;;  %v13529_v33 = vrot.slane %v5630_v26, 5  ;;  %v9004_v27 = vpop.f32.mrb[41].mxu1 }
 0x334   : > { %v5011_v42 = vshll.u32 %v13520_v43, 16  ;;  %v8495_v60 = vrot.slane %v5647_v52, 9  ;;  %v5793_v24 = vrot.slane %v5791_v40, 4  ;;  %v5794_v47 = vrot.slane %v13328_v13, 5 }
 0x335   : > { %7629 = vmatmul.mubr.bf16.gmra.mrb[144].mxu0 %v14212_v53  ;;  %v5798_v37 = vrot.slane %v13385_v49, 5  ;;  %v13535_v25 = vadd.f32 %v9004_v27, %v9003_v48  ;;  %v9006_v53 = vpop.f32.mrb[42].mxu1  ;;  %v8496_v18 = vrot.slane %v5648_v55, 9  ;;  %v8497_v45 = vrot.slane %v5649_v34, 9 }
 0x336   : > { %7636 = vmatprep.mubr.bf16.mxu0 %v8623_v10  ;;  %v5805_v7 = vrot.slane %v13408_v0, 5  ;;  %v9007_v26 = vpop.f32.mrb[43].mxu1  ;;  %v13540_v10 = vsel %vm9852_vm2, %v8495_v60, %v5791_v40  ;;  %v13544_v13 = vsel %vm9852_vm2, %v5793_v24, %v5794_v47  ;;  %v5801_v32 = vrot.slane %v13437_v15, 5  ;;  %v14213_v60 = vld [vmem:[#allocation42_spill] sm:$0xff]  ;;  %v14214_v24 = vld [vmem:[#allocation47_spill] sm:$0xff] }
 0x337   : > { %v5800_v52 = vrot.slane %v5798_v37, 4  ;;  %v13547_v48 = vadd.f32 %v9007_v26, %v9006_v53  ;;  %v13553_v46 = vsel %vm9852_vm2, %v8496_v18, %v5798_v37  ;;  %v5808_v15 = vrot.slane %v13471_v20, 5  ;;  %v14215_v18 = vld [vmem:[#allocation43_spill] sm:$0xff]  ;;  %v14216_v26 = vld [vmem:[#allocation48_spill] sm:$0xff]  ;;  %v4640_v20 = vld [vmem:[#allocation2 + $0xc8] sm:$0x1] }
 0x338   : > { %v13557_v40 = vsel %vm9852_vm2, %v8497_v45, %v5805_v7  ;;  %v5807_v27 = vrot.slane %v5805_v7, 4  ;;  %v13566_v47 = vadd.f32 %v14214_v24, %v14213_v60  ;;  %v5618_v53 = vrot.slane %v5617_v23, 4  ;;  %v14217_v45 = vld [vmem:[#allocation7_spill] sm:$0xff]  ;;  %v14219_v23 = vld [vmem:[#allocation8_spill] sm:$0xff] }
 0x339   : > { %v13561_v34 = vsel %vm9852_vm2, %v5800_v52, %v5801_v32  ;;  %v13572_v55 = vadd.f32 %v14216_v26, %v14215_v18  ;;  %v13576_v38 = vadd.f32 %v14218_v6, %v14217_v45  ;;  %v8624_v52 = vcombine.low %v5599_v4, %v5609_v58  ;;  %v14220_v60 = vld [vmem:[#allocation55_spill] sm:$0xff] }
 0x33a   : > { %v8640_v37 = vcombine.low %v13553_v46, %v13561_v34  ;;  %v4997_v7 = vshll.u32 %v13445_v11, 16  ;;  %v13581_v32 = vsel %vm9852_vm2, %v5807_v27, %v5808_v15  ;;  %v13585_v24 = vadd.f32 %v14220_v60, %v14219_v23  ;;  %v5040_v23 = vld [vmem:[#allocation2 + $0xc0] sm:$0xe] }
 0x33b   : > { %v14221_v18 = vcombine.low %v13297_v28, %v13311_v44  ;;  %v8575_v26 = vcombine.low %v4966_v35, %v4976_v31  ;;  %v14222_v6 = vrot.slane %v13447_v5, 5  ;;  %v14223_v11 = vrot.slane %v13520_v43, 5  ;;  %v14224_v28 = vld [vmem:[#allocation59_spill] sm:$0xff] }
 0x33c   : > { %v8641_v27 = vcombine.low %v13557_v40, %v13581_v32  ;;  %v4995_v45 = vrot.slane %v4994_v29, 4  ;;  %v13599_v60 = vrot.slane %v5011_v42, 5  ;;  %v14225_v44 = vshrl.u32 %v14224_v28, 16 }
 0x33d   : > { %7637 = vmatmul.mubr.bf16.gmra.mrb[148].mxu0 %v14221_v18  ;;  %v5190_v4 = vsel %vm9852_vm2, %v8480_v63, %v14222_v6  ;;  %v5198_v58 = vrot.slane %v14223_v11, 4  ;;  %7476 = vmatmul.mubr.bf16.gmra.mrb[116].mxu1 %v8575_v26  ;;  %v5199_v5 = vrot.slane %v4640_v20, 5  ;;  %v5623_v63 = vsel %vm9896_vm5, %v5618_v53, %v13452_v22  ;;  %v14227_v6 = vld [vmem:[#allocation62_spill] sm:$0xff]  ;;  %v14228_v53 = vld [vmem:[#allocation33_spill] sm:$0xff] }
 0x33e   : > { %7644 = vmatprep.mubr.bf16.mxu0 %v8624_v52  ;;  %v8592_v15 = vcombine.low %v5190_v4, %v13512_v21  ;;  %v5017_v35 = vrot.slane %v14225_v44, 4  ;;  %v5633_v31 = vsel %vm9896_vm5, %v13527_v8, %v13529_v33  ;;  %v14226_v21 = vor.u32 %v14211_v57, %v14210_v50  ;;  %v9743_v52 = vld [vmem:[#allocation2 + $0x1c] sm:$0xf]  ;;  %v14229_v11 = vld [vmem:[#allocation9_spill] sm:$0xff]  ;;  %v14230_v57 = vld [vmem:[#allocation26_spill] sm:$0xff] }
 0x33f   : > { %v4999_v42 = vrot.slane %v4997_v7, 5  ;;  %v5700_v18 = vrot.slane %v9743_v52, 5  ;;  %v7079_v26 = vadd.f32 %v13221_v51, %v14227_v6  ;;  %v8481_v4 = vrot.slane %v5040_v23, 9  ;;  %v14231_v7 = vld [vmem:[#allocation63_spill] sm:$0xff]  ;;  %v9744_v23 = vld [vmem:[#allocation2 + $0x34] sm:$0xf] }
 0x340   : > { %7483 = vmatprep.mubr.bf16.mxu1 %v8592_v15  ;;  %v4985_v29 = vrot.slane %v14226_v21, 4  ;;  %v5200_v22 = vsel %vm9852_vm2, %v5198_v58, %v5199_v5  ;;  %v5008_v28 = vor.u32 %v14229_v11, %v14228_v53  ;;  %v8625_v33 = vcombine.low %v5623_v63, %v5633_v31  ;;  %v9115_v6 = vpop.f32.mrb[72].mxu0  ;;  %v9745_v53 = vld [vmem:[#allocation2 + $0x20] sm:$0x1] }
 0x341   : > { %v5000_v8 = vsel %vm9896_vm5, %v4995_v45, %v4999_v42  ;;  %v5018_v50 = vor.u32 %v5017_v35, %v13599_v60  ;;  %v13624_v15 = vadd.f32 %v14231_v7, %v14230_v57  ;;  %v8608_v44 = vcombine.low %v13370_v3, %v13385_v49  ;;  %v5634_v35 = vld [vmem:[#allocation2 + $0x18] sm:$0xe]  ;;  %v9116_v57 = vpop.f32.mrb[73].mxu0  ;;  %v14233_v7 = vld [vmem:[#allocation64_spill] sm:$0xff] }
 0x342   : > { %v5714_v21 = vrot.slane %v9744_v23, 5  ;;  %v4990_v58 = vsel %vm9896_vm5, %v4985_v29, %v13487_v41  ;;  %v14232_v5 = vrot.slane %v13520_v43, 5  ;;  %v5021_v63 = vshll.u32 %v4640_v20, 16  ;;  %v5636_v29 = vld [vmem:[#allocation2 + $0x30] sm:$0xe] }
 0x343   : > { %v5702_v31 = vrot.slane %v5700_v18, 4  ;;  %v8576_v42 = vcombine.low %v4990_v58, %v5000_v8  ;;  %v5009_v3 = vrot.slane %v5008_v28, 4  ;;  %v5019_v49 = vrot.slane %v5018_v50, 4  ;;  %v9118_v8 = vpop.f32.mrb[74].mxu0  ;;  %v9747_v23 = vld [vmem:[#allocation2 + $0x28] sm:$0xf] }
 0x344   : > { %v5197_v45 = vsel %vm9852_vm2, %v8481_v4, %v14232_v5  ;;  %v5703_v11 = vrot.slane %v9745_v53, 5  ;;  %v13636_v41 = vadd.f32 %v14233_v7, %v7079_v26  ;;  %v7132_v43 = vadd.f32 %v13221_v51, %v13535_v25  ;;  %v9119_v26 = vpop.f32.mrb[75].mxu0  ;;  %v5635_v7 = vld [vmem:[#allocation2 + $0x24] sm:$0xe] }
 0x345   : > { %7645 = vmatmul.mubr.bf16.gmra.mrb[152].mxu0 %v8608_v44  ;;  %v8593_v52 = vcombine.low %v5197_v45, %v5200_v22  ;;  %7484 = vmatmul.mubr.bf16.gmra.mrb[120].mxu1 %v8576_v42  ;;  %v8482_v20 = vrot.slane %v5634_v35, 9  ;;  %v5716_v4 = vrot.slane %v5714_v21, 4  ;;  %v9117_v44 = vadd.f32 %v9116_v57, %v9115_v6 }
 0x346   : > { %7652 = vmatprep.mubr.bf16.mxu0 %v8625_v33  ;;  %v5023_v22 = vrot.slane %v5021_v63, 5  ;;  %v5704_v28 = vsel %vm9852_vm2, %v5702_v31, %v5703_v11  ;;  %v9746_v33 = vld [vmem:[#allocation2 + $0x38] sm:$0x1]  ;;  %v5707_v58 = vrot.slane %v9747_v23, 5  ;;  %v7135_v5 = vadd.f32 %v13221_v51, %v13547_v48  ;;  %v9749_v11 = vld [vmem:[#allocation2 + $0x4c] sm:$0xf] }
 0x347   : > { %7491 = vmatprep.mubr.bf16.mxu1 %v8593_v52  ;;  %v5717_v50 = vrot.slane %v9746_v33, 5  ;;  %v8609_v25 = vcombine.low %v13439_v36, %v13408_v0  ;;  %v13646_v45 = vadd.f32 %v9117_v44, %v7132_v43  ;;  %v9120_v35 = vadd.f32 %v9119_v26, %v9118_v8  ;;  %v9748_v52 = vld [vmem:[#allocation2 + $0x40] sm:$0xf]  ;;  %v9750_v44 = vld [vmem:[#allocation2 + $0x2c] sm:$0x1]  ;;  %v9009_v23 = vpop.f32.mrb[44].mxu1 }
 0x348   : > { %v5024_v63 = vsel %vm9896_vm5, %v5019_v49, %v5023_v22  ;;  %v8484_v42 = vrot.slane %v5636_v29, 9  ;;  %v5721_v31 = vrot.slane %v9748_v52, 5  ;;  %v5701_v6 = vsel %vm9852_vm2, %v8482_v20, %v5700_v18  ;;  %v5637_v18 = vld [vmem:[#allocation2 + $0x3c] sm:$0xe]  ;;  %v9121_v20 = vpop.f32.mrb[76].mxu0  ;;  %v14234_v8 = vld [vmem:[#allocation16_spill] sm:$0xff] }
 0x349   : > { %v5718_v53 = vsel %vm9852_vm2, %v5716_v4, %v5717_v50  ;;  %v5728_v48 = vrot.slane %v9749_v11, 5  ;;  %v13654_v57 = vadd.f32 %v9120_v35, %v7135_v5  ;;  %v5014_v0 = vsel %vm9896_vm5, %v5009_v3, %v13599_v60  ;;  %v9122_v19 = vpop.f32.mrb[77].mxu0  ;;  %v5638_v3 = vld [vmem:[#allocation2 + $0x48] sm:$0xe]  ;;  %v14235_v35 = vld [vmem:[#allocation30_spill] sm:$0xff] }
 0x34a   : > { %v8626_v36 = vcombine.low %v5701_v6, %v5704_v28  ;;  %v5709_v49 = vrot.slane %v5707_v58, 4  ;;  %v8577_v43 = vcombine.low %v5014_v0, %v5024_v63  ;;  %v5715_v29 = vsel %vm9852_vm2, %v8484_v42, %v5714_v21  ;;  %v9124_v5 = vpop.f32.mrb[78].mxu0  ;;  %v9751_v21 = vld [vmem:[#allocation2 + $0x44] sm:$0x1]  ;;  %v9010_v6 = vpop.f32.mrb[45].mxu1 }
 0x34b   : > { %v5710_v4 = vrot.slane %v9750_v44, 5  ;;  %v7092_v22 = vadd.f32 %v13221_v51, %v14234_v8  ;;  %v8628_v33 = vcombine.low %v5715_v29, %v5718_v53  ;;  %v5723_v50 = vrot.slane %v5721_v31, 4  ;;  %v9125_v53 = vpop.f32.mrb[79].mxu0  ;;  %v9752_v0 = vld [vmem:[#allocation2 + $0x50] sm:$0x1] }
 0x34c   : > { %v8483_v60 = vrot.slane %v5635_v7, 9  ;;  %v5730_v28 = vrot.slane %v5728_v48, 4  ;;  %v13663_v26 = vadd.f32 %v9122_v19, %v9121_v20  ;;  %v7095_v63 = vadd.f32 %v13221_v51, %v14235_v35  ;;  %v9753_v8 = vld [vmem:[#allocation2 + $0x58] sm:$0xf] }
 0x34d   : > { %7653 = vmatmul.mubr.bf16.gmra.mrb[156].mxu0 %v8609_v25  ;;  %7492 = vmatmul.mubr.bf16.gmra.mrb[124].mxu1 %v8577_v43  ;;  %v5724_v25 = vrot.slane %v9751_v21, 5  ;;  %v5711_v42 = vsel %vm9852_vm2, %v5709_v49, %v5710_v4  ;;  %v8485_v52 = vrot.slane %v5637_v18, 9  ;;  %v13671_v7 = vadd.f32 %v9010_v6, %v9009_v23  ;;  %v9012_v43 = vpop.f32.mrb[46].mxu1  ;;  %v14236_v18 = vld [vmem:[#allocation37_spill] sm:$0xff] }
 0x34e   : > { %9453 = vmatprep.mubr.bf16.mxu0 %v8626_v36  ;;  %9457 = vmatprep.mubr.bf16.mxu1 %v8628_v33  ;;  %v5708_v11 = vsel %vm9852_vm2, %v8483_v60, %v5707_v58  ;;  %v5731_v36 = vrot.slane %v9752_v0, 5  ;;  %v13673_v29 = vadd.f32 %v9125_v53, %v9124_v5  ;;  %v8486_v44 = vrot.slane %v5638_v3, 9  ;;  %v9013_v49 = vpop.f32.mrb[47].mxu1  ;;  %v9754_v60 = vld [vmem:[#allocation2 + $0x64] sm:$0xf] }
 0x34f   : > { %v5725_v20 = vsel %vm9852_vm2, %v5723_v50, %v5724_v25  ;;  %v5735_v33 = vrot.slane %v9753_v8, 5  ;;  %v13678_v4 = vadd.f32 %v14236_v18, %v7092_v22  ;;  %v8627_v19 = vcombine.low %v5708_v11, %v5711_v42  ;;  %v14237_v22 = vld [vmem:[#allocation17_spill] sm:$0xff]  ;;  %v5639_v42 = vld [vmem:[#allocation2 + $0x54] sm:$0xe]  ;;  %v9015_v53 = vpop.f32.mrb[48].mxu1 }
 0x350   : > { %v5732_v58 = vsel %vm9852_vm2, %v5730_v28, %v5731_v36  ;;  %v5742_v23 = vrot.slane %v9754_v60, 5  ;;  %v13682_v21 = vadd.f32 %v9013_v49, %v9012_v43  ;;  %v5722_v5 = vsel %vm9852_vm2, %v8485_v52, %v5721_v31  ;;  %v9755_v11 = vld [vmem:[#allocation2 + $0x5c] sm:$0x1]  ;;  %v5640_v36 = vld [vmem:[#allocation2 + $0x60] sm:$0xe]  ;;  %v9016_v43 = vpop.f32.mrb[49].mxu1 }
 0x351   : > { %v8629_v50 = vcombine.low %v5722_v5, %v5725_v20  ;;  %v5729_v3 = vsel %vm9852_vm2, %v8486_v44, %v5728_v48  ;;  %v5737_v35 = vrot.slane %v5735_v33, 4  ;;  %v13689_v6 = vadd.f32 %v14237_v22, %v7095_v63  ;;  %v9756_v31 = vld [vmem:[#allocation2 + $0x68] sm:$0x1]  ;;  %v9018_v8 = vpop.f32.mrb[50].mxu1  ;;  %v9757_v63 = vld [vmem:[#allocation2 + $0x70] sm:$0xf] }
 0x352   : > { %v8630_v25 = vcombine.low %v5729_v3, %v5732_v58  ;;  %v5744_v28 = vrot.slane %v5742_v23, 4  ;;  %v5738_v0 = vrot.slane %v9755_v11, 5  ;;  %v5745_v52 = vrot.slane %v9756_v31, 5  ;;  %v9019_v18 = vpop.f32.mrb[51].mxu1  ;;  %v9758_v60 = vld [vmem:[#allocation2 + $0x7c] sm:$0xf] }
 0x353   : > { %v13691_v20 = vadd.f32 %v9016_v43, %v9015_v53  ;;  %v8487_v48 = vrot.slane %v5639_v42, 9  ;;  %v5749_v49 = vrot.slane %v9757_v63, 5  ;;  %v5756_v5 = vrot.slane %v9758_v60, 5  ;;  %v5641_v11 = vld [vmem:[#allocation2 + $0x6c] sm:$0xe] }
 0x354   : > { %v5739_v44 = vsel %vm9852_vm2, %v5737_v35, %v5738_v0  ;;  %v5746_v58 = vsel %vm9852_vm2, %v5744_v28, %v5745_v52  ;;  %v7108_v35 = vadd.f32 %v13221_v51, %v13305_v61  ;;  %v9759_v28 = vld [vmem:[#allocation2 + $0x74] sm:$0x1]  ;;  %v5642_v43 = vld [vmem:[#allocation2 + $0x78] sm:$0xe]  ;;  %v7111_v31 = vadd.f32 %v13221_v51, %v13324_v54 }
 0x355   : > { %9454 = vmatmul.mubr.bf16.vlgmr.msra.gmra.mrb[160].mxu0 %v8627_v19  ;;  %9458 = vmatmul.mubr.bf16.vlgmr.msra.gmra.mrb[128].mxu1 %v8629_v50  ;;  %v8488_v19 = vrot.slane %v5640_v36, 9  ;;  %v13697_v50 = vadd.f32 %v9019_v18, %v9018_v8  ;;  %v5736_v3 = vsel %vm9852_vm2, %v8487_v48, %v5735_v33  ;;  %v5751_v53 = vrot.slane %v5749_v49, 4  ;;  %v9760_v33 = vld [vmem:[#allocation2 + $0x80] sm:$0x1]  ;;  %v9761_v48 = vld [vmem:[#allocation2 + $0x88] sm:$0xf] }
 0x356   : > { %9461 = vmatprep.mubr.bf16.mxu1 %v8630_v25  ;;  %v8631_v25 = vcombine.low %v5736_v3, %v5739_v44  ;;  %v5758_v0 = vrot.slane %v5756_v5, 4  ;;  %v5752_v36 = vrot.slane %v9759_v28, 5  ;;  %v5759_v52 = vrot.slane %v9760_v33, 5  ;;  %v9764_v28 = vld [vmem:[#allocation2 + $0x98] sm:$0x1] }
 0x357   : > { %v5743_v22 = vsel %vm9852_vm2, %v8488_v19, %v5742_v23  ;;  %v8489_v8 = vrot.slane %v5641_v11, 9  ;;  %v5763_v61 = vrot.slane %v9761_v48, 5  ;;  %v13710_v44 = vadd.f32 %v13322_v62, %v7108_v35  ;;  %v9762_v19 = vld [vmem:[#allocation2 + $0x94] sm:$0xf]  ;;  %v5643_v62 = vld [vmem:[#allocation2 + $0x84] sm:$0xe] }
 0x358   : > { %v8632_v42 = vcombine.low %v5743_v22, %v5746_v58  ;;  %v5753_v23 = vsel %vm9852_vm2, %v5751_v53, %v5752_v36  ;;  %v8490_v63 = vrot.slane %v5642_v43, 9  ;;  %v5760_v18 = vsel %vm9852_vm2, %v5758_v0, %v5759_v52  ;;  %v9763_v53 = vld [vmem:[#allocation2 + $0x8c] sm:$0x1]  ;;  %v5644_v0 = vld [vmem:[#allocation2 + $0x90] sm:$0xe] }
 0x359   : > { %v5770_v58 = vrot.slane %v9762_v19, 5  ;;  %v5750_v54 = vsel %vm9852_vm2, %v8489_v8, %v5749_v49  ;;  %v5765_v22 = vrot.slane %v5763_v61, 4  ;;  %v5766_v11 = vrot.slane %v9763_v53, 5 }
 0x35a   : > { %v8633_v60 = vcombine.low %v5750_v54, %v5753_v23  ;;  %v5757_v3 = vsel %vm9852_vm2, %v8490_v63, %v5756_v5  ;;  %v5773_v36 = vrot.slane %v9764_v28, 5  ;;  %v5777_v49 = vrot.slane %v13163_v56, 5 }
 0x35b   : > { %v5772_v35 = vrot.slane %v5770_v58, 4  ;;  %v8491_v43 = vrot.slane %v5643_v62, 9  ;;  %v5767_v5 = vsel %vm9852_vm2, %v5765_v22, %v5766_v11  ;;  %v8492_v33 = vrot.slane %v5644_v0, 9 }
 0x35c   : > { %v5779_v48 = vrot.slane %v5777_v49, 4  ;;  %v7124_v56 = vadd.f32 %v13221_v51, %v13480_v59  ;;  %v5780_v54 = vrot.slane %v13236_v9, 5  ;;  %v7151_v9 = vadd.f32 %v13221_v51, %v13697_v50 }
 0x35d   : > { %9462 = vmatmul.mubr.bf16.gmra.mrb[132].mxu1 %v8631_v25  ;;  %v8634_v25 = vcombine.low %v5757_v3, %v5760_v18  ;;  %v5764_v52 = vsel %vm9852_vm2, %v8491_v43, %v5763_v61  ;;  %v5771_v23 = vsel %vm9852_vm2, %v8492_v33, %v5770_v58  ;;  %v5645_v18 = vld [vmem:[#allocation2 + $0x9c] sm:$0xe]  ;;  %v5646_v61 = vld [vmem:[#allocation2 + $0xa8] sm:$0xe]  ;;  %v7127_v58 = vadd.f32 %v13221_v51, %v13494_v14 }
 0x35e   : > { %9465 = vmatprep.mubr.bf16.mxu1 %v8632_v42  ;;  %v13719_v42 = vadd.f32 %v13331_v16, %v7111_v31  ;;  %v5774_v16 = vsel %vm9852_vm2, %v5772_v35, %v5773_v36  ;;  %v5784_v31 = vrot.slane %v13205_v12, 5  ;;  %v8635_v8 = vcombine.low %v5764_v52, %v5767_v5 }
 0x35f   : > { %v8636_v63 = vcombine.low %v5771_v23, %v5774_v16  ;;  %v7148_v12 = vadd.f32 %v13221_v51, %v13691_v20  ;;  %v8493_v62 = vrot.slane %v5645_v18, 9  ;;  %v5781_v59 = vsel %vm9852_vm2, %v5779_v48, %v5780_v54 }
 0x360   : > { %v5787_v35 = vrot.slane %v13273_v30, 5  ;;  %v13746_v0 = vadd.f32 %v13458_v1, %v7124_v56  ;;  %v8494_v28 = vrot.slane %v5646_v61, 9  ;;  %v13757_v16 = vadd.f32 %v13482_v39, %v7127_v58 }
 0x361   : > { %v5778_v36 = vsel %vm9852_vm2, %v8493_v62, %v5777_v49  ;;  %v7140_v17 = vadd.f32 %v13221_v51, %v13671_v7  ;;  %v14238_v39 = vcombine.low %v13540_v10, %v13544_v13 }
 0x362   : > { %v8637_v30 = vcombine.low %v5778_v36, %v5781_v59  ;;  %v5785_v5 = vsel %vm9852_vm2, %v8494_v28, %v5784_v31 }
 0x363   : > { %v13772_v51 = vadd.f32 %v13663_v26, %v7140_v17 }
 0x365   : > { %9466 = vmatmul.mubr.bf16.gmra.mrb[136].mxu1 %v8633_v60  ;;  %v9127_v19 = vpop.f32.mrb[80].mxu0  ;;  %v5786_v60 = vrot.slane %v5784_v31, 4 }
 0x366   : > { %9469 = vmatprep.mubr.bf16.mxu1 %v8634_v25  ;;  %v9128_v3 = vpop.f32.mrb[81].mxu0 }
 0x367   : > { %v9129_v25 = vadd.f32 %v9128_v3, %v9127_v19  ;;  %v9130_v22 = vpop.f32.mrb[82].mxu0  ;;  %v5788_v14 = vsel %vm9852_vm2, %v5786_v60, %v5787_v35  ;;  %v9765_v3 = vld [vmem:[%s13949_s4] ss:$0 sm:$0xff] }
 0x368   : > { %v9131_v53 = vpop.f32.mrb[83].mxu0  ;;  %v8638_v50 = vcombine.low %v5785_v5, %v5788_v14 }
 0x369   : > { %v13743_v11 = vadd.f32 %v9129_v25, %v7148_v12  ;;  %v9132_v20 = vadd.f32 %v9131_v53, %v9130_v22  ;;  %v7143_v12 = vadd.f32 %v9765_v3, %v13682_v21 }
 0x36b   : > { %v13752_v43 = vadd.f32 %v9132_v20, %v7151_v9  ;;  %v13775_v13 = vadd.f32 %v13673_v29, %v7143_v12 }
 0x36d   : > { %9470 = vmatmul.mubr.bf16.gmra.mrb[140].mxu1 %v8635_v8  ;;  %v9133_v33 = vpop.f32.mrb[84].mxu0 }
 0x36e   : > { %9473 = vmatprep.mubr.bf16.mxu1 %v8636_v63  ;;  %v9134_v1 = vpop.f32.mrb[85].mxu0 }
 0x36f   : > { %v9135_v8 = vadd.f32 %v9134_v1, %v9133_v33  ;;  %v9136_v23 = vpop.f32.mrb[86].mxu0 }
 0x370   : > { %v9021_v52 = vpop.f32.mrb[52].mxu1  ;;  %v9137_v56 = vpop.f32.mrb[87].mxu0 }
 0x371   : > { %v9022_v48 = vpop.f32.mrb[53].mxu1  ;;  %v9138_v18 = vadd.f32 %v9137_v56, %v9136_v23 }
 0x372   : > { %v9023_v49 = vadd.f32 %v9022_v48, %v9021_v52  ;;  %v9024_v63 = vpop.f32.mrb[54].mxu1 }
 0x373   : > { %v9025_v19 = vpop.f32.mrb[55].mxu1 }
 0x374   : > { %v9026_v54 = vadd.f32 %v9025_v19, %v9024_v63  ;;  %v7156_v46 = vadd.f32 %v9765_v3, %v9023_v49 }
 0x375   : > { %9474 = vmatmul.mubr.bf16.gmra.mrb[144].mxu1 %v8637_v30 }
 0x376   : > { %9477 = vmatprep.mubr.bf16.mxu1 %v8638_v50  ;;  %v7159_v34 = vadd.f32 %v9765_v3, %v9026_v54 }
 0x378   : > { %v9027_v31 = vpop.f32.mrb[56].mxu1  ;;  %v13782_v22 = vadd.f32 %v9138_v18, %v7159_v34 }
 0x379   : > { %v9028_v60 = vpop.f32.mrb[57].mxu1 }
 0x37a   : > { %v9029_v61 = vadd.f32 %v9028_v60, %v9027_v31  ;;  %v9030_v25 = vpop.f32.mrb[58].mxu1 }
 0x37b   : > { %v9031_v7 = vpop.f32.mrb[59].mxu1 }
 0x37c   : > { %v9032_v10 = vadd.f32 %v9031_v7, %v9030_v25  ;;  %v7164_v62 = vadd.f32 %v9765_v3, %v9029_v61 }
 0x37d   : > { %9478 = vmatmul.mubr.bf16.gmra.mrb[148].mxu1 %v14238_v39 }
 0x37e   : > { %9481 = vmatprep.mubr.bf16.mxu1 %v8640_v37  ;;  %v13780_v37 = vadd.f32 %v9135_v8, %v7156_v46  ;;  %v7167_v53 = vadd.f32 %v9765_v3, %v9032_v10 }
 0x385   : > { %9482 = vmatmul.mubr.bf16.gmra.mrb[152].mxu1 %v8641_v27 }
 0x390   : > { %v9139_v21 = vpop.f32.mrb[88].mxu0 }
 0x391   : > { %v9140_v58 = vpop.f32.mrb[89].mxu0 }
 0x392   : > { %v9141_v26 = vadd.f32 %v9140_v58, %v9139_v21  ;;  %v9142_v59 = vpop.f32.mrb[90].mxu0 }
 0x393   : > { %v9143_v35 = vpop.f32.mrb[91].mxu0 }
 0x394   : > { %v13784_v9 = vadd.f32 %v9141_v26, %v7164_v62  ;;  %v9144_v29 = vadd.f32 %v9143_v35, %v9142_v59 }
 0x396   : > { %v13786_v20 = vadd.f32 %v9144_v29, %v7167_v53 }
 0x398   : > { %v9145_v40 = vpop.f32.mrb[92].mxu0 }
 0x399   : > { %v9146_v32 = vpop.f32.mrb[93].mxu0 }
 0x39a   : > { %v9147_v28 = vadd.f32 %v9146_v32, %v9145_v40  ;;  %v9148_v14 = vpop.f32.mrb[94].mxu0 }
 0x39b   : > { %v9033_v27 = vpop.f32.mrb[60].mxu1  ;;  %v9149_v30 = vpop.f32.mrb[95].mxu0 }
 0x39c   : > { %v9034_v36 = vpop.f32.mrb[61].mxu1  ;;  %v9150_v33 = vadd.f32 %v9149_v30, %v9148_v14 }
 0x39d   : > { %v9035_v5 = vadd.f32 %v9034_v36, %v9033_v27  ;;  %v9036_v50 = vpop.f32.mrb[62].mxu1 }
 0x39e   : > { %v9037_v1 = vpop.f32.mrb[63].mxu1 }
 0x39f   : > { %v7172_v52 = vadd.f32 %v9765_v3, %v9035_v5  ;;  %v9038_v8 = vadd.f32 %v9037_v1, %v9036_v50 }
 0x3a1   : > { %v7175_v23 = vadd.f32 %v9765_v3, %v9038_v8  ;;  %v13788_v56 = vadd.f32 %v9147_v28, %v7172_v52 }
 0x3a3   : > { %v9279_v48 = vpop.f32.mrb[96].mxu0  ;;  %v9167_v63 = vpop.f32.mrb[64].mxu1  ;;  %v13790_v54 = vadd.f32 %v9150_v33, %v7175_v23 }
 0x3a4   : > { %v9280_v49 = vpop.f32.mrb[97].mxu0  ;;  %v9168_v17 = vpop.f32.mrb[65].mxu1 }
 0x3a5   : > { %v9281_v18 = vadd.f32 %v9280_v49, %v9279_v48  ;;  %v9282_v19 = vpop.f32.mrb[98].mxu0  ;;  %v9169_v31 = vadd.f32 %v9168_v17, %v9167_v63  ;;  %v9170_v60 = vpop.f32.mrb[66].mxu1  ;;  %v14239_v63 = vld [vmem:[#allocation60_spill] sm:$0xff] }
 0x3a6   : > { %v9283_v39 = vpop.f32.mrb[99].mxu0  ;;  %v9171_v61 = vpop.f32.mrb[67].mxu1 }
 0x3a7   : > { %v9284_v12 = vadd.f32 %v9283_v39, %v9282_v19  ;;  %v7374_v25 = vadd.f32 %v9169_v31, %v13566_v47  ;;  %v9172_v7 = vadd.f32 %v9171_v61, %v9170_v60  ;;  %v14240_v19 = vld [vmem:[#allocation61_spill] sm:$0xff] }
 0x3a9   : > { %v7377_v3 = vadd.f32 %v9172_v7, %v13572_v55  ;;  %v13794_v46 = vadd.f32 %v9281_v18, %v7374_v25 }
 0x3ab   : > { %v9285_v10 = vpop.f32.mrb[100].mxu0  ;;  %v9173_v21 = vpop.f32.mrb[68].mxu1  ;;  %v13796_v26 = vadd.f32 %v9284_v12, %v7377_v3 }
 0x3ac   : > { %v9286_v34 = vpop.f32.mrb[101].mxu0  ;;  %v9174_v59 = vpop.f32.mrb[69].mxu1 }
 0x3ad   : > { %v9287_v58 = vadd.f32 %v9286_v34, %v9285_v10  ;;  %v9288_v62 = vpop.f32.mrb[102].mxu0  ;;  %v9175_v53 = vadd.f32 %v9174_v59, %v9173_v21  ;;  %v9176_v29 = vpop.f32.mrb[70].mxu1 }
 0x3ae   : > { %v9289_v35 = vpop.f32.mrb[103].mxu0  ;;  %v9177_v32 = vpop.f32.mrb[71].mxu1 }
 0x3af   : > { %v9290_v40 = vadd.f32 %v9289_v35, %v9288_v62  ;;  %v7382_v47 = vadd.f32 %v9175_v53, %v13576_v38  ;;  %v9178_v27 = vadd.f32 %v9177_v32, %v9176_v29 }
 0x3b1   : > { %v7385_v55 = vadd.f32 %v9178_v27, %v13585_v24  ;;  %v13800_v14 = vadd.f32 %v9287_v58, %v7382_v47 }
 0x3b3   : > { %v9179_v30 = vpop.f32.mrb[72].mxu1  ;;  %v13802_v33 = vadd.f32 %v9290_v40, %v7385_v55 }
 0x3b4   : > { %v9291_v28 = vpop.f32.mrb[104].mxu0  ;;  %v9180_v1 = vpop.f32.mrb[73].mxu1 }
 0x3b5   : > { %v9292_v36 = vpop.f32.mrb[105].mxu0  ;;  %v9181_v8 = vadd.f32 %v9180_v1, %v9179_v30  ;;  %v9182_v23 = vpop.f32.mrb[74].mxu1 }
 0x3b6   : > { %v9293_v5 = vadd.f32 %v9292_v36, %v9291_v28  ;;  %v9294_v50 = vpop.f32.mrb[106].mxu0  ;;  %v9183_v49 = vpop.f32.mrb[75].mxu1 }
 0x3b7   : > { %v9295_v52 = vpop.f32.mrb[107].mxu0  ;;  %v7390_v38 = vadd.f32 %v9181_v8, %v14239_v63  ;;  %v9184_v18 = vadd.f32 %v9183_v49, %v9182_v23  ;;  %v14242_v23 = vld [vmem:[#allocation5_spill] sm:$0xff] }
 0x3b8   : > { %v9296_v48 = vadd.f32 %v9295_v52, %v9294_v50  ;;  %v14241_v52 = vld [vmem:[#allocation20_spill] sm:$0xff] }
 0x3b9   : > { %v7393_v24 = vadd.f32 %v9184_v18, %v14240_v19  ;;  %v13806_v39 = vadd.f32 %v9293_v5, %v7390_v38 }
 0x3bb   : > { %v9185_v60 = vpop.f32.mrb[76].mxu1  ;;  %v13808_v25 = vadd.f32 %v9296_v48, %v7393_v24 }
 0x3bc   : > { %v9297_v17 = vpop.f32.mrb[108].mxu0  ;;  %v9186_v7 = vpop.f32.mrb[77].mxu1 }
 0x3bd   : > { %v9298_v31 = vpop.f32.mrb[109].mxu0  ;;  %v9187_v10 = vadd.f32 %v9186_v7, %v9185_v60  ;;  %v9188_v34 = vpop.f32.mrb[78].mxu1 }
 0x3be   : > { %v9299_v12 = vadd.f32 %v9298_v31, %v9297_v17  ;;  %v9300_v61 = vpop.f32.mrb[110].mxu0  ;;  %v9189_v58 = vpop.f32.mrb[79].mxu1 }
 0x3bf   : > { %v9301_v3 = vpop.f32.mrb[111].mxu0  ;;  %v7398_v62 = vadd.f32 %v9187_v10, %v13624_v15  ;;  %v9190_v59 = vadd.f32 %v9189_v58, %v9188_v34 }
 0x3c0   : > { %v9302_v21 = vadd.f32 %v9301_v3, %v9300_v61 }
 0x3c1   : > { %v7401_v35 = vadd.f32 %v9190_v59, %v13636_v41  ;;  %v13812_v29 = vadd.f32 %v9299_v12, %v7398_v62 }
 0x3c3   : > { %v9191_v32 = vpop.f32.mrb[80].mxu1  ;;  %v13814_v55 = vadd.f32 %v9302_v21, %v7401_v35 }
 0x3c4   : > { %v9192_v28 = vpop.f32.mrb[81].mxu1 }
 0x3c5   : > { %v9303_v53 = vpop.f32.mrb[112].mxu0  ;;  %v9193_v30 = vadd.f32 %v9192_v28, %v9191_v32  ;;  %v9194_v5 = vpop.f32.mrb[82].mxu1 }
 0x3c6   : > { %v9304_v40 = vpop.f32.mrb[113].mxu0  ;;  %v9195_v1 = vpop.f32.mrb[83].mxu1 }
 0x3c7   : > { %v9305_v47 = vadd.f32 %v9304_v40, %v9303_v53  ;;  %v9306_v27 = vpop.f32.mrb[114].mxu0  ;;  %v7406_v15 = vadd.f32 %v9193_v30, %v14241_v52  ;;  %v9196_v8 = vadd.f32 %v9195_v1, %v9194_v5 }
 0x3c8   : > { %v9307_v36 = vpop.f32.mrb[115].mxu0 }
 0x3c9   : > { %v9308_v50 = vadd.f32 %v9307_v36, %v9306_v27  ;;  %v7409_v41 = vadd.f32 %v9196_v8, %v14242_v23  ;;  %v13818_v49 = vadd.f32 %v9305_v47, %v7406_v15 }
 0x3cb   : > { %v9197_v38 = vpop.f32.mrb[84].mxu1  ;;  %v13820_v24 = vadd.f32 %v9308_v50, %v7409_v41  ;;  %v14243_v50 = vld [vmem:[#allocation25_spill] sm:$0xff] }
 0x3cc   : > { %v9198_v17 = vpop.f32.mrb[85].mxu1 }
 0x3cd   : > { %v9309_v48 = vpop.f32.mrb[116].mxu0  ;;  %v9199_v60 = vadd.f32 %v9198_v17, %v9197_v38  ;;  %v9200_v12 = vpop.f32.mrb[86].mxu1 }
 0x3ce   : > { %v9310_v63 = vpop.f32.mrb[117].mxu0  ;;  %v9201_v7 = vpop.f32.mrb[87].mxu1 }
 0x3cf   : > { %v9311_v18 = vadd.f32 %v9310_v63, %v9309_v48  ;;  %v9312_v19 = vpop.f32.mrb[118].mxu0  ;;  %v7414_v3 = vadd.f32 %v9199_v60, %v13678_v4  ;;  %v9202_v10 = vadd.f32 %v9201_v7, %v9200_v12 }
 0x3d0   : > { %v9313_v31 = vpop.f32.mrb[119].mxu0 }
 0x3d1   : > { %v9314_v61 = vadd.f32 %v9313_v31, %v9312_v19  ;;  %v7417_v34 = vadd.f32 %v9202_v10, %v13689_v6  ;;  %v13824_v58 = vadd.f32 %v9311_v18, %v7414_v3 }
 0x3d3   : > { %v9203_v59 = vpop.f32.mrb[88].mxu1  ;;  %v13826_v40 = vadd.f32 %v9314_v61, %v7417_v34 }
 0x3d4   : > { %v9204_v32 = vpop.f32.mrb[89].mxu1 }
 0x3d5   : > { %v9205_v27 = vadd.f32 %v9204_v32, %v9203_v59  ;;  %v9206_v28 = vpop.f32.mrb[90].mxu1 }
 0x3d6   : > { %v9315_v21 = vpop.f32.mrb[120].mxu0  ;;  %v9207_v30 = vpop.f32.mrb[91].mxu1 }
 0x3d7   : > { %v9316_v62 = vpop.f32.mrb[121].mxu0  ;;  %v7422_v4 = vadd.f32 %v9205_v27, %v13234_v2  ;;  %v9208_v5 = vadd.f32 %v9207_v30, %v9206_v28  ;;  %v14244_v28 = vld [vmem:[#allocation32_spill] sm:$0xff]  ;;  %v14245_v30 = vld [vmem:[#allocation39_spill] sm:$0xff] }
 0x3d8   : > { %v9317_v35 = vadd.f32 %v9316_v62, %v9315_v21  ;;  %v9318_v53 = vpop.f32.mrb[122].mxu0 }
 0x3d9   : > { %v9319_v47 = vpop.f32.mrb[123].mxu0  ;;  %v7425_v6 = vadd.f32 %v9208_v5, %v14243_v50 }
 0x3da   : > { %v9320_v36 = vadd.f32 %v9319_v47, %v9318_v53  ;;  %v13830_v52 = vadd.f32 %v9317_v35, %v7422_v4 }
 0x3db   : > { %v9209_v8 = vpop.f32.mrb[92].mxu1 }
 0x3dc   : > { %v13832_v48 = vadd.f32 %v9320_v36, %v7425_v6  ;;  %v9210_v63 = vpop.f32.mrb[93].mxu1 }
 0x3dd   : > { %v9211_v18 = vadd.f32 %v9210_v63, %v9209_v8  ;;  %v9212_v19 = vpop.f32.mrb[94].mxu1 }
 0x3de   : > { %v9213_v31 = vpop.f32.mrb[95].mxu1 }
 0x3df   : > { %v9321_v1 = vpop.f32.mrb[124].mxu0  ;;  %v7430_v2 = vadd.f32 %v9211_v18, %v13710_v44  ;;  %v9214_v60 = vadd.f32 %v9213_v31, %v9212_v19 }
 0x3e0   : > { %v9322_v15 = vpop.f32.mrb[125].mxu0 }
 0x3e1   : > { %v9323_v23 = vadd.f32 %v9322_v15, %v9321_v1  ;;  %v9324_v41 = vpop.f32.mrb[126].mxu0  ;;  %v7433_v12 = vadd.f32 %v9214_v60, %v13719_v42 }
 0x3e2   : > { %v9325_v38 = vpop.f32.mrb[127].mxu0 }
 0x3e3   : > { %v9326_v17 = vadd.f32 %v9325_v38, %v9324_v41  ;;  %v13836_v7 = vadd.f32 %v9323_v23, %v7430_v2  ;;  %v9215_v10 = vpop.f32.mrb[96].mxu1 }
 0x3e4   : > { %v9216_v59 = vpop.f32.mrb[97].mxu1 }
 0x3e5   : > { %v13838_v62 = vadd.f32 %v9326_v17, %v7433_v12  ;;  %v9217_v53 = vadd.f32 %v9216_v59, %v9215_v10  ;;  %v9218_v32 = vpop.f32.mrb[98].mxu1 }
 0x3e6   : > { %v9219_v27 = vpop.f32.mrb[99].mxu1 }
 0x3e7   : > { %v9327_v61 = vpop.f32.mrb[128].mxu0  ;;  %v7438_v44 = vadd.f32 %v9217_v53, %v14244_v28  ;;  %v9220_v36 = vadd.f32 %v9219_v27, %v9218_v32 }
 0x3e8   : > { %v9328_v3 = vpop.f32.mrb[129].mxu0 }
 0x3e9   : > { %v9329_v34 = vadd.f32 %v9328_v3, %v9327_v61  ;;  %v9330_v21 = vpop.f32.mrb[130].mxu0  ;;  %v7441_v42 = vadd.f32 %v9220_v36, %v14245_v30 }
 0x3ea   : > { %v9331_v35 = vpop.f32.mrb[131].mxu0 }
 0x3eb   : > { %v9332_v47 = vadd.f32 %v9331_v35, %v9330_v21  ;;  %v13842_v5 = vadd.f32 %v9329_v34, %v7438_v44  ;;  %v9221_v6 = vpop.f32.mrb[100].mxu1 }
 0x3ec   : > { %v9222_v23 = vpop.f32.mrb[101].mxu1 }
 0x3ed   : > { %v13844_v8 = vadd.f32 %v9332_v47, %v7441_v42  ;;  %v9223_v63 = vadd.f32 %v9222_v23, %v9221_v6  ;;  %v9224_v38 = vpop.f32.mrb[102].mxu1 }
 0x3ee   : > { %v9225_v19 = vpop.f32.mrb[103].mxu1 }
 0x3ef   : > { %v7446_v17 = vadd.f32 %v9223_v63, %v13746_v0  ;;  %v9226_v31 = vadd.f32 %v9225_v19, %v9224_v38 }
 0x3f0   : > { %v9333_v4 = vpop.f32.mrb[132].mxu0 }
 0x3f1   : > { %v9334_v50 = vpop.f32.mrb[133].mxu0  ;;  %v7449_v2 = vadd.f32 %v9226_v31, %v13757_v16 }
 0x3f2   : > { %v9335_v1 = vadd.f32 %v9334_v50, %v9333_v4  ;;  %v9336_v15 = vpop.f32.mrb[134].mxu0 }
 0x3f3   : > { %v9337_v41 = vpop.f32.mrb[135].mxu0  ;;  %v9227_v3 = vpop.f32.mrb[104].mxu1 }
 0x3f4   : > { %v9338_v18 = vadd.f32 %v9337_v41, %v9336_v15  ;;  %v13848_v12 = vadd.f32 %v9335_v1, %v7446_v17  ;;  %v9228_v59 = vpop.f32.mrb[105].mxu1 }
 0x3f5   : > { %v9229_v53 = vadd.f32 %v9228_v59, %v9227_v3  ;;  %v9230_v32 = vpop.f32.mrb[106].mxu1 }
 0x3f6   : > { %v13850_v21 = vadd.f32 %v9338_v18, %v7449_v2  ;;  %v9231_v27 = vpop.f32.mrb[107].mxu1 }
 0x3f7   : > { %v7454_v0 = vadd.f32 %v9229_v53, %v13646_v45  ;;  %v9232_v28 = vadd.f32 %v9231_v27, %v9230_v32 }
 0x3f8   : > { %v9339_v60 = vpop.f32.mrb[136].mxu0 }
 0x3f9   : > { %v9340_v61 = vpop.f32.mrb[137].mxu0  ;;  %v7457_v16 = vadd.f32 %v9232_v28, %v13654_v57 }
 0x3fa   : > { %v9341_v10 = vadd.f32 %v9340_v61, %v9339_v60  ;;  %v9342_v34 = vpop.f32.mrb[138].mxu0 }
 0x3fb   : > { %v9343_v35 = vpop.f32.mrb[139].mxu0  ;;  %v9233_v42 = vpop.f32.mrb[108].mxu1 }
 0x3fc   : > { %v9344_v47 = vadd.f32 %v9343_v35, %v9342_v34  ;;  %v13854_v36 = vadd.f32 %v9341_v10, %v7454_v0  ;;  %v9234_v1 = vpop.f32.mrb[109].mxu1 }
 0x3fd   : > { %v9235_v23 = vadd.f32 %v9234_v1, %v9233_v42  ;;  %v9236_v41 = vpop.f32.mrb[110].mxu1 }
 0x3fe   : > { %v13856_v6 = vadd.f32 %v9344_v47, %v7457_v16  ;;  %v9237_v38 = vpop.f32.mrb[111].mxu1 }
 0x3ff   : > { %v7462_v45 = vadd.f32 %v9235_v23, %v13772_v51  ;;  %v9238_v18 = vadd.f32 %v9237_v38, %v9236_v41 }
 0x400   : > { %v9345_v44 = vpop.f32.mrb[140].mxu0 }
 0x401   : > { %v9346_v30 = vpop.f32.mrb[141].mxu0  ;;  %v7465_v57 = vadd.f32 %v9238_v18, %v13775_v13 }
 0x402   : > { %v9347_v4 = vadd.f32 %v9346_v30, %v9345_v44  ;;  %v9348_v50 = vpop.f32.mrb[142].mxu0 }
 0x403   : > { %v9349_v15 = vpop.f32.mrb[143].mxu0  ;;  %v9239_v2 = vpop.f32.mrb[112].mxu1 }
 0x404   : > { %v9350_v63 = vadd.f32 %v9349_v15, %v9348_v50  ;;  %v13860_v17 = vadd.f32 %v9347_v4, %v7462_v45  ;;  %v9240_v10 = vpop.f32.mrb[113].mxu1 }
 0x405   : > { %v9241_v59 = vadd.f32 %v9240_v10, %v9239_v2  ;;  %v9242_v35 = vpop.f32.mrb[114].mxu1 }
 0x406   : > { %v13862_v3 = vadd.f32 %v9350_v63, %v7465_v57  ;;  %v9243_v32 = vpop.f32.mrb[115].mxu1 }
 0x407   : > { %v7470_v51 = vadd.f32 %v9241_v59, %v13743_v11  ;;  %v9244_v47 = vadd.f32 %v9243_v32, %v9242_v35 }
 0x408   : > { %v9351_v19 = vpop.f32.mrb[144].mxu0 }
 0x409   : > { %v9352_v31 = vpop.f32.mrb[145].mxu0  ;;  %v7473_v13 = vadd.f32 %v9244_v47, %v13752_v43 }
 0x40a   : > { %v9353_v60 = vadd.f32 %v9352_v31, %v9351_v19  ;;  %v9354_v61 = vpop.f32.mrb[146].mxu0 }
 0x40b   : > { %v9355_v34 = vpop.f32.mrb[147].mxu0 }
 0x40c   : > { %v9356_v53 = vadd.f32 %v9355_v34, %v9354_v61  ;;  %v13866_v0 = vadd.f32 %v9353_v60, %v7470_v51 }
 0x40e   : > { %v13868_v42 = vadd.f32 %v9356_v53, %v7473_v13 }
 0x410   : > { %v9357_v27 = vpop.f32.mrb[148].mxu0  ;;  %v9245_v16 = vpop.f32.mrb[116].mxu1 }
 0x411   : > { %v9358_v28 = vpop.f32.mrb[149].mxu0  ;;  %v9246_v4 = vpop.f32.mrb[117].mxu1 }
 0x412   : > { %v9359_v44 = vadd.f32 %v9358_v28, %v9357_v27  ;;  %v9360_v30 = vpop.f32.mrb[150].mxu0  ;;  %v9247_v1 = vadd.f32 %v9246_v4, %v9245_v16  ;;  %v9248_v15 = vpop.f32.mrb[118].mxu1 }
 0x413   : > { %v9361_v50 = vpop.f32.mrb[151].mxu0  ;;  %v9249_v41 = vpop.f32.mrb[119].mxu1 }
 0x414   : > { %v9362_v23 = vadd.f32 %v9361_v50, %v9360_v30  ;;  %v7478_v11 = vadd.f32 %v9247_v1, %v13780_v37  ;;  %v9250_v63 = vadd.f32 %v9249_v41, %v9248_v15 }
 0x416   : > { %v7481_v43 = vadd.f32 %v9250_v63, %v13782_v22  ;;  %v13872_v45 = vadd.f32 %v9359_v44, %v7478_v11 }
 0x418   : > { %v9363_v38 = vpop.f32.mrb[152].mxu0  ;;  %v9251_v57 = vpop.f32.mrb[120].mxu1  ;;  %v13874_v2 = vadd.f32 %v9362_v23, %v7481_v43 }
 0x419   : > { %v9364_v18 = vpop.f32.mrb[153].mxu0  ;;  %v9252_v60 = vpop.f32.mrb[121].mxu1 }
 0x41a   : > { %v9365_v19 = vadd.f32 %v9364_v18, %v9363_v38  ;;  %v9366_v31 = vpop.f32.mrb[154].mxu0  ;;  %v9253_v10 = vadd.f32 %v9252_v60, %v9251_v57  ;;  %v9254_v34 = vpop.f32.mrb[122].mxu1 }
 0x41b   : > { %v9367_v61 = vpop.f32.mrb[155].mxu0  ;;  %v9255_v35 = vpop.f32.mrb[123].mxu1 }
 0x41c   : > { %v9368_v59 = vadd.f32 %v9367_v61, %v9366_v31  ;;  %v7486_v37 = vadd.f32 %v9253_v10, %v13784_v9  ;;  %v9256_v53 = vadd.f32 %v9255_v35, %v9254_v34 }
 0x41e   : > { %v7489_v22 = vadd.f32 %v9256_v53, %v13786_v20  ;;  %v13879_v51 = vadd.f32 %v9365_v19, %v7486_v37 }
 0x420   : > { %v9369_v32 = vpop.f32.mrb[156].mxu0  ;;  %v9257_v13 = vpop.f32.mrb[124].mxu1  ;;  %v13881_v16 = vadd.f32 %v9368_v59, %v7489_v22 }
 0x421   : > { %v9370_v47 = vpop.f32.mrb[157].mxu0  ;;  %v9258_v44 = vpop.f32.mrb[125].mxu1 }
 0x422   : > { %v9371_v27 = vadd.f32 %v9370_v47, %v9369_v32  ;;  %v9372_v28 = vpop.f32.mrb[158].mxu0  ;;  %v9259_v4 = vadd.f32 %v9258_v44, %v9257_v13  ;;  %v9260_v50 = vpop.f32.mrb[126].mxu1 }
 0x423   : > { %v9373_v30 = vpop.f32.mrb[159].mxu0  ;;  %v9261_v9 = vpop.f32.mrb[127].mxu1 }
 0x424   : > { %v9374_v1 = vadd.f32 %v9373_v30, %v9372_v28  ;;  %v7494_v15 = vadd.f32 %v9259_v4, %v13788_v56  ;;  %v9262_v20 = vadd.f32 %v9261_v9, %v9260_v50 }
 0x426   : > { %v7497_v23 = vadd.f32 %v9262_v20, %v13790_v54  ;;  %v13885_v11 = vadd.f32 %v9371_v27, %v7494_v15 }
 0x428   : > { %v9455_v41 = vpop.f32.mrb[160].mxu0  ;;  %v9459_v18 = vpop.f32.mrb[128].mxu1  ;;  %v13889_v19 = vadd.f32 %v9374_v1, %v7497_v23 }
 0x429   : > { %v7704_v63 = vadd.f32 %v9455_v41, %v13800_v14  ;;  %v7695_v43 = vpop.f32.mrb[161].mxu0  ;;  %v7720_v31 = vadd.f32 %v9459_v18, %v13812_v29  ;;  %v7711_v60 = vpop.f32.mrb[129].mxu1 }
 0x42a   : > { %v7696_v38 = vadd.f32 %v7695_v43, %v13794_v46  ;;  %v9456_v57 = vpop.f32.mrb[162].mxu0  ;;  %v7712_v54 = vadd.f32 %v7711_v60, %v13806_v39  ;;  %v9460_v34 = vpop.f32.mrb[130].mxu1 }
 0x42b   : > { %v7707_v56 = vadd.f32 %v9456_v57, %v13802_v33  ;;  %v7698_v61 = vpop.f32.mrb[163].mxu0  ;;  %v7824_v14 = vmax.f32 %v7704_v63, 0.0  ;;  %v7723_v46 = vadd.f32 %v9460_v34, %v13814_v55  ;;  %v7714_v35 = vpop.f32.mrb[131].mxu1 }
 0x42c   : > { %v7699_v10 = vadd.f32 %v7698_v61, %v13796_v26  ;;  %v7822_v37 = vmax.f32 %v7696_v38, 0.0  ;;  %v7715_v39 = vadd.f32 %v7714_v35, %v13808_v25  ;;  %v7828_v26 = vmax.f32 %v7720_v31, 0.0 }
 0x42d   : > { %v7825_v59 = vmax.f32 %v7707_v56, 0.0  ;;  %v7829_v53 = vmax.f32 %v7723_v46, 0.0  ;;  %v7826_v22 = vmax.f32 %v7712_v54, 0.0 }
 0x42e   : > { %v7823_v33 = vmax.f32 %v7699_v10, 0.0  ;;  %v7827_v55 = vmax.f32 %v7715_v39, 0.0 }
 0x42f   : > { %v8821_v29 = vpack.c.bf16 %v7825_v59, %v7824_v14  ;;  %v8831_v47 = vpack.c.bf16 %v7829_v53, %v7828_v26 }
 0x430   : > { %v8816_v32 = vpack.c.bf16 %v7823_v33, %v7822_v37  ;;  %v8826_v13 = vpack.c.bf16 %v7827_v55, %v7826_v22  ;;  %v9463_v27 = vpop.f32.mrb[132].mxu1 }
 0x431   : > { %8893 = vst [vmem:[%s13899_s27 + $0x8] sm:$0xff] %v8821_v29   ;;  %8895 = vst [vmem:[%s13899_s27 + $0x18] sm:$0xff] %v8831_v47   ;;  %v7736_v28 = vadd.f32 %v9463_v27, %v13824_v58  ;;  %v7727_v44 = vpop.f32.mrb[133].mxu1 }
 0x432   : > { %8817 = vst [vmem:[%s13899_s27] sm:$0xff] %v8816_v32   ;;  %8894 = vst [vmem:[%s13899_s27 + $0x10] sm:$0xff] %v8826_v13   ;;  %v7728_v25 = vadd.f32 %v7727_v44, %v13818_v49  ;;  %v9464_v30 = vpop.f32.mrb[134].mxu1 }
 0x433   : > { %v7739_v4 = vadd.f32 %v9464_v30, %v13826_v40  ;;  %v7730_v50 = vpop.f32.mrb[135].mxu1  ;;  %v7832_v9 = vmax.f32 %v7736_v28, 0.0 }
 0x434   : > { %v7731_v1 = vadd.f32 %v7730_v50, %v13820_v24  ;;  %v7830_v20 = vmax.f32 %v7728_v25, 0.0 }
 0x435   : > { %v7833_v15 = vmax.f32 %v7739_v4, 0.0 }
 0x436   : > { %v7831_v23 = vmax.f32 %v7731_v1, 0.0 }
 0x437   : > { %v8841_v41 = vpack.c.bf16 %v7833_v15, %v7832_v9 }
 0x438   : > { %v8836_v63 = vpack.c.bf16 %v7831_v23, %v7830_v20  ;;  %v9467_v43 = vpop.f32.mrb[136].mxu1 }
 0x439   : > { %8897 = vst [vmem:[%s13899_s27 + $0x28] sm:$0xff] %v8841_v41   ;;  %v7752_v58 = vadd.f32 %v9467_v43, %v13836_v7  ;;  %v7743_v38 = vpop.f32.mrb[137].mxu1 }
 0x43a   : > { %8896 = vst [vmem:[%s13899_s27 + $0x20] sm:$0xff] %v8836_v63   ;;  %v7744_v49 = vadd.f32 %v7743_v38, %v13830_v52  ;;  %v9468_v40 = vpop.f32.mrb[138].mxu1 }
 0x43b   : > { %v7755_v18 = vadd.f32 %v9468_v40, %v13838_v62  ;;  %v7746_v24 = vpop.f32.mrb[139].mxu1  ;;  %v7836_v31 = vmax.f32 %v7752_v58, 0.0 }
 0x43c   : > { %v7747_v57 = vadd.f32 %v7746_v24, %v13832_v48  ;;  %v7834_v60 = vmax.f32 %v7744_v49, 0.0 }
 0x43d   : > { %v7837_v56 = vmax.f32 %v7755_v18, 0.0 }
 0x43e   : > { %v7835_v61 = vmax.f32 %v7747_v57, 0.0 }
 0x43f   : > { %v8851_v54 = vpack.c.bf16 %v7837_v56, %v7836_v31 }
 0x440   : > { %v8846_v10 = vpack.c.bf16 %v7835_v61, %v7834_v60  ;;  %v9471_v34 = vpop.f32.mrb[140].mxu1 }
 0x441   : > { %8899 = vst [vmem:[%s13899_s27 + $0x38] sm:$0xff] %v8851_v54   ;;  %v7768_v7 = vadd.f32 %v9471_v34, %v13848_v12  ;;  %v7759_v14 = vpop.f32.mrb[141].mxu1 }
 0x442   : > { %8898 = vst [vmem:[%s13899_s27 + $0x30] sm:$0xff] %v8846_v10   ;;  %v7760_v52 = vadd.f32 %v7759_v14, %v13842_v5  ;;  %v9472_v62 = vpop.f32.mrb[142].mxu1 }
 0x443   : > { %v7771_v59 = vadd.f32 %v9472_v62, %v13850_v21  ;;  %v7762_v48 = vpop.f32.mrb[143].mxu1  ;;  %v7840_v35 = vmax.f32 %v7768_v7, 0.0 }
 0x444   : > { %v7763_v46 = vadd.f32 %v7762_v48, %v13844_v8  ;;  %v7838_v33 = vmax.f32 %v7760_v52, 0.0 }
 0x445   : > { %v7841_v37 = vmax.f32 %v7771_v59, 0.0 }
 0x446   : > { %v7839_v39 = vmax.f32 %v7763_v46, 0.0 }
 0x447   : > { %v8861_v26 = vpack.c.bf16 %v7841_v37, %v7840_v35 }
 0x448   : > { %v8856_v29 = vpack.c.bf16 %v7839_v39, %v7838_v33  ;;  %v9475_v53 = vpop.f32.mrb[144].mxu1 }
 0x449   : > { %8901 = vst [vmem:[%s13899_s27 + $0x48] sm:$0xff] %v8861_v26   ;;  %v7784_v12 = vadd.f32 %v9475_v53, %v13860_v17  ;;  %v7775_v22 = vpop.f32.mrb[145].mxu1 }
 0x44a   : > { %8900 = vst [vmem:[%s13899_s27 + $0x40] sm:$0xff] %v8856_v29   ;;  %v7776_v5 = vadd.f32 %v7775_v22, %v13854_v36  ;;  %v9476_v21 = vpop.f32.mrb[146].mxu1 }
 0x44b   : > { %v7787_v32 = vadd.f32 %v9476_v21, %v13862_v3  ;;  %v7778_v8 = vpop.f32.mrb[147].mxu1  ;;  %v7844_v47 = vmax.f32 %v7784_v12, 0.0 }
 0x44c   : > { %v7779_v55 = vadd.f32 %v7778_v8, %v13856_v6  ;;  %v7842_v27 = vmax.f32 %v7776_v5, 0.0 }
 0x44d   : > { %v7845_v13 = vmax.f32 %v7787_v32, 0.0 }
 0x44e   : > { %v7843_v28 = vmax.f32 %v7779_v55, 0.0 }
 0x44f   : > { %v8871_v44 = vpack.c.bf16 %v7845_v13, %v7844_v47 }
 0x450   : > { %v8866_v25 = vpack.c.bf16 %v7843_v28, %v7842_v27  ;;  %v9479_v30 = vpop.f32.mrb[148].mxu1 }
 0x451   : > { %8903 = vst [vmem:[%s13899_s27 + $0x58] sm:$0xff] %v8871_v44   ;;  %v7800_v17 = vadd.f32 %v9479_v30, %v13872_v45  ;;  %v7791_v4 = vpop.f32.mrb[149].mxu1 }
 0x452   : > { %8902 = vst [vmem:[%s13899_s27 + $0x50] sm:$0xff] %v8866_v25   ;;  %v7792_v36 = vadd.f32 %v7791_v4, %v13866_v0  ;;  %v9480_v3 = vpop.f32.mrb[150].mxu1 }
 0x453   : > { %v7803_v50 = vadd.f32 %v9480_v3, %v13874_v2  ;;  %v7794_v6 = vpop.f32.mrb[151].mxu1  ;;  %v7848_v9 = vmax.f32 %v7800_v17, 0.0 }
 0x454   : > { %v7795_v1 = vadd.f32 %v7794_v6, %v13868_v42  ;;  %v7846_v20 = vmax.f32 %v7792_v36, 0.0 }
 0x455   : > { %v7849_v15 = vmax.f32 %v7803_v50, 0.0 }
 0x456   : > { %v7847_v23 = vmax.f32 %v7795_v1, 0.0 }
 0x457   : > { %v8881_v41 = vpack.c.bf16 %v7849_v15, %v7848_v9 }
 0x458   : > { %v8876_v63 = vpack.c.bf16 %v7847_v23, %v7846_v20  ;;  %v9483_v43 = vpop.f32.mrb[152].mxu1 }
 0x459   : > { %8905 = vst [vmem:[%s13899_s27 + $0x68] sm:$0xff] %v8881_v41   ;;  %v7816_v45 = vadd.f32 %v9483_v43, %v13885_v11  ;;  %v7807_v58 = vpop.f32.mrb[153].mxu1 }
 0x45a   : > { %8904 = vst [vmem:[%s13899_s27 + $0x60] sm:$0xff] %v8876_v63   ;;  %v7808_v0 = vadd.f32 %v7807_v58, %v13879_v51  ;;  %v9484_v2 = vpop.f32.mrb[154].mxu1 }
 0x45b   : > { %v7819_v38 = vadd.f32 %v9484_v2, %v13889_v19  ;;  %v7810_v42 = vpop.f32.mrb[155].mxu1  ;;  %v7852_v40 = vmax.f32 %v7816_v45, 0.0 }
 0x45c   : > { %v7811_v49 = vadd.f32 %v7810_v42, %v13881_v16  ;;  %v7850_v24 = vmax.f32 %v7808_v0, 0.0 }
 0x45d   : > { %v7853_v18 = vmax.f32 %v7819_v38, 0.0 }
 0x45e   : > { %v7851_v57 = vmax.f32 %v7811_v49, 0.0 }
 0x45f   : > { %v8891_v31 = vpack.c.bf16 %v7853_v18, %v7852_v40 }
 0x460   : > { %v8886_v56 = vpack.c.bf16 %v7851_v57, %v7850_v24 }
 0x461   : > { %8907 = vst [vmem:[%s13899_s27 + $0x78] sm:$0xff] %v8891_v31  }
 0x462   : > { %8906 = vst [vmem:[%s13899_s27 + $0x70] sm:$0xff] %v8886_v56  }
 0x463 PF: > { %s15_s18 = sadd.s32 1, %s9772_s18  }
 0x464   : > { %p12_p5 = scmp.ge.s32.totalorder %s15_s18, 4  }
 0x466   :  { %14 = sbr.rel (!%p12_p5) target bundleno = 1 (0x1), region = 75 }

</bundles_post_ra>
